<compile_context>
chip_gen: v7x
topology: tpu7x:2x2x1
jax: 0.10.0
libtpu: 0.0.40
codegen_flags: <defaults>
</compile_context>

<pallas_src>
import functools
import math

import jax
import jax.numpy as jnp
from jax.experimental import pallas as pl
from jax.experimental.pallas import tpu as pltpu


# ------------------------------- config -------------------------------------
# Scaled-down hyperparameters (the real model: img 224, D=768, depth=12, heads=12).
BATCH = 2
CHANNELS = 3
FRAMES = 8          # cfg.DATA.NUM_FRAMES
IMG = 64            # cfg.DATA.TRAIN_CROP_SIZE
PATCH = 16
N_PATCH = (IMG // PATCH) * (IMG // PATCH)    # 16
EMBED = 64
HEADS = 4
HEAD_DIM = EMBED // HEADS
MLP_HIDDEN = 4 * EMBED
DEPTH = 3
NUM_PROMPTS = 1
NUM_CLASSES = 8     # cfg.MODEL.NUM_CLASSES (actual_num_classes)
LN_EPS = 1e-6

ROW_TILE = 256                      # rows per grid step for activation-streaming kernels
VMEM_LIMIT = 48 * 1024 * 1024       # explicit budget; headroom under v7x's 64 MiB physical VMEM


# ----------------------------- small helpers --------------------------------

def _round_up(x, m):
    return ((x + m - 1) // m) * m


def _row_tiling(m):
    """Pick (row_tile, padded_rows) for a row-streamed kernel."""
    if m <= ROW_TILE:
        tm = _round_up(m, 8)
        return tm, tm
    return ROW_TILE, _round_up(m, ROW_TILE)


def _pad_rows(x, m_pad):
    m = x.shape[0]
    if m_pad == m:
        return x
    return jnp.pad(x, ((0, m_pad - m), (0, 0)))


def _cparams():
    return pltpu.CompilerParams(dimension_semantics=("parallel",),
                                vmem_limit_bytes=VMEM_LIMIT)


def _gelu_tanh(x):
    # TODO(synk): nn.GELU uses exact erf; tanh approximation used in-kernel.
    c = math.sqrt(2.0 / math.pi)
    return 0.5 * x * (1.0 + jnp.tanh(c * (x + 0.044715 * x * x * x)))


# ----------------------------- Pallas kernels -------------------------------

def _linear_kernel(x_ref, w_ref, b_ref, o_ref, *, act):
    x = x_ref[...].astype(jnp.bfloat16)                       # bf16 MXU inputs
    y = jnp.dot(x, w_ref[...], preferred_element_type=jnp.float32)
    y = y + b_ref[...].astype(jnp.float32)
    if act == "gelu":
        y = _gelu_tanh(y)
    o_ref[...] = y.astype(o_ref.dtype)


def _ln_linear_kernel(x_ref, g_ref, bln_ref, w_ref, b_ref, o_ref, *, eps, act):
    # Fused LayerNorm -> Linear (-> GELU).  LN math in f32, matmul in bf16.
    x = x_ref[...].astype(jnp.float32)
    mu = jnp.mean(x, axis=-1, keepdims=True)
    var = jnp.mean(jnp.square(x - mu), axis=-1, keepdims=True)
    h = (x - mu) * jax.lax.rsqrt(var + eps)
    h = h * g_ref[...].astype(jnp.float32) + bln_ref[...].astype(jnp.float32)
    y = jnp.dot(h.astype(jnp.bfloat16), w_ref[...],
                preferred_element_type=jnp.float32)
    y = y + b_ref[...].astype(jnp.float32)
    if act == "gelu":
        y = _gelu_tanh(y)
    o_ref[...] = y.astype(o_ref.dtype)


def _linear_residual_kernel(x_ref, w_ref, b_ref, r_ref, o_ref):
    # Fused Linear + residual add; residual buffer is aliased with the output.
    x = x_ref[...].astype(jnp.bfloat16)
    y = jnp.dot(x, w_ref[...], preferred_element_type=jnp.float32)
    y = y + b_ref[...].astype(jnp.float32) + r_ref[...].astype(jnp.float32)
    o_ref[...] = y.astype(o_ref.dtype)


def _layernorm_kernel(x_ref, g_ref, b_ref, o_ref, *, eps):
    x = x_ref[...].astype(jnp.float32)
    mu = jnp.mean(x, axis=-1, keepdims=True)
    var = jnp.mean(jnp.square(x - mu), axis=-1, keepdims=True)
    y = (x - mu) * jax.lax.rsqrt(var + eps)
    o_ref[...] = (y * g_ref[...].astype(jnp.float32)
                  + b_ref[...].astype(jnp.float32)).astype(o_ref.dtype)


def _attention_kernel(qkv_ref, o_ref, *, heads, head_dim, scale):
    # One batch element per grid step; qkv stays lane-dense (S, 3*D) and heads are
    # sliced inside the kernel (no host-side (2,0,3,1,4) transposes).
    d = heads * head_dim
    qkv = qkv_ref[0].astype(jnp.float32)                      # (S, 3D)
    outs = []
    for h in range(heads):
        lo, hi = h * head_dim, (h + 1) * head_dim
        q = qkv[:, lo:hi] * scale
        k = qkv[:, d + lo:d + hi]
        v = qkv[:, 2 * d + lo:2 * d + hi]
        # scores = q @ k^T via dot_general (contract last dims; no explicit .T)
        s = jax.lax.dot_general(q.astype(jnp.bfloat16), k.astype(jnp.bfloat16),
                                dimension_numbers=(((1,), (1,)), ((), ())),
                                preferred_element_type=jnp.float32)
        s = s - jnp.max(s, axis=-1, keepdims=True)
        p = jnp.exp(s)
        inv = pl.reciprocal(jnp.sum(p, axis=-1, keepdims=True), approx=True)
        p = p * inv
        out = jnp.dot(p.astype(jnp.bfloat16), v.astype(jnp.bfloat16),
                      preferred_element_type=jnp.float32)
        outs.append(out)
    # Single lane-dense (S, D) store instead of per-head narrow masked stores.
    o_ref[0] = jnp.concatenate(outs, axis=-1).astype(o_ref.dtype)


# ----------------------------- Pallas wrappers -------------------------------

def pallas_linear(x, w, b, act=None):
    M, K = x.shape
    N = w.shape[1]
    tm, Mp = _row_tiling(M)
    xp = _pad_rows(x, Mp)
    out = pl.pallas_call(
        functools.partial(_linear_kernel, act=act),
        out_shape=jax.ShapeDtypeStruct((Mp, N), jnp.float32),
        grid=(Mp // tm,),
        in_specs=[pl.BlockSpec((tm, K), lambda i: (i, 0)),
                  pl.BlockSpec((K, N), lambda i: (0, 0)),
                  pl.BlockSpec((1, N), lambda i: (0, 0))],
        out_specs=pl.BlockSpec((tm, N), lambda i: (i, 0)),
        compiler_params=_cparams(),
    )(xp, w, b)
    return out if Mp == M else out[:M]


def pallas_ln_linear(x, g, bln, w, b, act=None, eps=LN_EPS):
    M, K = x.shape
    N = w.shape[1]
    tm, Mp = _row_tiling(M)
    xp = _pad_rows(x, Mp)
    out = pl.pallas_call(
        functools.partial(_ln_linear_kernel, eps=eps, act=act),
        out_shape=jax.ShapeDtypeStruct((Mp, N), jnp.float32),
        grid=(Mp // tm,),
        in_specs=[pl.BlockSpec((tm, K), lambda i: (i, 0)),
                  pl.BlockSpec((1, K), lambda i: (0, 0)),
                  pl.BlockSpec((1, K), lambda i: (0, 0)),
                  pl.BlockSpec((K, N), lambda i: (0, 0)),
                  pl.BlockSpec((1, N), lambda i: (0, 0))],
        out_specs=pl.BlockSpec((tm, N), lambda i: (i, 0)),
        compiler_params=_cparams(),
    )(xp, g, bln, w, b)
    return out if Mp == M else out[:M]


def pallas_linear_residual(x, w, b, res):
    M, K = x.shape
    N = w.shape[1]
    tm, Mp = _row_tiling(M)
    xp = _pad_rows(x, Mp)
    rp = _pad_rows(res, Mp)
    out = pl.pallas_call(
        _linear_residual_kernel,
        out_shape=jax.ShapeDtypeStruct((Mp, N), jnp.float32),
        grid=(Mp // tm,),
        in_specs=[pl.BlockSpec((tm, K), lambda i: (i, 0)),
                  pl.BlockSpec((K, N), lambda i: (0, 0)),
                  pl.BlockSpec((1, N), lambda i: (0, 0)),
                  pl.BlockSpec((tm, N), lambda i: (i, 0))],
        out_specs=pl.BlockSpec((tm, N), lambda i: (i, 0)),
        input_output_aliases={3: 0},      # residual buffer reused as the output
        compiler_params=_cparams(),
    )(xp, w, b, rp)
    return out if Mp == M else out[:M]


def pallas_layernorm(x, g, b, eps=LN_EPS):
    M, D = x.shape
    tm, Mp = _row_tiling(M)
    xp = _pad_rows(x, Mp)
    out = pl.pallas_call(
        functools.partial(_layernorm_kernel, eps=eps),
        out_shape=jax.ShapeDtypeStruct((Mp, D), jnp.float32),
        grid=(Mp // tm,),
        in_specs=[pl.BlockSpec((tm, D), lambda i: (i, 0)),
                  pl.BlockSpec((1, D), lambda i: (0, 0)),
                  pl.BlockSpec((1, D), lambda i: (0, 0))],
        out_specs=pl.BlockSpec((tm, D), lambda i: (i, 0)),
        compiler_params=_cparams(),
    )(xp, g, b)
    return out if Mp == M else out[:M]


def pallas_attention(qkv, heads, head_dim):
    B, S, threeD = qkv.shape
    D = heads * head_dim
    scale = head_dim ** -0.5
    return pl.pallas_call(
        functools.partial(_attention_kernel, heads=heads, head_dim=head_dim,
                          scale=scale),
        out_shape=jax.ShapeDtypeStruct((B, S, D), jnp.float32),
        grid=(B,),
        in_specs=[pl.BlockSpec((1, S, threeD), lambda i: (i, 0, 0))],
        out_specs=pl.BlockSpec((1, S, D), lambda i: (i, 0, 0)),
        compiler_params=_cparams(),
    )(qkv)


# ----------------------------- model definition -----------------------------

def init_params(key):
    keys = iter(jax.random.split(key, 16 + 8 * DEPTH))

    def nrm(shape, std=0.02, dtype=jnp.float32):
        return (std * jax.random.normal(next(keys), shape,
                                        dtype=jnp.float32)).astype(dtype)

    p = {
        # matmul weights stored bf16 (MXU native); biases / LN params / embeds f32
        "patch_w": nrm((CHANNELS * PATCH * PATCH, EMBED), dtype=jnp.bfloat16),
        "patch_b": jnp.zeros((1, EMBED), jnp.float32),
        "cls_token": nrm((1, 1, EMBED)),
        "prompt_token": nrm((1, NUM_PROMPTS, EMBED)),
        "pos_embed": nrm((1, 1 + N_PATCH, EMBED)),
        "time_embed": nrm((1, FRAMES, EMBED)),
        "norm_g": jnp.ones((1, EMBED), jnp.float32),
        "norm_b": jnp.zeros((1, EMBED), jnp.float32),
        "head_w": nrm((EMBED, NUM_CLASSES)),
        "head_b": jnp.zeros((1, NUM_CLASSES), jnp.float32),
        "blocks": [],
    }
    for _ in range(DEPTH):
        p["blocks"].append({
            "ln1_g": jnp.ones((1, EMBED), jnp.float32),
            "ln1_b": jnp.zeros((1, EMBED), jnp.float32),
            "qkv_w": nrm((EMBED, 3 * EMBED), dtype=jnp.bfloat16),
            "qkv_b": jnp.zeros((1, 3 * EMBED), jnp.float32),
            "proj_w": nrm((EMBED, EMBED), dtype=jnp.bfloat16),
            "proj_b": jnp.zeros((1, EMBED), jnp.float32),
            "ln2_g": jnp.ones((1, EMBED), jnp.float32),
            "ln2_b": jnp.zeros((1, EMBED), jnp.float32),
            "fc1_w": nrm((EMBED, MLP_HIDDEN), dtype=jnp.bfloat16),
            "fc1_b": jnp.zeros((1, MLP_HIDDEN), jnp.float32),
            "fc2_w": nrm((MLP_HIDDEN, EMBED), dtype=jnp.bfloat16),
            "fc2_b": jnp.zeros((1, EMBED), jnp.float32),
        })
    return p


def transformer_block(x, bp):
    # x: (B, S, D)
    B, S, D = x.shape
    M = B * S
    x2 = x.reshape(M, D)

    # --- attention: fused LN1+QKV -> per-batch attention -> fused proj+residual ---
    qkv = pallas_ln_linear(x2, bp["ln1_g"], bp["ln1_b"],
                           bp["qkv_w"], bp["qkv_b"])           # (M, 3D)
    attn = pallas_attention(qkv.reshape(B, S, 3 * D), HEADS, HEAD_DIM)  # (B, S, D)
    x2 = pallas_linear_residual(attn.reshape(M, D),
                                bp["proj_w"], bp["proj_b"], x2)

    # --- mlp: fused LN2+fc1+GELU -> fused fc2+residual ---
    h = pallas_ln_linear(x2, bp["ln2_g"], bp["ln2_b"],
                         bp["fc1_w"], bp["fc1_b"], act="gelu")
    x2 = pallas_linear_residual(h, bp["fc2_w"], bp["fc2_b"], x2)

    return x2.reshape(B, S, D)


def forward(x, params):
    """x: (B, C, T, H, W) float32. Returns x_resPrompt[-1]: (B, NUM_CLASSES)."""
    B, C, T, H, W = x.shape
    nh, nw = H // PATCH, W // PATCH
    N = nh * nw

    # ---- patch embed (Conv2d k=16 s=16 as matmul over flattened patches) ----
    xp = x.transpose(0, 2, 3, 4, 1)                                   # B,T,H,W,C
    xp = xp.reshape(B, T, nh, PATCH, nw, PATCH, C)
    xp = xp.transpose(0, 1, 2, 4, 6, 3, 5)                            # B,T,nh,nw,C,p,p
    xp = xp.reshape(B * T * N, C * PATCH * PATCH)
    tok = pallas_linear(xp, params["patch_w"], params["patch_b"])     # (B*T*N, D)
    tok = tok.reshape(B * T, N, EMBED)

    # ---- cls token + spatial positional embedding ----
    cls = jnp.broadcast_to(params["cls_token"], (B * T, 1, EMBED))
    xt = jnp.concatenate([cls, tok], axis=1) + params["pos_embed"]    # (B*T, 1+N, D)

    # ---- temporal positional embedding (attention_type != 'space_only') ----
    cls_b = xt[:B, 0:1, :]                                            # (B, 1, D)
    xpat = xt[:, 1:, :].reshape(B, T, N, EMBED).transpose(0, 2, 1, 3) # (B, N, T, D)
    xpat = xpat.reshape(B * N, T, EMBED) + params["time_embed"]
    xpat = xpat.reshape(B, N * T, EMBED)
    xs = jnp.concatenate([cls_b, xpat], axis=1)                       # (B, 1+N*T, D)

    # ---- prepend resPrompt token ----
    prompt = jnp.broadcast_to(params["prompt_token"], (B, NUM_PROMPTS, EMBED))
    xs = jnp.concatenate([prompt, xs], axis=1)                        # (B, S, D)

    # ---- transformer blocks (joint space-time attention) ----
    for bp in params["blocks"]:
        xs = transformer_block(xs, bp)

    # ---- final norm + prompt head (== x_resPrompt[-1]) ----
    Bsz, S, D = xs.shape
    xn = pallas_layernorm(xs.reshape(Bsz * S, D), params["norm_g"], params["norm_b"])
    xn = xn.reshape(Bsz, S, D)
    prompt_feat = jnp.mean(xn[:, :NUM_PROMPTS, :], axis=1)            # (B, D)
    # Tiny classifier head (B x D @ D x NUM_CLASSES) — far below one MXU tile,
    # so plain jnp is cheaper than a dedicated pallas_call.
    logits = prompt_feat @ params["head_w"] + params["head_b"]
    return logits


if __name__ == "__main__":
    key = jax.random.PRNGKey(0)
    kx, kp = jax.random.split(key)
    x = jax.random.normal(kx, (BATCH, CHANNELS, FRAMES, IMG, IMG), dtype=jnp.float32)
    params = init_params(kp)

    fwd = jax.jit(forward)
    out = fwd(x, params)
    out = jax.block_until_ready(out)
    assert out.shape == (BATCH, NUM_CLASSES), out.shape
    assert bool(jnp.all(jnp.isfinite(out)))
    print("KERNEL_OK")
</pallas_src>

<mosaic_0001>
module attributes {stable_mosaic.version = 11 : i64} {
  func.func @_linear_kernel(%arg0: i32, %arg1: memref<256x768xf32, #tpu.memory_space<vmem>>, %arg2: memref<768x64xbf16, #tpu.memory_space<vmem>>, %arg3: memref<1x64xf32, #tpu.memory_space<vmem>>, %arg4: memref<256x64xf32, #tpu.memory_space<vmem>>) attributes {dimension_semantics = [#tpu.dimension_semantics<parallel>], iteration_bounds = array<i64: 1>, scalar_prefetch = 0 : i64, scratch_operands = 0 : i64, tpu.core_type = #tpu.core_type<tc>, window_params = [{transform_indices = @transform_0, window_bounds = array<i64: 256, 768>}, {pipeline_mode = #tpu.pipeline_mode<synchronous>, transform_indices = @transform_1, window_bounds = array<i64: 768, 64>}, {pipeline_mode = #tpu.pipeline_mode<synchronous>, transform_indices = @transform_2, window_bounds = array<i64: 1, 64>}, {transform_indices = @transform_3, window_bounds = array<i64: 256, 64>}]} {
    %c0 = arith.constant 0 : index
    %c0_0 = arith.constant 0 : index
    %0 = vector.load %arg1[%c0, %c0_0] : memref<256x768xf32, #tpu.memory_space<vmem>>, vector<256x768xf32>
    %1 = arith.truncf %0 : vector<256x768xf32> to vector<256x768xbf16>
    %c0_1 = arith.constant 0 : index
    %c0_2 = arith.constant 0 : index
    %2 = vector.load %arg2[%c0_1, %c0_2] : memref<768x64xbf16, #tpu.memory_space<vmem>>, vector<768x64xbf16>
    %cst = arith.constant dense<0.000000e+00> : vector<256x64xf32>
    %3 = tpu.matmul %1, %2, %cst {dimension_numbers = #tpu.dot_dimension_numbers<[1], [0], [0], [1], [0, 0, 1, 1], [], []>} : vector<256x768xbf16>, vector<768x64xbf16>, vector<256x64xf32> -> vector<256x64xf32>
    %c0_3 = arith.constant 0 : index
    %c0_4 = arith.constant 0 : index
    %4 = vector.load %arg3[%c0_3, %c0_4] : memref<1x64xf32, #tpu.memory_space<vmem>>, vector<1x64xf32>
    %5 = vector.broadcast %4 : vector<1x64xf32> to vector<256x64xf32>
    %6 = arith.addf %3, %5 : vector<256x64xf32>
    %c0_5 = arith.constant 0 : index
    %c0_6 = arith.constant 0 : index
    %7 = vector.load %arg4[%c0_5, %c0_6] : memref<256x64xf32, #tpu.memory_space<vmem>>, vector<256x64xf32>
    tpu.vector_store %arg4[%c0_5, %c0_6], %6 {strides = array<i32>} : memref<256x64xf32, #tpu.memory_space<vmem>>, vector<256x64xf32>,
    return
  }
  func.func @transform_0(%arg0: i32) -> (i32, i32) {
    %c0_i32 = arith.constant 0 : i32
    %c0_i32_0 = arith.constant 0 : i32
    return %arg0, %c0_i32 : i32, i32
  }
  func.func @transform_1(%arg0: i32) -> (i32, i32) {
    %c0_i32 = arith.constant 0 : i32
    %c0_i32_0 = arith.constant 0 : i32
    %c0_i32_1 = arith.constant 0 : i32
    return %c0_i32, %c0_i32_0 : i32, i32
  }
  func.func @transform_2(%arg0: i32) -> (i32, i32) {
    %c0_i32 = arith.constant 0 : i32
    %c0_i32_0 = arith.constant 0 : i32
    %c0_i32_1 = arith.constant 0 : i32
    return %c0_i32, %c0_i32_0 : i32, i32
  }
  func.func @transform_3(%arg0: i32) -> (i32, i32) {
    %c0_i32 = arith.constant 0 : i32
    %c0_i32_0 = arith.constant 0 : i32
    return %arg0, %c0_i32 : i32, i32
  }
}

module attributes {stable_mosaic.version = 11 : i64} {
  func.func @_ln_linear_kernel(%arg0: i32, %arg1: memref<256x64xf32, #tpu.memory_space<vmem>>, %arg2: memref<1x64xf32, #tpu.memory_space<vmem>>, %arg3: memref<1x64xf32, #tpu.memory_space<vmem>>, %arg4: memref<64x192xbf16, #tpu.memory_space<vmem>>, %arg5: memref<1x192xf32, #tpu.memory_space<vmem>>, %arg6: memref<256x192xf32, #tpu.memory_space<vmem>>) attributes {dimension_semantics = [#tpu.dimension_semantics<parallel>], iteration_bounds = array<i64: 2>, scalar_prefetch = 0 : i64, scratch_operands = 0 : i64, tpu.core_type = #tpu.core_type<tc>, window_params = [{transform_indices = @transform_0, window_bounds = array<i64: 256, 64>}, {pipeline_mode = #tpu.pipeline_mode<synchronous>, transform_indices = @transform_1, window_bounds = array<i64: 1, 64>}, {pipeline_mode = #tpu.pipeline_mode<synchronous>, transform_indices = @transform_2, window_bounds = array<i64: 1, 64>}, {pipeline_mode = #tpu.pipeline_mode<synchronous>, transform_indices = @transform_3, window_bounds = array<i64: 64, 192>}, {pipeline_mode = #tpu.pipeline_mode<synchronous>, transform_indices = @transform_4, window_bounds = array<i64: 1, 192>}, {transform_indices = @transform_5, window_bounds = array<i64: 256, 192>}]} {
    %c0 = arith.constant 0 : index
    %c0_0 = arith.constant 0 : index
    %0 = vector.load %arg1[%c0, %c0_0] : memref<256x64xf32, #tpu.memory_space<vmem>>, vector<256x64xf32>
    %cst = arith.constant dense<0.000000e+00> : vector<256xf32>
    %1 = vector.multi_reduction <add>, %0, %cst [1] : vector<256x64xf32> to vector<256xf32>
    %2 = vector.shape_cast %1 : vector<256xf32> to vector<256x1xf32>
    %cst_1 = arith.constant 6.400000e+01 : f32
    %3 = vector.broadcast %cst_1 : f32 to vector<256x1xf32>
    %4 = arith.divf %2, %3 : vector<256x1xf32>
    %5 = vector.broadcast %4 : vector<256x1xf32> to vector<256x64xf32>
    %6 = arith.subf %0, %5 : vector<256x64xf32>
    %7 = arith.mulf %6, %6 : vector<256x64xf32>
    %cst_2 = arith.constant dense<0.000000e+00> : vector<256xf32>
    %8 = vector.multi_reduction <add>, %7, %cst_2 [1] : vector<256x64xf32> to vector<256xf32>
    %9 = vector.shape_cast %8 : vector<256xf32> to vector<256x1xf32>
    %cst_3 = arith.constant 6.400000e+01 : f32
    %10 = vector.broadcast %cst_3 : f32 to vector<256x1xf32>
    %11 = arith.divf %9, %10 : vector<256x1xf32>
    %12 = vector.broadcast %4 : vector<256x1xf32> to vector<256x64xf32>
    %13 = arith.subf %0, %12 : vector<256x64xf32>
    %cst_4 = arith.constant 9.99999997E-7 : f32
    %14 = vector.broadcast %cst_4 : f32 to vector<256x1xf32>
    %15 = arith.addf %11, %14 : vector<256x1xf32>
    %16 = math.rsqrt %15 : vector<256x1xf32>
    %17 = vector.broadcast %16 : vector<256x1xf32> to vector<256x64xf32>
    %18 = arith.mulf %13, %17 : vector<256x64xf32>
    %c0_5 = arith.constant 0 : index
    %c0_6 = arith.constant 0 : index
    %19 = vector.load %arg2[%c0_5, %c0_6] : memref<1x64xf32, #tpu.memory_space<vmem>>, vector<1x64xf32>
    %20 = vector.broadcast %19 : vector<1x64xf32> to vector<256x64xf32>
    %21 = arith.mulf %18, %20 : vector<256x64xf32>
    %c0_7 = arith.constant 0 : index
    %c0_8 = arith.constant 0 : index
    %22 = vector.load %arg3[%c0_7, %c0_8] : memref<1x64xf32, #tpu.memory_space<vmem>>, vector<1x64xf32>
    %23 = vector.broadcast %22 : vector<1x64xf32> to vector<256x64xf32>
    %24 = arith.addf %21, %23 : vector<256x64xf32>
    %25 = arith.truncf %24 : vector<256x64xf32> to vector<256x64xbf16>
    %c0_9 = arith.constant 0 : index
    %c0_10 = arith.constant 0 : index
    %26 = vector.load %arg4[%c0_9, %c0_10] : memref<64x192xbf16, #tpu.memory_space<vmem>>, vector<64x192xbf16>
    %cst_11 = arith.constant dense<0.000000e+00> : vector<256x192xf32>
    %27 = tpu.matmul %25, %26, %cst_11 {dimension_numbers = #tpu.dot_dimension_numbers<[1], [0], [0], [1], [0, 0, 1, 1], [], []>} : vector<256x64xbf16>, vector<64x192xbf16>, vector<256x192xf32> -> vector<256x192xf32>
    %c0_12 = arith.constant 0 : index
    %c0_13 = arith.constant 0 : index
    %28 = vector.load %arg5[%c0_12, %c0_13] : memref<1x192xf32, #tpu.memory_space<vmem>>, vector<1x192xf32>
    %29 = vector.broadcast %28 : vector<1x192xf32> to vector<256x192xf32>
    %30 = arith.addf %27, %29 : vector<256x192xf32>
    %c0_14 = arith.constant 0 : index
    %c0_15 = arith.constant 0 : index
    %31 = vector.load %arg6[%c0_14, %c0_15] : memref<256x192xf32, #tpu.memory_space<vmem>>, vector<256x192xf32>
    tpu.vector_store %arg6[%c0_14, %c0_15], %30 {strides = array<i32>} : memref<256x192xf32, #tpu.memory_space<vmem>>, vector<256x192xf32>,
    return
  }
  func.func @transform_0(%arg0: i32) -> (i32, i32) {
    %c0_i32 = arith.constant 0 : i32
    %c0_i32_0 = arith.constant 0 : i32
    return %arg0, %c0_i32 : i32, i32
  }
  func.func @transform_1(%arg0: i32) -> (i32, i32) {
    %c0_i32 = arith.constant 0 : i32
    %c0_i32_0 = arith.constant 0 : i32
    %c0_i32_1 = arith.constant 0 : i32
    return %c0_i32, %c0_i32_0 : i32, i32
  }
  func.func @transform_2(%arg0: i32) -> (i32, i32) {
    %c0_i32 = arith.constant 0 : i32
    %c0_i32_0 = arith.constant 0 : i32
    %c0_i32_1 = arith.constant 0 : i32
    return %c0_i32, %c0_i32_0 : i32, i32
  }
  func.func @transform_3(%arg0: i32) -> (i32, i32) {
    %c0_i32 = arith.constant 0 : i32
    %c0_i32_0 = arith.constant 0 : i32
    %c0_i32_1 = arith.constant 0 : i32
    return %c0_i32, %c0_i32_0 : i32, i32
  }
  func.func @transform_4(%arg0: i32) -> (i32, i32) {
    %c0_i32 = arith.constant 0 : i32
    %c0_i32_0 = arith.constant 0 : i32
    %c0_i32_1 = arith.constant 0 : i32
    return %c0_i32, %c0_i32_0 : i32, i32
  }
  func.func @transform_5(%arg0: i32) -> (i32, i32) {
    %c0_i32 = arith.constant 0 : i32
    %c0_i32_0 = arith.constant 0 : i32
    return %arg0, %c0_i32 : i32, i32
  }
}

module attributes {stable_mosaic.version = 11 : i64} {
  func.func @_attention_kernel(%arg0: i32, %arg1: memref<1x130x192xf32, #tpu.memory_space<vmem>>, %arg2: memref<1x130x64xf32, #tpu.memory_space<vmem>>) attributes {dimension_semantics = [#tpu.dimension_semantics<parallel>], iteration_bounds = array<i64: 2>, scalar_prefetch = 0 : i64, scratch_operands = 0 : i64, tpu.core_type = #tpu.core_type<tc>, window_params = [{transform_indices = @transform_0, window_bounds = array<i64: 1, 130, 192>}, {transform_indices = @transform_1, window_bounds = array<i64: 1, 130, 64>}]} {
    %c0 = arith.constant 0 : index
    %c0_0 = arith.constant 0 : index
    %c0_1 = arith.constant 0 : index
    %0 = vector.load %arg1[%c0, %c0_0, %c0_1] : memref<1x130x192xf32, #tpu.memory_space<vmem>>, vector<1x130x192xf32>
    %1 = vector.shape_cast %0 : vector<1x130x192xf32> to vector<130x192xf32>
    %2 = vector.extract_strided_slice %1 {offsets = [0, 0], sizes = [130, 16], strides = [1, 1]} : vector<130x192xf32> to vector<130x16xf32>
    %cst = arith.constant 2.500000e-01 : f32
    %3 = vector.broadcast %cst : f32 to vector<130x16xf32>
    %4 = arith.mulf %2, %3 : vector<130x16xf32>
    %5 = vector.extract_strided_slice %1 {offsets = [0, 64], sizes = [130, 16], strides = [1, 1]} : vector<130x192xf32> to vector<130x16xf32>
    %6 = vector.extract_strided_slice %1 {offsets = [0, 128], sizes = [130, 16], strides = [1, 1]} : vector<130x192xf32> to vector<130x16xf32>
    %7 = arith.truncf %4 : vector<130x16xf32> to vector<130x16xbf16>
    %8 = arith.truncf %5 : vector<130x16xf32> to vector<130x16xbf16>
    %cst_2 = arith.constant dense<0.000000e+00> : vector<130x130xf32>
    %9 = tpu.matmul %7, %8, %cst_2 {dimension_numbers = #tpu.dot_dimension_numbers<[1], [1], [0], [0], [0, 0, 1, 0], [], []>} : vector<130x16xbf16>, vector<130x16xbf16>, vector<130x130xf32> -> vector<130x130xf32>
    %cst_3 = arith.constant dense<0xFF800000> : vector<130xf32>
    %10 = vector.multi_reduction <maximumf>, %9, %cst_3 [1] : vector<130x130xf32> to vector<130xf32>
    %11 = vector.shape_cast %10 : vector<130xf32> to vector<130x1xf32>
    %12 = vector.broadcast %11 : vector<130x1xf32> to vector<130x130xf32>
    %13 = arith.subf %9, %12 : vector<130x130xf32>
    %14 = math.exp %13 : vector<130x130xf32>
    %cst_4 = arith.constant dense<0.000000e+00> : vector<130xf32>
    %15 = vector.multi_reduction <add>, %14, %cst_4 [1] : vector<130x130xf32> to vector<130xf32>
    %16 = vector.shape_cast %15 : vector<130xf32> to vector<130x1xf32>
    %17 = tpu.reciprocal %16 {approx = true} : vector<130x1xf32> -> vector<130x1xf32>
    %18 = vector.broadcast %17 : vector<130x1xf32> to vector<130x130xf32>
    %19 = arith.mulf %14, %18 : vector<130x130xf32>
    %20 = arith.truncf %19 : vector<130x130xf32> to vector<130x130xbf16>
    %21 = arith.truncf %6 : vector<130x16xf32> to vector<130x16xbf16>
    %cst_5 = arith.constant dense<0.000000e+00> : vector<130x16xf32>
    %22 = tpu.matmul %20, %21, %cst_5 {dimension_numbers = #tpu.dot_dimension_numbers<[1], [0], [0], [1], [0, 0, 1, 1], [], []>} : vector<130x130xbf16>, vector<130x16xbf16>, vector<130x16xf32> -> vector<130x16xf32>
    %23 = vector.extract_strided_slice %1 {offsets = [0, 16], sizes = [130, 16], strides = [1, 1]} : vector<130x192xf32> to vector<130x16xf32>
    %cst_6 = arith.constant 2.500000e-01 : f32
    %24 = vector.broadcast %cst_6 : f32 to vector<130x16xf32>
    %25 = arith.mulf %23, %24 : vector<130x16xf32>
    %26 = vector.extract_strided_slice %1 {offsets = [0, 80], sizes = [130, 16], strides = [1, 1]} : vector<130x192xf32> to vector<130x16xf32>
    %27 = vector.extract_strided_slice %1 {offsets = [0, 144], sizes = [130, 16], strides = [1, 1]} : vector<130x192xf32> to vector<130x16xf32>
    %28 = arith.truncf %25 : vector<130x16xf32> to vector<130x16xbf16>
    %29 = arith.truncf %26 : vector<130x16xf32> to vector<130x16xbf16>
    %cst_7 = arith.constant dense<0.000000e+00> : vector<130x130xf32>
    %30 = tpu.matmul %28, %29, %cst_7 {dimension_numbers = #tpu.dot_dimension_numbers<[1], [1], [0], [0], [0, 0, 1, 0], [], []>} : vector<130x16xbf16>, vector<130x16xbf16>, vector<130x130xf32> -> vector<130x130xf32>
    %cst_8 = arith.constant dense<0xFF800000> : vector<130xf32>
    %31 = vector.multi_reduction <maximumf>, %30, %cst_8 [1] : vector<130x130xf32> to vector<130xf32>
    %32 = vector.shape_cast %31 : vector<130xf32> to vector<130x1xf32>
    %33 = vector.broadcast %32 : vector<130x1xf32> to vector<130x130xf32>
    %34 = arith.subf %30, %33 : vector<130x130xf32>
    %35 = math.exp %34 : vector<130x130xf32>
    %cst_9 = arith.constant dense<0.000000e+00> : vector<130xf32>
    %36 = vector.multi_reduction <add>, %35, %cst_9 [1] : vector<130x130xf32> to vector<130xf32>
    %37 = vector.shape_cast %36 : vector<130xf32> to vector<130x1xf32>
    %38 = tpu.reciprocal %37 {approx = true} : vector<130x1xf32> -> vector<130x1xf32>
    %39 = vector.broadcast %38 : vector<130x1xf32> to vector<130x130xf32>
    %40 = arith.mulf %35, %39 : vector<130x130xf32>
    %41 = arith.truncf %40 : vector<130x130xf32> to vector<130x130xbf16>
    %42 = arith.truncf %27 : vector<130x16xf32> to vector<130x16xbf16>
    %cst_10 = arith.constant dense<0.000000e+00> : vector<130x16xf32>
    %43 = tpu.matmul %41, %42, %cst_10 {dimension_numbers = #tpu.dot_dimension_numbers<[1], [0], [0], [1], [0, 0, 1, 1], [], []>} : vector<130x130xbf16>, vector<130x16xbf16>, vector<130x16xf32> -> vector<130x16xf32>
    %44 = vector.extract_strided_slice %1 {offsets = [0, 32], sizes = [130, 16], strides = [1, 1]} : vector<130x192xf32> to vector<130x16xf32>
    %cst_11 = arith.constant 2.500000e-01 : f32
    %45 = vector.broadcast %cst_11 : f32 to vector<130x16xf32>
    %46 = arith.mulf %44, %45 : vector<130x16xf32>
    %47 = vector.extract_strided_slice %1 {offsets = [0, 96], sizes = [130, 16], strides = [1, 1]} : vector<130x192xf32> to vector<130x16xf32>
    %48 = vector.extract_strided_slice %1 {offsets = [0, 160], sizes = [130, 16], strides = [1, 1]} : vector<130x192xf32> to vector<130x16xf32>
    %49 = arith.truncf %46 : vector<130x16xf32> to vector<130x16xbf16>
    %50 = arith.truncf %47 : vector<130x16xf32> to vector<130x16xbf16>
    %cst_12 = arith.constant dense<0.000000e+00> : vector<130x130xf32>
    %51 = tpu.matmul %49, %50, %cst_12 {dimension_numbers = #tpu.dot_dimension_numbers<[1], [1], [0], [0], [0, 0, 1, 0], [], []>} : vector<130x16xbf16>, vector<130x16xbf16>, vector<130x130xf32> -> vector<130x130xf32>
    %cst_13 = arith.constant dense<0xFF800000> : vector<130xf32>
    %52 = vector.multi_reduction <maximumf>, %51, %cst_13 [1] : vector<130x130xf32> to vector<130xf32>
    %53 = vector.shape_cast %52 : vector<130xf32> to vector<130x1xf32>
    %54 = vector.broadcast %53 : vector<130x1xf32> to vector<130x130xf32>
    %55 = arith.subf %51, %54 : vector<130x130xf32>
    %56 = math.exp %55 : vector<130x130xf32>
    %cst_14 = arith.constant dense<0.000000e+00> : vector<130xf32>
    %57 = vector.multi_reduction <add>, %56, %cst_14 [1] : vector<130x130xf32> to vector<130xf32>
    %58 = vector.shape_cast %57 : vector<130xf32> to vector<130x1xf32>
    %59 = tpu.reciprocal %58 {approx = true} : vector<130x1xf32> -> vector<130x1xf32>
    %60 = vector.broadcast %59 : vector<130x1xf32> to vector<130x130xf32>
    %61 = arith.mulf %56, %60 : vector<130x130xf32>
    %62 = arith.truncf %61 : vector<130x130xf32> to vector<130x130xbf16>
    %63 = arith.truncf %48 : vector<130x16xf32> to vector<130x16xbf16>
    %cst_15 = arith.constant dense<0.000000e+00> : vector<130x16xf32>
    %64 = tpu.matmul %62, %63, %cst_15 {dimension_numbers = #tpu.dot_dimension_numbers<[1], [0], [0], [1], [0, 0, 1, 1], [], []>} : vector<130x130xbf16>, vector<130x16xbf16>, vector<130x16xf32> -> vector<130x16xf32>
    %65 = vector.extract_strided_slice %1 {offsets = [0, 48], sizes = [130, 16], strides = [1, 1]} : vector<130x192xf32> to vector<130x16xf32>
    %cst_16 = arith.constant 2.500000e-01 : f32
    %66 = vector.broadcast %cst_16 : f32 to vector<130x16xf32>
    %67 = arith.mulf %65, %66 : vector<130x16xf32>
    %68 = vector.extract_strided_slice %1 {offsets = [0, 112], sizes = [130, 16], strides = [1, 1]} : vector<130x192xf32> to vector<130x16xf32>
    %69 = vector.extract_strided_slice %1 {offsets = [0, 176], sizes = [130, 16], strides = [1, 1]} : vector<130x192xf32> to vector<130x16xf32>
    %70 = arith.truncf %67 : vector<130x16xf32> to vector<130x16xbf16>
    %71 = arith.truncf %68 : vector<130x16xf32> to vector<130x16xbf16>
    %cst_17 = arith.constant dense<0.000000e+00> : vector<130x130xf32>
    %72 = tpu.matmul %70, %71, %cst_17 {dimension_numbers = #tpu.dot_dimension_numbers<[1], [1], [0], [0], [0, 0, 1, 0], [], []>} : vector<130x16xbf16>, vector<130x16xbf16>, vector<130x130xf32> -> vector<130x130xf32>
    %cst_18 = arith.constant dense<0xFF800000> : vector<130xf32>
    %73 = vector.multi_reduction <maximumf>, %72, %cst_18 [1] : vector<130x130xf32> to vector<130xf32>
    %74 = vector.shape_cast %73 : vector<130xf32> to vector<130x1xf32>
    %75 = vector.broadcast %74 : vector<130x1xf32> to vector<130x130xf32>
    %76 = arith.subf %72, %75 : vector<130x130xf32>
    %77 = math.exp %76 : vector<130x130xf32>
    %cst_19 = arith.constant dense<0.000000e+00> : vector<130xf32>
    %78 = vector.multi_reduction <add>, %77, %cst_19 [1] : vector<130x130xf32> to vector<130xf32>
    %79 = vector.shape_cast %78 : vector<130xf32> to vector<130x1xf32>
    %80 = tpu.reciprocal %79 {approx = true} : vector<130x1xf32> -> vector<130x1xf32>
    %81 = vector.broadcast %80 : vector<130x1xf32> to vector<130x130xf32>
    %82 = arith.mulf %77, %81 : vector<130x130xf32>
    %83 = arith.truncf %82 : vector<130x130xf32> to vector<130x130xbf16>
    %84 = arith.truncf %69 : vector<130x16xf32> to vector<130x16xbf16>
    %cst_20 = arith.constant dense<0.000000e+00> : vector<130x16xf32>
    %85 = tpu.matmul %83, %84, %cst_20 {dimension_numbers = #tpu.dot_dimension_numbers<[1], [0], [0], [1], [0, 0, 1, 1], [], []>} : vector<130x130xbf16>, vector<130x16xbf16>, vector<130x16xf32> -> vector<130x16xf32>
    %86 = tpu.concatenate %22, %43, %64, %85 in 1 : vector<130x16xf32>, vector<130x16xf32>, vector<130x16xf32>, vector<130x16xf32> -> vector<130x64xf32>
    %c0_21 = arith.constant 0 : index
    %c0_22 = arith.constant 0 : index
    %c0_23 = arith.constant 0 : index
    %87 = vector.load %arg2[%c0_21, %c0_22, %c0_23] : memref<1x130x64xf32, #tpu.memory_space<vmem>>, vector<1x130x64xf32>
    %88 = vector.shape_cast %87 : vector<1x130x64xf32> to vector<130x64xf32>
    %89 = vector.shape_cast %86 : vector<130x64xf32> to vector<1x130x64xf32>
    tpu.vector_store %arg2[%c0_21, %c0_22, %c0_23], %89 {strides = array<i32>} : memref<1x130x64xf32, #tpu.memory_space<vmem>>, vector<1x130x64xf32>,
    return
  }
  func.func @transform_0(%arg0: i32) -> (i32, i32, i32) {
    %c0_i32 = arith.constant 0 : i32
    %c0_i32_0 = arith.constant 0 : i32
    %c0_i32_1 = arith.constant 0 : i32
    return %arg0, %c0_i32, %c0_i32_0 : i32, i32, i32
  }
  func.func @transform_1(%arg0: i32) -> (i32, i32, i32) {
    %c0_i32 = arith.constant 0 : i32
    %c0_i32_0 = arith.constant 0 : i32
    %c0_i32_1 = arith.constant 0 : i32
    return %arg0, %c0_i32, %c0_i32_0 : i32, i32, i32
  }
}

module attributes {stable_mosaic.version = 11 : i64} {
  func.func @_linear_residual_kernel(%arg0: i32, %arg1: memref<256x64xf32, #tpu.memory_space<vmem>>, %arg2: memref<64x64xbf16, #tpu.memory_space<vmem>>, %arg3: memref<1x64xf32, #tpu.memory_space<vmem>>, %arg4: memref<256x64xf32, #tpu.memory_space<vmem>>, %arg5: memref<256x64xf32, #tpu.memory_space<vmem>>) attributes {dimension_semantics = [#tpu.dimension_semantics<parallel>], iteration_bounds = array<i64: 2>, scalar_prefetch = 0 : i64, scratch_operands = 0 : i64, tpu.core_type = #tpu.core_type<tc>, window_params = [{transform_indices = @transform_0, window_bounds = array<i64: 256, 64>}, {pipeline_mode = #tpu.pipeline_mode<synchronous>, transform_indices = @transform_1, window_bounds = array<i64: 64, 64>}, {pipeline_mode = #tpu.pipeline_mode<synchronous>, transform_indices = @transform_2, window_bounds = array<i64: 1, 64>}, {transform_indices = @transform_3, window_bounds = array<i64: 256, 64>}, {transform_indices = @transform_4, window_bounds = array<i64: 256, 64>}]} {
    %c0 = arith.constant 0 : index
    %c0_0 = arith.constant 0 : index
    %0 = vector.load %arg1[%c0, %c0_0] : memref<256x64xf32, #tpu.memory_space<vmem>>, vector<256x64xf32>
    %1 = arith.truncf %0 : vector<256x64xf32> to vector<256x64xbf16>
    %c0_1 = arith.constant 0 : index
    %c0_2 = arith.constant 0 : index
    %2 = vector.load %arg2[%c0_1, %c0_2] : memref<64x64xbf16, #tpu.memory_space<vmem>>, vector<64x64xbf16>
    %cst = arith.constant dense<0.000000e+00> : vector<256x64xf32>
    %3 = tpu.matmul %1, %2, %cst {dimension_numbers = #tpu.dot_dimension_numbers<[1], [0], [0], [1], [0, 0, 1, 1], [], []>} : vector<256x64xbf16>, vector<64x64xbf16>, vector<256x64xf32> -> vector<256x64xf32>
    %c0_3 = arith.constant 0 : index
    %c0_4 = arith.constant 0 : index
    %4 = vector.load %arg3[%c0_3, %c0_4] : memref<1x64xf32, #tpu.memory_space<vmem>>, vector<1x64xf32>
    %5 = vector.broadcast %4 : vector<1x64xf32> to vector<256x64xf32>
    %6 = arith.addf %3, %5 : vector<256x64xf32>
    %c0_5 = arith.constant 0 : index
    %c0_6 = arith.constant 0 : index
    %7 = vector.load %arg4[%c0_5, %c0_6] : memref<256x64xf32, #tpu.memory_space<vmem>>, vector<256x64xf32>
    %8 = arith.addf %6, %7 : vector<256x64xf32>
    %c0_7 = arith.constant 0 : index
    %c0_8 = arith.constant 0 : index
    %9 = vector.load %arg5[%c0_7, %c0_8] : memref<256x64xf32, #tpu.memory_space<vmem>>, vector<256x64xf32>
    tpu.vector_store %arg5[%c0_7, %c0_8], %8 {strides = array<i32>} : memref<256x64xf32, #tpu.memory_space<vmem>>, vector<256x64xf32>,
    return
  }
  func.func @transform_0(%arg0: i32) -> (i32, i32) {
    %c0_i32 = arith.constant 0 : i32
    %c0_i32_0 = arith.constant 0 : i32
    return %arg0, %c0_i32 : i32, i32
  }
  func.func @transform_1(%arg0: i32) -> (i32, i32) {
    %c0_i32 = arith.constant 0 : i32
    %c0_i32_0 = arith.constant 0 : i32
    %c0_i32_1 = arith.constant 0 : i32
    return %c0_i32, %c0_i32_0 : i32, i32
  }
  func.func @transform_2(%arg0: i32) -> (i32, i32) {
    %c0_i32 = arith.constant 0 : i32
    %c0_i32_0 = arith.constant 0 : i32
    %c0_i32_1 = arith.constant 0 : i32
    return %c0_i32, %c0_i32_0 : i32, i32
  }
  func.func @transform_3(%arg0: i32) -> (i32, i32) {
    %c0_i32 = arith.constant 0 : i32
    %c0_i32_0 = arith.constant 0 : i32
    return %arg0, %c0_i32 : i32, i32
  }
  func.func @transform_4(%arg0: i32) -> (i32, i32) {
    %c0_i32 = arith.constant 0 : i32
    %c0_i32_0 = arith.constant 0 : i32
    return %arg0, %c0_i32 : i32, i32
  }
}

module attributes {stable_mosaic.version = 11 : i64} {
  func.func @_ln_linear_kernel(%arg0: i32, %arg1: memref<256x64xf32, #tpu.memory_space<vmem>>, %arg2: memref<1x64xf32, #tpu.memory_space<vmem>>, %arg3: memref<1x64xf32, #tpu.memory_space<vmem>>, %arg4: memref<64x256xbf16, #tpu.memory_space<vmem>>, %arg5: memref<1x256xf32, #tpu.memory_space<vmem>>, %arg6: memref<256x256xf32, #tpu.memory_space<vmem>>) attributes {dimension_semantics = [#tpu.dimension_semantics<parallel>], iteration_bounds = array<i64: 2>, scalar_prefetch = 0 : i64, scratch_operands = 0 : i64, tpu.core_type = #tpu.core_type<tc>, window_params = [{transform_indices = @transform_0, window_bounds = array<i64: 256, 64>}, {pipeline_mode = #tpu.pipeline_mode<synchronous>, transform_indices = @transform_1, window_bounds = array<i64: 1, 64>}, {pipeline_mode = #tpu.pipeline_mode<synchronous>, transform_indices = @transform_2, window_bounds = array<i64: 1, 64>}, {pipeline_mode = #tpu.pipeline_mode<synchronous>, transform_indices = @transform_3, window_bounds = array<i64: 64, 256>}, {pipeline_mode = #tpu.pipeline_mode<synchronous>, transform_indices = @transform_4, window_bounds = array<i64: 1, 256>}, {transform_indices = @transform_5, window_bounds = array<i64: 256, 256>}]} {
    %c0 = arith.constant 0 : index
    %c0_0 = arith.constant 0 : index
    %0 = vector.load %arg1[%c0, %c0_0] : memref<256x64xf32, #tpu.memory_space<vmem>>, vector<256x64xf32>
    %cst = arith.constant dense<0.000000e+00> : vector<256xf32>
    %1 = vector.multi_reduction <add>, %0, %cst [1] : vector<256x64xf32> to vector<256xf32>
    %2 = vector.shape_cast %1 : vector<256xf32> to vector<256x1xf32>
    %cst_1 = arith.constant 6.400000e+01 : f32
    %3 = vector.broadcast %cst_1 : f32 to vector<256x1xf32>
    %4 = arith.divf %2, %3 : vector<256x1xf32>
    %5 = vector.broadcast %4 : vector<256x1xf32> to vector<256x64xf32>
    %6 = arith.subf %0, %5 : vector<256x64xf32>
    %7 = arith.mulf %6, %6 : vector<256x64xf32>
    %cst_2 = arith.constant dense<0.000000e+00> : vector<256xf32>
    %8 = vector.multi_reduction <add>, %7, %cst_2 [1] : vector<256x64xf32> to vector<256xf32>
    %9 = vector.shape_cast %8 : vector<256xf32> to vector<256x1xf32>
    %cst_3 = arith.constant 6.400000e+01 : f32
    %10 = vector.broadcast %cst_3 : f32 to vector<256x1xf32>
    %11 = arith.divf %9, %10 : vector<256x1xf32>
    %12 = vector.broadcast %4 : vector<256x1xf32> to vector<256x64xf32>
    %13 = arith.subf %0, %12 : vector<256x64xf32>
    %cst_4 = arith.constant 9.99999997E-7 : f32
    %14 = vector.broadcast %cst_4 : f32 to vector<256x1xf32>
    %15 = arith.addf %11, %14 : vector<256x1xf32>
    %16 = math.rsqrt %15 : vector<256x1xf32>
    %17 = vector.broadcast %16 : vector<256x1xf32> to vector<256x64xf32>
    %18 = arith.mulf %13, %17 : vector<256x64xf32>
    %c0_5 = arith.constant 0 : index
    %c0_6 = arith.constant 0 : index
    %19 = vector.load %arg2[%c0_5, %c0_6] : memref<1x64xf32, #tpu.memory_space<vmem>>, vector<1x64xf32>
    %20 = vector.broadcast %19 : vector<1x64xf32> to vector<256x64xf32>
    %21 = arith.mulf %18, %20 : vector<256x64xf32>
    %c0_7 = arith.constant 0 : index
    %c0_8 = arith.constant 0 : index
    %22 = vector.load %arg3[%c0_7, %c0_8] : memref<1x64xf32, #tpu.memory_space<vmem>>, vector<1x64xf32>
    %23 = vector.broadcast %22 : vector<1x64xf32> to vector<256x64xf32>
    %24 = arith.addf %21, %23 : vector<256x64xf32>
    %25 = arith.truncf %24 : vector<256x64xf32> to vector<256x64xbf16>
    %c0_9 = arith.constant 0 : index
    %c0_10 = arith.constant 0 : index
    %26 = vector.load %arg4[%c0_9, %c0_10] : memref<64x256xbf16, #tpu.memory_space<vmem>>, vector<64x256xbf16>
    %cst_11 = arith.constant dense<0.000000e+00> : vector<256x256xf32>
    %27 = tpu.matmul %25, %26, %cst_11 {dimension_numbers = #tpu.dot_dimension_numbers<[1], [0], [0], [1], [0, 0, 1, 1], [], []>} : vector<256x64xbf16>, vector<64x256xbf16>, vector<256x256xf32> -> vector<256x256xf32>
    %c0_12 = arith.constant 0 : index
    %c0_13 = arith.constant 0 : index
    %28 = vector.load %arg5[%c0_12, %c0_13] : memref<1x256xf32, #tpu.memory_space<vmem>>, vector<1x256xf32>
    %29 = vector.broadcast %28 : vector<1x256xf32> to vector<256x256xf32>
    %30 = arith.addf %27, %29 : vector<256x256xf32>
    %cst_14 = arith.constant 5.000000e-01 : f32
    %31 = vector.broadcast %cst_14 : f32 to vector<256x256xf32>
    %32 = arith.mulf %31, %30 : vector<256x256xf32>
    %cst_15 = arith.constant 4.471500e-02 : f32
    %33 = vector.broadcast %cst_15 : f32 to vector<256x256xf32>
    %34 = arith.mulf %33, %30 : vector<256x256xf32>
    %35 = arith.mulf %34, %30 : vector<256x256xf32>
    %36 = arith.mulf %35, %30 : vector<256x256xf32>
    %37 = arith.addf %30, %36 : vector<256x256xf32>
    %cst_16 = arith.constant 0.797884583 : f32
    %38 = vector.broadcast %cst_16 : f32 to vector<256x256xf32>
    %39 = arith.mulf %38, %37 : vector<256x256xf32>
    %40 = math.tanh %39 : vector<256x256xf32>
    %cst_17 = arith.constant 1.000000e+00 : f32
    %41 = vector.broadcast %cst_17 : f32 to vector<256x256xf32>
    %42 = arith.addf %41, %40 : vector<256x256xf32>
    %43 = arith.mulf %32, %42 : vector<256x256xf32>
    %c0_18 = arith.constant 0 : index
    %c0_19 = arith.constant 0 : index
    %44 = vector.load %arg6[%c0_18, %c0_19] : memref<256x256xf32, #tpu.memory_space<vmem>>, vector<256x256xf32>
    tpu.vector_store %arg6[%c0_18, %c0_19], %43 {strides = array<i32>} : memref<256x256xf32, #tpu.memory_space<vmem>>, vector<256x256xf32>,
    return
  }
  func.func @transform_0(%arg0: i32) -> (i32, i32) {
    %c0_i32 = arith.constant 0 : i32
    %c0_i32_0 = arith.constant 0 : i32
    return %arg0, %c0_i32 : i32, i32
  }
  func.func @transform_1(%arg0: i32) -> (i32, i32) {
    %c0_i32 = arith.constant 0 : i32
    %c0_i32_0 = arith.constant 0 : i32
    %c0_i32_1 = arith.constant 0 : i32
    return %c0_i32, %c0_i32_0 : i32, i32
  }
  func.func @transform_2(%arg0: i32) -> (i32, i32) {
    %c0_i32 = arith.constant 0 : i32
    %c0_i32_0 = arith.constant 0 : i32
    %c0_i32_1 = arith.constant 0 : i32
    return %c0_i32, %c0_i32_0 : i32, i32
  }
  func.func @transform_3(%arg0: i32) -> (i32, i32) {
    %c0_i32 = arith.constant 0 : i32
    %c0_i32_0 = arith.constant 0 : i32
    %c0_i32_1 = arith.constant 0 : i32
    return %c0_i32, %c0_i32_0 : i32, i32
  }
  func.func @transform_4(%arg0: i32) -> (i32, i32) {
    %c0_i32 = arith.constant 0 : i32
    %c0_i32_0 = arith.constant 0 : i32
    %c0_i32_1 = arith.constant 0 : i32
    return %c0_i32, %c0_i32_0 : i32, i32
  }
  func.func @transform_5(%arg0: i32) -> (i32, i32) {
    %c0_i32 = arith.constant 0 : i32
    %c0_i32_0 = arith.constant 0 : i32
    return %arg0, %c0_i32 : i32, i32
  }
}

module attributes {stable_mosaic.version = 11 : i64} {
  func.func @_linear_residual_kernel(%arg0: i32, %arg1: memref<256x256xf32, #tpu.memory_space<vmem>>, %arg2: memref<256x64xbf16, #tpu.memory_space<vmem>>, %arg3: memref<1x64xf32, #tpu.memory_space<vmem>>, %arg4: memref<256x64xf32, #tpu.memory_space<vmem>>, %arg5: memref<256x64xf32, #tpu.memory_space<vmem>>) attributes {dimension_semantics = [#tpu.dimension_semantics<parallel>], iteration_bounds = array<i64: 2>, scalar_prefetch = 0 : i64, scratch_operands = 0 : i64, tpu.core_type = #tpu.core_type<tc>, window_params = [{transform_indices = @transform_0, window_bounds = array<i64: 256, 256>}, {pipeline_mode = #tpu.pipeline_mode<synchronous>, transform_indices = @transform_1, window_bounds = array<i64: 256, 64>}, {pipeline_mode = #tpu.pipeline_mode<synchronous>, transform_indices = @transform_2, window_bounds = array<i64: 1, 64>}, {transform_indices = @transform_3, window_bounds = array<i64: 256, 64>}, {transform_indices = @transform_4, window_bounds = array<i64: 256, 64>}]} {
    %c0 = arith.constant 0 : index
    %c0_0 = arith.constant 0 : index
    %0 = vector.load %arg1[%c0, %c0_0] : memref<256x256xf32, #tpu.memory_space<vmem>>, vector<256x256xf32>
    %1 = arith.truncf %0 : vector<256x256xf32> to vector<256x256xbf16>
    %c0_1 = arith.constant 0 : index
    %c0_2 = arith.constant 0 : index
    %2 = vector.load %arg2[%c0_1, %c0_2] : memref<256x64xbf16, #tpu.memory_space<vmem>>, vector<256x64xbf16>
    %cst = arith.constant dense<0.000000e+00> : vector<256x64xf32>
    %3 = tpu.matmul %1, %2, %cst {dimension_numbers = #tpu.dot_dimension_numbers<[1], [0], [0], [1], [0, 0, 1, 1], [], []>} : vector<256x256xbf16>, vector<256x64xbf16>, vector<256x64xf32> -> vector<256x64xf32>
    %c0_3 = arith.constant 0 : index
    %c0_4 = arith.constant 0 : index
    %4 = vector.load %arg3[%c0_3, %c0_4] : memref<1x64xf32, #tpu.memory_space<vmem>>, vector<1x64xf32>
    %5 = vector.broadcast %4 : vector<1x64xf32> to vector<256x64xf32>
    %6 = arith.addf %3, %5 : vector<256x64xf32>
    %c0_5 = arith.constant 0 : index
    %c0_6 = arith.constant 0 : index
    %7 = vector.load %arg4[%c0_5, %c0_6] : memref<256x64xf32, #tpu.memory_space<vmem>>, vector<256x64xf32>
    %8 = arith.addf %6, %7 : vector<256x64xf32>
    %c0_7 = arith.constant 0 : index
    %c0_8 = arith.constant 0 : index
    %9 = vector.load %arg5[%c0_7, %c0_8] : memref<256x64xf32, #tpu.memory_space<vmem>>, vector<256x64xf32>
    tpu.vector_store %arg5[%c0_7, %c0_8], %8 {strides = array<i32>} : memref<256x64xf32, #tpu.memory_space<vmem>>, vector<256x64xf32>,
    return
  }
  func.func @transform_0(%arg0: i32) -> (i32, i32) {
    %c0_i32 = arith.constant 0 : i32
    %c0_i32_0 = arith.constant 0 : i32
    return %arg0, %c0_i32 : i32, i32
  }
  func.func @transform_1(%arg0: i32) -> (i32, i32) {
    %c0_i32 = arith.constant 0 : i32
    %c0_i32_0 = arith.constant 0 : i32
    %c0_i32_1 = arith.constant 0 : i32
    return %c0_i32, %c0_i32_0 : i32, i32
  }
  func.func @transform_2(%arg0: i32) -> (i32, i32) {
    %c0_i32 = arith.constant 0 : i32
    %c0_i32_0 = arith.constant 0 : i32
    %c0_i32_1 = arith.constant 0 : i32
    return %c0_i32, %c0_i32_0 : i32, i32
  }
  func.func @transform_3(%arg0: i32) -> (i32, i32) {
    %c0_i32 = arith.constant 0 : i32
    %c0_i32_0 = arith.constant 0 : i32
    return %arg0, %c0_i32 : i32, i32
  }
  func.func @transform_4(%arg0: i32) -> (i32, i32) {
    %c0_i32 = arith.constant 0 : i32
    %c0_i32_0 = arith.constant 0 : i32
    return %arg0, %c0_i32 : i32, i32
  }
}

module attributes {stable_mosaic.version = 11 : i64} {
  func.func @_layernorm_kernel(%arg0: i32, %arg1: memref<256x64xf32, #tpu.memory_space<vmem>>, %arg2: memref<1x64xf32, #tpu.memory_space<vmem>>, %arg3: memref<1x64xf32, #tpu.memory_space<vmem>>, %arg4: memref<256x64xf32, #tpu.memory_space<vmem>>) attributes {dimension_semantics = [#tpu.dimension_semantics<parallel>], iteration_bounds = array<i64: 2>, scalar_prefetch = 0 : i64, scratch_operands = 0 : i64, tpu.core_type = #tpu.core_type<tc>, window_params = [{transform_indices = @transform_0, window_bounds = array<i64: 256, 64>}, {pipeline_mode = #tpu.pipeline_mode<synchronous>, transform_indices = @transform_1, window_bounds = array<i64: 1, 64>}, {pipeline_mode = #tpu.pipeline_mode<synchronous>, transform_indices = @transform_2, window_bounds = array<i64: 1, 64>}, {transform_indices = @transform_3, window_bounds = array<i64: 256, 64>}]} {
    %c0 = arith.constant 0 : index
    %c0_0 = arith.constant 0 : index
    %0 = vector.load %arg1[%c0, %c0_0] : memref<256x64xf32, #tpu.memory_space<vmem>>, vector<256x64xf32>
    %cst = arith.constant dense<0.000000e+00> : vector<256xf32>
    %1 = vector.multi_reduction <add>, %0, %cst [1] : vector<256x64xf32> to vector<256xf32>
    %2 = vector.shape_cast %1 : vector<256xf32> to vector<256x1xf32>
    %cst_1 = arith.constant 6.400000e+01 : f32
    %3 = vector.broadcast %cst_1 : f32 to vector<256x1xf32>
    %4 = arith.divf %2, %3 : vector<256x1xf32>
    %5 = vector.broadcast %4 : vector<256x1xf32> to vector<256x64xf32>
    %6 = arith.subf %0, %5 : vector<256x64xf32>
    %7 = arith.mulf %6, %6 : vector<256x64xf32>
    %cst_2 = arith.constant dense<0.000000e+00> : vector<256xf32>
    %8 = vector.multi_reduction <add>, %7, %cst_2 [1] : vector<256x64xf32> to vector<256xf32>
    %9 = vector.shape_cast %8 : vector<256xf32> to vector<256x1xf32>
    %cst_3 = arith.constant 6.400000e+01 : f32
    %10 = vector.broadcast %cst_3 : f32 to vector<256x1xf32>
    %11 = arith.divf %9, %10 : vector<256x1xf32>
    %12 = vector.broadcast %4 : vector<256x1xf32> to vector<256x64xf32>
    %13 = arith.subf %0, %12 : vector<256x64xf32>
    %cst_4 = arith.constant 9.99999997E-7 : f32
    %14 = vector.broadcast %cst_4 : f32 to vector<256x1xf32>
    %15 = arith.addf %11, %14 : vector<256x1xf32>
    %16 = math.rsqrt %15 : vector<256x1xf32>
    %17 = vector.broadcast %16 : vector<256x1xf32> to vector<256x64xf32>
    %18 = arith.mulf %13, %17 : vector<256x64xf32>
    %c0_5 = arith.constant 0 : index
    %c0_6 = arith.constant 0 : index
    %19 = vector.load %arg2[%c0_5, %c0_6] : memref<1x64xf32, #tpu.memory_space<vmem>>, vector<1x64xf32>
    %20 = vector.broadcast %19 : vector<1x64xf32> to vector<256x64xf32>
    %21 = arith.mulf %18, %20 : vector<256x64xf32>
    %c0_7 = arith.constant 0 : index
    %c0_8 = arith.constant 0 : index
    %22 = vector.load %arg3[%c0_7, %c0_8] : memref<1x64xf32, #tpu.memory_space<vmem>>, vector<1x64xf32>
    %23 = vector.broadcast %22 : vector<1x64xf32> to vector<256x64xf32>
    %24 = arith.addf %21, %23 : vector<256x64xf32>
    %c0_9 = arith.constant 0 : index
    %c0_10 = arith.constant 0 : index
    %25 = vector.load %arg4[%c0_9, %c0_10] : memref<256x64xf32, #tpu.memory_space<vmem>>, vector<256x64xf32>
    tpu.vector_store %arg4[%c0_9, %c0_10], %24 {strides = array<i32>} : memref<256x64xf32, #tpu.memory_space<vmem>>, vector<256x64xf32>,
    return
  }
  func.func @transform_0(%arg0: i32) -> (i32, i32) {
    %c0_i32 = arith.constant 0 : i32
    %c0_i32_0 = arith.constant 0 : i32
    return %arg0, %c0_i32 : i32, i32
  }
  func.func @transform_1(%arg0: i32) -> (i32, i32) {
    %c0_i32 = arith.constant 0 : i32
    %c0_i32_0 = arith.constant 0 : i32
    %c0_i32_1 = arith.constant 0 : i32
    return %c0_i32, %c0_i32_0 : i32, i32
  }
  func.func @transform_2(%arg0: i32) -> (i32, i32) {
    %c0_i32 = arith.constant 0 : i32
    %c0_i32_0 = arith.constant 0 : i32
    %c0_i32_1 = arith.constant 0 : i32
    return %c0_i32, %c0_i32_0 : i32, i32
  }
  func.func @transform_3(%arg0: i32) -> (i32, i32) {
    %c0_i32 = arith.constant 0 : i32
    %c0_i32_0 = arith.constant 0 : i32
    return %arg0, %c0_i32 : i32, i32
  }
}

</mosaic_0001>

<bundles_post_ra>
// kernel: forward.17
= control target key start
LH: loop header
LB: loop body
LE: loop exit
PB: predicated region body
PF: predicated region fallthrough
CT: control target
= control target key end

     0   :  { %vm1177_vm0 = vcmask 523264   ;;  %s2664_s1 = inlined_call_operand.vmem [shape: bf16[768,64], index: 1, kind: input, shape index: {}]   ;;  %s2665_s0 = inlined_call_operand.vmem [shape: f32[256,768], index: 0, kind: input, shape index: {}]   ;;  %s2666_s2 = inlined_call_operand.vmem [shape: f32[1,64], index: 2, kind: input, shape index: {}]   ;;  %s2667_s3 = inlined_call_operand.vmem [shape: f32[256,64], index: 3, kind: output, shape index: {}]  }
   0x1   :  { %v1615_v0 = vld [vmem:[%s2664_s1 + $0x40] sm:$0xff]   ;;  %v1617_v2 = vld [vmem:[%s2664_s1 + $0x48] sm:$0xff]   ;;  %v1619_v4 = vld [vmem:[%s2664_s1 + $0x50] sm:$0xff]  }
   0x2   :  { %v1616_v1 = vld [vmem:[%s2664_s1] sm:$0xff]   ;;  %1263 = vmatprep.subr.bf16.mxu0 %v1615_v0  ;;  %1599 = vmatprep.subr.bf16.mxu1 %v1615_v0  ;;  %v1618_v3 = vld [vmem:[%s2664_s1 + $0x8] sm:$0xff]   ;;  %v1620_v5 = vld [vmem:[%s2664_s1 + $0x10] sm:$0xff]  }
   0x3   :  { %1264 = vmatpush3.bf16.msra.mxu0 %v1616_v1  ;;  %1607 = vmatpush3.bf16.msra.mxu1 %v1616_v1  ;;  %v1621_v6 = vld [vmem:[%s2664_s1 + $0x58] sm:$0xff]   ;;  %v1623_v8 = vld [vmem:[%s2664_s1 + $0x60] sm:$0xff]   ;;  %v1625_v10 = vld [vmem:[%s2664_s1 + $0x68] sm:$0xff]  }
   0x4   :  { %1265 = vmatprep.subr.bf16.mxu0 %v1617_v2  ;;  %1600 = vmatprep.subr.bf16.mxu1 %v1617_v2  ;;  %v1622_v7 = vld [vmem:[%s2664_s1 + $0x18] sm:$0xff]   ;;  %v1624_v9 = vld [vmem:[%s2664_s1 + $0x20] sm:$0xff]   ;;  %v16_v11 = vld [vmem:[%s2665_s0 + $0x8] sm:$0xff] }
   0x5   :  { %v22_v12 = vld [vmem:[%s2665_s0 + $0x38] sm:$0xff]  ;;  %v112_v13 = vld [vmem:[%s2665_s0 + $0x308] sm:$0xff]  ;;  %v1627_v18 = vld [vmem:[%s2664_s1 + $0x70] sm:$0xff]  }
   0x6   :  { %v208_v14 = vpack.c.bf16 %v22_v12, %v16_v11  ;;  %v118_v15 = vld [vmem:[%s2665_s0 + $0x338] sm:$0xff]  ;;  %v1626_v17 = vld [vmem:[%s2664_s1 + $0x28] sm:$0xff]   ;;  %v1628_v19 = vld [vmem:[%s2664_s1 + $0x30] sm:$0xff]  }
   0x7   :  { %1266 = vmatpush3.bf16.msra.mxu0 %v1618_v3  ;;  %1608 = vmatpush3.bf16.msra.mxu1 %v1618_v3  ;;  %v256_v16 = vpack.c.bf16 %v118_v15, %v112_v13  ;;  %v1629_v20 = vld [vmem:[%s2664_s1 + $0x78] sm:$0xff]   ;;  %v15_v22 = vld [vmem:[%s2665_s0] sm:$0xff]  ;;  %v21_v23 = vld [vmem:[%s2665_s0 + $0x30] sm:$0xff] }
   0x8   :  { %1267 = vmatprep.subr.bf16.mxu0 %v1619_v4  ;;  %1601 = vmatprep.subr.bf16.mxu1 %v1619_v4  ;;  %v1630_v21 = vld [vmem:[%s2664_s1 + $0x38] sm:$0xff]   ;;  %v111_v24 = vld [vmem:[%s2665_s0 + $0x300] sm:$0xff]  ;;  %v117_v25 = vld [vmem:[%s2665_s0 + $0x330] sm:$0xff]  ;;  %v207_v32 = vpack.c.bf16 %v21_v23, %v15_v22 }
   0x9   :  { %726 = vmatprep.mubr.bf16.mxu0 %v208_v14  ;;  %790 = vmatprep.mubr.bf16.mxu1 %v256_v16  ;;  %v1631_v26 = vld [vmem:[%s2664_s1 + $0xc0] sm:$0xff]   ;;  %v28_v28 = vld [vmem:[%s2665_s0 + $0x68] sm:$0xff]  ;;  %v34_v29 = vld [vmem:[%s2665_s0 + $0x98] sm:$0xff]  ;;  %v255_v33 = vpack.c.bf16 %v117_v25, %v111_v24 }
   0xa   :  { %v1633_v27 = vld [vmem:[%s2664_s1 + $0x140] sm:$0xff]   ;;  %v124_v30 = vld [vmem:[%s2665_s0 + $0x368] sm:$0xff]  ;;  %v130_v31 = vld [vmem:[%s2665_s0 + $0x398] sm:$0xff]  ;;  %v214_v37 = vpack.c.bf16 %v34_v29, %v28_v28 }
   0xb   :  { %1268 = vmatpush3.bf16.msra.mxu0 %v1620_v5  ;;  %1609 = vmatpush3.bf16.msra.mxu1 %v1620_v5  ;;  %v1632_v34 = vld [vmem:[%s2664_s1 + $0x80] sm:$0xff]   ;;  %v1635_v36 = vld [vmem:[%s2664_s1 + $0xc8] sm:$0xff]   ;;  %v262_v38 = vpack.c.bf16 %v130_v31, %v124_v30  ;;  %v33_v41 = vld [vmem:[%s2665_s0 + $0x90] sm:$0xff] }
   0xc   :  { %1269 = vmatprep.subr.bf16.mxu0 %v1621_v6  ;;  %1602 = vmatprep.subr.bf16.mxu1 %v1621_v6  ;;  %v1634_v35 = vld [vmem:[%s2664_s1 + $0x100] sm:$0xff]   ;;  %v1637_v39 = vld [vmem:[%s2664_s1 + $0x148] sm:$0xff]   ;;  %v129_v43 = vld [vmem:[%s2665_s0 + $0x390] sm:$0xff] }
   0xd   :  { %v27_v40 = vld [vmem:[%s2665_s0 + $0x60] sm:$0xff]  ;;  %v1636_v44 = vld [vmem:[%s2664_s1 + $0x88] sm:$0xff]   ;;  %v46_v47 = vld [vmem:[%s2665_s0 + $0xf8] sm:$0xff] }
   0xe   :  { %v123_v42 = vld [vmem:[%s2665_s0 + $0x360] sm:$0xff]  ;;  %v1638_v45 = vld [vmem:[%s2664_s1 + $0x108] sm:$0xff]   ;;  %v142_v49 = vld [vmem:[%s2665_s0 + $0x3f8] sm:$0xff]  ;;  %v213_v52 = vpack.c.bf16 %v33_v41, %v27_v40 }
   0xf   :  { %1270 = vmatpush3.bf16.msra.mxu0 %v1622_v7  ;;  %1610 = vmatpush3.bf16.msra.mxu1 %v1622_v7  ;;  %v40_v46 = vld [vmem:[%s2665_s0 + $0xc8] sm:$0xff]  ;;  %v1639_v50 = vld [vmem:[%s2664_s1 + $0xd0] sm:$0xff]   ;;  %v261_v53 = vpack.c.bf16 %v129_v43, %v123_v42  ;;  %v1643_v58 = vld [vmem:[%s2664_s1 + $0xd8] sm:$0xff]  }
  0x10   :  { %1271 = vmatprep.subr.bf16.mxu0 %v1623_v8  ;;  %1603 = vmatprep.subr.bf16.mxu1 %v1623_v8  ;;  %v136_v48 = vld [vmem:[%s2665_s0 + $0x3c8] sm:$0xff]  ;;  %v1641_v51 = vld [vmem:[%s2664_s1 + $0x150] sm:$0xff]   ;;  %v220_v55 = vpack.c.bf16 %v46_v47, %v40_v46  ;;  %v39_v59 = vld [vmem:[%s2665_s0 + $0xc0] sm:$0xff] }
  0x11   :  { %v1640_v54 = vld [vmem:[%s2664_s1 + $0x90] sm:$0xff]   ;;  %v268_v56 = vpack.c.bf16 %v142_v49, %v136_v48  ;;  %v1645_v61 = vld [vmem:[%s2664_s1 + $0x158] sm:$0xff]   ;;  %v135_v62 = vld [vmem:[%s2665_s0 + $0x3c0] sm:$0xff] }
  0x12   :  { %v1642_v57 = vld [vmem:[%s2664_s1 + $0x110] sm:$0xff]   ;;  %v52_v0 = vld [vmem:[%s2665_s0 + $0x128] sm:$0xff]  ;;  %v58_v1 = vld [vmem:[%s2665_s0 + $0x158] sm:$0xff] }
  0x13   :  { %1272 = vmatpush3.bf16.msra.mxu0 %v1624_v9  ;;  %1611 = vmatpush3.bf16.msra.mxu1 %v1624_v9  ;;  %v45_v60 = vld [vmem:[%s2665_s0 + $0xf0] sm:$0xff]  ;;  %v148_v2 = vld [vmem:[%s2665_s0 + $0x428] sm:$0xff]  ;;  %v154_v3 = vld [vmem:[%s2665_s0 + $0x458] sm:$0xff]  ;;  %v226_v9 = vpack.c.bf16 %v58_v1, %v52_v0 }
  0x14   :  { %1273 = vmatprep.subr.bf16.mxu0 %v1625_v10  ;;  %1604 = vmatprep.subr.bf16.mxu1 %v1625_v10  ;;  %v141_v63 = vld [vmem:[%s2665_s0 + $0x3f0] sm:$0xff]  ;;  %v1644_v4 = vld [vmem:[%s2664_s1 + $0x98] sm:$0xff]   ;;  %v219_v6 = vpack.c.bf16 %v45_v60, %v39_v59  ;;  %v1647_v8 = vld [vmem:[%s2664_s1 + $0xe0] sm:$0xff]   ;;  %v274_v10 = vpack.c.bf16 %v154_v3, %v148_v2 }
  0x15   :  { %v1646_v5 = vld [vmem:[%s2664_s1 + $0x118] sm:$0xff]   ;;  %v267_v7 = vpack.c.bf16 %v141_v63, %v135_v62  ;;  %v1648_v11 = vld [vmem:[%s2664_s1 + $0xa0] sm:$0xff]   ;;  %v57_v14 = vld [vmem:[%s2665_s0 + $0x150] sm:$0xff] }
  0x16   :  { %v1649_v12 = vld [vmem:[%s2664_s1 + $0x160] sm:$0xff]   ;;  %v1651_v22 = vld [vmem:[%s2664_s1 + $0xe8] sm:$0xff]   ;;  %v69_v31 = vld [vmem:[%s2665_s0 + $0x1b0] sm:$0xff] }
  0x17   :  { %1274 = vmatpush3.bf16.msra.mxu0 %v1626_v17  ;;  %1612 = vmatpush3.bf16.msra.mxu1 %v1626_v17  ;;  %v51_v13 = vld [vmem:[%s2665_s0 + $0x120] sm:$0xff]  ;;  %v153_v17 = vld [vmem:[%s2665_s0 + $0x450] sm:$0xff]  ;;  %v1652_v23 = vld [vmem:[%s2664_s1 + $0xa8] sm:$0xff]  }
  0x18   :  { %1275 = vmatprep.subr.bf16.mxu0 %v1627_v18  ;;  %1605 = vmatprep.subr.bf16.mxu1 %v1627_v18  ;;  %v1650_v15 = vld [vmem:[%s2664_s1 + $0x120] sm:$0xff]   ;;  %v64_v18 = vld [vmem:[%s2665_s0 + $0x188] sm:$0xff]  ;;  %v225_v24 = vpack.c.bf16 %v57_v14, %v51_v13  ;;  %v1657_v40 = vld [vmem:[%s2664_s1 + $0x170] sm:$0xff]  }
  0x19   :  { %v147_v16 = vld [vmem:[%s2665_s0 + $0x420] sm:$0xff]  ;;  %v1654_v29 = vld [vmem:[%s2664_s1 + $0x128] sm:$0xff]   ;;  %v1658_v43 = vld [vmem:[%s2664_s1 + $0x130] sm:$0xff]  }
  0x1a   :  { %v273_v25 = vpack.c.bf16 %v153_v17, %v147_v16  ;;  %v63_v30 = vld [vmem:[%s2665_s0 + $0x180] sm:$0xff]  ;;  %v81_v47 = vld [vmem:[%s2665_s0 + $0x210] sm:$0xff]  ;;  %v100_v2 = vld [vmem:[%s2665_s0 + $0x2a8] sm:$0xff] }
  0x1b   :  { %1276 = vmatpush3.bf16.msra.mxu0 %v1628_v19  ;;  %1613 = vmatpush3.bf16.msra.mxu1 %v1628_v19  ;;  %v70_v19 = vld [vmem:[%s2665_s0 + $0x1b8] sm:$0xff]  ;;  %v231_v41 = vpack.c.bf16 %v69_v31, %v63_v30  ;;  %v75_v46 = vld [vmem:[%s2665_s0 + $0x1e0] sm:$0xff]  ;;  %v177_v49 = vld [vmem:[%s2665_s0 + $0x510] sm:$0xff] }
  0x1c   :  { %1277 = vmatprep.subr.bf16.mxu0 %v1629_v20  ;;  %1606 = vmatprep.subr.bf16.mxu1 %v1629_v20  ;;  %v160_v20 = vld [vmem:[%s2665_s0 + $0x488] sm:$0xff]  ;;  %v171_v48 = vld [vmem:[%s2665_s0 + $0x4e0] sm:$0xff]  ;;  %v93_v63 = vld [vmem:[%s2665_s0 + $0x270] sm:$0xff] }
  0x1d   :  { %v285_v59 = vpack.c.bf16 %v177_v49, %v171_v48  ;;  %v87_v62 = vld [vmem:[%s2665_s0 + $0x240] sm:$0xff]  ;;  %v189_v1 = vld [vmem:[%s2665_s0 + $0x570] sm:$0xff]  ;;  %v106_v3 = vld [vmem:[%s2665_s0 + $0x2d8] sm:$0xff] }
  0x1e   :  { %v183_v0 = vld [vmem:[%s2665_s0 + $0x540] sm:$0xff]  ;;  %v201_v13 = vld [vmem:[%s2665_s0 + $0x5d0] sm:$0xff]  ;;  %v18_v14 = vld [vmem:[%s2665_s0 + $0x18] sm:$0xff] }
  0x1f   :  { %1278 = vmatpush3.bf16.msra.mxu0 %v1630_v21  ;;  %1614 = vmatpush3.bf16.msra.mxu1 %v1630_v21  ;;  %v166_v21 = vld [vmem:[%s2665_s0 + $0x4b8] sm:$0xff]  ;;  %v20_v16 = vld [vmem:[%s2665_s0 + $0x28] sm:$0xff]  ;;  %v43_v48 = vld [vmem:[%s2665_s0 + $0xe0] sm:$0xff] }
  0x20   :  { %1375 = vmatprep.subr.bf16.mxu1 %v1631_v26  ;;  %1487 = vmatprep.subr.bf16.mxu0 %v1633_v27  ;;  %v1653_v26 = vld [vmem:[%s2664_s1 + $0x168] sm:$0xff]   ;;  %v232_v27 = vpack.c.bf16 %v70_v19, %v64_v18  ;;  %v280_v28 = vpack.c.bf16 %v166_v21, %v160_v20  ;;  %v26_v17 = vld [vmem:[%s2665_s0 + $0x58] sm:$0xff]  ;;  %v49_v49 = vld [vmem:[%s2665_s0 + $0x110] sm:$0xff] }
  0x21   :  { %v212_v21 = vpack.c.bf16 %v26_v17, %v20_v16 }
  0x22   :  { %727 = vmatmul.mubr.bf16.vlgmr.msra.gmra.mrb[0].mxu0 %v207_v32  ;;  %791 = vmatmul.mubr.bf16.vlgmr.msra.gmra.mrb[0].mxu1 %v255_v33  ;;  %v159_v32 = vld [vmem:[%s2665_s0 + $0x480] sm:$0xff]  ;;  %v165_v33 = vld [vmem:[%s2665_s0 + $0x4b0] sm:$0xff] }
  0x23   :  { %1376 = vmatpush3.bf16.msra.mxu1 %v1632_v34  ;;  %1488 = vmatpush3.bf16.msra.mxu0 %v1634_v35  ;;  %v76_v34 = vld [vmem:[%s2665_s0 + $0x1e8] sm:$0xff]  ;;  %v82_v35 = vld [vmem:[%s2665_s0 + $0x218] sm:$0xff]  ;;  %v279_v42 = vpack.c.bf16 %v165_v33, %v159_v32 }
  0x24   :  { %734 = vmatprep.mubr.bf16.mxu0 %v214_v37  ;;  %798 = vmatprep.mubr.bf16.mxu1 %v262_v38  ;;  %v178_v37 = vld [vmem:[%s2665_s0 + $0x518] sm:$0xff]  ;;  %v1655_v38 = vld [vmem:[%s2664_s1 + $0xf0] sm:$0xff]  }
  0x25   :  { %1377 = vmatprep.subr.bf16.mxu1 %v1635_v36  ;;  %1489 = vmatprep.subr.bf16.mxu0 %v1637_v39  ;;  %v172_v36 = vld [vmem:[%s2665_s0 + $0x4e8] sm:$0xff]  ;;  %v1656_v39 = vld [vmem:[%s2664_s1 + $0xb0] sm:$0xff]  }
  0x27   :  { %1378 = vmatpush3.bf16.msra.mxu1 %v1636_v44  ;;  %1490 = vmatpush3.bf16.msra.mxu0 %v1638_v45  ;;  %v238_v44 = vpack.c.bf16 %v82_v35, %v76_v34  ;;  %v286_v45 = vpack.c.bf16 %v178_v37, %v172_v36  ;;  %v29_v34 = vld [vmem:[%s2665_s0 + $0x70] sm:$0xff]  ;;  %v35_v35 = vld [vmem:[%s2665_s0 + $0xa0] sm:$0xff] }
  0x28   :  { %1379 = vmatprep.subr.bf16.mxu1 %v1639_v50  ;;  %1491 = vmatprep.subr.bf16.mxu0 %v1641_v51  ;;  %v88_v50 = vld [vmem:[%s2665_s0 + $0x248] sm:$0xff]  ;;  %v94_v51 = vld [vmem:[%s2665_s0 + $0x278] sm:$0xff]  ;;  %v31_v36 = vld [vmem:[%s2665_s0 + $0x80] sm:$0xff] }
  0x29   :  { %v244_v60 = vpack.c.bf16 %v94_v51, %v88_v50  ;;  %v37_v37 = vld [vmem:[%s2665_s0 + $0xb0] sm:$0xff]  ;;  %v54_v50 = vld [vmem:[%s2665_s0 + $0x138] sm:$0xff]  ;;  %v60_v51 = vld [vmem:[%s2665_s0 + $0x168] sm:$0xff] }
  0x2a   :  { %735 = vmatmul.mubr.bf16.gmra.mrb[4].mxu0 %v213_v52  ;;  %799 = vmatmul.mubr.bf16.gmra.mrb[4].mxu1 %v261_v53  ;;  %v184_v52 = vld [vmem:[%s2665_s0 + $0x548] sm:$0xff]  ;;  %v190_v53 = vld [vmem:[%s2665_s0 + $0x578] sm:$0xff] }
  0x2b   :  { %742 = vmatprep.mubr.bf16.mxu0 %v220_v55  ;;  %806 = vmatprep.mubr.bf16.mxu1 %v268_v56  ;;  %v1660_v55 = vld [vmem:[%s2664_s1 + $0xb8] sm:$0xff]  }
  0x2c   :  { %1380 = vmatpush3.bf16.msra.mxu1 %v1640_v54  ;;  %1492 = vmatpush3.bf16.msra.mxu0 %v1642_v57  ;;  %v1659_v54 = vld [vmem:[%s2664_s1 + $0xf8] sm:$0xff]  }
  0x2d   :  { %1381 = vmatprep.subr.bf16.mxu1 %v1643_v58  ;;  %1493 = vmatprep.subr.bf16.mxu0 %v1645_v61  ;;  %v1661_v56 = vld [vmem:[%s2664_s1 + $0x178] sm:$0xff]   ;;  %v237_v58 = vpack.c.bf16 %v81_v47, %v75_v46  ;;  %v292_v61 = vpack.c.bf16 %v190_v53, %v184_v52  ;;  %v41_v46 = vld [vmem:[%s2665_s0 + $0xd0] sm:$0xff]  ;;  %v47_v47 = vld [vmem:[%s2665_s0 + $0x100] sm:$0xff] }
  0x2e   :  { %v1662_v57 = vld [vmem:[%s2664_s1 + $0x138] sm:$0xff]   ;;  %v56_v52 = vld [vmem:[%s2665_s0 + $0x148] sm:$0xff] }
  0x2f   :  { %v62_v53 = vld [vmem:[%s2665_s0 + $0x178] sm:$0xff] }
  0x30   :  { %1382 = vmatpush3.bf16.msra.mxu1 %v1644_v4  ;;  %1494 = vmatpush3.bf16.msra.mxu0 %v1646_v5  ;;  %v196_v4 = vld [vmem:[%s2665_s0 + $0x5a8] sm:$0xff]  ;;  %v202_v5 = vld [vmem:[%s2665_s0 + $0x5d8] sm:$0xff] }
  0x31   :  { %1383 = vmatprep.subr.bf16.mxu1 %v1647_v8  ;;  %1495 = vmatprep.subr.bf16.mxu0 %v1649_v12  ;;  %v250_v8 = vpack.c.bf16 %v106_v3, %v100_v2  ;;  %v195_v12 = vld [vmem:[%s2665_s0 + $0x5a0] sm:$0xff] }
  0x32   :  { %743 = vmatmul.mubr.bf16.gmra.mrb[8].mxu0 %v219_v6  ;;  %807 = vmatmul.mubr.bf16.gmra.mrb[8].mxu1 %v267_v7  ;;  %v243_v6 = vpack.c.bf16 %v93_v63, %v87_v62  ;;  %v291_v7 = vpack.c.bf16 %v189_v1, %v183_v0  ;;  %v297_v19 = vpack.c.bf16 %v201_v13, %v195_v12  ;;  %v66_v62 = vld [vmem:[%s2665_s0 + $0x198] sm:$0xff]  ;;  %v72_v63 = vld [vmem:[%s2665_s0 + $0x1c8] sm:$0xff] }
  0x33   :  { %750 = vmatprep.mubr.bf16.mxu0 %v226_v9  ;;  %814 = vmatprep.mubr.bf16.mxu1 %v274_v10  ;;  %v298_v9 = vpack.c.bf16 %v202_v5, %v196_v4  ;;  %v99_v10 = vld [vmem:[%s2665_s0 + $0x2a0] sm:$0xff]  ;;  %v68_v0 = vld [vmem:[%s2665_s0 + $0x1a8] sm:$0xff]  ;;  %v74_v1 = vld [vmem:[%s2665_s0 + $0x1d8] sm:$0xff]  ;;  %v234_v4 = vpack.c.bf16 %v72_v63, %v66_v62 }
  0x34   :  { %1384 = vmatpush3.bf16.msra.mxu1 %v1648_v11  ;;  %1496 = vmatpush3.bf16.msra.mxu0 %v1650_v15  ;;  %v105_v11 = vld [vmem:[%s2665_s0 + $0x2d0] sm:$0xff]  ;;  %v24_v15 = vld [vmem:[%s2665_s0 + $0x48] sm:$0xff]  ;;  %v236_v5 = vpack.c.bf16 %v74_v1, %v68_v0  ;;  %v86_v13 = vld [vmem:[%s2665_s0 + $0x238] sm:$0xff] }
  0x35   :  { %1385 = vmatprep.subr.bf16.mxu1 %v1651_v22  ;;  %1497 = vmatprep.subr.bf16.mxu0 %v1653_v26  ;;  %v249_v18 = vpack.c.bf16 %v105_v11, %v99_v10  ;;  %v210_v20 = vpack.c.bf16 %v24_v15, %v18_v14  ;;  %v17_v22 = vld [vmem:[%s2665_s0 + $0x10] sm:$0xff]  ;;  %v30_v26 = vld [vmem:[%s2665_s0 + $0x78] sm:$0xff]  ;;  %v84_v11 = vld [vmem:[%s2665_s0 + $0x228] sm:$0xff] }
  0x36   :  { %v78_v10 = vld [vmem:[%s2665_s0 + $0x1f8] sm:$0xff]  ;;  %v80_v12 = vld [vmem:[%s2665_s0 + $0x208] sm:$0xff] }
  0x37   :  { %v240_v16 = vpack.c.bf16 %v84_v11, %v78_v10  ;;  %v242_v17 = vpack.c.bf16 %v86_v13, %v80_v12 }
  0x38   :  { %1386 = vmatpush3.bf16.msra.mxu1 %v1652_v23  ;;  %1498 = vmatpush3.bf16.msra.mxu0 %v1654_v29  ;;  %v23_v23 = vld [vmem:[%s2665_s0 + $0x40] sm:$0xff]  ;;  %v38_v29 = vld [vmem:[%s2665_s0 + $0xb8] sm:$0xff] }
  0x39   :  { %1387 = vmatprep.subr.bf16.mxu1 %v1655_v38  ;;  %1499 = vmatprep.subr.bf16.mxu0 %v1657_v40  ;;  %v209_v30 = vpack.c.bf16 %v23_v23, %v17_v22  ;;  %v42_v38 = vld [vmem:[%s2665_s0 + $0xd8] sm:$0xff]  ;;  %v44_v40 = vld [vmem:[%s2665_s0 + $0xe8] sm:$0xff] }
  0x3a   :  { %751 = vmatmul.mubr.bf16.gmra.mrb[12].mxu0 %v225_v24  ;;  %815 = vmatmul.mubr.bf16.gmra.mrb[12].mxu1 %v273_v25  ;;  %v19_v24 = vld [vmem:[%s2665_s0 + $0x20] sm:$0xff]  ;;  %v25_v25 = vld [vmem:[%s2665_s0 + $0x50] sm:$0xff]  ;;  %v90_v22 = vld [vmem:[%s2665_s0 + $0x258] sm:$0xff] }
  0x3b   :  { %758 = vmatprep.mubr.bf16.mxu0 %v232_v27  ;;  %822 = vmatprep.mubr.bf16.mxu1 %v280_v28  ;;  %v36_v27 = vld [vmem:[%s2665_s0 + $0xa8] sm:$0xff]  ;;  %v211_v31 = vpack.c.bf16 %v25_v25, %v19_v24  ;;  %v98_v25 = vld [vmem:[%s2665_s0 + $0x298] sm:$0xff] }
  0x3c   :  { %1388 = vmatpush3.bf16.msra.mxu1 %v1656_v39  ;;  %1500 = vmatpush3.bf16.msra.mxu0 %v1658_v43  ;;  %v32_v28 = vld [vmem:[%s2665_s0 + $0x88] sm:$0xff]  ;;  %v216_v32 = vpack.c.bf16 %v36_v27, %v30_v26  ;;  %v217_v43 = vpack.c.bf16 %v37_v37, %v31_v36  ;;  %v110_v37 = vld [vmem:[%s2665_s0 + $0x2f8] sm:$0xff] }
  0x3d   :  { %1389 = vmatprep.subr.bf16.mxu1 %v1659_v54  ;;  %1501 = vmatprep.subr.bf16.mxu0 %v1661_v56  ;;  %v218_v33 = vpack.c.bf16 %v38_v29, %v32_v28  ;;  %v48_v39 = vld [vmem:[%s2665_s0 + $0x108] sm:$0xff]  ;;  %v221_v54 = vpack.c.bf16 %v47_v47, %v41_v46  ;;  %v228_v56 = vpack.c.bf16 %v60_v51, %v54_v50  ;;  %v114_v46 = vld [vmem:[%s2665_s0 + $0x318] sm:$0xff] }
  0x3e   :  { %v96_v23 = vld [vmem:[%s2665_s0 + $0x288] sm:$0xff] }
  0x3f   :  { %v92_v24 = vld [vmem:[%s2665_s0 + $0x268] sm:$0xff]  ;;  %v246_v28 = vpack.c.bf16 %v96_v23, %v90_v22 }
  0x40   :  { %1390 = vmatpush3.bf16.msra.mxu1 %v1660_v55  ;;  %1502 = vmatpush3.bf16.msra.mxu0 %v1662_v57  ;;  %v223_v55 = vpack.c.bf16 %v49_v49, %v43_v48  ;;  %v230_v57 = vpack.c.bf16 %v62_v53, %v56_v52  ;;  %v248_v29 = vpack.c.bf16 %v98_v25, %v92_v24  ;;  %v104_v36 = vld [vmem:[%s2665_s0 + $0x2c8] sm:$0xff]  ;;  %v122_v49 = vld [vmem:[%s2665_s0 + $0x358] sm:$0xff] }
  0x41   :  { %v120_v47 = vld [vmem:[%s2665_s0 + $0x348] sm:$0xff] }
  0x42   :  { %759 = vmatmul.mubr.bf16.gmra.mrb[16].mxu0 %v231_v41  ;;  %823 = vmatmul.mubr.bf16.gmra.mrb[16].mxu1 %v279_v42  ;;  %v50_v41 = vld [vmem:[%s2665_s0 + $0x118] sm:$0xff]  ;;  %v215_v42 = vpack.c.bf16 %v35_v35, %v29_v34  ;;  %v108_v35 = vld [vmem:[%s2665_s0 + $0x2e8] sm:$0xff]  ;;  %v258_v52 = vpack.c.bf16 %v120_v47, %v114_v46 }
  0x43   :  { %766 = vmatprep.mubr.bf16.mxu0 %v238_v44  ;;  %830 = vmatprep.mubr.bf16.mxu1 %v286_v45  ;;  %v222_v44 = vpack.c.bf16 %v48_v39, %v42_v38  ;;  %v224_v45 = vpack.c.bf16 %v50_v41, %v44_v40  ;;  %v102_v34 = vld [vmem:[%s2665_s0 + $0x2b8] sm:$0xff]  ;;  %v254_v41 = vpack.c.bf16 %v110_v37, %v104_v36  ;;  %v116_v48 = vld [vmem:[%s2665_s0 + $0x328] sm:$0xff] }
  0x44   :  { %v252_v40 = vpack.c.bf16 %v108_v35, %v102_v34  ;;  %v260_v53 = vpack.c.bf16 %v122_v49, %v116_v48 }
  0x4a   :  { %767 = vmatmul.mubr.bf16.gmra.mrb[20].mxu0 %v237_v58  ;;  %831 = vmatmul.mubr.bf16.gmra.mrb[20].mxu1 %v285_v59  ;;  %v53_v58 = vld [vmem:[%s2665_s0 + $0x130] sm:$0xff]  ;;  %v59_v59 = vld [vmem:[%s2665_s0 + $0x160] sm:$0xff] }
  0x4b   :  { %774 = vmatprep.mubr.bf16.mxu0 %v244_v60  ;;  %838 = vmatprep.mubr.bf16.mxu1 %v292_v61  ;;  %v55_v60 = vld [vmem:[%s2665_s0 + $0x140] sm:$0xff]  ;;  %v61_v61 = vld [vmem:[%s2665_s0 + $0x170] sm:$0xff]  ;;  %v227_v2 = vpack.c.bf16 %v59_v59, %v53_v58  ;;  %v126_v58 = vld [vmem:[%s2665_s0 + $0x378] sm:$0xff] }
  0x4c   :  { %v229_v3 = vpack.c.bf16 %v61_v61, %v55_v60  ;;  %v132_v59 = vld [vmem:[%s2665_s0 + $0x3a8] sm:$0xff]  ;;  %v134_v61 = vld [vmem:[%s2665_s0 + $0x3b8] sm:$0xff] }
  0x4d   :  { %v128_v60 = vld [vmem:[%s2665_s0 + $0x388] sm:$0xff]  ;;  %v264_v0 = vpack.c.bf16 %v132_v59, %v126_v58 }
  0x4e   :  { %v266_v1 = vpack.c.bf16 %v134_v61, %v128_v60 }
  0x52   :  { %775 = vmatmul.mubr.bf16.gmra.mrb[24].mxu0 %v243_v6  ;;  %839 = vmatmul.mubr.bf16.gmra.mrb[24].mxu1 %v291_v7  ;;  %v65_v6 = vld [vmem:[%s2665_s0 + $0x190] sm:$0xff]  ;;  %v71_v7 = vld [vmem:[%s2665_s0 + $0x1c0] sm:$0xff] }
  0x53   :  { %782 = vmatprep.mubr.bf16.mxu0 %v250_v8  ;;  %846 = vmatprep.mubr.bf16.mxu1 %v298_v9  ;;  %v67_v8 = vld [vmem:[%s2665_s0 + $0x1a0] sm:$0xff]  ;;  %v73_v9 = vld [vmem:[%s2665_s0 + $0x1d0] sm:$0xff]  ;;  %v233_v14 = vpack.c.bf16 %v71_v7, %v65_v6  ;;  %v138_v6 = vld [vmem:[%s2665_s0 + $0x3d8] sm:$0xff] }
  0x54   :  { %v235_v15 = vpack.c.bf16 %v73_v9, %v67_v8  ;;  %v144_v7 = vld [vmem:[%s2665_s0 + $0x408] sm:$0xff]  ;;  %v146_v9 = vld [vmem:[%s2665_s0 + $0x418] sm:$0xff] }
  0x55   :  { %v140_v8 = vld [vmem:[%s2665_s0 + $0x3e8] sm:$0xff]  ;;  %v270_v12 = vpack.c.bf16 %v144_v7, %v138_v6 }
  0x56   :  { %v272_v13 = vpack.c.bf16 %v146_v9, %v140_v8 }
  0x5a   :  { %783 = vmatmul.mubr.bf16.gmra.mrb[28].mxu0 %v249_v18  ;;  %847 = vmatmul.mubr.bf16.gmra.mrb[28].mxu1 %v297_v19  ;;  %v77_v18 = vld [vmem:[%s2665_s0 + $0x1f0] sm:$0xff]  ;;  %v83_v19 = vld [vmem:[%s2665_s0 + $0x220] sm:$0xff] }
  0x5b   :  { %887 = vmatprep.mubr.bf16.mxu1 %v210_v20  ;;  %1048 = vmatprep.mubr.bf16.mxu0 %v212_v21  ;;  %v79_v20 = vld [vmem:[%s2665_s0 + $0x200] sm:$0xff]  ;;  %v85_v21 = vld [vmem:[%s2665_s0 + $0x230] sm:$0xff]  ;;  %v239_v26 = vpack.c.bf16 %v83_v19, %v77_v18  ;;  %v150_v18 = vld [vmem:[%s2665_s0 + $0x438] sm:$0xff] }
  0x5c   :  { %v241_v27 = vpack.c.bf16 %v85_v21, %v79_v20  ;;  %v156_v19 = vld [vmem:[%s2665_s0 + $0x468] sm:$0xff]  ;;  %v158_v21 = vld [vmem:[%s2665_s0 + $0x478] sm:$0xff] }
  0x5d   :  { %v152_v20 = vld [vmem:[%s2665_s0 + $0x448] sm:$0xff]  ;;  %v276_v24 = vpack.c.bf16 %v156_v19, %v150_v18  ;;  %v2406_v18 = vld [vmem:[%s2666_s2] ss:$0 sm:$0xff] }
  0x5e   :  { %v278_v25 = vpack.c.bf16 %v158_v21, %v152_v20 }
  0x62   :  { %888 = vmatmul.mubr.bf16.vlgmr.msra.gmra.mrb[32].mxu1 %v209_v30  ;;  %1049 = vmatmul.mubr.bf16.vlgmr.msra.gmra.mrb[32].mxu0 %v211_v31  ;;  %v89_v30 = vld [vmem:[%s2665_s0 + $0x250] sm:$0xff]  ;;  %v95_v31 = vld [vmem:[%s2665_s0 + $0x280] sm:$0xff] }
  0x63   :  { %895 = vmatprep.mubr.bf16.mxu1 %v216_v32  ;;  %1056 = vmatprep.mubr.bf16.mxu0 %v218_v33  ;;  %v91_v32 = vld [vmem:[%s2665_s0 + $0x260] sm:$0xff]  ;;  %v97_v33 = vld [vmem:[%s2665_s0 + $0x290] sm:$0xff]  ;;  %v245_v38 = vpack.c.bf16 %v95_v31, %v89_v30  ;;  %v162_v30 = vld [vmem:[%s2665_s0 + $0x498] sm:$0xff] }
  0x64   :  { %v247_v39 = vpack.c.bf16 %v97_v33, %v91_v32  ;;  %v168_v31 = vld [vmem:[%s2665_s0 + $0x4c8] sm:$0xff]  ;;  %v170_v33 = vld [vmem:[%s2665_s0 + $0x4d8] sm:$0xff] }
  0x65   :  { %v164_v32 = vld [vmem:[%s2665_s0 + $0x4a8] sm:$0xff]  ;;  %v282_v36 = vpack.c.bf16 %v168_v31, %v162_v30 }
  0x66   :  { %v284_v37 = vpack.c.bf16 %v170_v33, %v164_v32 }
  0x6a   :  { %896 = vmatmul.mubr.bf16.gmra.mrb[36].mxu1 %v215_v42  ;;  %1057 = vmatmul.mubr.bf16.gmra.mrb[36].mxu0 %v217_v43  ;;  %v101_v42 = vld [vmem:[%s2665_s0 + $0x2b0] sm:$0xff]  ;;  %v107_v43 = vld [vmem:[%s2665_s0 + $0x2e0] sm:$0xff] }
  0x6b   :  { %903 = vmatprep.mubr.bf16.mxu1 %v222_v44  ;;  %1064 = vmatprep.mubr.bf16.mxu0 %v224_v45  ;;  %v103_v44 = vld [vmem:[%s2665_s0 + $0x2c0] sm:$0xff]  ;;  %v109_v45 = vld [vmem:[%s2665_s0 + $0x2f0] sm:$0xff]  ;;  %v251_v50 = vpack.c.bf16 %v107_v43, %v101_v42  ;;  %v174_v42 = vld [vmem:[%s2665_s0 + $0x4f8] sm:$0xff] }
  0x6c   :  { %v253_v51 = vpack.c.bf16 %v109_v45, %v103_v44  ;;  %v180_v43 = vld [vmem:[%s2665_s0 + $0x528] sm:$0xff]  ;;  %v182_v45 = vld [vmem:[%s2665_s0 + $0x538] sm:$0xff] }
  0x6d   :  { %v176_v44 = vld [vmem:[%s2665_s0 + $0x508] sm:$0xff]  ;;  %v288_v48 = vpack.c.bf16 %v180_v43, %v174_v42 }
  0x6e   :  { %v290_v49 = vpack.c.bf16 %v182_v45, %v176_v44 }
  0x72   :  { %904 = vmatmul.mubr.bf16.gmra.mrb[40].mxu1 %v221_v54  ;;  %1065 = vmatmul.mubr.bf16.gmra.mrb[40].mxu0 %v223_v55  ;;  %v113_v54 = vld [vmem:[%s2665_s0 + $0x310] sm:$0xff]  ;;  %v119_v55 = vld [vmem:[%s2665_s0 + $0x340] sm:$0xff] }
  0x73   :  { %911 = vmatprep.mubr.bf16.mxu1 %v228_v56  ;;  %1072 = vmatprep.mubr.bf16.mxu0 %v230_v57  ;;  %v115_v56 = vld [vmem:[%s2665_s0 + $0x320] sm:$0xff]  ;;  %v121_v57 = vld [vmem:[%s2665_s0 + $0x350] sm:$0xff]  ;;  %v257_v62 = vpack.c.bf16 %v119_v55, %v113_v54  ;;  %v186_v54 = vld [vmem:[%s2665_s0 + $0x558] sm:$0xff] }
  0x74   :  { %v259_v63 = vpack.c.bf16 %v121_v57, %v115_v56  ;;  %v192_v55 = vld [vmem:[%s2665_s0 + $0x588] sm:$0xff]  ;;  %v194_v57 = vld [vmem:[%s2665_s0 + $0x598] sm:$0xff] }
  0x75   :  { %v188_v56 = vld [vmem:[%s2665_s0 + $0x568] sm:$0xff]  ;;  %v294_v60 = vpack.c.bf16 %v192_v55, %v186_v54 }
  0x76   :  { %v296_v61 = vpack.c.bf16 %v194_v57, %v188_v56 }
  0x7a   :  { %912 = vmatmul.mubr.bf16.gmra.mrb[44].mxu1 %v227_v2  ;;  %1073 = vmatmul.mubr.bf16.gmra.mrb[44].mxu0 %v229_v3  ;;  %v125_v2 = vld [vmem:[%s2665_s0 + $0x370] sm:$0xff]  ;;  %v131_v3 = vld [vmem:[%s2665_s0 + $0x3a0] sm:$0xff] }
  0x7b   :  { %919 = vmatprep.mubr.bf16.mxu1 %v234_v4  ;;  %1080 = vmatprep.mubr.bf16.mxu0 %v236_v5  ;;  %v127_v4 = vld [vmem:[%s2665_s0 + $0x380] sm:$0xff]  ;;  %v133_v5 = vld [vmem:[%s2665_s0 + $0x3b0] sm:$0xff]  ;;  %v263_v10 = vpack.c.bf16 %v131_v3, %v125_v2  ;;  %v198_v2 = vld [vmem:[%s2665_s0 + $0x5b8] sm:$0xff] }
  0x7c   :  { %v265_v11 = vpack.c.bf16 %v133_v5, %v127_v4  ;;  %v204_v3 = vld [vmem:[%s2665_s0 + $0x5e8] sm:$0xff]  ;;  %v206_v5 = vld [vmem:[%s2665_s0 + $0x5f8] sm:$0xff] }
  0x7d   :  { %v200_v4 = vld [vmem:[%s2665_s0 + $0x5c8] sm:$0xff]  ;;  %v300_v8 = vpack.c.bf16 %v204_v3, %v198_v2 }
  0x7e   :  { %v302_v9 = vpack.c.bf16 %v206_v5, %v200_v4 }
  0x82   :  { %920 = vmatmul.mubr.bf16.gmra.mrb[48].mxu1 %v233_v14  ;;  %1081 = vmatmul.mubr.bf16.gmra.mrb[48].mxu0 %v235_v15  ;;  %v137_v14 = vld [vmem:[%s2665_s0 + $0x3d0] sm:$0xff]  ;;  %v143_v15 = vld [vmem:[%s2665_s0 + $0x400] sm:$0xff] }
  0x83   :  { %927 = vmatprep.mubr.bf16.mxu1 %v240_v16  ;;  %1088 = vmatprep.mubr.bf16.mxu0 %v242_v17  ;;  %v139_v16 = vld [vmem:[%s2665_s0 + $0x3e0] sm:$0xff]  ;;  %v145_v17 = vld [vmem:[%s2665_s0 + $0x410] sm:$0xff]  ;;  %v269_v22 = vpack.c.bf16 %v143_v15, %v137_v14 }
  0x84   :  { %v271_v23 = vpack.c.bf16 %v145_v17, %v139_v16 }
  0x8a   :  { %928 = vmatmul.mubr.bf16.gmra.mrb[52].mxu1 %v239_v26  ;;  %1089 = vmatmul.mubr.bf16.gmra.mrb[52].mxu0 %v241_v27  ;;  %v149_v26 = vld [vmem:[%s2665_s0 + $0x430] sm:$0xff]  ;;  %v155_v27 = vld [vmem:[%s2665_s0 + $0x460] sm:$0xff] }
  0x8b   :  { %935 = vmatprep.mubr.bf16.mxu1 %v246_v28  ;;  %1096 = vmatprep.mubr.bf16.mxu0 %v248_v29  ;;  %v151_v28 = vld [vmem:[%s2665_s0 + $0x440] sm:$0xff]  ;;  %v157_v29 = vld [vmem:[%s2665_s0 + $0x470] sm:$0xff]  ;;  %v275_v34 = vpack.c.bf16 %v155_v27, %v149_v26 }
  0x8c   :  { %v277_v35 = vpack.c.bf16 %v157_v29, %v151_v28 }
  0x92   :  { %936 = vmatmul.mubr.bf16.gmra.mrb[56].mxu1 %v245_v38  ;;  %1097 = vmatmul.mubr.bf16.gmra.mrb[56].mxu0 %v247_v39  ;;  %v161_v38 = vld [vmem:[%s2665_s0 + $0x490] sm:$0xff]  ;;  %v167_v39 = vld [vmem:[%s2665_s0 + $0x4c0] sm:$0xff] }
  0x93   :  { %943 = vmatprep.mubr.bf16.mxu1 %v252_v40  ;;  %1104 = vmatprep.mubr.bf16.mxu0 %v254_v41  ;;  %v163_v40 = vld [vmem:[%s2665_s0 + $0x4a0] sm:$0xff]  ;;  %v169_v41 = vld [vmem:[%s2665_s0 + $0x4d0] sm:$0xff]  ;;  %v281_v46 = vpack.c.bf16 %v167_v39, %v161_v38 }
  0x94   :  { %v283_v47 = vpack.c.bf16 %v169_v41, %v163_v40 }
  0x9a   :  { %944 = vmatmul.mubr.bf16.gmra.mrb[60].mxu1 %v251_v50  ;;  %1105 = vmatmul.mubr.bf16.gmra.mrb[60].mxu0 %v253_v51  ;;  %v173_v50 = vld [vmem:[%s2665_s0 + $0x4f0] sm:$0xff]  ;;  %v179_v51 = vld [vmem:[%s2665_s0 + $0x520] sm:$0xff] }
  0x9b   :  { %951 = vmatprep.mubr.bf16.mxu1 %v258_v52  ;;  %1112 = vmatprep.mubr.bf16.mxu0 %v260_v53  ;;  %v175_v52 = vld [vmem:[%s2665_s0 + $0x500] sm:$0xff]  ;;  %v181_v53 = vld [vmem:[%s2665_s0 + $0x530] sm:$0xff]  ;;  %v287_v58 = vpack.c.bf16 %v179_v51, %v173_v50 }
  0x9c   :  { %v289_v59 = vpack.c.bf16 %v181_v53, %v175_v52 }
  0xa2   :  { %952 = vmatmul.mubr.bf16.gmra.mrb[64].mxu1 %v257_v62  ;;  %1113 = vmatmul.mubr.bf16.gmra.mrb[64].mxu0 %v259_v63  ;;  %v185_v62 = vld [vmem:[%s2665_s0 + $0x550] sm:$0xff]  ;;  %v191_v63 = vld [vmem:[%s2665_s0 + $0x580] sm:$0xff] }
  0xa3   :  { %959 = vmatprep.mubr.bf16.mxu1 %v264_v0  ;;  %1120 = vmatprep.mubr.bf16.mxu0 %v266_v1  ;;  %v187_v0 = vld [vmem:[%s2665_s0 + $0x560] sm:$0xff]  ;;  %v193_v1 = vld [vmem:[%s2665_s0 + $0x590] sm:$0xff]  ;;  %v293_v6 = vpack.c.bf16 %v191_v63, %v185_v62 }
  0xa4   :  { %v295_v7 = vpack.c.bf16 %v193_v1, %v187_v0 }
  0xaa   :  { %960 = vmatmul.mubr.bf16.gmra.mrb[68].mxu1 %v263_v10  ;;  %1121 = vmatmul.mubr.bf16.gmra.mrb[68].mxu0 %v265_v11  ;;  %v197_v10 = vld [vmem:[%s2665_s0 + $0x5b0] sm:$0xff]  ;;  %v203_v11 = vld [vmem:[%s2665_s0 + $0x5e0] sm:$0xff] }
  0xab   :  { %967 = vmatprep.mubr.bf16.mxu1 %v270_v12  ;;  %1128 = vmatprep.mubr.bf16.mxu0 %v272_v13  ;;  %v199_v12 = vld [vmem:[%s2665_s0 + $0x5c0] sm:$0xff]  ;;  %v205_v13 = vld [vmem:[%s2665_s0 + $0x5f0] sm:$0xff]  ;;  %v299_v14 = vpack.c.bf16 %v203_v11, %v197_v10 }
  0xac   :  { %v301_v15 = vpack.c.bf16 %v205_v13, %v199_v12 }
  0xb2   :  { %968 = vmatmul.mubr.bf16.gmra.mrb[72].mxu1 %v269_v22  ;;  %1129 = vmatmul.mubr.bf16.gmra.mrb[72].mxu0 %v271_v23 }
  0xb3   :  { %975 = vmatprep.mubr.bf16.mxu1 %v276_v24  ;;  %1136 = vmatprep.mubr.bf16.mxu0 %v278_v25 }
  0xba   :  { %976 = vmatmul.mubr.bf16.gmra.mrb[76].mxu1 %v275_v34  ;;  %1137 = vmatmul.mubr.bf16.gmra.mrb[76].mxu0 %v277_v35 }
  0xbb   :  { %983 = vmatprep.mubr.bf16.mxu1 %v282_v36  ;;  %1144 = vmatprep.mubr.bf16.mxu0 %v284_v37 }
  0xc2   :  { %984 = vmatmul.mubr.bf16.gmra.mrb[80].mxu1 %v281_v46  ;;  %1145 = vmatmul.mubr.bf16.gmra.mrb[80].mxu0 %v283_v47 }
  0xc3   :  { %991 = vmatprep.mubr.bf16.mxu1 %v288_v48  ;;  %1152 = vmatprep.mubr.bf16.mxu0 %v290_v49 }
  0xca   :  { %992 = vmatmul.mubr.bf16.gmra.mrb[84].mxu1 %v287_v58  ;;  %1153 = vmatmul.mubr.bf16.gmra.mrb[84].mxu0 %v289_v59 }
  0xcb   :  { %999 = vmatprep.mubr.bf16.mxu1 %v294_v60  ;;  %1160 = vmatprep.mubr.bf16.mxu0 %v296_v61 }
  0xd2   :  { %1000 = vmatmul.mubr.bf16.gmra.mrb[88].mxu1 %v293_v6  ;;  %1161 = vmatmul.mubr.bf16.gmra.mrb[88].mxu0 %v295_v7 }
  0xd3   :  { %1007 = vmatprep.mubr.bf16.mxu1 %v300_v8  ;;  %1168 = vmatprep.mubr.bf16.mxu0 %v302_v9 }
  0xda   :  { %1008 = vmatmul.mubr.bf16.gmra.mrb[92].mxu1 %v299_v14  ;;  %1169 = vmatmul.mubr.bf16.gmra.mrb[92].mxu0 %v301_v15 }
  0xf5   :  { %v1279_v16 = vpop.f32.mrb[0].mxu0  ;;  %v1327_v17 = vpop.f32.mrb[0].mxu1 }
  0xf6   :  { %v1280_v19 = vpop.f32.mrb[1].mxu0  ;;  %v1328_v20 = vpop.f32.mrb[1].mxu1 }
  0xf7   :  { %v2408_v21 = vadd.f32 %v1280_v19, %v1279_v16  ;;  %v1329_v22 = vadd.f32 %v1328_v20, %v1327_v17  ;;  %v1282_v23 = vpop.f32.mrb[2].mxu0  ;;  %v1330_v24 = vpop.f32.mrb[2].mxu1 }
  0xf8   :  { %v1283_v25 = vpop.f32.mrb[3].mxu0  ;;  %v1331_v26 = vpop.f32.mrb[3].mxu1 }
  0xf9   :  { %v2411_v27 = vadd.f32 %v1329_v22, %v2406_v18  ;;  %v2413_v28 = vadd.f32 %v1283_v25, %v1282_v23  ;;  %v1332_v29 = vadd.f32 %v1331_v26, %v1330_v24 }
  0xfb   :  { %v2416_v30 = vadd.f32 %v1332_v29, %v2406_v18 }
  0xfd   :  { %v1285_v31 = vpop.f32.mrb[4].mxu0  ;;  %v1333_v32 = vpop.f32.mrb[4].mxu1 }
  0xfe   :  { %v1286_v33 = vpop.f32.mrb[5].mxu0  ;;  %v1334_v34 = vpop.f32.mrb[5].mxu1 }
  0xff   :  { %v2418_v35 = vadd.f32 %v1286_v33, %v1285_v31  ;;  %v1335_v36 = vadd.f32 %v1334_v34, %v1333_v32  ;;  %v1288_v37 = vpop.f32.mrb[6].mxu0  ;;  %v1336_v38 = vpop.f32.mrb[6].mxu1 }
 0x100   :  { %v1289_v39 = vpop.f32.mrb[7].mxu0  ;;  %v1337_v40 = vpop.f32.mrb[7].mxu1 }
 0x101   :  { %v2421_v41 = vadd.f32 %v1335_v36, %v2406_v18  ;;  %v2423_v42 = vadd.f32 %v1289_v39, %v1288_v37  ;;  %v1338_v43 = vadd.f32 %v1337_v40, %v1336_v38 }
 0x103   :  { %v2426_v44 = vadd.f32 %v1338_v43, %v2406_v18 }
 0x105   :  { %v1291_v45 = vpop.f32.mrb[8].mxu0  ;;  %v1339_v46 = vpop.f32.mrb[8].mxu1 }
 0x106   :  { %v1292_v47 = vpop.f32.mrb[9].mxu0  ;;  %v1340_v48 = vpop.f32.mrb[9].mxu1 }
 0x107   :  { %v2428_v49 = vadd.f32 %v1292_v47, %v1291_v45  ;;  %v1341_v50 = vadd.f32 %v1340_v48, %v1339_v46  ;;  %v1294_v51 = vpop.f32.mrb[10].mxu0  ;;  %v1342_v52 = vpop.f32.mrb[10].mxu1 }
 0x108   :  { %v1295_v53 = vpop.f32.mrb[11].mxu0  ;;  %v1343_v54 = vpop.f32.mrb[11].mxu1 }
 0x109   :  { %v2431_v55 = vadd.f32 %v1341_v50, %v2406_v18  ;;  %v2433_v56 = vadd.f32 %v1295_v53, %v1294_v51  ;;  %v1344_v57 = vadd.f32 %v1343_v54, %v1342_v52 }
 0x10b   :  { %v2436_v58 = vadd.f32 %v1344_v57, %v2406_v18 }
 0x10d   :  { %v1297_v59 = vpop.f32.mrb[12].mxu0  ;;  %v1345_v60 = vpop.f32.mrb[12].mxu1 }
 0x10e   :  { %v1298_v61 = vpop.f32.mrb[13].mxu0  ;;  %v1346_v62 = vpop.f32.mrb[13].mxu1 }
 0x10f   :  { %v2438_v63 = vadd.f32 %v1298_v61, %v1297_v59  ;;  %v1347_v0 = vadd.f32 %v1346_v62, %v1345_v60  ;;  %v1300_v1 = vpop.f32.mrb[14].mxu0  ;;  %v1348_v2 = vpop.f32.mrb[14].mxu1 }
 0x110   :  { %v1301_v3 = vpop.f32.mrb[15].mxu0  ;;  %v1349_v4 = vpop.f32.mrb[15].mxu1 }
 0x111   :  { %v2441_v5 = vadd.f32 %v1347_v0, %v2406_v18  ;;  %v2443_v6 = vadd.f32 %v1301_v3, %v1300_v1  ;;  %v1350_v7 = vadd.f32 %v1349_v4, %v1348_v2 }
 0x113   :  { %v2446_v8 = vadd.f32 %v1350_v7, %v2406_v18 }
 0x115   :  { %v1303_v9 = vpop.f32.mrb[16].mxu0  ;;  %v1351_v10 = vpop.f32.mrb[16].mxu1 }
 0x116   :  { %v1304_v11 = vpop.f32.mrb[17].mxu0  ;;  %v1352_v12 = vpop.f32.mrb[17].mxu1 }
 0x117   :  { %v2448_v13 = vadd.f32 %v1304_v11, %v1303_v9  ;;  %v1353_v14 = vadd.f32 %v1352_v12, %v1351_v10  ;;  %v1306_v15 = vpop.f32.mrb[18].mxu0  ;;  %v1354_v16 = vpop.f32.mrb[18].mxu1 }
 0x118   :  { %v1307_v17 = vpop.f32.mrb[19].mxu0  ;;  %v1355_v19 = vpop.f32.mrb[19].mxu1 }
 0x119   :  { %v2451_v20 = vadd.f32 %v1353_v14, %v2406_v18  ;;  %v2453_v22 = vadd.f32 %v1307_v17, %v1306_v15  ;;  %v1356_v23 = vadd.f32 %v1355_v19, %v1354_v16 }
 0x11b   :  { %v2456_v24 = vadd.f32 %v1356_v23, %v2406_v18 }
 0x11d   :  { %v1309_v25 = vpop.f32.mrb[20].mxu0  ;;  %v1357_v26 = vpop.f32.mrb[20].mxu1 }
 0x11e   :  { %v1310_v29 = vpop.f32.mrb[21].mxu0  ;;  %v1358_v31 = vpop.f32.mrb[21].mxu1 }
 0x11f   :  { %v2458_v32 = vadd.f32 %v1310_v29, %v1309_v25  ;;  %v1359_v33 = vadd.f32 %v1358_v31, %v1357_v26  ;;  %v1312_v34 = vpop.f32.mrb[22].mxu0  ;;  %v1360_v36 = vpop.f32.mrb[22].mxu1  ;;  %v729_v31 = vadd.f32 %v2408_v21, %v2406_v18 }
 0x120   :  { %v1313_v37 = vpop.f32.mrb[23].mxu0  ;;  %v1361_v38 = vpop.f32.mrb[23].mxu1 }
 0x121   :  { %v2461_v39 = vadd.f32 %v1359_v33, %v2406_v18  ;;  %v2463_v40 = vadd.f32 %v1313_v37, %v1312_v34  ;;  %v1362_v43 = vadd.f32 %v1361_v38, %v1360_v36 }
 0x123   :  { %v2466_v45 = vadd.f32 %v1362_v43, %v2406_v18 }
 0x125   :  { %v1315_v46 = vpop.f32.mrb[24].mxu0  ;;  %v1363_v47 = vpop.f32.mrb[24].mxu1 }
 0x126   :  { %v1316_v48 = vpop.f32.mrb[25].mxu0  ;;  %v1364_v50 = vpop.f32.mrb[25].mxu1 }
 0x127   :  { %v2468_v51 = vadd.f32 %v1316_v48, %v1315_v46  ;;  %v1365_v52 = vadd.f32 %v1364_v50, %v1363_v47  ;;  %v1318_v53 = vpop.f32.mrb[26].mxu0  ;;  %v1366_v54 = vpop.f32.mrb[26].mxu1  ;;  %v732_v46 = vadd.f32 %v2413_v28, %v2406_v18 }
 0x128   :  { %v1319_v57 = vpop.f32.mrb[27].mxu0  ;;  %v1367_v59 = vpop.f32.mrb[27].mxu1 }
 0x129   :  { %v2471_v60 = vadd.f32 %v1365_v52, %v2406_v18  ;;  %v2473_v61 = vadd.f32 %v1319_v57, %v1318_v53  ;;  %v1368_v62 = vadd.f32 %v1367_v59, %v1366_v54 }
 0x12b   :  { %v2476_v0 = vadd.f32 %v1368_v62, %v2406_v18 }
 0x12d   :  { %v1321_v1 = vpop.f32.mrb[28].mxu0  ;;  %v1369_v2 = vpop.f32.mrb[28].mxu1 }
 0x12e   :  { %v1322_v3 = vpop.f32.mrb[29].mxu0  ;;  %v1370_v4 = vpop.f32.mrb[29].mxu1 }
 0x12f   :  { %v2478_v7 = vadd.f32 %v1322_v3, %v1321_v1  ;;  %v1371_v9 = vadd.f32 %v1370_v4, %v1369_v2  ;;  %v1324_v10 = vpop.f32.mrb[30].mxu0  ;;  %v1372_v11 = vpop.f32.mrb[30].mxu1  ;;  %v737_v1 = vadd.f32 %v2418_v35, %v2406_v18 }
 0x130   :  { %v1325_v12 = vpop.f32.mrb[31].mxu0  ;;  %v1373_v14 = vpop.f32.mrb[31].mxu1 }
 0x131   :  { %v2481_v15 = vadd.f32 %v1371_v9, %v2406_v18  ;;  %v2483_v16 = vadd.f32 %v1325_v12, %v1324_v10  ;;  %v1374_v17 = vadd.f32 %v1373_v14, %v1372_v11  ;;  %v740_v11 = vadd.f32 %v2423_v42, %v2406_v18 }
 0x133   :  { %v2486_v19 = vadd.f32 %v1374_v17, %v2406_v18 }
 0x135   :  { %v1391_v23 = vpop.f32.mrb[32].mxu1  ;;  %v1503_v25 = vpop.f32.mrb[32].mxu0 }
 0x136   :  { %v1392_v26 = vpop.f32.mrb[33].mxu1  ;;  %v1504_v29 = vpop.f32.mrb[33].mxu0 }
 0x137   :  { %v1393_v33 = vadd.f32 %v1392_v26, %v1391_v23  ;;  %v1505_v34 = vadd.f32 %v1504_v29, %v1503_v25  ;;  %v1394_v36 = vpop.f32.mrb[34].mxu1  ;;  %v1506_v37 = vpop.f32.mrb[34].mxu0 }
 0x138   :  { %v1395_v38 = vpop.f32.mrb[35].mxu1  ;;  %v1507_v43 = vpop.f32.mrb[35].mxu0 }
 0x139   :  { %v890_v47 = vadd.f32 %v1393_v33, %v729_v31  ;;  %v1396_v48 = vadd.f32 %v1395_v38, %v1394_v36  ;;  %v1508_v50 = vadd.f32 %v1507_v43, %v1506_v37 }
 0x13b   :  { %v1051_v52 = vadd.f32 %v1505_v34, %v890_v47  ;;  %v893_v53 = vadd.f32 %v1396_v48, %v732_v46  ;;  %v745_v34 = vadd.f32 %v2428_v49, %v2406_v18  ;;  %v748_v47 = vadd.f32 %v2433_v56, %v2406_v18 }
 0x13d   :  { %1178 = vst.msk [vmem:[%s2667_s3] sm:$0xff] %vm1177_vm0, %v1051_v52  ;;  %v1054_v21 = vadd.f32 %v1508_v50, %v893_v53  ;;  %v1397_v54 = vpop.f32.mrb[36].mxu1  ;;  %v1509_v57 = vpop.f32.mrb[36].mxu0 }
 0x13e   :  { %v1398_v59 = vpop.f32.mrb[37].mxu1  ;;  %v1510_v62 = vpop.f32.mrb[37].mxu0 }
 0x13f   :  { %1179 = vst.msk [vmem:[%s2667_s3 + $0x8] sm:$0xff] %vm1177_vm0, %v1054_v21  ;;  %v1399_v28 = vadd.f32 %v1398_v59, %v1397_v54  ;;  %v1511_v2 = vadd.f32 %v1510_v62, %v1509_v57  ;;  %v1400_v3 = vpop.f32.mrb[38].mxu1  ;;  %v1512_v4 = vpop.f32.mrb[38].mxu0 }
 0x140   :  { %v1401_v9 = vpop.f32.mrb[39].mxu1  ;;  %v1513_v10 = vpop.f32.mrb[39].mxu0 }
 0x141   :  { %v898_v12 = vadd.f32 %v1399_v28, %v737_v1  ;;  %v1402_v14 = vadd.f32 %v1401_v9, %v1400_v3  ;;  %v1514_v17 = vadd.f32 %v1513_v10, %v1512_v4  ;;  %v753_v1 = vadd.f32 %v2438_v63, %v2406_v18 }
 0x142   :  { %v756_v10 = vadd.f32 %v2443_v6, %v2406_v18 }
 0x143   :  { %v1059_v23 = vadd.f32 %v1511_v2, %v898_v12  ;;  %v901_v25 = vadd.f32 %v1402_v14, %v740_v11 }
 0x145   :  { %1180 = vst.msk [vmem:[%s2667_s3 + $0x10] sm:$0xff] %vm1177_vm0, %v1059_v23  ;;  %v1062_v35 = vadd.f32 %v1514_v17, %v901_v25  ;;  %v1403_v26 = vpop.f32.mrb[40].mxu1  ;;  %v1515_v29 = vpop.f32.mrb[40].mxu0 }
 0x146   :  { %v1404_v31 = vpop.f32.mrb[41].mxu1  ;;  %v1516_v33 = vpop.f32.mrb[41].mxu0 }
 0x147   :  { %1181 = vst.msk [vmem:[%s2667_s3 + $0x18] sm:$0xff] %vm1177_vm0, %v1062_v35  ;;  %v1405_v42 = vadd.f32 %v1404_v31, %v1403_v26  ;;  %v1517_v36 = vadd.f32 %v1516_v33, %v1515_v29  ;;  %v1406_v37 = vpop.f32.mrb[42].mxu1  ;;  %v1518_v38 = vpop.f32.mrb[42].mxu0  ;;  %v761_v31 = vadd.f32 %v2448_v13, %v2406_v18 }
 0x148   :  { %v1407_v43 = vpop.f32.mrb[43].mxu1  ;;  %v1519_v46 = vpop.f32.mrb[43].mxu0 }
 0x149   :  { %v906_v48 = vadd.f32 %v1405_v42, %v745_v34  ;;  %v1408_v50 = vadd.f32 %v1407_v43, %v1406_v37  ;;  %v1520_v52 = vadd.f32 %v1519_v46, %v1518_v38  ;;  %v764_v38 = vadd.f32 %v2453_v22, %v2406_v18 }
 0x14b   :  { %v1067_v53 = vadd.f32 %v1517_v36, %v906_v48  ;;  %v909_v21 = vadd.f32 %v1408_v50, %v748_v47 }
 0x14d   :  { %1182 = vst.msk [vmem:[%s2667_s3 + $0x20] sm:$0xff] %vm1177_vm0, %v1067_v53  ;;  %v1070_v49 = vadd.f32 %v1520_v52, %v909_v21  ;;  %v1409_v54 = vpop.f32.mrb[44].mxu1  ;;  %v1521_v57 = vpop.f32.mrb[44].mxu0 }
 0x14e   :  { %v1410_v59 = vpop.f32.mrb[45].mxu1  ;;  %v1522_v62 = vpop.f32.mrb[45].mxu0 }
 0x14f   :  { %1183 = vst.msk [vmem:[%s2667_s3 + $0x28] sm:$0xff] %vm1177_vm0, %v1070_v49  ;;  %v1411_v56 = vadd.f32 %v1410_v59, %v1409_v54  ;;  %v1523_v28 = vadd.f32 %v1522_v62, %v1521_v57  ;;  %v1412_v2 = vpop.f32.mrb[46].mxu1  ;;  %v1524_v3 = vpop.f32.mrb[46].mxu0  ;;  %v769_v54 = vadd.f32 %v2458_v32, %v2406_v18 }
 0x150   :  { %v1413_v4 = vpop.f32.mrb[47].mxu1  ;;  %v1525_v9 = vpop.f32.mrb[47].mxu0 }
 0x151   :  { %v914_v11 = vadd.f32 %v1411_v56, %v753_v1  ;;  %v1414_v12 = vadd.f32 %v1413_v4, %v1412_v2  ;;  %v1526_v14 = vadd.f32 %v1525_v9, %v1524_v3 }
 0x153   :  { %v1075_v17 = vadd.f32 %v1523_v28, %v914_v11  ;;  %v917_v23 = vadd.f32 %v1414_v12, %v756_v10  ;;  %v772_v28 = vadd.f32 %v2463_v40, %v2406_v18 }
 0x155   :  { %1184 = vst.msk [vmem:[%s2667_s3 + $0x30] sm:$0xff] %vm1177_vm0, %v1075_v17  ;;  %v1078_v63 = vadd.f32 %v1526_v14, %v917_v23  ;;  %v1415_v25 = vpop.f32.mrb[48].mxu1  ;;  %v1527_v35 = vpop.f32.mrb[48].mxu0  ;;  %v777_v23 = vadd.f32 %v2468_v51, %v2406_v18 }
 0x156   :  { %v1416_v26 = vpop.f32.mrb[49].mxu1  ;;  %v1528_v29 = vpop.f32.mrb[49].mxu0 }
 0x157   :  { %1185 = vst.msk [vmem:[%s2667_s3 + $0x38] sm:$0xff] %vm1177_vm0, %v1078_v63  ;;  %v1417_v6 = vadd.f32 %v1416_v26, %v1415_v25  ;;  %v1529_v33 = vadd.f32 %v1528_v29, %v1527_v35  ;;  %v1418_v34 = vpop.f32.mrb[50].mxu1  ;;  %v1530_v42 = vpop.f32.mrb[50].mxu0 }
 0x158   :  { %v1419_v36 = vpop.f32.mrb[51].mxu1  ;;  %v1531_v37 = vpop.f32.mrb[51].mxu0 }
 0x159   :  { %v922_v43 = vadd.f32 %v1417_v6, %v761_v31  ;;  %v1420_v46 = vadd.f32 %v1419_v36, %v1418_v34  ;;  %v1532_v47 = vadd.f32 %v1531_v37, %v1530_v42  ;;  %v780_v31 = vadd.f32 %v2473_v61, %v2406_v18 }
 0x15b   :  { %v1083_v48 = vadd.f32 %v1529_v33, %v922_v43  ;;  %v925_v50 = vadd.f32 %v1420_v46, %v764_v38 }
 0x15d   :  { %1186 = vst.msk [vmem:[%s2667_s3 + $0x40] sm:$0xff] %vm1177_vm0, %v1083_v48  ;;  %v1086_v13 = vadd.f32 %v1532_v47, %v925_v50  ;;  %v1421_v52 = vpop.f32.mrb[52].mxu1  ;;  %v1533_v53 = vpop.f32.mrb[52].mxu0  ;;  %v785_v47 = vadd.f32 %v2478_v7, %v2406_v18 }
 0x15e   :  { %v1422_v21 = vpop.f32.mrb[53].mxu1  ;;  %v1534_v49 = vpop.f32.mrb[53].mxu0 }
 0x15f   :  { %1187 = vst.msk [vmem:[%s2667_s3 + $0x48] sm:$0xff] %vm1177_vm0, %v1086_v13  ;;  %v1423_v22 = vadd.f32 %v1422_v21, %v1421_v52  ;;  %v1535_v57 = vadd.f32 %v1534_v49, %v1533_v53  ;;  %v1424_v59 = vpop.f32.mrb[54].mxu1  ;;  %v1536_v62 = vpop.f32.mrb[54].mxu0  ;;  %v788_v21 = vadd.f32 %v2483_v16, %v2406_v18 }
 0x160   :  { %v1425_v1 = vpop.f32.mrb[55].mxu1  ;;  %v1537_v56 = vpop.f32.mrb[55].mxu0 }
 0x161   :  { %v930_v2 = vadd.f32 %v1423_v22, %v769_v54  ;;  %v1426_v3 = vadd.f32 %v1425_v1, %v1424_v59  ;;  %v1538_v4 = vadd.f32 %v1537_v56, %v1536_v62 }
 0x163   :  { %v1091_v9 = vadd.f32 %v1535_v57, %v930_v2  ;;  %v933_v10 = vadd.f32 %v1426_v3, %v772_v28 }
 0x165   :  { %1188 = vst.msk [vmem:[%s2667_s3 + $0x50] sm:$0xff] %vm1177_vm0, %v1091_v9  ;;  %v1094_v32 = vadd.f32 %v1538_v4, %v933_v10  ;;  %v1427_v11 = vpop.f32.mrb[56].mxu1  ;;  %v1539_v12 = vpop.f32.mrb[56].mxu0 }
 0x166   :  { %v1428_v14 = vpop.f32.mrb[57].mxu1  ;;  %v1540_v17 = vpop.f32.mrb[57].mxu0 }
 0x167   :  { %1189 = vst.msk [vmem:[%s2667_s3 + $0x58] sm:$0xff] %vm1177_vm0, %v1094_v32  ;;  %v1429_v40 = vadd.f32 %v1428_v14, %v1427_v11  ;;  %v1541_v63 = vadd.f32 %v1540_v17, %v1539_v12  ;;  %v1430_v25 = vpop.f32.mrb[58].mxu1  ;;  %v1542_v35 = vpop.f32.mrb[58].mxu0 }
 0x168   :  { %v1431_v26 = vpop.f32.mrb[59].mxu1  ;;  %v1543_v29 = vpop.f32.mrb[59].mxu0 }
 0x169   :  { %v938_v6 = vadd.f32 %v1429_v40, %v777_v23  ;;  %v1432_v33 = vadd.f32 %v1431_v26, %v1430_v25  ;;  %v1544_v34 = vadd.f32 %v1543_v29, %v1542_v35 }
 0x16b   :  { %v1099_v42 = vadd.f32 %v1541_v63, %v938_v6  ;;  %v941_v36 = vadd.f32 %v1432_v33, %v780_v31 }
 0x16d   :  { %1190 = vst.msk [vmem:[%s2667_s3 + $0x60] sm:$0xff] %vm1177_vm0, %v1099_v42  ;;  %v1102_v51 = vadd.f32 %v1544_v34, %v941_v36  ;;  %v1433_v37 = vpop.f32.mrb[60].mxu1  ;;  %v1545_v38 = vpop.f32.mrb[60].mxu0 }
 0x16e   :  { %v1434_v43 = vpop.f32.mrb[61].mxu1  ;;  %v1546_v46 = vpop.f32.mrb[61].mxu0 }
 0x16f   :  { %1191 = vst.msk [vmem:[%s2667_s3 + $0x68] sm:$0xff] %vm1177_vm0, %v1102_v51  ;;  %v1435_v61 = vadd.f32 %v1434_v43, %v1433_v37  ;;  %v1547_v48 = vadd.f32 %v1546_v46, %v1545_v38  ;;  %v1436_v50 = vpop.f32.mrb[62].mxu1  ;;  %v1548_v13 = vpop.f32.mrb[62].mxu0 }
 0x170   :  { %v1437_v52 = vpop.f32.mrb[63].mxu1  ;;  %v1549_v53 = vpop.f32.mrb[63].mxu0 }
 0x171   :  { %v946_v49 = vadd.f32 %v1435_v61, %v785_v47  ;;  %v1438_v54 = vadd.f32 %v1437_v52, %v1436_v50  ;;  %v1550_v22 = vadd.f32 %v1549_v53, %v1548_v13 }
 0x173   :  { %v1107_v57 = vadd.f32 %v1547_v48, %v946_v49  ;;  %v949_v59 = vadd.f32 %v1438_v54, %v788_v21 }
 0x175   :  { %1192 = vst.msk [vmem:[%s2667_s3 + $0x70] sm:$0xff] %vm1177_vm0, %v1107_v57  ;;  %v1110_v7 = vadd.f32 %v1550_v22, %v949_v59  ;;  %v1439_v62 = vpop.f32.mrb[64].mxu1  ;;  %v1551_v1 = vpop.f32.mrb[64].mxu0 }
 0x176   :  { %v1440_v56 = vpop.f32.mrb[65].mxu1  ;;  %v1552_v28 = vpop.f32.mrb[65].mxu0 }
 0x177   :  { %1193 = vst.msk [vmem:[%s2667_s3 + $0x78] sm:$0xff] %vm1177_vm0, %v1110_v7  ;;  %v1441_v18 = vadd.f32 %v1440_v56, %v1439_v62  ;;  %v1553_v16 = vadd.f32 %v1552_v28, %v1551_v1  ;;  %v1442_v2 = vpop.f32.mrb[66].mxu1  ;;  %v1554_v3 = vpop.f32.mrb[66].mxu0 }
 0x178   :  { %v1443_v4 = vpop.f32.mrb[67].mxu1  ;;  %v1555_v9 = vpop.f32.mrb[67].mxu0 }
 0x179   :  { %v954_v10 = vadd.f32 %v1441_v18, %v2411_v27  ;;  %v1444_v32 = vadd.f32 %v1443_v4, %v1442_v2  ;;  %v1556_v11 = vadd.f32 %v1555_v9, %v1554_v3 }
 0x17b   :  { %v1115_v12 = vadd.f32 %v1553_v16, %v954_v10  ;;  %v957_v14 = vadd.f32 %v1444_v32, %v2416_v30 }
 0x17d   :  { %1194 = vst.msk [vmem:[%s2667_s3 + $0x80] sm:$0xff] %vm1177_vm0, %v1115_v12  ;;  %v1118_v17 = vadd.f32 %v1556_v11, %v957_v14  ;;  %v1445_v23 = vpop.f32.mrb[68].mxu1  ;;  %v1557_v40 = vpop.f32.mrb[68].mxu0 }
 0x17e   :  { %v1446_v63 = vpop.f32.mrb[69].mxu1  ;;  %v1558_v25 = vpop.f32.mrb[69].mxu0 }
 0x17f   :  { %1195 = vst.msk [vmem:[%s2667_s3 + $0x88] sm:$0xff] %vm1177_vm0, %v1118_v17  ;;  %v1447_v27 = vadd.f32 %v1446_v63, %v1445_v23  ;;  %v1559_v35 = vadd.f32 %v1558_v25, %v1557_v40  ;;  %v1448_v26 = vpop.f32.mrb[70].mxu1  ;;  %v1560_v29 = vpop.f32.mrb[70].mxu0 }
 0x180   :  { %v1449_v30 = vpop.f32.mrb[71].mxu1  ;;  %v1561_v31 = vpop.f32.mrb[71].mxu0 }
 0x181   :  { %v962_v6 = vadd.f32 %v1447_v27, %v2421_v41  ;;  %v1450_v33 = vadd.f32 %v1449_v30, %v1448_v26  ;;  %v1562_v34 = vadd.f32 %v1561_v31, %v1560_v29 }
 0x183   :  { %v1123_v42 = vadd.f32 %v1559_v35, %v962_v6  ;;  %v965_v36 = vadd.f32 %v1450_v33, %v2426_v44 }
 0x185   :  { %1196 = vst.msk [vmem:[%s2667_s3 + $0x90] sm:$0xff] %vm1177_vm0, %v1123_v42  ;;  %v1126_v51 = vadd.f32 %v1562_v34, %v965_v36  ;;  %v1451_v37 = vpop.f32.mrb[72].mxu1  ;;  %v1563_v38 = vpop.f32.mrb[72].mxu0 }
 0x186   :  { %v1452_v43 = vpop.f32.mrb[73].mxu1  ;;  %v1564_v46 = vpop.f32.mrb[73].mxu0 }
 0x187   :  { %1197 = vst.msk [vmem:[%s2667_s3 + $0x98] sm:$0xff] %vm1177_vm0, %v1126_v51  ;;  %v1453_v41 = vadd.f32 %v1452_v43, %v1451_v37  ;;  %v1565_v47 = vadd.f32 %v1564_v46, %v1563_v38  ;;  %v1454_v61 = vpop.f32.mrb[74].mxu1  ;;  %v1566_v48 = vpop.f32.mrb[74].mxu0 }
 0x188   :  { %v1455_v44 = vpop.f32.mrb[75].mxu1  ;;  %v1567_v50 = vpop.f32.mrb[75].mxu0 }
 0x189   :  { %v970_v13 = vadd.f32 %v1453_v41, %v2431_v55  ;;  %v1456_v52 = vadd.f32 %v1455_v44, %v1454_v61  ;;  %v1568_v53 = vadd.f32 %v1567_v50, %v1566_v48 }
 0x18b   :  { %v1131_v21 = vadd.f32 %v1565_v47, %v970_v13  ;;  %v973_v49 = vadd.f32 %v1456_v52, %v2436_v58 }
 0x18d   :  { %1198 = vst.msk [vmem:[%s2667_s3 + $0xa0] sm:$0xff] %vm1177_vm0, %v1131_v21  ;;  %v1134_v54 = vadd.f32 %v1568_v53, %v973_v49  ;;  %v1457_v22 = vpop.f32.mrb[76].mxu1  ;;  %v1569_v57 = vpop.f32.mrb[76].mxu0 }
 0x18e   :  { %v1458_v59 = vpop.f32.mrb[77].mxu1  ;;  %v1570_v7 = vpop.f32.mrb[77].mxu0 }
 0x18f   :  { %1199 = vst.msk [vmem:[%s2667_s3 + $0xa8] sm:$0xff] %vm1177_vm0, %v1134_v54  ;;  %v1459_v55 = vadd.f32 %v1458_v59, %v1457_v22  ;;  %v1571_v62 = vadd.f32 %v1570_v7, %v1569_v57  ;;  %v1460_v1 = vpop.f32.mrb[78].mxu1  ;;  %v1572_v56 = vpop.f32.mrb[78].mxu0 }
 0x190   :  { %v1461_v58 = vpop.f32.mrb[79].mxu1  ;;  %v1573_v28 = vpop.f32.mrb[79].mxu0 }
 0x191   :  { %v978_v18 = vadd.f32 %v1459_v55, %v2441_v5  ;;  %v1462_v16 = vadd.f32 %v1461_v58, %v1460_v1  ;;  %v1574_v2 = vadd.f32 %v1573_v28, %v1572_v56 }
 0x193   :  { %v1139_v3 = vadd.f32 %v1571_v62, %v978_v18  ;;  %v981_v4 = vadd.f32 %v1462_v16, %v2446_v8 }
 0x195   :  { %1200 = vst.msk [vmem:[%s2667_s3 + $0xb0] sm:$0xff] %vm1177_vm0, %v1139_v3  ;;  %v1142_v9 = vadd.f32 %v1574_v2, %v981_v4  ;;  %v1463_v10 = vpop.f32.mrb[80].mxu1  ;;  %v1575_v32 = vpop.f32.mrb[80].mxu0 }
 0x196   :  { %v1464_v11 = vpop.f32.mrb[81].mxu1  ;;  %v1576_v12 = vpop.f32.mrb[81].mxu0 }
 0x197   :  { %1201 = vst.msk [vmem:[%s2667_s3 + $0xb8] sm:$0xff] %vm1177_vm0, %v1142_v9  ;;  %v1465_v5 = vadd.f32 %v1464_v11, %v1463_v10  ;;  %v1577_v14 = vadd.f32 %v1576_v12, %v1575_v32  ;;  %v1466_v17 = vpop.f32.mrb[82].mxu1  ;;  %v1578_v23 = vpop.f32.mrb[82].mxu0 }
 0x198   :  { %v1467_v8 = vpop.f32.mrb[83].mxu1  ;;  %v1579_v40 = vpop.f32.mrb[83].mxu0 }
 0x199   :  { %v986_v63 = vadd.f32 %v1465_v5, %v2451_v20  ;;  %v1468_v25 = vadd.f32 %v1467_v8, %v1466_v17  ;;  %v1580_v27 = vadd.f32 %v1579_v40, %v1578_v23 }
 0x19b   :  { %v1147_v35 = vadd.f32 %v1577_v14, %v986_v63  ;;  %v989_v26 = vadd.f32 %v1468_v25, %v2456_v24 }
 0x19d   :  { %1202 = vst.msk [vmem:[%s2667_s3 + $0xc0] sm:$0xff] %vm1177_vm0, %v1147_v35  ;;  %v1150_v29 = vadd.f32 %v1580_v27, %v989_v26  ;;  %v1469_v30 = vpop.f32.mrb[84].mxu1  ;;  %v1581_v31 = vpop.f32.mrb[84].mxu0 }
 0x19e   :  { %v1470_v6 = vpop.f32.mrb[85].mxu1  ;;  %v1582_v33 = vpop.f32.mrb[85].mxu0 }
 0x19f   :  { %1203 = vst.msk [vmem:[%s2667_s3 + $0xc8] sm:$0xff] %vm1177_vm0, %v1150_v29  ;;  %v1471_v20 = vadd.f32 %v1470_v6, %v1469_v30  ;;  %v1583_v34 = vadd.f32 %v1582_v33, %v1581_v31  ;;  %v1472_v42 = vpop.f32.mrb[86].mxu1  ;;  %v1584_v36 = vpop.f32.mrb[86].mxu0 }
 0x1a0   :  { %v1473_v24 = vpop.f32.mrb[87].mxu1  ;;  %v1585_v51 = vpop.f32.mrb[87].mxu0 }
 0x1a1   :  { %v994_v37 = vadd.f32 %v1471_v20, %v2461_v39  ;;  %v1474_v38 = vadd.f32 %v1473_v24, %v1472_v42  ;;  %v1586_v43 = vadd.f32 %v1585_v51, %v1584_v36 }
 0x1a3   :  { %v1155_v46 = vadd.f32 %v1583_v34, %v994_v37  ;;  %v997_v41 = vadd.f32 %v1474_v38, %v2466_v45 }
 0x1a5   :  { %1204 = vst.msk [vmem:[%s2667_s3 + $0xd0] sm:$0xff] %vm1177_vm0, %v1155_v46  ;;  %v1158_v47 = vadd.f32 %v1586_v43, %v997_v41  ;;  %v1475_v61 = vpop.f32.mrb[88].mxu1  ;;  %v1587_v48 = vpop.f32.mrb[88].mxu0 }
 0x1a6   :  { %v1476_v44 = vpop.f32.mrb[89].mxu1  ;;  %v1588_v50 = vpop.f32.mrb[89].mxu0 }
 0x1a7   :  { %1205 = vst.msk [vmem:[%s2667_s3 + $0xd8] sm:$0xff] %vm1177_vm0, %v1158_v47  ;;  %v1477_v39 = vadd.f32 %v1476_v44, %v1475_v61  ;;  %v1589_v13 = vadd.f32 %v1588_v50, %v1587_v48  ;;  %v1478_v52 = vpop.f32.mrb[90].mxu1  ;;  %v1590_v53 = vpop.f32.mrb[90].mxu0 }
 0x1a8   :  { %v1479_v45 = vpop.f32.mrb[91].mxu1  ;;  %v1591_v21 = vpop.f32.mrb[91].mxu0 }
 0x1a9   :  { %v1002_v49 = vadd.f32 %v1477_v39, %v2471_v60  ;;  %v1480_v54 = vadd.f32 %v1479_v45, %v1478_v52  ;;  %v1592_v22 = vadd.f32 %v1591_v21, %v1590_v53 }
 0x1ab   :  { %v1163_v57 = vadd.f32 %v1589_v13, %v1002_v49  ;;  %v1005_v59 = vadd.f32 %v1480_v54, %v2476_v0 }
 0x1ad   :  { %1206 = vst.msk [vmem:[%s2667_s3 + $0xe0] sm:$0xff] %vm1177_vm0, %v1163_v57  ;;  %v1166_v7 = vadd.f32 %v1592_v22, %v1005_v59  ;;  %v1481_v55 = vpop.f32.mrb[92].mxu1  ;;  %v1593_v62 = vpop.f32.mrb[92].mxu0 }
 0x1ae   :  { %v1482_v1 = vpop.f32.mrb[93].mxu1  ;;  %v1594_v56 = vpop.f32.mrb[93].mxu0 }
 0x1af   :  { %1207 = vst.msk [vmem:[%s2667_s3 + $0xe8] sm:$0xff] %vm1177_vm0, %v1166_v7  ;;  %v1483_v60 = vadd.f32 %v1482_v1, %v1481_v55  ;;  %v1595_v58 = vadd.f32 %v1594_v56, %v1593_v62  ;;  %v1484_v28 = vpop.f32.mrb[94].mxu1  ;;  %v1596_v18 = vpop.f32.mrb[94].mxu0 }
 0x1b0   :  { %v1485_v0 = vpop.f32.mrb[95].mxu1  ;;  %v1597_v16 = vpop.f32.mrb[95].mxu0 }
 0x1b1   :  { %v1010_v2 = vadd.f32 %v1483_v60, %v2481_v15  ;;  %v1486_v3 = vadd.f32 %v1485_v0, %v1484_v28  ;;  %v1598_v4 = vadd.f32 %v1597_v16, %v1596_v18 }
 0x1b3   :  { %v1171_v9 = vadd.f32 %v1595_v58, %v1010_v2  ;;  %v1013_v10 = vadd.f32 %v1486_v3, %v2486_v19 }
 0x1b5   :  { %1208 = vst.msk [vmem:[%s2667_s3 + $0xf0] sm:$0xff] %vm1177_vm0, %v1171_v9  ;;  %v1174_v32 = vadd.f32 %v1598_v4, %v1013_v10 }
 0x1b7   :  { %1209 = vst.msk [vmem:[%s2667_s3 + $0xf8] sm:$0xff] %vm1177_vm0, %v1174_v32 }

// kernel: forward.18
= control target key start
LH: loop header
LB: loop body
LE: loop exit
PB: predicated region body
PF: predicated region fallthrough
CT: control target
= control target key end

     0   :  { %s1369_s18 = smov 0   ;;  %s2075_s0 = inlined_call_operand.vmem [shape: f32[512,64], index: 0, kind: input, shape index: {}]   ;;  %s2076_s1 = inlined_call_operand.vmem [shape: f32[1,64], index: 1, kind: input, shape index: {}]   ;;  %s2077_s2 = inlined_call_operand.vmem [shape: f32[1,64], index: 2, kind: input, shape index: {}]   ;;  %s2078_s3 = inlined_call_operand.vmem [shape: bf16[64,192], index: 3, kind: input, shape index: {}]   ;;  %s2079_s4 = inlined_call_operand.vmem [shape: f32[1,192], index: 4, kind: input, shape index: {}]   ;;  %s2080_s5 = inlined_call_operand.vmem [shape: f32[512,192], index: 5, kind: output, shape index: {}]  }
   0x1 LB: > { %s1198_s19 = sadd.s32 4294967295, %s1336_s18   ;;  %p1202_p0 = scmp.ge.s32.totalorder %s1336_s18, 1  ;;  %s1336_s18 = sphi %s1369_s18, %s15_s18  }
   0x2   : > { %p188_p1 = scmp.lt.s32.totalorder %s1336_s18, 3 }
   0x4   : > { %p189_p2 = pnand %p1202_p0, %p188_p1 }
   0x5   : > { %s1203_s20 = sshll.u32 (!%p189_p2), %s1198_s19, 5  ;;  %vm263_vm0 = vcmask (!%p189_p2), 523264  }
   0x6   : > { %192 = sbr.rel (%p189_p2) target bundleno = 614 (0x266), region = 40  ;;  %p218_p3 = scmp.lt.s32.totalorder (!%p189_p2), %s1203_s20, 63 }
   0xd   : > { %s2082_s20 = smov (!%p218_p3, %s1203_s20), 63 }
   0xe   : > { %s1204_s21 = sshll.u32 %s2082_s20, 3 }
   0xf   : > { %s1383_s24 = scalar_lea.vmem %s2075_s0, %s1204_s21 }
  0x10   : > { %v1386_v0 = vld [vmem:[%s1383_s24] sm:$0xff]  ;;  %v1392_v2 = vld [vmem:[%s1383_s24 + $0x8] sm:$0xff]  ;;  %v1406_v8 = vld [vmem:[%s1383_s24 + $0x10] sm:$0xff] }
  0x11   : > { %v1389_v1 = vld [vmem:[%s1383_s24 + $0x80] sm:$0xff]  ;;  %v264_v3 = vsel %vm263_vm0, %v1386_v0, 0.0  ;;  %v1399_v5 = vld [vmem:[%s1383_s24 + $0x88] sm:$0xff]  ;;  %v267_v6 = vsel %vm263_vm0, %v1392_v2, 0.0  ;;  %v1409_v9 = vld [vmem:[%s1383_s24 + $0x18] sm:$0xff]  ;;  %v270_v10 = vsel %vm263_vm0, %v1406_v8, 0.0 }
  0x12   : > { %v312_v4 = vsel %vm263_vm0, %v1389_v1, 0.0  ;;  %265 = vadd.xlane.f32.xlu0 %v264_v3  ;;  %v315_v7 = vsel %vm263_vm0, %v1399_v5, 0.0  ;;  %v273_v11 = vsel %vm263_vm0, %v1409_v9, 0.0  ;;  %v1416_v12 = vld [vmem:[%s1383_s24 + $0x90] sm:$0xff]  ;;  %v1419_v13 = vld [vmem:[%s1383_s24 + $0x98] sm:$0xff]  ;;  %v1426_v16 = vld [vmem:[%s1383_s24 + $0x20] sm:$0xff] }
  0x13   : > { %313 = vadd.xlane.f32.xlu1 %v312_v4  ;;  %v318_v14 = vsel %vm263_vm0, %v1416_v12, 0.0  ;;  %v321_v15 = vsel %vm263_vm0, %v1419_v13, 0.0  ;;  %v1429_v17 = vld [vmem:[%s1383_s24 + $0x28] sm:$0xff]  ;;  %v276_v18 = vsel %vm263_vm0, %v1426_v16, 0.0  ;;  %v1436_v20 = vld [vmem:[%s1383_s24 + $0xa0] sm:$0xff]  ;;  %v1446_v24 = vld [vmem:[%s1383_s24 + $0x30] sm:$0xff] }
  0x14   : > { %v279_v19 = vsel %vm263_vm0, %v1429_v17, 0.0  ;;  %v1439_v21 = vld [vmem:[%s1383_s24 + $0xa8] sm:$0xff]  ;;  %v324_v22 = vsel %vm263_vm0, %v1436_v20, 0.0  ;;  %v1449_v25 = vld [vmem:[%s1383_s24 + $0x38] sm:$0xff]  ;;  %v282_v26 = vsel %vm263_vm0, %v1446_v24, 0.0  ;;  %v1456_v28 = vld [vmem:[%s1383_s24 + $0xb0] sm:$0xff] }
  0x15   : > { %v327_v23 = vsel %vm263_vm0, %v1439_v21, 0.0  ;;  %v285_v27 = vsel %vm263_vm0, %v1449_v25, 0.0  ;;  %v1459_v29 = vld [vmem:[%s1383_s24 + $0xb8] sm:$0xff]  ;;  %v330_v30 = vsel %vm263_vm0, %v1456_v28, 0.0  ;;  %v1466_v32 = vld [vmem:[%s1383_s24 + $0x40] sm:$0xff]  ;;  %v1469_v33 = vld [vmem:[%s1383_s24 + $0x48] sm:$0xff] }
  0x16   : > { %268 = vadd.xlane.f32.xlu0 %v267_v6  ;;  %v333_v31 = vsel %vm263_vm0, %v1459_v29, 0.0  ;;  %v288_v34 = vsel %vm263_vm0, %v1466_v32, 0.0  ;;  %v291_v35 = vsel %vm263_vm0, %v1469_v33, 0.0  ;;  %v1476_v36 = vld [vmem:[%s1383_s24 + $0xc0] sm:$0xff]  ;;  %v1479_v37 = vld [vmem:[%s1383_s24 + $0xc8] sm:$0xff]  ;;  %v1486_v40 = vld [vmem:[%s1383_s24 + $0x50] sm:$0xff] }
  0x17   : > { %316 = vadd.xlane.f32.xlu1 %v315_v7  ;;  %v336_v38 = vsel %vm263_vm0, %v1476_v36, 0.0  ;;  %v339_v39 = vsel %vm263_vm0, %v1479_v37, 0.0  ;;  %v1489_v41 = vld [vmem:[%s1383_s24 + $0x58] sm:$0xff]  ;;  %v294_v42 = vsel %vm263_vm0, %v1486_v40, 0.0  ;;  %v1496_v44 = vld [vmem:[%s1383_s24 + $0xd0] sm:$0xff]  ;;  %v1506_v48 = vld [vmem:[%s1383_s24 + $0x60] sm:$0xff] }
  0x18   : > { %v297_v43 = vsel %vm263_vm0, %v1489_v41, 0.0  ;;  %v1499_v45 = vld [vmem:[%s1383_s24 + $0xd8] sm:$0xff]  ;;  %v342_v46 = vsel %vm263_vm0, %v1496_v44, 0.0  ;;  %v1509_v49 = vld [vmem:[%s1383_s24 + $0x68] sm:$0xff]  ;;  %v300_v50 = vsel %vm263_vm0, %v1506_v48, 0.0  ;;  %v1516_v52 = vld [vmem:[%s1383_s24 + $0xe0] sm:$0xff] }
  0x19   : > { %v345_v47 = vsel %vm263_vm0, %v1499_v45, 0.0  ;;  %v303_v51 = vsel %vm263_vm0, %v1509_v49, 0.0  ;;  %v1519_v53 = vld [vmem:[%s1383_s24 + $0xe8] sm:$0xff]  ;;  %v348_v54 = vsel %vm263_vm0, %v1516_v52, 0.0  ;;  %v1526_v56 = vld [vmem:[%s1383_s24 + $0x70] sm:$0xff]  ;;  %v1529_v57 = vld [vmem:[%s1383_s24 + $0x78] sm:$0xff] }
  0x1a   : > { %271 = vadd.xlane.f32.xlu0 %v270_v10  ;;  %v351_v55 = vsel %vm263_vm0, %v1519_v53, 0.0  ;;  %v306_v58 = vsel %vm263_vm0, %v1526_v56, 0.0  ;;  %v309_v59 = vsel %vm263_vm0, %v1529_v57, 0.0  ;;  %v1536_v60 = vld [vmem:[%s1383_s24 + $0xf0] sm:$0xff]  ;;  %v1539_v61 = vld [vmem:[%s1383_s24 + $0xf8] sm:$0xff]  ;;  %s1236_s24 = sshll.u32 %s2082_s20, 4 }
  0x1b   : > { %274 = vadd.xlane.f32.xlu1 %v273_v11  ;;  %v354_v62 = vsel %vm263_vm0, %v1536_v60, 0.0  ;;  %v357_v63 = vsel %vm263_vm0, %v1539_v61, 0.0  ;;  %s1910_s27 = scalar_lea.vmem %s2080_s5, %s1236_s24 }
  0x1e   : > { %319 = vadd.xlane.f32.xlu0 %v318_v14 }
  0x1f   : > { %322 = vadd.xlane.f32.xlu1 %v321_v15 }
  0x22   : > { %277 = vadd.xlane.f32.xlu0 %v276_v18 }
  0x23   : > { %280 = vadd.xlane.f32.xlu1 %v279_v19 }
  0x26   : > { %325 = vadd.xlane.f32.xlu0 %v324_v22 }
  0x27   : > { %328 = vadd.xlane.f32.xlu1 %v327_v23 }
  0x2a   : > { %283 = vadd.xlane.f32.xlu0 %v282_v26 }
  0x2b   : > { %286 = vadd.xlane.f32.xlu1 %v285_v27 }
  0x2e   : > { %331 = vadd.xlane.f32.xlu0 %v330_v30 }
  0x2f   : > { %334 = vadd.xlane.f32.xlu1 %v333_v31 }
  0x32   : > { %289 = vadd.xlane.f32.xlu0 %v288_v34 }
  0x33   : > { %292 = vadd.xlane.f32.xlu1 %v291_v35 }
  0x36   : > { %337 = vadd.xlane.f32.xlu0 %v336_v38 }
  0x37   : > { %340 = vadd.xlane.f32.xlu1 %v339_v39 }
  0x3a   : > { %295 = vadd.xlane.f32.xlu0 %v294_v42 }
  0x3b   : > { %298 = vadd.xlane.f32.xlu1 %v297_v43 }
  0x3e   : > { %343 = vadd.xlane.f32.xlu0 %v342_v46 }
  0x3f   : > { %346 = vadd.xlane.f32.xlu1 %v345_v47 }
  0x42   : > { %301 = vadd.xlane.f32.xlu0 %v300_v50 }
  0x43   : > { %304 = vadd.xlane.f32.xlu1 %v303_v51 }
  0x46   : > { %349 = vadd.xlane.f32.xlu0 %v348_v54 }
  0x47   : > { %352 = vadd.xlane.f32.xlu1 %v351_v55 }
  0x4a   : > { %307 = vadd.xlane.f32.xlu0 %v306_v58 }
  0x4b   : > { %310 = vadd.xlane.f32.xlu1 %v309_v59 }
  0x4e   : > { %355 = vadd.xlane.f32.xlu0 %v354_v62 }
  0x4f   : > { %358 = vadd.xlane.f32.xlu1 %v357_v63 }
  0x9f   : > { %v266_v3 = vpop.xlane.xlu0 %265 }
  0xa0   : > { %v314_v4 = vpop.xlane.xlu1 %313  ;;  %v361_v6 = vmul.f32 0.015625, %v266_v3 }
  0xa1   : > { %v377_v7 = vmul.f32 0.015625, %v314_v4 }
  0xa2   : > { %v1546_v10 = vsub.f32 %v1386_v0, %v361_v6 }
  0xa3   : > { %v1549_v11 = vsub.f32 %v1389_v1, %v377_v7  ;;  %v269_v14 = vpop.xlane.xlu0 %268 }
  0xa4   : > { %v317_v15 = vpop.xlane.xlu1 %316  ;;  %v362_v18 = vmul.f32 0.015625, %v269_v14  ;;  %v425_v22 = vmul.f32 %v1546_v10, %v1546_v10 }
  0xa5   : > { %v378_v19 = vmul.f32 0.015625, %v317_v15  ;;  %v441_v23 = vmul.f32 %v1549_v11, %v1549_v11 }
  0xa6   : > { %v1556_v26 = vsub.f32 %v1392_v2, %v362_v18  ;;  %v457_v0 = vsel %vm263_vm0, %v425_v22, 0.0 }
  0xa7   : > { %v1559_v27 = vsub.f32 %v1399_v5, %v378_v19  ;;  %458 = vadd.xlane.f32.xlu0 %v457_v0  ;;  %v272_v1 = vpop.xlane.xlu0 %271  ;;  %v505_v31 = vsel %vm263_vm0, %v441_v23, 0.0 }
  0xa8   : > { %v275_v30 = vpop.xlane.xlu1 %274  ;;  %v363_v34 = vmul.f32 0.015625, %v272_v1  ;;  %v426_v38 = vmul.f32 %v1556_v26, %v1556_v26 }
  0xa9   : > { %v364_v35 = vmul.f32 0.015625, %v275_v30  ;;  %v442_v39 = vmul.f32 %v1559_v27, %v1559_v27 }
  0xaa   : > { %v1568_v2 = vsub.f32 %v1406_v8, %v363_v34  ;;  %v460_v42 = vsel %vm263_vm0, %v426_v38, 0.0 }
  0xab   : > { %v1571_v5 = vsub.f32 %v1409_v9, %v364_v35  ;;  %506 = vadd.xlane.f32.xlu0 %v505_v31  ;;  %461 = vadd.xlane.f32.xlu1 %v460_v42  ;;  %v320_v43 = vpop.xlane.xlu0 %319  ;;  %v508_v47 = vsel %vm263_vm0, %v442_v39, 0.0 }
  0xac   : > { %v323_v46 = vpop.xlane.xlu1 %322  ;;  %v379_v50 = vmul.f32 0.015625, %v320_v43  ;;  %v427_v54 = vmul.f32 %v1568_v2, %v1568_v2 }
  0xad   : > { %v380_v51 = vmul.f32 0.015625, %v323_v46  ;;  %v428_v8 = vmul.f32 %v1571_v5, %v1571_v5 }
  0xae   : > { %v1580_v55 = vsub.f32 %v1416_v12, %v379_v50  ;;  %v463_v58 = vsel %vm263_vm0, %v427_v54, 0.0 }
  0xaf   : > { %v1583_v9 = vsub.f32 %v1419_v13, %v380_v51  ;;  %509 = vadd.xlane.f32.xlu1 %v508_v47  ;;  %464 = vadd.xlane.f32.xlu0 %v463_v58  ;;  %v278_v59 = vpop.xlane.xlu0 %277  ;;  %v466_v63 = vsel %vm263_vm0, %v428_v8, 0.0 }
  0xb0   : > { %v281_v62 = vpop.xlane.xlu1 %280  ;;  %v365_v3 = vmul.f32 0.015625, %v278_v59  ;;  %v443_v6 = vmul.f32 %v1580_v55, %v1580_v55 }
  0xb1   : > { %v366_v4 = vmul.f32 0.015625, %v281_v62  ;;  %v444_v12 = vmul.f32 %v1583_v9, %v1583_v9 }
  0xb2   : > { %v1592_v7 = vsub.f32 %v1426_v16, %v365_v3  ;;  %v511_v14 = vsel %vm263_vm0, %v443_v6, 0.0  ;;  %v1254_v6 = vld [vmem:[%s2078_s3 + $0x4] ss:$8 sps:$4 sm:$0xff]  }
  0xb3   : > { %v1595_v13 = vsub.f32 %v1429_v17, %v366_v4  ;;  %467 = vadd.xlane.f32.xlu1 %v466_v63  ;;  %512 = vadd.xlane.f32.xlu0 %v511_v14  ;;  %v326_v15 = vpop.xlane.xlu0 %325  ;;  %v514_v19 = vsel %vm263_vm0, %v444_v12, 0.0 }
  0xb4   : > { %v329_v18 = vpop.xlane.xlu1 %328  ;;  %v381_v22 = vmul.f32 0.015625, %v326_v15  ;;  %v429_v0 = vmul.f32 %v1592_v7, %v1592_v7  ;;  %v1256_v15 = vld [vmem:[%s2078_s3] ss:$8 sps:$4 sm:$0xff]   ;;  %883 = vmatprep.subr.bf16.mxu0 %v1254_v6  ;;  %1237 = vmatprep.subr.bf16.mxu1 %v1254_v6  ;;  %v1263_v6 = vld [vmem:[%s2078_s3 + $0x34] ss:$8 sps:$4 sm:$0xff]  }
  0xb5   : > { %v382_v23 = vmul.f32 0.015625, %v329_v18  ;;  %v430_v16 = vmul.f32 %v1595_v13, %v1595_v13  ;;  %884 = vmatpush1.bf16.msra.mxu0 %v1256_v15  ;;  %1241 = vmatpush1.bf16.msra.mxu1 %v1256_v15 }
  0xb6   : > { %v1604_v1 = vsub.f32 %v1436_v20, %v381_v22  ;;  %v469_v30 = vsel %vm263_vm0, %v429_v0, 0.0 }
  0xb7   : > { %v1607_v17 = vsub.f32 %v1439_v21, %v382_v23  ;;  %515 = vadd.xlane.f32.xlu1 %v514_v19  ;;  %470 = vadd.xlane.f32.xlu0 %v469_v30  ;;  %v284_v31 = vpop.xlane.xlu0 %283  ;;  %v472_v35 = vsel %vm263_vm0, %v430_v16, 0.0  ;;  %v1257_v30 = vld [vmem:[%s2078_s3 + $0x14] ss:$8 sps:$4 sm:$0xff]  }
  0xb8   : > { %v287_v34 = vpop.xlane.xlu1 %286  ;;  %v367_v38 = vmul.f32 0.015625, %v284_v31  ;;  %v445_v42 = vmul.f32 %v1604_v1, %v1604_v1  ;;  %885 = vmatprep.subr.bf16.mxu0 %v1257_v30  ;;  %1238 = vmatprep.subr.bf16.mxu1 %v1257_v30 }
  0xb9   : > { %v368_v39 = vmul.f32 0.015625, %v287_v34  ;;  %v446_v20 = vmul.f32 %v1607_v17, %v1607_v17 }
  0xba   : > { %v1616_v43 = vsub.f32 %v1446_v24, %v367_v38  ;;  %v517_v46 = vsel %vm263_vm0, %v445_v42, 0.0 }
  0xbb   : > { %v1619_v21 = vsub.f32 %v1449_v25, %v368_v39  ;;  %473 = vadd.xlane.f32.xlu1 %v472_v35  ;;  %518 = vadd.xlane.f32.xlu0 %v517_v46  ;;  %v332_v47 = vpop.xlane.xlu0 %331  ;;  %v520_v51 = vsel %vm263_vm0, %v446_v20, 0.0  ;;  %v1259_v35 = vld [vmem:[%s2078_s3 + $0x10] ss:$8 sps:$4 sm:$0xff]  }
  0xbc   : > { %v335_v50 = vpop.xlane.xlu1 %334  ;;  %v383_v54 = vmul.f32 0.015625, %v332_v47  ;;  %v431_v58 = vmul.f32 %v1616_v43, %v1616_v43  ;;  %886 = vmatpush1.bf16.msra.mxu0 %v1259_v35  ;;  %1242 = vmatpush1.bf16.msra.mxu1 %v1259_v35 }
  0xbd   : > { %v384_v8 = vmul.f32 0.015625, %v335_v50  ;;  %v432_v24 = vmul.f32 %v1619_v21, %v1619_v21  ;;  %v1260_v50 = vld [vmem:[%s2078_s3 + $0x24] ss:$8 sps:$4 sm:$0xff]  }
  0xbe   : > { %v1628_v59 = vsub.f32 %v1456_v28, %v383_v54  ;;  %v475_v62 = vsel %vm263_vm0, %v431_v58, 0.0  ;;  %887 = vmatprep.subr.bf16.mxu0 %v1260_v50  ;;  %1239 = vmatprep.subr.bf16.mxu1 %v1260_v50 }
  0xbf   : > { %v1631_v25 = vsub.f32 %v1459_v29, %v384_v8  ;;  %521 = vadd.xlane.f32.xlu1 %v520_v51  ;;  %476 = vadd.xlane.f32.xlu0 %v475_v62  ;;  %v290_v63 = vpop.xlane.xlu0 %289  ;;  %v478_v4 = vsel %vm263_vm0, %v432_v24, 0.0  ;;  %v1262_v8 = vld [vmem:[%s2078_s3 + $0x20] ss:$8 sps:$4 sm:$0xff]  }
  0xc0   : > { %v293_v3 = vpop.xlane.xlu1 %292  ;;  %v369_v12 = vmul.f32 0.015625, %v290_v63  ;;  %v447_v28 = vmul.f32 %v1628_v59, %v1628_v59  ;;  %888 = vmatpush1.bf16.msra.mxu0 %v1262_v8  ;;  %1243 = vmatpush1.bf16.msra.mxu1 %v1262_v8 }
  0xc1   : > { %v370_v14 = vmul.f32 0.015625, %v293_v3  ;;  %v448_v29 = vmul.f32 %v1631_v25, %v1631_v25  ;;  %889 = vmatprep.subr.bf16.mxu0 %v1263_v6  ;;  %1240 = vmatprep.subr.bf16.mxu1 %v1263_v6 }
  0xc2   : > { %v1646_v18 = vsub.f32 %v1466_v32, %v369_v12  ;;  %v523_v22 = vsel %vm263_vm0, %v447_v28, 0.0  ;;  %v1265_v28 = vld [vmem:[%s2078_s3 + $0x30] ss:$8 sps:$4 sm:$0xff]  }
  0xc3   : > { %v1649_v19 = vsub.f32 %v1469_v33, %v370_v14  ;;  %479 = vadd.xlane.f32.xlu1 %v478_v4  ;;  %524 = vadd.xlane.f32.xlu0 %v523_v22  ;;  %v338_v23 = vpop.xlane.xlu0 %337  ;;  %v526_v16 = vsel %vm263_vm0, %v448_v29, 0.0 }
  0xc4   : > { %v341_v0 = vpop.xlane.xlu1 %340  ;;  %v385_v31 = vmul.f32 0.015625, %v338_v23  ;;  %v433_v33 = vmul.f32 %v1646_v18, %v1646_v18  ;;  %890 = vmatpush1.bf16.msra.mxu0 %v1265_v28  ;;  %1244 = vmatpush1.bf16.msra.mxu1 %v1265_v28 }
  0xc5   : > { %v386_v32 = vmul.f32 0.015625, %v341_v0  ;;  %v434_v34 = vmul.f32 %v1649_v19, %v1649_v19 }
  0xc6   : > { %v1664_v38 = vsub.f32 %v1476_v36, %v385_v31  ;;  %v481_v42 = vsel %vm263_vm0, %v433_v33, 0.0 }
  0xc7   : > { %v1667_v39 = vsub.f32 %v1479_v37, %v386_v32  ;;  %527 = vadd.xlane.f32.xlu1 %v526_v16  ;;  %482 = vadd.xlane.f32.xlu0 %v481_v42  ;;  %v296_v20 = vpop.xlane.xlu0 %295  ;;  %v484_v47 = vsel %vm263_vm0, %v434_v34, 0.0 }
  0xc8   : > { %v299_v46 = vpop.xlane.xlu1 %298  ;;  %v371_v51 = vmul.f32 0.015625, %v296_v20  ;;  %v449_v37 = vmul.f32 %v1664_v38, %v1664_v38 }
  0xc9   : > { %v372_v36 = vmul.f32 0.015625, %v299_v46  ;;  %v450_v54 = vmul.f32 %v1667_v39, %v1667_v39 }
  0xca   : > { %v1682_v58 = vsub.f32 %v1486_v40, %v371_v51  ;;  %v529_v62 = vsel %vm263_vm0, %v449_v37, 0.0 }
  0xcb   : > { %v1685_v24 = vsub.f32 %v1489_v41, %v372_v36  ;;  %485 = vadd.xlane.f32.xlu1 %v484_v47  ;;  %530 = vadd.xlane.f32.xlu0 %v529_v62  ;;  %v344_v63 = vpop.xlane.xlu0 %343  ;;  %v532_v4 = vsel %vm263_vm0, %v450_v54, 0.0 }
  0xcc   : > { %v347_v3 = vpop.xlane.xlu1 %346  ;;  %v387_v12 = vmul.f32 0.015625, %v344_v63  ;;  %v435_v41 = vmul.f32 %v1682_v58, %v1682_v58 }
  0xcd   : > { %v388_v40 = vmul.f32 0.015625, %v347_v3  ;;  %v436_v14 = vmul.f32 %v1685_v24, %v1685_v24 }
  0xce   : > { %v1700_v29 = vsub.f32 %v1496_v44, %v387_v12  ;;  %v487_v22 = vsel %vm263_vm0, %v435_v41, 0.0 }
  0xcf   : > { %v1703_v15 = vsub.f32 %v1499_v45, %v388_v40  ;;  %533 = vadd.xlane.f32.xlu1 %v532_v4  ;;  %488 = vadd.xlane.f32.xlu0 %v487_v22  ;;  %v302_v23 = vpop.xlane.xlu0 %301  ;;  %v490_v16 = vsel %vm263_vm0, %v436_v14, 0.0  ;;  %v1338_v45 = vmov 0  }
  0xd0   : > { %v305_v0 = vpop.xlane.xlu1 %304  ;;  %v373_v30 = vmul.f32 0.015625, %v302_v23  ;;  %v451_v32 = vmul.f32 %v1700_v29, %v1700_v29  ;;  %915 = vmatprep.mubr.bf16.mxu0 %v1338_v45  ;;  %995 = vmatprep.mubr.bf16.mxu1 %v1338_v45 }
  0xd1   : > { %v374_v31 = vmul.f32 0.015625, %v305_v0  ;;  %v452_v44 = vmul.f32 %v1703_v15, %v1703_v15 }
  0xd2   : > { %v1714_v33 = vsub.f32 %v1506_v48, %v373_v30  ;;  %v535_v35 = vsel %vm263_vm0, %v451_v32, 0.0 }
  0xd3   : > { %v1717_v34 = vsub.f32 %v1509_v49, %v374_v31  ;;  %491 = vadd.xlane.f32.xlu1 %v490_v16  ;;  %536 = vadd.xlane.f32.xlu0 %v535_v35  ;;  %v350_v42 = vpop.xlane.xlu0 %349  ;;  %v538_v46 = vsel %vm263_vm0, %v452_v44, 0.0 }
  0xd4   : > { %v353_v20 = vpop.xlane.xlu1 %352  ;;  %v389_v47 = vmul.f32 0.015625, %v350_v42  ;;  %v437_v51 = vmul.f32 %v1714_v33, %v1714_v33 }
  0xd5   : > { %v390_v50 = vmul.f32 0.015625, %v353_v20  ;;  %v438_v48 = vmul.f32 %v1717_v34, %v1717_v34 }
  0xd6   : > { %v1726_v36 = vsub.f32 %v1516_v52, %v389_v47  ;;  %v493_v37 = vsel %vm263_vm0, %v437_v51, 0.0 }
  0xd7   : > { %v1729_v49 = vsub.f32 %v1519_v53, %v390_v50  ;;  %539 = vadd.xlane.f32.xlu1 %v538_v46  ;;  %494 = vadd.xlane.f32.xlu0 %v493_v37  ;;  %v308_v54 = vpop.xlane.xlu0 %307  ;;  %v496_v62 = vsel %vm263_vm0, %v438_v48, 0.0 }
  0xd8   : > { %v311_v8 = vpop.xlane.xlu1 %310  ;;  %v375_v63 = vmul.f32 0.015625, %v308_v54  ;;  %v453_v4 = vmul.f32 %v1726_v36, %v1726_v36 }
  0xd9   : > { %v376_v3 = vmul.f32 0.015625, %v311_v8  ;;  %v454_v52 = vmul.f32 %v1729_v49, %v1729_v49 }
  0xda   : > { %v1738_v6 = vsub.f32 %v1526_v56, %v375_v63  ;;  %v541_v12 = vsel %vm263_vm0, %v453_v4, 0.0 }
  0xdb   : > { %v1741_v53 = vsub.f32 %v1529_v57, %v376_v3  ;;  %497 = vadd.xlane.f32.xlu1 %v496_v62  ;;  %542 = vadd.xlane.f32.xlu0 %v541_v12  ;;  %v356_v40 = vpop.xlane.xlu0 %355  ;;  %v544_v14 = vsel %vm263_vm0, %v454_v52, 0.0 }
  0xdc   : > { %v359_v41 = vpop.xlane.xlu1 %358  ;;  %v391_v28 = vmul.f32 0.015625, %v356_v40  ;;  %v439_v23 = vmul.f32 %v1738_v6, %v1738_v6 }
  0xdd   : > { %v392_v22 = vmul.f32 0.015625, %v359_v41  ;;  %v440_v56 = vmul.f32 %v1741_v53, %v1741_v53 }
  0xde   : > { %v1750_v0 = vsub.f32 %v1536_v60, %v391_v28  ;;  %v499_v16 = vsel %vm263_vm0, %v439_v23, 0.0 }
  0xdf   : > { %v1753_v57 = vsub.f32 %v1539_v61, %v392_v22  ;;  %545 = vadd.xlane.f32.xlu1 %v544_v14  ;;  %500 = vadd.xlane.f32.xlu0 %v499_v16  ;;  %v502_v30 = vsel %vm263_vm0, %v440_v56, 0.0 }
  0xe0   : > { %v455_v31 = vmul.f32 %v1750_v0, %v1750_v0 }
  0xe1   : > { %v456_v32 = vmul.f32 %v1753_v57, %v1753_v57 }
  0xe2   : > { %v547_v44 = vsel %vm263_vm0, %v455_v31, 0.0  ;;  %v1767_v31 = vld [vmem:[%s2076_s1] ss:$0 sm:$0xff] }
  0xe3   : > { %503 = vadd.xlane.f32.xlu1 %v502_v30  ;;  %548 = vadd.xlane.f32.xlu0 %v547_v44  ;;  %v550_v60 = vsel %vm263_vm0, %v456_v32, 0.0 }
  0xe7   : > { %551 = vadd.xlane.f32.xlu1 %v550_v60 }
 0x134   : > { %v459_v61 = vpop.xlane.xlu0 %458 }
 0x135   : > { %v553_v35 = vmul.f32 0.015625, %v459_v61 }
 0x137   : > { %v585_v42 = vadd.f32 1e-06, %v553_v35 }
 0x138   : > { %v462_v20 = vpop.xlane.xlu1 %461  ;;  %v507_v46 = vpop.xlane.xlu0 %506 }
 0x139   : > { %1266 = vrsqrt.f32 %v585_v42  ;;  %v554_v47 = vmul.f32 0.015625, %v462_v20  ;;  %v569_v50 = vmul.f32 0.015625, %v507_v46 }
 0x13b   : > { %v586_v51 = vadd.f32 1e-06, %v554_v47  ;;  %v601_v48 = vadd.f32 1e-06, %v569_v50 }
 0x13c   : > { %v510_v37 = vpop.xlane.xlu1 %509  ;;  %v465_v54 = vpop.xlane.xlu0 %464 }
 0x13d   : > { %1268 = vrsqrt.f32 %v586_v51  ;;  %v570_v8 = vmul.f32 0.015625, %v510_v37  ;;  %v555_v62 = vmul.f32 0.015625, %v465_v54  ;;  %v1775_v51 = vld [vmem:[%s2077_s2] ss:$0 sm:$0xff] }
 0x13e   : > { %1270 = vrsqrt.f32 %v601_v48 }
 0x13f   : > { %v602_v63 = vadd.f32 1e-06, %v570_v8  ;;  %v587_v3 = vadd.f32 1e-06, %v555_v62 }
 0x140   : > { %v468_v4 = vpop.xlane.xlu1 %467  ;;  %v513_v52 = vpop.xlane.xlu0 %512 }
 0x141   : > { %1272 = vrsqrt.f32 %v602_v63  ;;  %v556_v12 = vmul.f32 0.015625, %v468_v4  ;;  %v571_v40 = vmul.f32 0.015625, %v513_v52 }
 0x142   : > { %1274 = vrsqrt.f32 %v587_v3 }
 0x143   : > { %v1267_v41 = vpop.eup %1266  ;;  %v588_v14 = vadd.f32 1e-06, %v556_v12  ;;  %v603_v28 = vadd.f32 1e-06, %v571_v40 }
 0x144   : > { %v649_v22 = vmul.f32 %v1267_v41, %v1546_v10  ;;  %v516_v23 = vpop.xlane.xlu1 %515  ;;  %v471_v56 = vpop.xlane.xlu0 %470 }
 0x145   : > { %1276 = vrsqrt.f32 %v588_v14  ;;  %v572_v16 = vmul.f32 0.015625, %v516_v23  ;;  %v557_v30 = vmul.f32 0.015625, %v471_v56 }
 0x146   : > { %1278 = vrsqrt.f32 %v603_v28  ;;  %v688_v10 = vmul.f32 %v1767_v31, %v649_v22 }
 0x147   : > { %v1269_v32 = vpop.eup %1268  ;;  %v604_v44 = vadd.f32 1e-06, %v572_v16  ;;  %v589_v60 = vadd.f32 1e-06, %v557_v30 }
 0x148   : > { %v1271_v61 = vpop.eup %1270  ;;  %v650_v35 = vmul.f32 %v1269_v32, %v1556_v26  ;;  %v474_v42 = vpop.xlane.xlu1 %473 }
 0x149   : > { %v519_v20 = vpop.xlane.xlu0 %518  ;;  %v665_v46 = vmul.f32 %v1271_v61, %v1549_v11  ;;  %1280 = vrsqrt.f32 %v604_v44  ;;  %v558_v47 = vmul.f32 0.015625, %v474_v42  ;;  %v727_v11 = vadd.f32 %v1775_v51, %v688_v10 }
 0x14a   : > { %v573_v50 = vmul.f32 0.015625, %v519_v20  ;;  %1282 = vrsqrt.f32 %v589_v60  ;;  %v689_v48 = vmul.f32 %v1767_v31, %v650_v35 }
 0x14b   : > { %v1273_v37 = vpop.eup %1272  ;;  %v590_v54 = vadd.f32 1e-06, %v558_v47  ;;  %v704_v52 = vmul.f32 %v1767_v31, %v665_v46 }
 0x14c   : > { %v605_v26 = vadd.f32 1e-06, %v573_v50  ;;  %v1275_v8 = vpop.eup %1274  ;;  %v666_v62 = vmul.f32 %v1273_v37, %v1559_v27  ;;  %v522_v63 = vpop.xlane.xlu1 %521  ;;  %v728_v4 = vadd.f32 %v1775_v51, %v689_v48 }
 0x14d   : > { %v477_v3 = vpop.xlane.xlu0 %476  ;;  %v651_v12 = vmul.f32 %v1275_v8, %v1568_v2  ;;  %1284 = vrsqrt.f32 %v590_v54  ;;  %v574_v40 = vmul.f32 0.015625, %v522_v63  ;;  %v743_v44 = vadd.f32 %v1775_v51, %v704_v52 }
 0x14e   : > { %v559_v41 = vmul.f32 0.015625, %v477_v3  ;;  %1286 = vrsqrt.f32 %v605_v26  ;;  %v759_v14 = vpack.c.bf16 %v728_v4, %v727_v11  ;;  %v705_v28 = vmul.f32 %v1767_v31, %v666_v62 }
 0x14f   : > { %v1277_v22 = vpop.eup %1276  ;;  %v606_v23 = vadd.f32 1e-06, %v574_v40  ;;  %v690_v60 = vmul.f32 %v1767_v31, %v651_v12 }
 0x150   : > { %v591_v27 = vadd.f32 1e-06, %v559_v41  ;;  %v1279_v56 = vpop.eup %1278  ;;  %v652_v16 = vmul.f32 %v1277_v22, %v1571_v5  ;;  %v480_v30 = vpop.xlane.xlu1 %479  ;;  %1218 = vmatmul.mubr.msk.bf16.vlgmr.msra.gmra.mrb[0].mxu0 %vm263_vm0, %v759_v14  ;;  %v744_v2 = vadd.f32 %v1775_v51, %v705_v28 }
 0x151   : > { %v525_v32 = vpop.xlane.xlu0 %524  ;;  %v667_v61 = vmul.f32 %v1279_v56, %v1580_v55  ;;  %1288 = vrsqrt.f32 %v606_v23  ;;  %v560_v35 = vmul.f32 0.015625, %v480_v30  ;;  %925 = vmatprep.mubr.bf16.mxu0 %v1338_v45  ;;  %v729_v55 = vadd.f32 %v1775_v51, %v690_v60 }
 0x152   : > { %v575_v42 = vmul.f32 0.015625, %v525_v32  ;;  %1290 = vrsqrt.f32 %v591_v27  ;;  %v767_v20 = vpack.c.bf16 %v744_v2, %v743_v44  ;;  %v691_v5 = vmul.f32 %v1767_v31, %v652_v16 }
 0x153   : > { %v1281_v10 = vpop.eup %1280  ;;  %v592_v46 = vadd.f32 1e-06, %v560_v35  ;;  %v706_v8 = vmul.f32 %v1767_v31, %v667_v61 }
 0x154   : > { %v607_v47 = vadd.f32 1e-06, %v575_v42  ;;  %v1283_v50 = vpop.eup %1282  ;;  %v668_v48 = vmul.f32 %v1281_v10, %v1583_v9  ;;  %v528_v37 = vpop.xlane.xlu1 %527  ;;  %1226 = vmatmul.mubr.msk.bf16.vlgmr.msra.gmra.mrb[0].mxu1 %vm263_vm0, %v767_v20  ;;  %v730_v26 = vadd.f32 %v1775_v51, %v691_v5 }
 0x155   : > { %v483_v54 = vpop.xlane.xlu0 %482  ;;  %v653_v62 = vmul.f32 %v1283_v50, %v1592_v7  ;;  %1292 = vrsqrt.f32 %v592_v46  ;;  %v576_v63 = vmul.f32 0.015625, %v528_v37  ;;  %1005 = vmatprep.mubr.bf16.mxu1 %v1338_v45  ;;  %v745_v7 = vadd.f32 %v1775_v51, %v706_v8 }
 0x156   : > { %v561_v3 = vmul.f32 0.015625, %v483_v54  ;;  %1294 = vrsqrt.f32 %v607_v47  ;;  %v760_v11 = vpack.c.bf16 %v730_v26, %v729_v55  ;;  %v707_v9 = vmul.f32 %v1767_v31, %v668_v48 }
 0x157   : > { %v1285_v4 = vpop.eup %1284  ;;  %v608_v52 = vadd.f32 1e-06, %v576_v63  ;;  %v692_v23 = vmul.f32 %v1767_v31, %v653_v62 }
 0x158   : > { %v593_v12 = vadd.f32 1e-06, %v561_v3  ;;  %v1287_v40 = vpop.eup %1286  ;;  %v654_v41 = vmul.f32 %v1285_v4, %v1595_v13  ;;  %v486_v14 = vpop.xlane.xlu1 %485  ;;  %1219 = vmatmul.mubr.msk.bf16.gmra.mrb[4].mxu0 %vm263_vm0, %v760_v11  ;;  %v746_v22 = vadd.f32 %v1775_v51, %v707_v9 }
 0x159   : > { %v531_v28 = vpop.xlane.xlu0 %530  ;;  %v669_v27 = vmul.f32 %v1287_v40, %v1604_v1  ;;  %1296 = vrsqrt.f32 %v608_v52  ;;  %v562_v56 = vmul.f32 0.015625, %v486_v14  ;;  %935 = vmatprep.mubr.bf16.mxu0 %v1338_v45  ;;  %v731_v1 = vadd.f32 %v1775_v51, %v692_v23 }
 0x15a   : > { %v577_v16 = vmul.f32 0.015625, %v531_v28  ;;  %1298 = vrsqrt.f32 %v593_v12  ;;  %v768_v30 = vpack.c.bf16 %v746_v22, %v745_v7  ;;  %v693_v13 = vmul.f32 %v1767_v31, %v654_v41 }
 0x15b   : > { %v1289_v32 = vpop.eup %1288  ;;  %v594_v44 = vadd.f32 1e-06, %v562_v56  ;;  %v708_v5 = vmul.f32 %v1767_v31, %v669_v27 }
 0x15c   : > { %v609_v2 = vadd.f32 1e-06, %v577_v16  ;;  %v1291_v60 = vpop.eup %1290  ;;  %v670_v61 = vmul.f32 %v1289_v32, %v1607_v17  ;;  %v534_v35 = vpop.xlane.xlu1 %533  ;;  %1227 = vmatmul.mubr.msk.bf16.gmra.mrb[4].mxu1 %vm263_vm0, %v768_v30  ;;  %v732_v20 = vadd.f32 %v1775_v51, %v693_v13 }
 0x15d   : > { %v489_v42 = vpop.xlane.xlu0 %488  ;;  %v655_v10 = vmul.f32 %v1291_v60, %v1616_v43  ;;  %1300 = vrsqrt.f32 %v594_v44  ;;  %v578_v46 = vmul.f32 0.015625, %v534_v35  ;;  %1015 = vmatprep.mubr.bf16.mxu1 %v1338_v45  ;;  %v747_v43 = vadd.f32 %v1775_v51, %v708_v5 }
 0x15e   : > { %v563_v47 = vmul.f32 0.015625, %v489_v42  ;;  %1302 = vrsqrt.f32 %v609_v2  ;;  %v761_v50 = vpack.c.bf16 %v732_v20, %v731_v1  ;;  %v709_v17 = vmul.f32 %v1767_v31, %v670_v61 }
 0x15f   : > { %v1293_v48 = vpop.eup %1292  ;;  %v610_v37 = vadd.f32 1e-06, %v578_v46  ;;  %v694_v3 = vmul.f32 %v1767_v31, %v655_v10 }
 0x160   : > { %v595_v54 = vadd.f32 1e-06, %v563_v47  ;;  %v1295_v55 = vpop.eup %1294  ;;  %v656_v26 = vmul.f32 %v1293_v48, %v1619_v21  ;;  %v492_v8 = vpop.xlane.xlu1 %491  ;;  %1220 = vmatmul.mubr.msk.bf16.gmra.mrb[8].mxu0 %vm263_vm0, %v761_v50  ;;  %v748_v63 = vadd.f32 %v1775_v51, %v709_v17 }
 0x161   : > { %v537_v62 = vpop.xlane.xlu0 %536  ;;  %v671_v11 = vmul.f32 %v1295_v55, %v1628_v59  ;;  %1304 = vrsqrt.f32 %v610_v37  ;;  %v564_v9 = vmul.f32 0.015625, %v492_v8  ;;  %945 = vmatprep.mubr.bf16.mxu0 %v1338_v45  ;;  %v733_v59 = vadd.f32 %v1775_v51, %v694_v3 }
 0x162   : > { %v579_v4 = vmul.f32 0.015625, %v537_v62  ;;  %1306 = vrsqrt.f32 %v595_v54  ;;  %v769_v52 = vpack.c.bf16 %v748_v63, %v747_v43  ;;  %v695_v21 = vmul.f32 %v1767_v31, %v656_v26 }
 0x163   : > { %v1297_v12 = vpop.eup %1296  ;;  %v596_v40 = vadd.f32 1e-06, %v564_v9  ;;  %v710_v27 = vmul.f32 %v1767_v31, %v671_v11 }
 0x164   : > { %v611_v41 = vadd.f32 1e-06, %v579_v4  ;;  %v1299_v14 = vpop.eup %1298  ;;  %v672_v28 = vmul.f32 %v1297_v12, %v1631_v25  ;;  %v540_v7 = vpop.xlane.xlu1 %539  ;;  %1228 = vmatmul.mubr.msk.bf16.gmra.mrb[8].mxu1 %vm263_vm0, %v769_v52  ;;  %v734_v23 = vadd.f32 %v1775_v51, %v695_v21 }
 0x165   : > { %v495_v22 = vpop.xlane.xlu0 %494  ;;  %v657_v56 = vmul.f32 %v1299_v14, %v1646_v18  ;;  %1308 = vrsqrt.f32 %v596_v40  ;;  %v580_v16 = vmul.f32 0.015625, %v540_v7  ;;  %1025 = vmatprep.mubr.bf16.mxu1 %v1338_v45  ;;  %v749_v18 = vadd.f32 %v1775_v51, %v710_v27 }
 0x166   : > { %v565_v30 = vmul.f32 0.015625, %v495_v22  ;;  %1310 = vrsqrt.f32 %v611_v41  ;;  %v762_v13 = vpack.c.bf16 %v734_v23, %v733_v59  ;;  %v711_v25 = vmul.f32 %v1767_v31, %v672_v28 }
 0x167   : > { %v1301_v32 = vpop.eup %1300  ;;  %v612_v44 = vadd.f32 1e-06, %v580_v16  ;;  %v696_v20 = vmul.f32 %v1767_v31, %v657_v56 }
 0x168   : > { %v597_v2 = vadd.f32 1e-06, %v565_v30  ;;  %v1303_v60 = vpop.eup %1302  ;;  %v658_v61 = vmul.f32 %v1301_v32, %v1649_v19  ;;  %v498_v35 = vpop.xlane.xlu1 %497  ;;  %1221 = vmatmul.mubr.msk.bf16.gmra.mrb[12].mxu0 %vm263_vm0, %v762_v13  ;;  %v750_v1 = vadd.f32 %v1775_v51, %v711_v25 }
 0x169   : > { %v543_v42 = vpop.xlane.xlu0 %542  ;;  %v673_v5 = vmul.f32 %v1303_v60, %v1664_v38  ;;  %1312 = vrsqrt.f32 %v612_v44  ;;  %v566_v10 = vmul.f32 0.015625, %v498_v35  ;;  %955 = vmatprep.mubr.bf16.mxu0 %v1338_v45  ;;  %v735_v38 = vadd.f32 %v1775_v51, %v696_v20 }
 0x16a   : > { %v581_v46 = vmul.f32 0.015625, %v543_v42  ;;  %1314 = vrsqrt.f32 %v597_v2  ;;  %v770_v47 = vpack.c.bf16 %v750_v1, %v749_v18  ;;  %v697_v19 = vmul.f32 %v1767_v31, %v658_v61 }
 0x16b   : > { %v1305_v50 = vpop.eup %1304  ;;  %v598_v17 = vadd.f32 1e-06, %v566_v10  ;;  %v712_v62 = vmul.f32 %v1767_v31, %v673_v5 }
 0x16c   : > { %v613_v48 = vadd.f32 1e-06, %v581_v46  ;;  %v1307_v37 = vpop.eup %1306  ;;  %v674_v54 = vmul.f32 %v1305_v50, %v1667_v39  ;;  %v546_v55 = vpop.xlane.xlu1 %545  ;;  %1229 = vmatmul.mubr.msk.bf16.gmra.mrb[12].mxu1 %vm263_vm0, %v770_v47  ;;  %v736_v8 = vadd.f32 %v1775_v51, %v697_v19 }
 0x16d   : > { %v501_v26 = vpop.xlane.xlu0 %500  ;;  %v659_v43 = vmul.f32 %v1307_v37, %v1682_v58  ;;  %1316 = vrsqrt.f32 %v598_v17  ;;  %v582_v63 = vmul.f32 0.015625, %v546_v55  ;;  %1035 = vmatprep.mubr.bf16.mxu1 %v1338_v45  ;;  %v751_v58 = vadd.f32 %v1775_v51, %v712_v62 }
 0x16e   : > { %v567_v3 = vmul.f32 0.015625, %v501_v26  ;;  %1318 = vrsqrt.f32 %v613_v48  ;;  %v763_v11 = vpack.c.bf16 %v736_v8, %v735_v38  ;;  %v713_v39 = vmul.f32 %v1767_v31, %v674_v54 }
 0x16f   : > { %v1309_v9 = vpop.eup %1308  ;;  %v614_v4 = vadd.f32 1e-06, %v582_v63  ;;  %v698_v28 = vmul.f32 %v1767_v31, %v659_v43 }
 0x170   : > { %v599_v52 = vadd.f32 1e-06, %v567_v3  ;;  %v1311_v21 = vpop.eup %1310  ;;  %v660_v12 = vmul.f32 %v1309_v9, %v1685_v24  ;;  %v504_v40 = vpop.xlane.xlu1 %503  ;;  %1222 = vmatmul.mubr.msk.bf16.gmra.mrb[16].mxu0 %vm263_vm0, %v763_v11  ;;  %v752_v14 = vadd.f32 %v1775_v51, %v713_v39 }
 0x171   : > { %v549_v41 = vpop.xlane.xlu0 %548  ;;  %v675_v7 = vmul.f32 %v1311_v21, %v1700_v29  ;;  %1320 = vrsqrt.f32 %v614_v4  ;;  %v568_v22 = vmul.f32 0.015625, %v504_v40  ;;  %965 = vmatprep.mubr.bf16.mxu0 %v1338_v45  ;;  %v737_v29 = vadd.f32 %v1775_v51, %v698_v28 }
 0x172   : > { %v583_v59 = vmul.f32 0.015625, %v549_v41  ;;  %1322 = vrsqrt.f32 %v599_v52  ;;  %v771_v23 = vpack.c.bf16 %v752_v14, %v751_v58  ;;  %v699_v24 = vmul.f32 %v1767_v31, %v660_v12  ;;  %v783_v14 = vld [vmem:[%s2079_s4] sm:$0x3] }
 0x173   : > { %v1313_v27 = vpop.eup %1312  ;;  %v600_v56 = vadd.f32 1e-06, %v568_v22  ;;  %v714_v44 = vmul.f32 %v1767_v31, %v675_v7  ;;  %v785_v40 = vlaneseq }
 0x174   : > { %v615_v16 = vadd.f32 1e-06, %v583_v59  ;;  %v1315_v30 = vpop.eup %1314  ;;  %v676_v13 = vmul.f32 %v1313_v27, %v1703_v15  ;;  %v552_v25 = vpop.xlane.xlu1 %551  ;;  %1230 = vmatmul.mubr.msk.bf16.gmra.mrb[16].mxu1 %vm263_vm0, %v771_v23  ;;  %v738_v32 = vadd.f32 %v1775_v51, %v699_v24 }
 0x175   : > { %v661_v2 = vmul.f32 %v1315_v30, %v1714_v33  ;;  %1324 = vrsqrt.f32 %v600_v56  ;;  %v584_v60 = vmul.f32 0.015625, %v552_v25  ;;  %1045 = vmatprep.mubr.bf16.mxu1 %v1338_v45  ;;  %v753_v20 = vadd.f32 %v1775_v51, %v714_v44 }
 0x176   : > { %1326 = vrsqrt.f32 %v615_v16  ;;  %v764_v61 = vpack.c.bf16 %v738_v32, %v737_v29  ;;  %v715_v35 = vmul.f32 %v1767_v31, %v676_v13  ;;  %v786_v41 = vshrl.u32 %v785_v40, 7 }
 0x177   : > { %v1317_v15 = vpop.eup %1316  ;;  %v616_v42 = vadd.f32 1e-06, %v584_v60  ;;  %v700_v33 = vmul.f32 %v1767_v31, %v661_v2 }
 0x178   : > { %v1319_v18 = vpop.eup %1318  ;;  %v662_v1 = vmul.f32 %v1317_v15, %v1717_v34  ;;  %1223 = vmatmul.mubr.msk.bf16.gmra.mrb[20].mxu0 %vm263_vm0, %v764_v61  ;;  %v754_v5 = vadd.f32 %v1775_v51, %v715_v35  ;;  %v787_v58 = vsub.s32 0, %v786_v41 }
 0x179   : > { %v677_v10 = vmul.f32 %v1319_v18, %v1726_v36  ;;  %1328 = vrsqrt.f32 %v616_v42  ;;  %975 = vmatprep.mubr.bf16.mxu0 %v1338_v45  ;;  %v739_v17 = vadd.f32 %v1775_v51, %v700_v33 }
 0x17a   : > { %v772_v46 = vpack.c.bf16 %v754_v5, %v753_v20  ;;  %v701_v47 = vmul.f32 %v1767_v31, %v662_v1  ;;  %v1903_v28 = vrot.slane %v783_v14, %v787_v58 }
 0x17b   : > { %v1321_v19 = vpop.eup %1320  ;;  %v716_v37 = vmul.f32 %v1767_v31, %v677_v10 }
 0x17c   : > { %v1323_v50 = vpop.eup %1322  ;;  %v678_v34 = vmul.f32 %v1321_v19, %v1729_v49  ;;  %1231 = vmatmul.mubr.msk.bf16.gmra.mrb[20].mxu1 %vm263_vm0, %v772_v46  ;;  %v740_v48 = vadd.f32 %v1775_v51, %v701_v47 }
 0x17d   : > { %v663_v36 = vmul.f32 %v1323_v50, %v1738_v6  ;;  %1055 = vmatprep.mubr.bf16.mxu1 %v1338_v45  ;;  %v755_v49 = vadd.f32 %v1775_v51, %v716_v37 }
 0x17e   : > { %v765_v54 = vpack.c.bf16 %v740_v48, %v739_v17  ;;  %v717_v55 = vmul.f32 %v1767_v31, %v678_v34 }
 0x17f   : > { %v1325_v26 = vpop.eup %1324  ;;  %v702_v43 = vmul.f32 %v1767_v31, %v663_v36 }
 0x180   : > { %v1327_v38 = vpop.eup %1326  ;;  %v664_v8 = vmul.f32 %v1325_v26, %v1741_v53  ;;  %1224 = vmatmul.mubr.msk.bf16.gmra.mrb[24].mxu0 %vm263_vm0, %v765_v54  ;;  %v756_v62 = vadd.f32 %v1775_v51, %v717_v55 }
 0x181   : > { %v679_v63 = vmul.f32 %v1327_v38, %v1750_v0  ;;  %985 = vmatprep.mubr.bf16.mxu0 %v1338_v45  ;;  %v741_v53 = vadd.f32 %v1775_v51, %v702_v43 }
 0x182   : > { %v773_v6 = vpack.c.bf16 %v756_v62, %v755_v49  ;;  %v703_v3 = vmul.f32 %v1767_v31, %v664_v8 }
 0x183   : > { %v1329_v11 = vpop.eup %1328  ;;  %v718_v4 = vmul.f32 %v1767_v31, %v679_v63 }
 0x184   : > { %v680_v39 = vmul.f32 %v1329_v11, %v1753_v57  ;;  %1232 = vmatmul.mubr.msk.bf16.gmra.mrb[24].mxu1 %vm263_vm0, %v773_v6  ;;  %v742_v9 = vadd.f32 %v1775_v51, %v703_v3 }
 0x185   : > { %1065 = vmatprep.mubr.bf16.mxu1 %v1338_v45  ;;  %v757_v21 = vadd.f32 %v1775_v51, %v718_v4  ;;  %v791_v45 = vsub.s32 1, %v786_v41 }
 0x186   : > { %v766_v0 = vpack.c.bf16 %v742_v9, %v741_v53  ;;  %v719_v52 = vmul.f32 %v1767_v31, %v680_v39 }
 0x187   : > { %v1905_v31 = vrot.slane %v783_v14, %v791_v45 }
 0x188   : > { %1225 = vmatmul.mubr.msk.bf16.gmra.mrb[28].mxu0 %vm263_vm0, %v766_v0  ;;  %v758_v57 = vadd.f32 %v1775_v51, %v719_v52 }
 0x18a   : > { %v774_v12 = vpack.c.bf16 %v758_v57, %v757_v21 }
 0x18c   : > { %1233 = vmatmul.mubr.msk.bf16.gmra.mrb[28].mxu1 %vm263_vm0, %v774_v12 }
 0x223   : > { %v917_v51 = vpop.f32.mrb[0].mxu0 }
 0x224   : > { %v918_v7 = vadd.f32 %v917_v51, %v1903_v28  ;;  %v919_v22 = vpop.f32.mrb[1].mxu0 }
 0x225   : > { %v920_v59 = vadd.f32 %v919_v22, %v1905_v31  ;;  %v921_v23 = vpop.f32.mrb[2].mxu0 }
 0x226   : > { %1076 = vst [vmem:[%s1910_s27] sm:$0xff] %v918_v7  ;;  %v922_v24 = vadd.f32 %v921_v23, %v1903_v28  ;;  %v923_v27 = vpop.f32.mrb[3].mxu0 }
 0x227   : > { %1077 = vst.msk [vmem:[%s1910_s27 + $0x8] sm:$0xff] %vm263_vm0, %v920_v59  ;;  %v924_v56 = vadd.f32 %v923_v27, %v1905_v31  ;;  %v997_v16 = vpop.f32.mrb[0].mxu1 }
 0x228   : > { %1078 = vst [vmem:[%s1910_s27 + $0x10] sm:$0xff] %v922_v24  ;;  %v998_v30 = vadd.f32 %v997_v16, %v1903_v28  ;;  %v999_v13 = vpop.f32.mrb[1].mxu1 }
 0x229   : > { %1079 = vst.msk [vmem:[%s1910_s27 + $0x18] sm:$0xff] %vm263_vm0, %v924_v56  ;;  %v1000_v25 = vadd.f32 %v999_v13, %v1905_v31  ;;  %v1001_v29 = vpop.f32.mrb[2].mxu1 }
 0x22a   : > { %1108 = vst [vmem:[%s1910_s27 + $0x100] sm:$0xff] %v998_v30  ;;  %v1002_v32 = vadd.f32 %v1001_v29, %v1903_v28  ;;  %v1003_v44 = vpop.f32.mrb[3].mxu1 }
 0x22b   : > { %1109 = vst.msk [vmem:[%s1910_s27 + $0x108] sm:$0xff] %vm263_vm0, %v1000_v25  ;;  %v1004_v2 = vadd.f32 %v1003_v44, %v1905_v31  ;;  %v927_v60 = vpop.f32.mrb[4].mxu0 }
 0x22c   : > { %1110 = vst [vmem:[%s1910_s27 + $0x110] sm:$0xff] %v1002_v32  ;;  %v928_v61 = vadd.f32 %v927_v60, %v1903_v28  ;;  %v929_v35 = vpop.f32.mrb[5].mxu0 }
 0x22d   : > { %1111 = vst.msk [vmem:[%s1910_s27 + $0x118] sm:$0xff] %vm263_vm0, %v1004_v2  ;;  %v930_v15 = vadd.f32 %v929_v35, %v1905_v31  ;;  %v931_v42 = vpop.f32.mrb[6].mxu0 }
 0x22e   : > { %1080 = vst [vmem:[%s1910_s27 + $0x20] sm:$0xff] %v928_v61  ;;  %v932_v18 = vadd.f32 %v931_v42, %v1903_v28  ;;  %v933_v1 = vpop.f32.mrb[7].mxu0 }
 0x22f   : > { %1081 = vst.msk [vmem:[%s1910_s27 + $0x28] sm:$0xff] %vm263_vm0, %v930_v15  ;;  %v934_v20 = vadd.f32 %v933_v1, %v1905_v31  ;;  %v1007_v5 = vpop.f32.mrb[4].mxu1 }
 0x230   : > { %1082 = vst [vmem:[%s1910_s27 + $0x30] sm:$0xff] %v932_v18  ;;  %v1008_v33 = vadd.f32 %v1007_v5, %v1903_v28  ;;  %v1009_v10 = vpop.f32.mrb[5].mxu1 }
 0x231   : > { %1083 = vst.msk [vmem:[%s1910_s27 + $0x38] sm:$0xff] %vm263_vm0, %v934_v20  ;;  %v1010_v46 = vadd.f32 %v1009_v10, %v1905_v31  ;;  %v1011_v47 = vpop.f32.mrb[6].mxu1 }
 0x232   : > { %1112 = vst [vmem:[%s1910_s27 + $0x120] sm:$0xff] %v1008_v33  ;;  %v1012_v19 = vadd.f32 %v1011_v47, %v1903_v28  ;;  %v1013_v50 = vpop.f32.mrb[7].mxu1 }
 0x233   : > { %1113 = vst.msk [vmem:[%s1910_s27 + $0x128] sm:$0xff] %vm263_vm0, %v1010_v46  ;;  %v1014_v34 = vadd.f32 %v1013_v50, %v1905_v31  ;;  %v937_v17 = vpop.f32.mrb[8].mxu0 }
 0x234   : > { %1114 = vst [vmem:[%s1910_s27 + $0x130] sm:$0xff] %v1012_v19  ;;  %v938_v48 = vadd.f32 %v937_v17, %v1903_v28  ;;  %v939_v37 = vpop.f32.mrb[9].mxu0 }
 0x235   : > { %1115 = vst.msk [vmem:[%s1910_s27 + $0x138] sm:$0xff] %vm263_vm0, %v1014_v34  ;;  %v940_v36 = vadd.f32 %v939_v37, %v1905_v31  ;;  %v941_v54 = vpop.f32.mrb[10].mxu0 }
 0x236   : > { %1084 = vst [vmem:[%s1910_s27 + $0x40] sm:$0xff] %v938_v48  ;;  %v942_v55 = vadd.f32 %v941_v54, %v1903_v28  ;;  %v943_v26 = vpop.f32.mrb[11].mxu0 }
 0x237   : > { %1085 = vst.msk [vmem:[%s1910_s27 + $0x48] sm:$0xff] %vm263_vm0, %v940_v36  ;;  %v944_v38 = vadd.f32 %v943_v26, %v1905_v31  ;;  %v1017_v8 = vpop.f32.mrb[8].mxu1 }
 0x238   : > { %1086 = vst [vmem:[%s1910_s27 + $0x50] sm:$0xff] %v942_v55  ;;  %v1018_v49 = vadd.f32 %v1017_v8, %v1903_v28  ;;  %v1019_v62 = vpop.f32.mrb[9].mxu1 }
 0x239   : > { %1087 = vst.msk [vmem:[%s1910_s27 + $0x58] sm:$0xff] %vm263_vm0, %v944_v38  ;;  %v1020_v43 = vadd.f32 %v1019_v62, %v1905_v31  ;;  %v1021_v63 = vpop.f32.mrb[10].mxu1 }
 0x23a   : > { %1116 = vst [vmem:[%s1910_s27 + $0x140] sm:$0xff] %v1018_v49  ;;  %v1022_v6 = vadd.f32 %v1021_v63, %v1903_v28  ;;  %v1023_v3 = vpop.f32.mrb[11].mxu1 }
 0x23b   : > { %1117 = vst.msk [vmem:[%s1910_s27 + $0x148] sm:$0xff] %vm263_vm0, %v1020_v43  ;;  %v1024_v11 = vadd.f32 %v1023_v3, %v1905_v31  ;;  %v947_v39 = vpop.f32.mrb[12].mxu0 }
 0x23c   : > { %1118 = vst [vmem:[%s1910_s27 + $0x150] sm:$0xff] %v1022_v6  ;;  %v948_v53 = vadd.f32 %v947_v39, %v1903_v28  ;;  %v949_v9 = vpop.f32.mrb[13].mxu0 }
 0x23d   : > { %1119 = vst.msk [vmem:[%s1910_s27 + $0x158] sm:$0xff] %vm263_vm0, %v1024_v11  ;;  %v950_v4 = vadd.f32 %v949_v9, %v1905_v31  ;;  %v951_v0 = vpop.f32.mrb[14].mxu0 }
 0x23e   : > { %1088 = vst [vmem:[%s1910_s27 + $0x60] sm:$0xff] %v948_v53  ;;  %v952_v52 = vadd.f32 %v951_v0, %v1903_v28  ;;  %v953_v21 = vpop.f32.mrb[15].mxu0 }
 0x23f   : > { %1089 = vst.msk [vmem:[%s1910_s27 + $0x68] sm:$0xff] %vm263_vm0, %v950_v4  ;;  %v954_v57 = vadd.f32 %v953_v21, %v1905_v31  ;;  %v1027_v12 = vpop.f32.mrb[12].mxu1 }
 0x240   : > { %1090 = vst [vmem:[%s1910_s27 + $0x70] sm:$0xff] %v952_v52  ;;  %v1028_v40 = vadd.f32 %v1027_v12, %v1903_v28  ;;  %v1029_v41 = vpop.f32.mrb[13].mxu1 }
 0x241   : > { %1091 = vst.msk [vmem:[%s1910_s27 + $0x78] sm:$0xff] %vm263_vm0, %v954_v57  ;;  %v1030_v58 = vadd.f32 %v1029_v41, %v1905_v31  ;;  %v1031_v14 = vpop.f32.mrb[14].mxu1 }
 0x242   : > { %1120 = vst [vmem:[%s1910_s27 + $0x160] sm:$0xff] %v1028_v40  ;;  %v1032_v45 = vadd.f32 %v1031_v14, %v1903_v28  ;;  %v1033_v51 = vpop.f32.mrb[15].mxu1 }
 0x243   : > { %1121 = vst.msk [vmem:[%s1910_s27 + $0x168] sm:$0xff] %vm263_vm0, %v1030_v58  ;;  %v1034_v7 = vadd.f32 %v1033_v51, %v1905_v31  ;;  %v957_v22 = vpop.f32.mrb[16].mxu0 }
 0x244   : > { %1122 = vst [vmem:[%s1910_s27 + $0x170] sm:$0xff] %v1032_v45  ;;  %v958_v59 = vadd.f32 %v957_v22, %v1903_v28  ;;  %v959_v23 = vpop.f32.mrb[17].mxu0 }
 0x245   : > { %1123 = vst.msk [vmem:[%s1910_s27 + $0x178] sm:$0xff] %vm263_vm0, %v1034_v7  ;;  %v960_v24 = vadd.f32 %v959_v23, %v1905_v31  ;;  %v961_v27 = vpop.f32.mrb[18].mxu0 }
 0x246   : > { %1092 = vst [vmem:[%s1910_s27 + $0x80] sm:$0xff] %v958_v59  ;;  %v962_v56 = vadd.f32 %v961_v27, %v1903_v28  ;;  %v963_v16 = vpop.f32.mrb[19].mxu0 }
 0x247   : > { %1093 = vst.msk [vmem:[%s1910_s27 + $0x88] sm:$0xff] %vm263_vm0, %v960_v24  ;;  %v964_v30 = vadd.f32 %v963_v16, %v1905_v31  ;;  %v1037_v13 = vpop.f32.mrb[16].mxu1 }
 0x248   : > { %1094 = vst [vmem:[%s1910_s27 + $0x90] sm:$0xff] %v962_v56  ;;  %v1038_v25 = vadd.f32 %v1037_v13, %v1903_v28  ;;  %v1039_v29 = vpop.f32.mrb[17].mxu1 }
 0x249   : > { %1095 = vst.msk [vmem:[%s1910_s27 + $0x98] sm:$0xff] %vm263_vm0, %v964_v30  ;;  %v1040_v32 = vadd.f32 %v1039_v29, %v1905_v31  ;;  %v1041_v44 = vpop.f32.mrb[18].mxu1 }
 0x24a   : > { %1124 = vst [vmem:[%s1910_s27 + $0x180] sm:$0xff] %v1038_v25  ;;  %v1042_v2 = vadd.f32 %v1041_v44, %v1903_v28  ;;  %v1043_v60 = vpop.f32.mrb[19].mxu1 }
 0x24b   : > { %1125 = vst.msk [vmem:[%s1910_s27 + $0x188] sm:$0xff] %vm263_vm0, %v1040_v32  ;;  %v1044_v61 = vadd.f32 %v1043_v60, %v1905_v31  ;;  %v967_v35 = vpop.f32.mrb[20].mxu0 }
 0x24c   : > { %1126 = vst [vmem:[%s1910_s27 + $0x190] sm:$0xff] %v1042_v2  ;;  %v968_v15 = vadd.f32 %v967_v35, %v1903_v28  ;;  %v969_v42 = vpop.f32.mrb[21].mxu0 }
 0x24d   : > { %1127 = vst.msk [vmem:[%s1910_s27 + $0x198] sm:$0xff] %vm263_vm0, %v1044_v61  ;;  %v970_v18 = vadd.f32 %v969_v42, %v1905_v31  ;;  %v971_v1 = vpop.f32.mrb[22].mxu0 }
 0x24e   : > { %1096 = vst [vmem:[%s1910_s27 + $0xa0] sm:$0xff] %v968_v15  ;;  %v972_v20 = vadd.f32 %v971_v1, %v1903_v28  ;;  %v973_v5 = vpop.f32.mrb[23].mxu0 }
 0x24f   : > { %1097 = vst.msk [vmem:[%s1910_s27 + $0xa8] sm:$0xff] %vm263_vm0, %v970_v18  ;;  %v974_v33 = vadd.f32 %v973_v5, %v1905_v31  ;;  %v1047_v10 = vpop.f32.mrb[20].mxu1 }
 0x250   : > { %1098 = vst [vmem:[%s1910_s27 + $0xb0] sm:$0xff] %v972_v20  ;;  %v1048_v46 = vadd.f32 %v1047_v10, %v1903_v28  ;;  %v1049_v47 = vpop.f32.mrb[21].mxu1 }
 0x251   : > { %1099 = vst.msk [vmem:[%s1910_s27 + $0xb8] sm:$0xff] %vm263_vm0, %v974_v33  ;;  %v1050_v19 = vadd.f32 %v1049_v47, %v1905_v31  ;;  %v1051_v50 = vpop.f32.mrb[22].mxu1 }
 0x252   : > { %1128 = vst [vmem:[%s1910_s27 + $0x1a0] sm:$0xff] %v1048_v46  ;;  %v1052_v34 = vadd.f32 %v1051_v50, %v1903_v28  ;;  %v1053_v17 = vpop.f32.mrb[23].mxu1 }
 0x253   : > { %1129 = vst.msk [vmem:[%s1910_s27 + $0x1a8] sm:$0xff] %vm263_vm0, %v1050_v19  ;;  %v1054_v48 = vadd.f32 %v1053_v17, %v1905_v31  ;;  %v977_v37 = vpop.f32.mrb[24].mxu0 }
 0x254   : > { %1130 = vst [vmem:[%s1910_s27 + $0x1b0] sm:$0xff] %v1052_v34  ;;  %v978_v36 = vadd.f32 %v977_v37, %v1903_v28  ;;  %v979_v54 = vpop.f32.mrb[25].mxu0 }
 0x255   : > { %1131 = vst.msk [vmem:[%s1910_s27 + $0x1b8] sm:$0xff] %vm263_vm0, %v1054_v48  ;;  %v980_v55 = vadd.f32 %v979_v54, %v1905_v31  ;;  %v981_v26 = vpop.f32.mrb[26].mxu0 }
 0x256   : > { %1100 = vst [vmem:[%s1910_s27 + $0xc0] sm:$0xff] %v978_v36  ;;  %v982_v38 = vadd.f32 %v981_v26, %v1903_v28  ;;  %v983_v8 = vpop.f32.mrb[27].mxu0 }
 0x257   : > { %1101 = vst.msk [vmem:[%s1910_s27 + $0xc8] sm:$0xff] %vm263_vm0, %v980_v55  ;;  %v984_v49 = vadd.f32 %v983_v8, %v1905_v31  ;;  %v1057_v62 = vpop.f32.mrb[24].mxu1 }
 0x258   : > { %1102 = vst [vmem:[%s1910_s27 + $0xd0] sm:$0xff] %v982_v38  ;;  %v1058_v43 = vadd.f32 %v1057_v62, %v1903_v28  ;;  %v1059_v63 = vpop.f32.mrb[25].mxu1 }
 0x259   : > { %1103 = vst.msk [vmem:[%s1910_s27 + $0xd8] sm:$0xff] %vm263_vm0, %v984_v49  ;;  %v1060_v6 = vadd.f32 %v1059_v63, %v1905_v31  ;;  %v1061_v3 = vpop.f32.mrb[26].mxu1 }
 0x25a   : > { %1132 = vst [vmem:[%s1910_s27 + $0x1c0] sm:$0xff] %v1058_v43  ;;  %v1062_v11 = vadd.f32 %v1061_v3, %v1903_v28  ;;  %v1063_v39 = vpop.f32.mrb[27].mxu1 }
 0x25b   : > { %1133 = vst.msk [vmem:[%s1910_s27 + $0x1c8] sm:$0xff] %vm263_vm0, %v1060_v6  ;;  %v1064_v53 = vadd.f32 %v1063_v39, %v1905_v31  ;;  %v987_v9 = vpop.f32.mrb[28].mxu0 }
 0x25c   : > { %1134 = vst [vmem:[%s1910_s27 + $0x1d0] sm:$0xff] %v1062_v11  ;;  %v988_v4 = vadd.f32 %v987_v9, %v1903_v28  ;;  %v989_v0 = vpop.f32.mrb[29].mxu0 }
 0x25d   : > { %1135 = vst.msk [vmem:[%s1910_s27 + $0x1d8] sm:$0xff] %vm263_vm0, %v1064_v53  ;;  %v990_v52 = vadd.f32 %v989_v0, %v1905_v31  ;;  %v991_v21 = vpop.f32.mrb[30].mxu0 }
 0x25e   : > { %1104 = vst [vmem:[%s1910_s27 + $0xe0] sm:$0xff] %v988_v4  ;;  %v992_v57 = vadd.f32 %v991_v21, %v1903_v28  ;;  %v993_v12 = vpop.f32.mrb[31].mxu0 }
 0x25f   : > { %1105 = vst.msk [vmem:[%s1910_s27 + $0xe8] sm:$0xff] %vm263_vm0, %v990_v52  ;;  %v994_v40 = vadd.f32 %v993_v12, %v1905_v31  ;;  %v1067_v41 = vpop.f32.mrb[28].mxu1 }
 0x260   : > { %1106 = vst [vmem:[%s1910_s27 + $0xf0] sm:$0xff] %v992_v57  ;;  %v1068_v58 = vadd.f32 %v1067_v41, %v1903_v28  ;;  %v1069_v14 = vpop.f32.mrb[29].mxu1 }
 0x261   : > { %1107 = vst.msk [vmem:[%s1910_s27 + $0xf8] sm:$0xff] %vm263_vm0, %v994_v40  ;;  %v1070_v45 = vadd.f32 %v1069_v14, %v1905_v31  ;;  %v1071_v51 = vpop.f32.mrb[30].mxu1 }
 0x262   : > { %1136 = vst [vmem:[%s1910_s27 + $0x1e0] sm:$0xff] %v1068_v58  ;;  %v1072_v7 = vadd.f32 %v1071_v51, %v1903_v28  ;;  %v1073_v22 = vpop.f32.mrb[31].mxu1 }
 0x263   : > { %1137 = vst.msk [vmem:[%s1910_s27 + $0x1e8] sm:$0xff] %vm263_vm0, %v1070_v45  ;;  %v1074_v59 = vadd.f32 %v1073_v22, %v1905_v31 }
 0x264   : > { %1138 = vst [vmem:[%s1910_s27 + $0x1f0] sm:$0xff] %v1072_v7 }
 0x265   : > { %1139 = vst.msk [vmem:[%s1910_s27 + $0x1f8] sm:$0xff] %vm263_vm0, %v1074_v59 }
 0x266 PF: > { %s15_s18 = sadd.s32 1, %s1336_s18  }
 0x267   : > { %p12_p4 = scmp.ge.s32.totalorder %s15_s18, 4  }
 0x269   :  { %14 = sbr.rel (!%p12_p4) target bundleno = 1 (0x1), region = 70 }

// kernel: forward.20
= control target key start
LH: loop header
LB: loop body
LE: loop exit
PB: predicated region body
PF: predicated region fallthrough
CT: control target
= control target key end

     0   :  { %s832_s15 = smov 0   ;;  %s1128_s0 = inlined_call_operand.vmem [shape: f32[512,64], index: 0, kind: input, shape index: {}]   ;;  %s1129_s1 = inlined_call_operand.vmem [shape: bf16[64,64], index: 1, kind: input, shape index: {}]   ;;  %s1130_s2 = inlined_call_operand.vmem [shape: f32[1,64], index: 2, kind: input, shape index: {}]   ;;  %s1131_s3 = inlined_call_operand.vmem [shape: f32[512,64], index: 3, kind: input, shape index: {}, may-alias: {3,4}]   ;;  %s1132_s4 = inlined_call_operand.vmem [shape: f32[512,64], index: 4, kind: output, shape index: {}, may-alias: {3,4}]  }
   0x1 LB: > { %s685_s16 = sadd.s32 4294967295, %s805_s15   ;;  %p689_p0 = scmp.ge.s32.totalorder %s805_s15, 1  ;;  %s805_s15 = sphi %s832_s15, %s14_s15  }
   0x2   : > { %p174_p1 = scmp.lt.s32.totalorder %s805_s15, 3 }
   0x4   : > { %p175_p2 = pnand %p689_p0, %p174_p1 }
   0x5   : > { %v795_v0 = vld [vmem:[%s1129_s1] sm:$0xff] (!%p175_p2)   ;;  %s690_s19 = sshll.u32 (!%p175_p2), %s685_s16, 5  ;;  %v796_v1 = vld [vmem:[%s1129_s1 + $0x8] sm:$0xff] (!%p175_p2)   ;;  %v797_v2 = vld [vmem:[%s1129_s1 + $0x10] sm:$0xff] (!%p175_p2)   ;;  %vm311_vm0 = vcmask (!%p175_p2), 523264  }
   0x6   : > { %178 = sbr.rel (%p175_p2) target bundleno = 267 (0x10b), region = 36  ;;  %p206_p3 = scmp.lt.s32.totalorder (!%p175_p2), %s690_s19, 63  ;;  %739 = vmatprep.subr.bf16.mxu0 (!%p175_p2), %v795_v0  ;;  %779 = vmatprep.subr.bf16.mxu1 (!%p175_p2), %v795_v0  ;;  %v798_v6 = vld [vmem:[%s1129_s1 + $0x18] sm:$0xff] (!%p175_p2)   ;;  %v917_v52 = vld [vmem:[%s1130_s2] ss:$0 sm:$0xff] (!%p175_p2) }
   0x7   : > { %740 = vmatpush3.bf16.msra.mxu0 (!%p175_p2), %v795_v0  ;;  %783 = vmatpush3.bf16.msra.mxu1 (!%p175_p2), %v795_v0 }
   0x8   : > { %741 = vmatprep.subr.bf16.mxu0 (!%p175_p2), %v796_v1  ;;  %780 = vmatprep.subr.bf16.mxu1 (!%p175_p2), %v796_v1 }
   0xb   : > { %742 = vmatpush3.bf16.msra.mxu0 (!%p175_p2), %v796_v1  ;;  %784 = vmatpush3.bf16.msra.mxu1 (!%p175_p2), %v796_v1 }
   0xc   : > { %743 = vmatprep.subr.bf16.mxu0 (!%p175_p2), %v797_v2  ;;  %781 = vmatprep.subr.bf16.mxu1 (!%p175_p2), %v797_v2 }
   0xd   : > { %s1134_s19 = smov (!%p206_p3, %s690_s19), 63 }
   0xe   : > { %s849_s24 = sshll.u32 %s1134_s19, 3 }
   0xf   : > { %s855_s27 = scalar_lea.vmem %s1128_s0, %s849_s24  ;;  %744 = vmatpush3.bf16.msra.mxu0 %v797_v2  ;;  %785 = vmatpush3.bf16.msra.mxu1 %v797_v2  ;;  %s912_s6 = scalar_lea.vmem %s1131_s3, %s849_s24 }
  0x10   : > { %v224_v3 = vld [vmem:[%s855_s27] sm:$0xff]  ;;  %v225_v4 = vld [vmem:[%s855_s27 + $0x8] sm:$0xff]  ;;  %v226_v10 = vld [vmem:[%s855_s27 + $0x10] sm:$0xff]  ;;  %745 = vmatprep.subr.bf16.mxu0 %v798_v6  ;;  %782 = vmatprep.subr.bf16.mxu1 %v798_v6  ;;  %s996_s11 = scalar_lea.vmem %s1132_s4, %s849_s24 }
  0x11   : > { %v240_v5 = vld [vmem:[%s855_s27 + $0x80] sm:$0xff]  ;;  %v256_v7 = vpack.c.bf16 %v225_v4, %v224_v3  ;;  %v241_v8 = vld [vmem:[%s855_s27 + $0x88] sm:$0xff]  ;;  %v227_v11 = vld [vmem:[%s855_s27 + $0x18] sm:$0xff] }
  0x12   : > { %v264_v9 = vpack.c.bf16 %v241_v8, %v240_v5  ;;  %v242_v12 = vld [vmem:[%s855_s27 + $0x90] sm:$0xff]  ;;  %v243_v13 = vld [vmem:[%s855_s27 + $0x98] sm:$0xff]  ;;  %v228_v14 = vld [vmem:[%s855_s27 + $0x20] sm:$0xff]  ;;  %v257_v18 = vpack.c.bf16 %v227_v11, %v226_v10 }
  0x13   : > { %747 = vmatprep.mubr.msk.bf16.mxu0 %vm311_vm0, %v256_v7  ;;  %v229_v15 = vld [vmem:[%s855_s27 + $0x28] sm:$0xff]  ;;  %v244_v16 = vld [vmem:[%s855_s27 + $0xa0] sm:$0xff]  ;;  %v265_v19 = vpack.c.bf16 %v243_v13, %v242_v12  ;;  %746 = vmatpush3.bf16.msra.mxu0 %v798_v6  ;;  %v230_v22 = vld [vmem:[%s855_s27 + $0x30] sm:$0xff] }
  0x14   : > { %v245_v17 = vld [vmem:[%s855_s27 + $0xa8] sm:$0xff]  ;;  %763 = vmatprep.mubr.msk.bf16.mxu1 %vm311_vm0, %v264_v9  ;;  %786 = vmatpush3.bf16.msra.mxu1 %v798_v6  ;;  %v258_v20 = vpack.c.bf16 %v229_v15, %v228_v14  ;;  %v231_v23 = vld [vmem:[%s855_s27 + $0x38] sm:$0xff]  ;;  %v246_v24 = vld [vmem:[%s855_s27 + $0xb0] sm:$0xff] }
  0x15   : > { %v266_v21 = vpack.c.bf16 %v245_v17, %v244_v16  ;;  %v247_v25 = vld [vmem:[%s855_s27 + $0xb8] sm:$0xff]  ;;  %v232_v26 = vld [vmem:[%s855_s27 + $0x40] sm:$0xff]  ;;  %v233_v27 = vld [vmem:[%s855_s27 + $0x48] sm:$0xff]  ;;  %v259_v30 = vpack.c.bf16 %v231_v23, %v230_v22 }
  0x16   : > { %748 = vmatmul.mubr.msk.bf16.vlgmr.msra.gmra.mrb[0].mxu0 %vm311_vm0, %v257_v18  ;;  %v248_v28 = vld [vmem:[%s855_s27 + $0xc0] sm:$0xff]  ;;  %v249_v29 = vld [vmem:[%s855_s27 + $0xc8] sm:$0xff]  ;;  %v267_v31 = vpack.c.bf16 %v247_v25, %v246_v24  ;;  %v260_v32 = vpack.c.bf16 %v233_v27, %v232_v26  ;;  %v234_v34 = vld [vmem:[%s855_s27 + $0x50] sm:$0xff] }
  0x17   : > { %764 = vmatmul.mubr.msk.bf16.vlgmr.msra.gmra.mrb[0].mxu1 %vm311_vm0, %v265_v19  ;;  %751 = vmatprep.mubr.msk.bf16.mxu0 %vm311_vm0, %v258_v20  ;;  %v268_v33 = vpack.c.bf16 %v249_v29, %v248_v28  ;;  %v235_v35 = vld [vmem:[%s855_s27 + $0x58] sm:$0xff]  ;;  %v250_v36 = vld [vmem:[%s855_s27 + $0xd0] sm:$0xff]  ;;  %v236_v38 = vld [vmem:[%s855_s27 + $0x60] sm:$0xff] }
  0x18   : > { %767 = vmatprep.mubr.msk.bf16.mxu1 %vm311_vm0, %v266_v21  ;;  %v251_v37 = vld [vmem:[%s855_s27 + $0xd8] sm:$0xff]  ;;  %v237_v39 = vld [vmem:[%s855_s27 + $0x68] sm:$0xff]  ;;  %v252_v40 = vld [vmem:[%s855_s27 + $0xe0] sm:$0xff]  ;;  %v261_v42 = vpack.c.bf16 %v235_v35, %v234_v34 }
  0x19   : > { %v253_v41 = vld [vmem:[%s855_s27 + $0xe8] sm:$0xff]  ;;  %v269_v43 = vpack.c.bf16 %v251_v37, %v250_v36  ;;  %v262_v44 = vpack.c.bf16 %v237_v39, %v236_v38  ;;  %v238_v46 = vld [vmem:[%s855_s27 + $0x70] sm:$0xff]  ;;  %v239_v47 = vld [vmem:[%s855_s27 + $0x78] sm:$0xff] }
  0x1a   : > { %v270_v45 = vpack.c.bf16 %v253_v41, %v252_v40  ;;  %v254_v48 = vld [vmem:[%s855_s27 + $0xf0] sm:$0xff]  ;;  %v255_v49 = vld [vmem:[%s855_s27 + $0xf8] sm:$0xff]  ;;  %v263_v50 = vpack.c.bf16 %v239_v47, %v238_v46  ;;  %v521_v55 = vld [vmem:[%s912_s6] sm:$0xff] }
  0x1b   : > { %v271_v51 = vpack.c.bf16 %v255_v49, %v254_v48  ;;  %v523_v53 = vld [vmem:[%s912_s6 + $0x10] sm:$0xff]  ;;  %v537_v56 = vld [vmem:[%s912_s6 + $0x80] sm:$0xff]  ;;  %v524_v59 = vld [vmem:[%s912_s6 + $0x18] sm:$0xff] }
  0x1c   : > { %v539_v54 = vld [vmem:[%s912_s6 + $0x90] sm:$0xff]  ;;  %v540_v60 = vld [vmem:[%s912_s6 + $0x98] sm:$0xff]  ;;  %v522_v61 = vld [vmem:[%s912_s6 + $0x8] sm:$0xff] }
  0x1d   : > { %v538_v62 = vld [vmem:[%s912_s6 + $0x88] sm:$0xff]  ;;  %v928_v63 = vld [vmem:[%s912_s6 + $0x30] sm:$0xff]  ;;  %v934_v1 = vld [vmem:[%s912_s6 + $0x20] sm:$0xff] }
  0x1e   : > { %752 = vmatmul.mubr.msk.bf16.gmra.mrb[4].mxu0 %vm311_vm0, %v259_v30  ;;  %v931_v0 = vld [vmem:[%s912_s6 + $0xb0] sm:$0xff]  ;;  %v937_v2 = vld [vmem:[%s912_s6 + $0xa0] sm:$0xff]  ;;  %v940_v3 = vld [vmem:[%s912_s6 + $0x38] sm:$0xff] }
  0x1f   : > { %768 = vmatmul.mubr.msk.bf16.gmra.mrb[4].mxu1 %vm311_vm0, %v267_v31  ;;  %755 = vmatprep.mubr.msk.bf16.mxu0 %vm311_vm0, %v260_v32  ;;  %v943_v4 = vld [vmem:[%s912_s6 + $0xb8] sm:$0xff]  ;;  %v946_v5 = vld [vmem:[%s912_s6 + $0x28] sm:$0xff]  ;;  %v952_v7 = vld [vmem:[%s912_s6 + $0x50] sm:$0xff] }
  0x20   : > { %771 = vmatprep.mubr.msk.bf16.mxu1 %vm311_vm0, %v268_v33  ;;  %v949_v6 = vld [vmem:[%s912_s6 + $0xa8] sm:$0xff]  ;;  %v955_v8 = vld [vmem:[%s912_s6 + $0xd0] sm:$0xff]  ;;  %v958_v9 = vld [vmem:[%s912_s6 + $0x40] sm:$0xff] }
  0x21   : > { %v961_v10 = vld [vmem:[%s912_s6 + $0xc0] sm:$0xff]  ;;  %v964_v11 = vld [vmem:[%s912_s6 + $0x58] sm:$0xff]  ;;  %v970_v13 = vld [vmem:[%s912_s6 + $0x48] sm:$0xff] }
  0x22   : > { %v967_v12 = vld [vmem:[%s912_s6 + $0xd8] sm:$0xff]  ;;  %v973_v14 = vld [vmem:[%s912_s6 + $0xc8] sm:$0xff]  ;;  %v976_v15 = vld [vmem:[%s912_s6 + $0x70] sm:$0xff] }
  0x23   : > { %v979_v16 = vld [vmem:[%s912_s6 + $0xf0] sm:$0xff]  ;;  %v984_v21 = vld [vmem:[%s912_s6 + $0x60] sm:$0xff]  ;;  %v990_v23 = vld [vmem:[%s912_s6 + $0x78] sm:$0xff] }
  0x24   : > { %v987_v22 = vld [vmem:[%s912_s6 + $0xe0] sm:$0xff]  ;;  %v1001_v28 = vld [vmem:[%s912_s6 + $0xf8] sm:$0xff]  ;;  %v1004_v29 = vld [vmem:[%s912_s6 + $0x68] sm:$0xff] }
  0x25   : > { %v1007_v30 = vld [vmem:[%s912_s6 + $0xe8] sm:$0xff] }
  0x26   : > { %756 = vmatmul.mubr.msk.bf16.gmra.mrb[8].mxu0 %vm311_vm0, %v261_v42 }
  0x27   : > { %772 = vmatmul.mubr.msk.bf16.gmra.mrb[8].mxu1 %vm311_vm0, %v269_v43  ;;  %759 = vmatprep.mubr.msk.bf16.mxu0 %vm311_vm0, %v262_v44 }
  0x28   : > { %775 = vmatprep.mubr.msk.bf16.mxu1 %vm311_vm0, %v270_v45 }
  0x2e   : > { %760 = vmatmul.mubr.msk.bf16.gmra.mrb[12].mxu0 %vm311_vm0, %v263_v50 }
  0x2f   : > { %776 = vmatmul.mubr.msk.bf16.gmra.mrb[12].mxu1 %vm311_vm0, %v271_v51 }
  0xe9   : > { %v749_v57 = vpop.f32.mrb[0].mxu0 }
  0xea   : > { %v765_v58 = vpop.f32.mrb[0].mxu1  ;;  %v403_v17 = vadd.f32 %v749_v57, %v917_v52  ;;  %v394_v19 = vpop.f32.mrb[1].mxu0 }
  0xeb   : > { %v467_v18 = vadd.f32 %v765_v58, %v917_v52  ;;  %v458_v20 = vpop.f32.mrb[1].mxu1  ;;  %v395_v24 = vadd.f32 %v917_v52, %v394_v19  ;;  %v750_v26 = vpop.f32.mrb[2].mxu0 }
  0xec   : > { %v459_v25 = vadd.f32 %v917_v52, %v458_v20  ;;  %v766_v27 = vpop.f32.mrb[2].mxu1  ;;  %v555_v31 = vadd.f32 %v523_v53, %v403_v17  ;;  %v406_v33 = vadd.f32 %v750_v26, %v917_v52  ;;  %v397_v35 = vpop.f32.mrb[3].mxu0 }
  0xed   : > { %v571_v32 = vadd.f32 %v539_v54, %v467_v18  ;;  %v470_v34 = vadd.f32 %v766_v27, %v917_v52  ;;  %v461_v36 = vpop.f32.mrb[3].mxu1  ;;  %v553_v37 = vadd.f32 %v521_v55, %v395_v24  ;;  %v398_v39 = vadd.f32 %v917_v52, %v397_v35 }
  0xee   : > { %v569_v38 = vadd.f32 %v537_v56, %v459_v25  ;;  %v462_v40 = vadd.f32 %v917_v52, %v461_v36  ;;  %v556_v41 = vadd.f32 %v524_v59, %v406_v33  ;;  %587 = vst.msk [vmem:[%s996_s11 + $0x10] sm:$0xff] %vm311_vm0, %v555_v31 }
  0xef   : > { %v572_v42 = vadd.f32 %v540_v60, %v470_v34  ;;  %603 = vst.msk [vmem:[%s996_s11 + $0x90] sm:$0xff] %vm311_vm0, %v571_v32  ;;  %v554_v43 = vadd.f32 %v522_v61, %v398_v39  ;;  %585 = vst.msk [vmem:[%s996_s11] sm:$0xff] %vm311_vm0, %v553_v37 }
  0xf0   : > { %v570_v44 = vadd.f32 %v538_v62, %v462_v40  ;;  %601 = vst.msk [vmem:[%s996_s11 + $0x80] sm:$0xff] %vm311_vm0, %v569_v38  ;;  %588 = vst.msk [vmem:[%s996_s11 + $0x18] sm:$0xff] %vm311_vm0, %v556_v41 }
  0xf1   : > { %604 = vst.msk [vmem:[%s996_s11 + $0x98] sm:$0xff] %vm311_vm0, %v572_v42  ;;  %v753_v45 = vpop.f32.mrb[4].mxu0  ;;  %586 = vst.msk [vmem:[%s996_s11 + $0x8] sm:$0xff] %vm311_vm0, %v554_v43 }
  0xf2   : > { %v769_v46 = vpop.f32.mrb[4].mxu1  ;;  %602 = vst.msk [vmem:[%s996_s11 + $0x88] sm:$0xff] %vm311_vm0, %v570_v44  ;;  %v419_v47 = vadd.f32 %v753_v45, %v917_v52  ;;  %v410_v49 = vpop.f32.mrb[5].mxu0 }
  0xf3   : > { %v483_v48 = vadd.f32 %v769_v46, %v917_v52  ;;  %v474_v50 = vpop.f32.mrb[5].mxu1  ;;  %v411_v51 = vadd.f32 %v917_v52, %v410_v49  ;;  %v754_v54 = vpop.f32.mrb[6].mxu0 }
  0xf4   : > { %v475_v53 = vadd.f32 %v917_v52, %v474_v50  ;;  %v770_v55 = vpop.f32.mrb[6].mxu1  ;;  %v559_v56 = vadd.f32 %v928_v63, %v419_v47  ;;  %v422_v58 = vadd.f32 %v754_v54, %v917_v52  ;;  %v413_v60 = vpop.f32.mrb[7].mxu0 }
  0xf5   : > { %v575_v57 = vadd.f32 %v931_v0, %v483_v48  ;;  %v486_v59 = vadd.f32 %v770_v55, %v917_v52  ;;  %v477_v61 = vpop.f32.mrb[7].mxu1  ;;  %v557_v62 = vadd.f32 %v934_v1, %v411_v51  ;;  %v414_v63 = vadd.f32 %v917_v52, %v413_v60 }
  0xf6   : > { %v573_v17 = vadd.f32 %v937_v2, %v475_v53  ;;  %v478_v18 = vadd.f32 %v917_v52, %v477_v61  ;;  %v560_v0 = vadd.f32 %v940_v3, %v422_v58  ;;  %591 = vst.msk [vmem:[%s996_s11 + $0x30] sm:$0xff] %vm311_vm0, %v559_v56 }
  0xf7   : > { %v576_v19 = vadd.f32 %v943_v4, %v486_v59  ;;  %607 = vst.msk [vmem:[%s996_s11 + $0xb0] sm:$0xff] %vm311_vm0, %v575_v57  ;;  %v558_v20 = vadd.f32 %v946_v5, %v414_v63  ;;  %589 = vst.msk [vmem:[%s996_s11 + $0x20] sm:$0xff] %vm311_vm0, %v557_v62 }
  0xf8   : > { %v574_v1 = vadd.f32 %v949_v6, %v478_v18  ;;  %605 = vst.msk [vmem:[%s996_s11 + $0xa0] sm:$0xff] %vm311_vm0, %v573_v17  ;;  %592 = vst.msk [vmem:[%s996_s11 + $0x38] sm:$0xff] %vm311_vm0, %v560_v0 }
  0xf9   : > { %608 = vst.msk [vmem:[%s996_s11 + $0xb8] sm:$0xff] %vm311_vm0, %v576_v19  ;;  %v757_v2 = vpop.f32.mrb[8].mxu0  ;;  %590 = vst.msk [vmem:[%s996_s11 + $0x28] sm:$0xff] %vm311_vm0, %v558_v20 }
  0xfa   : > { %v773_v3 = vpop.f32.mrb[8].mxu1  ;;  %606 = vst.msk [vmem:[%s996_s11 + $0xa8] sm:$0xff] %vm311_vm0, %v574_v1  ;;  %v435_v4 = vadd.f32 %v757_v2, %v917_v52  ;;  %v426_v24 = vpop.f32.mrb[9].mxu0 }
  0xfb   : > { %v499_v5 = vadd.f32 %v773_v3, %v917_v52  ;;  %v490_v6 = vpop.f32.mrb[9].mxu1  ;;  %v427_v25 = vadd.f32 %v917_v52, %v426_v24  ;;  %v758_v27 = vpop.f32.mrb[10].mxu0 }
  0xfc   : > { %v491_v26 = vadd.f32 %v917_v52, %v490_v6  ;;  %v774_v31 = vpop.f32.mrb[10].mxu1  ;;  %v563_v32 = vadd.f32 %v952_v7, %v435_v4  ;;  %v438_v34 = vadd.f32 %v758_v27, %v917_v52  ;;  %v429_v36 = vpop.f32.mrb[11].mxu0 }
  0xfd   : > { %v579_v33 = vadd.f32 %v955_v8, %v499_v5  ;;  %v502_v35 = vadd.f32 %v774_v31, %v917_v52  ;;  %v493_v37 = vpop.f32.mrb[11].mxu1  ;;  %v561_v38 = vadd.f32 %v958_v9, %v427_v25  ;;  %v430_v7 = vadd.f32 %v917_v52, %v429_v36 }
  0xfe   : > { %v577_v39 = vadd.f32 %v961_v10, %v491_v26  ;;  %v494_v40 = vadd.f32 %v917_v52, %v493_v37  ;;  %v564_v8 = vadd.f32 %v964_v11, %v438_v34  ;;  %595 = vst.msk [vmem:[%s996_s11 + $0x50] sm:$0xff] %vm311_vm0, %v563_v32 }
  0xff   : > { %v580_v41 = vadd.f32 %v967_v12, %v502_v35  ;;  %611 = vst.msk [vmem:[%s996_s11 + $0xd0] sm:$0xff] %vm311_vm0, %v579_v33  ;;  %v562_v42 = vadd.f32 %v970_v13, %v430_v7  ;;  %593 = vst.msk [vmem:[%s996_s11 + $0x40] sm:$0xff] %vm311_vm0, %v561_v38 }
 0x100   : > { %v578_v9 = vadd.f32 %v973_v14, %v494_v40  ;;  %609 = vst.msk [vmem:[%s996_s11 + $0xc0] sm:$0xff] %vm311_vm0, %v577_v39  ;;  %596 = vst.msk [vmem:[%s996_s11 + $0x58] sm:$0xff] %vm311_vm0, %v564_v8 }
 0x101   : > { %612 = vst.msk [vmem:[%s996_s11 + $0xd8] sm:$0xff] %vm311_vm0, %v580_v41  ;;  %v761_v10 = vpop.f32.mrb[12].mxu0  ;;  %594 = vst.msk [vmem:[%s996_s11 + $0x48] sm:$0xff] %vm311_vm0, %v562_v42 }
 0x102   : > { %v777_v11 = vpop.f32.mrb[12].mxu1  ;;  %610 = vst.msk [vmem:[%s996_s11 + $0xc8] sm:$0xff] %vm311_vm0, %v578_v9  ;;  %v451_v12 = vadd.f32 %v761_v10, %v917_v52  ;;  %v442_v43 = vpop.f32.mrb[13].mxu0 }
 0x103   : > { %v515_v13 = vadd.f32 %v777_v11, %v917_v52  ;;  %v506_v14 = vpop.f32.mrb[13].mxu1  ;;  %v443_v44 = vadd.f32 %v917_v52, %v442_v43  ;;  %v762_v46 = vpop.f32.mrb[14].mxu0 }
 0x104   : > { %v507_v45 = vadd.f32 %v917_v52, %v506_v14  ;;  %v778_v47 = vpop.f32.mrb[14].mxu1  ;;  %v567_v48 = vadd.f32 %v976_v15, %v451_v12  ;;  %v454_v50 = vadd.f32 %v762_v46, %v917_v52  ;;  %v445_v53 = vpop.f32.mrb[15].mxu0 }
 0x105   : > { %v583_v49 = vadd.f32 %v979_v16, %v515_v13  ;;  %v518_v51 = vadd.f32 %v778_v47, %v917_v52  ;;  %v509_v54 = vpop.f32.mrb[15].mxu1  ;;  %v565_v55 = vadd.f32 %v984_v21, %v443_v44  ;;  %v446_v15 = vadd.f32 %v917_v52, %v445_v53 }
 0x106   : > { %v581_v56 = vadd.f32 %v987_v22, %v507_v45  ;;  %v510_v57 = vadd.f32 %v917_v52, %v509_v54  ;;  %v568_v16 = vadd.f32 %v990_v23, %v454_v50  ;;  %599 = vst.msk [vmem:[%s996_s11 + $0x70] sm:$0xff] %vm311_vm0, %v567_v48 }
 0x107   : > { %v584_v58 = vadd.f32 %v1001_v28, %v518_v51  ;;  %615 = vst.msk [vmem:[%s996_s11 + $0xf0] sm:$0xff] %vm311_vm0, %v583_v49  ;;  %v566_v59 = vadd.f32 %v1004_v29, %v446_v15  ;;  %597 = vst.msk [vmem:[%s996_s11 + $0x60] sm:$0xff] %vm311_vm0, %v565_v55 }
 0x108   : > { %v582_v60 = vadd.f32 %v1007_v30, %v510_v57  ;;  %613 = vst.msk [vmem:[%s996_s11 + $0xe0] sm:$0xff] %vm311_vm0, %v581_v56  ;;  %600 = vst.msk [vmem:[%s996_s11 + $0x78] sm:$0xff] %vm311_vm0, %v568_v16 }
 0x109   : > { %616 = vst.msk [vmem:[%s996_s11 + $0xf8] sm:$0xff] %vm311_vm0, %v584_v58  ;;  %598 = vst.msk [vmem:[%s996_s11 + $0x68] sm:$0xff] %vm311_vm0, %v566_v59 }
 0x10a   : > { %614 = vst.msk [vmem:[%s996_s11 + $0xe8] sm:$0xff] %vm311_vm0, %v582_v60 }
 0x10b PF: > { %s14_s15 = sadd.s32 1, %s805_s15  }
 0x10c   : > { %p11_p4 = scmp.ge.s32.totalorder %s14_s15, 4  }
 0x10e   :  { %13 = sbr.rel (!%p11_p4) target bundleno = 1 (0x1), region = 69 }

// kernel: forward.19
= control target key start
LH: loop header
LB: loop body
LE: loop exit
PB: predicated region body
PF: predicated region fallthrough
CT: control target
= control target key end

     0   :  { %s3786_s6 = smov 0   ;;  %s6010_s0 = inlined_call_operand.vmem [shape: f32[2,130,192], index: 0, kind: input, shape index: {}]   ;;  %s6011_s1 = inlined_call_operand.vmem [shape: f32[2,130,64], index: 1, kind: output, shape index: {}]  }
   0x1 LB: > { %s3235_s7 = sadd.s32 4294967295, %s3766_s6   ;;  %p3239_p0 = scmp.ge.s32.totalorder %s3766_s6, 1  ;;  %s3766_s6 = sphi %s3786_s6, %s11_s6  }
   0x2   : > { %p87_p1 = scmp.lt.s32.totalorder %s3766_s6, 3 }
   0x4   : > { %p88_p2 = pnand %p3239_p0, %p87_p1 }
   0x6   : > { %91 = sbr.rel (%p88_p2) target bundleno = 2030 (0x7ee), region = 24 }
   0xd   : > { %p107_p3 = scmp.lt.s32.totalorder %s3235_s7, 1  ;;  %v6012_v0 = vmov 0   ;;  %s3769_s12 = smov 64   ;;  %vm214_vm0 = vcmask 130048   ;;  %vm390_vm1 = vcmask 15360   ;;  %vm455_vm2 = vcmask 1041408  }
   0xe   : > { %269 = vmatprep.subr.bf16.mxu0 %v6012_v0  ;;  %301 = vmatprep.mubr.bf16.mxu0 %v6012_v0  ;;  %s3770_s13 = smov 48   ;;  %vm457_vm3 = vcmask 9216   ;;  %vm738_vm4 = vcmask 1040384   ;;  %s3771_s14 = smov 112   ;;  %vm3125_vm5 = vcmask 261120   ;;  %vm3143_vm6 = vcmask 392192  }
   0xf   : > { %s6434_s7 = smov (!%p107_p3, %s3235_s7), 1  ;;  %742 = vmatprep.subr.bf16.mxu1 %v6012_v0  ;;  %s3772_s15 = smov 32   ;;  %vm3161_vm7 = vcmask 523264   ;;  %vm3178_vm8 = vcmask 517120  }
  0x10   : > { %s3334_s8 = smul.u32 272, %s6434_s7  ;;  %s3773_s16 = smov 16  }
  0x11   : > { %s3774_s17 = smov 96   ;;  %s3775_s18 = smov 80  }
  0x12   : > { %s3803_s11 = scalar_lea.vmem %s6010_s0, %s3334_s8  ;;  %s3335_s19 = smul.u32 136, %s6434_s7 }
  0x13   : > { %v118_v1 = vld [vmem:[%s3803_s11] sm:$0xff]  ;;  %v120_v2 = vld [vmem:[%s3803_s11 + $0x10] sm:$0xff] }
  0x14   : > { %v122_v3 = vld [vmem:[%s3803_s11 + $0x20] sm:$0xff]  ;;  %v3808_v4 = vpack.c.bf16 %v120_v2, %v118_v1  ;;  %v124_v5 = vld [vmem:[%s3803_s11 + $0x30] sm:$0xff]  ;;  %v152_v27 = vmul.f32 0.25, %v118_v1  ;;  %v153_v28 = vmul.f32 0.25, %v120_v2  ;;  %s5924_s22 = scalar_lea.vmem %s6011_s1, %s3335_s19 }
  0x15   : > { %v3812_v6 = vld [vmem:[%s3803_s11 + $0x40] sm:$0xff]  ;;  %v3815_v7 = vld [vmem:[%s3803_s11 + $0x50] sm:$0xff]  ;;  %v3828_v11 = vpack.c.bf16 %v124_v5, %v122_v3  ;;  %v154_v30 = vmul.f32 0.25, %v122_v3  ;;  %v155_v31 = vmul.f32 0.25, %v124_v5 }
  0x16   : > { %v3819_v8 = vpack.c.bf16 %v3815_v7, %v3812_v6  ;;  %v3822_v9 = vld [vmem:[%s3803_s11 + $0x60] sm:$0xff]  ;;  %v3825_v10 = vld [vmem:[%s3803_s11 + $0x70] sm:$0xff]  ;;  %196 = vrot.lane.b32.xlu0 %v3808_v4, %s3769_s12  ;;  %v3889_v29 = vpack.c.bf16 %v153_v28, %v152_v27  ;;  %v156_v51 = vmul.f32 0.25, %v3812_v6  ;;  %v157_v52 = vmul.f32 0.25, %v3815_v7 }
  0x17   : > { %v3833_v12 = vpack.c.bf16 %v3825_v10, %v3822_v9  ;;  %v3836_v13 = vld [vmem:[%s3803_s11 + $0x80] sm:$0xff]  ;;  %v3839_v14 = vld [vmem:[%s3803_s11 + $0x90] sm:$0xff]  ;;  %v3891_v32 = vpack.c.bf16 %v155_v31, %v154_v30  ;;  %v158_v54 = vmul.f32 0.25, %v3822_v9  ;;  %v159_v55 = vmul.f32 0.25, %v3825_v10 }
  0x18   : > { %200 = vrot.lane.b32.xlu1 %v3819_v8, %s3769_s12  ;;  %v3842_v15 = vld [vmem:[%s3803_s11 + $0xa0] sm:$0xff]  ;;  %v3845_v16 = vld [vmem:[%s3803_s11 + $0xb0] sm:$0xff]  ;;  %v3850_v17 = vpack.c.bf16 %v3839_v14, %v3836_v13  ;;  %v3921_v53 = vpack.c.bf16 %v157_v52, %v156_v51  ;;  %v160_v57 = vmul.f32 0.25, %v3836_v13  ;;  %v161_v58 = vmul.f32 0.25, %v3839_v14 }
  0x19   : > { %v3855_v18 = vpack.c.bf16 %v3845_v16, %v3842_v15  ;;  %v3858_v19 = vld [vmem:[%s3803_s11 + $0xc0] sm:$0xff]  ;;  %v3861_v20 = vld [vmem:[%s3803_s11 + $0xd0] sm:$0xff]  ;;  %v3928_v56 = vpack.c.bf16 %v159_v55, %v158_v54  ;;  %v162_v60 = vmul.f32 0.25, %v3842_v15  ;;  %v163_v61 = vmul.f32 0.25, %v3845_v16 }
  0x1a   : > { %198 = vrot.lane.b32.xlu0 %v3828_v11, %s3769_s12  ;;  %v3864_v21 = vld [vmem:[%s3803_s11 + $0xe0] sm:$0xff]  ;;  %v3867_v22 = vld [vmem:[%s3803_s11 + $0xf0] sm:$0xff]  ;;  %v3872_v23 = vpack.c.bf16 %v3861_v20, %v3858_v19  ;;  %v3935_v59 = vpack.c.bf16 %v161_v58, %v160_v57  ;;  %v164_v63 = vmul.f32 0.25, %v3858_v19  ;;  %v165_v1 = vmul.f32 0.25, %v3861_v20 }
  0x1b   : > { %v3877_v24 = vpack.c.bf16 %v3867_v22, %v3864_v21  ;;  %v3880_v25 = vld [vmem:[%s3803_s11 + $0x100] sm:$0x3]  ;;  %v3942_v62 = vpack.c.bf16 %v163_v61, %v162_v60  ;;  %v166_v3 = vmul.f32 0.25, %v3864_v21  ;;  %v167_v5 = vmul.f32 0.25, %v3867_v22 }
  0x1c   : > { %202 = vrot.lane.b32.xlu1 %v3833_v12, %s3769_s12  ;;  %v3885_v26 = vpack.c.bf16 %v3880_v25, %v3880_v25  ;;  %v3949_v2 = vpack.c.bf16 %v165_v1, %v164_v63  ;;  %v168_v7 = vmul.f32 0.25, %v3880_v25 }
  0x1d   : > { %6145 = vst [vmem:[#allocation2_spill] sm:$0xff] %v3942_v62  ;;  %v3956_v6 = vpack.c.bf16 %v167_v5, %v166_v3 }
  0x1e   : > { %204 = vrot.lane.b32.xlu0 %v3850_v17, %s3769_s12  ;;  %6146 = vst [vmem:[#allocation3_spill] sm:$0xff] %v3949_v2  ;;  %v3962_v9 = vpack.c.bf16 %v168_v7, %v168_v7 }
  0x1f   : > { %6147 = vst [vmem:[#allocation4_spill] sm:$0xff] %v3956_v6 }
  0x20   : > { %206 = vrot.lane.b32.xlu1 %v3855_v18, %s3769_s12  ;;  %6148 = vst [vmem:[#allocation5_spill] sm:$0xff] %v3962_v9 }
  0x22   : > { %208 = vrot.lane.b32.xlu0 %v3872_v23, %s3769_s12 }
  0x24   : > { %210 = vrot.lane.b32.xlu1 %v3877_v24, %s3769_s12 }
  0x26   : > { %212 = vrot.lane.b32.xlu0 %v3885_v26, %s3769_s12 }
  0x28   : > { %873 = vrot.lane.b32.xlu1 %v3808_v4, %s3770_s13 }
  0x88   : > { %v197_v33 = vpop.permute.xlu0 %196 }
  0x89   : > { %v243_v34 = vsel %vm214_vm0, %v197_v33, 0 }
  0x8a   : > { %270 = vmatpush1.bf16.xpose.msra.mxu0 %v243_v34  ;;  %v201_v37 = vpop.permute.xlu1 %200 }
  0x8b   : > { %271 = vmatprep.subr.bf16.mxu0 %v6012_v0  ;;  %v249_v38 = vsel %vm214_vm0, %v201_v37, 0 }
  0x8c   : > { %v199_v35 = vpop.permute.xlu0 %198 }
  0x8d   : > { %v246_v36 = vsel %vm214_vm0, %v199_v35, 0 }
  0x8e   : > { %v203_v39 = vpop.permute.xlu1 %202 }
  0x8f   : > { %v252_v40 = vsel %vm214_vm0, %v203_v39, 0 }
  0x90   : > { %v205_v41 = vpop.permute.xlu0 %204 }
  0x91   : > { %v255_v42 = vsel %vm214_vm0, %v205_v41, 0 }
  0x92   : > { %272 = vmatpush1.bf16.xpose.msra.mxu0 %v246_v36  ;;  %v207_v43 = vpop.permute.xlu1 %206 }
  0x93   : > { %273 = vmatprep.subr.bf16.mxu0 %v6012_v0  ;;  %v258_v44 = vsel %vm214_vm0, %v207_v43, 0 }
  0x94   : > { %v209_v45 = vpop.permute.xlu0 %208 }
  0x95   : > { %v261_v46 = vsel %vm214_vm0, %v209_v45, 0 }
  0x96   : > { %v211_v47 = vpop.permute.xlu1 %210 }
  0x97   : > { %v264_v48 = vsel %vm214_vm0, %v211_v47, 0 }
  0x98   : > { %v213_v49 = vpop.permute.xlu0 %212 }
  0x99   : > { %v267_v50 = vsel %vm214_vm0, %v213_v49, 0 }
  0x9a   : > { %274 = vmatpush1.bf16.xpose.msra.mxu0 %v249_v38 }
  0x9b   : > { %275 = vmatprep.subr.bf16.mxu0 %v6012_v0 }
  0xa2   : > { %276 = vmatpush1.bf16.xpose.msra.mxu0 %v252_v40 }
  0xa3   : > { %277 = vmatprep.subr.bf16.mxu0 %v6012_v0 }
  0xaa   : > { %278 = vmatpush1.bf16.xpose.msra.mxu0 %v255_v42 }
  0xab   : > { %279 = vmatprep.subr.bf16.mxu0 %v6012_v0 }
  0xb2   : > { %280 = vmatpush1.bf16.xpose.msra.mxu0 %v258_v44 }
  0xb3   : > { %281 = vmatprep.subr.bf16.mxu0 %v6012_v0 }
  0xba   : > { %282 = vmatpush1.bf16.xpose.msra.mxu0 %v261_v46 }
  0xbb   : > { %283 = vmatprep.subr.bf16.mxu0 %v6012_v0 }
  0xc2   : > { %284 = vmatpush1.bf16.xpose.msra.mxu0 %v264_v48 }
  0xc3   : > { %285 = vmatprep.subr.bf16.mxu0 %v6012_v0 }
  0xca   : > { %286 = vmatpush1.bf16.xpose.msra.mxu0 %v267_v50 }
  0xcb   : > { %1440 = vmatprep.subr.bf16.mxu0 %v6012_v0 }
  0xd1   : > { %3242 = vmatmul.mubr.msk.bf16.vlgmr.msra.gmra.mrb[0].mxu0 %vm214_vm0, %v3889_v29 }
  0xd2   : > { %311 = vmatprep.mubr.bf16.mxu0 %v6012_v0 }
  0xd9   : > { %3243 = vmatmul.mubr.msk.bf16.gmra.mrb[4].mxu0 %vm214_vm0, %v3891_v32 }
  0xda   : > { %321 = vmatprep.mubr.bf16.mxu0 %v6012_v0 }
  0xe1   : > { %3244 = vmatmul.mubr.msk.bf16.gmra.mrb[8].mxu0 %vm214_vm0, %v3921_v53 }
  0xe2   : > { %331 = vmatprep.mubr.bf16.mxu0 %v6012_v0 }
  0xe9   : > { %3245 = vmatmul.mubr.msk.bf16.gmra.mrb[12].mxu0 %vm214_vm0, %v3928_v56 }
  0xea   : > { %341 = vmatprep.mubr.bf16.mxu0 %v6012_v0 }
  0xf1   : > { %3246 = vmatmul.mubr.msk.bf16.gmra.mrb[16].mxu0 %vm214_vm0, %v3935_v59 }
  0xf2   : > { %351 = vmatprep.mubr.bf16.mxu0 %v6012_v0 }
  0xf9   : > { %3247 = vmatmul.mubr.msk.bf16.gmra.mrb[20].mxu0 %vm214_vm0, %v3942_v62 }
  0xfa   : > { %361 = vmatprep.mubr.bf16.mxu0 %v6012_v0 }
 0x101   : > { %3248 = vmatmul.mubr.msk.bf16.gmra.mrb[24].mxu0 %vm214_vm0, %v3949_v2 }
 0x102   : > { %371 = vmatprep.mubr.bf16.mxu0 %v6012_v0 }
 0x109   : > { %3249 = vmatmul.mubr.msk.bf16.gmra.mrb[28].mxu0 %vm214_vm0, %v3956_v6  ;;  %v121_v6 = vld [vmem:[%s3803_s11 + $0x18] sm:$0xff] }
 0x10a   : > { %381 = vmatprep.mubr.bf16.mxu0 %v6012_v0 }
 0x111   : > { %3250 = vmatmul.mubr.msk.bf16.gmra.mrb[32].mxu0 %vm214_vm0, %v3962_v9 }
 0x1a4   : > { %v3966_v10 = vpop.f32.mrb[0].mxu0 }
 0x1a5   : > { %v3968_v13 = vpop.f32.mrb[1].mxu0 }
 0x1a6   : > { %v391_v14 = vsel %vm390_vm1, %v3968_v13, -inf  ;;  %v3972_v15 = vpop.f32.mrb[2].mxu0 }
 0x1a7   : > { %v3974_v16 = vpop.f32.mrb[3].mxu0  ;;  %v392_v19 = vmax.f32 %v3966_v10, %v391_v14 }
 0x1a8   : > { %v395_v20 = vsel %vm390_vm1, %v3974_v16, -inf }
 0x1a9   : > { %393 = vmax.xlane.f32.xlu1 %v392_v19  ;;  %v396_v21 = vmax.f32 %v3972_v15, %v395_v20 }
 0x1ab   : > { %397 = vmax.xlane.f32.xlu0 %v396_v21 }
 0x1ac   : > { %v3980_v22 = vpop.f32.mrb[4].mxu0 }
 0x1ad   : > { %v3982_v25 = vpop.f32.mrb[5].mxu0 }
 0x1ae   : > { %v399_v27 = vsel %vm390_vm1, %v3982_v25, -inf  ;;  %v3986_v28 = vpop.f32.mrb[6].mxu0 }
 0x1af   : > { %v3988_v30 = vpop.f32.mrb[7].mxu0  ;;  %v400_v31 = vmax.f32 %v3980_v22, %v399_v27 }
 0x1b0   : > { %v403_v33 = vsel %vm390_vm1, %v3988_v30, -inf }
 0x1b1   : > { %401 = vmax.xlane.f32.xlu0 %v400_v31  ;;  %v404_v34 = vmax.f32 %v3986_v28, %v403_v33 }
 0x1b3   : > { %405 = vmax.xlane.f32.xlu1 %v404_v34 }
 0x1b4   : > { %v3994_v35 = vpop.f32.mrb[8].mxu0 }
 0x1b5   : > { %v3996_v36 = vpop.f32.mrb[9].mxu0 }
 0x1b6   : > { %v407_v37 = vsel %vm390_vm1, %v3996_v36, -inf  ;;  %v4000_v38 = vpop.f32.mrb[10].mxu0 }
 0x1b7   : > { %v4002_v39 = vpop.f32.mrb[11].mxu0  ;;  %v408_v40 = vmax.f32 %v3994_v35, %v407_v37 }
 0x1b8   : > { %v411_v41 = vsel %vm390_vm1, %v4002_v39, -inf }
 0x1b9   : > { %409 = vmax.xlane.f32.xlu0 %v408_v40  ;;  %v412_v42 = vmax.f32 %v4000_v38, %v411_v41 }
 0x1bb   : > { %413 = vmax.xlane.f32.xlu1 %v412_v42 }
 0x1bc   : > { %v4008_v43 = vpop.f32.mrb[12].mxu0 }
 0x1bd   : > { %v4010_v44 = vpop.f32.mrb[13].mxu0 }
 0x1be   : > { %v415_v45 = vsel %vm390_vm1, %v4010_v44, -inf  ;;  %v4014_v46 = vpop.f32.mrb[14].mxu0 }
 0x1bf   : > { %v4016_v47 = vpop.f32.mrb[15].mxu0  ;;  %v416_v48 = vmax.f32 %v4008_v43, %v415_v45 }
 0x1c0   : > { %v419_v49 = vsel %vm390_vm1, %v4016_v47, -inf }
 0x1c1   : > { %417 = vmax.xlane.f32.xlu0 %v416_v48  ;;  %v420_v50 = vmax.f32 %v4014_v46, %v419_v49 }
 0x1c3   : > { %421 = vmax.xlane.f32.xlu1 %v420_v50 }
 0x1c4   : > { %v4022_v51 = vpop.f32.mrb[16].mxu0 }
 0x1c5   : > { %v4024_v52 = vpop.f32.mrb[17].mxu0 }
 0x1c6   : > { %v423_v54 = vsel %vm390_vm1, %v4024_v52, -inf  ;;  %v4028_v55 = vpop.f32.mrb[18].mxu0 }
 0x1c7   : > { %v424_v57 = vmax.f32 %v4022_v51, %v423_v54  ;;  %v4031_v58 = vpop.f32.mrb[19].mxu0 }
 0x1c8   : > { %v427_v60 = vsel %vm390_vm1, %v4031_v58, -inf }
 0x1c9   : > { %425 = vmax.xlane.f32.xlu0 %v424_v57  ;;  %v428_v61 = vmax.f32 %v4028_v55, %v427_v60 }
 0x1cc   : > { %v4036_v63 = vpop.f32.mrb[20].mxu0 }
 0x1cd   : > { %v4038_v1 = vpop.f32.mrb[21].mxu0 }
 0x1ce   : > { %v431_v3 = vsel %vm390_vm1, %v4038_v1, -inf  ;;  %v4042_v5 = vpop.f32.mrb[22].mxu0 }
 0x1cf   : > { %v4044_v7 = vpop.f32.mrb[23].mxu0  ;;  %v432_v14 = vmax.f32 %v4036_v63, %v431_v3 }
 0x1d0   : > { %v435_v19 = vsel %vm390_vm1, %v4044_v7, -inf }
 0x1d1   : > { %v436_v20 = vmax.f32 %v4042_v5, %v435_v19 }
 0x1d4   : > { %877 = vrot.lane.b32.xlu1 %v3819_v8, %s3770_s13  ;;  %v4052_v21 = vpop.f32.mrb[24].mxu0 }
 0x1d5   : > { %v4054_v27 = vpop.f32.mrb[25].mxu0 }
 0x1d6   : > { %v439_v31 = vsel %vm390_vm1, %v4054_v27, -inf  ;;  %v4058_v33 = vpop.f32.mrb[26].mxu0 }
 0x1d7   : > { %v4060_v34 = vpop.f32.mrb[27].mxu0  ;;  %v440_v37 = vmax.f32 %v4052_v21, %v439_v31 }
 0x1d8   : > { %v443_v40 = vsel %vm390_vm1, %v4060_v34, -inf }
 0x1d9   : > { %v444_v41 = vmax.f32 %v4058_v33, %v443_v40 }
 0x1dc   : > { %v4066_v42 = vpop.f32.mrb[28].mxu0 }
 0x1dd   : > { %v4068_v45 = vpop.f32.mrb[29].mxu0 }
 0x1de   : > { %v447_v48 = vsel %vm390_vm1, %v4068_v45, -inf  ;;  %v4072_v49 = vpop.f32.mrb[30].mxu0 }
 0x1df   : > { %875 = vrot.lane.b32.xlu0 %v3828_v11, %s3770_s13  ;;  %v4076_v50 = vpop.f32.mrb[31].mxu0  ;;  %v448_v54 = vmax.f32 %v4066_v42, %v447_v48 }
 0x1e0   : > { %v451_v57 = vsel %vm390_vm1, %v4076_v50, -inf }
 0x1e1   : > { %v452_v60 = vmax.f32 %v4072_v49, %v451_v57  ;;  %v119_v57 = vld [vmem:[%s3803_s11 + $0x8] sm:$0xff] }
 0x1e4   : > { %v4082_v3 = vpop.f32.mrb[32].mxu0 }
 0x1e5   : > { %v456_v19 = vsel %vm455_vm2, %v4082_v3, -inf  ;;  %v4086_v31 = vpop.f32.mrb[33].mxu0 }
 0x1e6   : > { %v458_v40 = vsel %vm457_vm3, %v4086_v31, -inf  ;;  %v387_v48 = vpop.f32.mrb[34].mxu0 }
 0x1e7   : > { %v459_v0 = vmax.f32 %v456_v19, %v458_v40  ;;  %v388_v9 = vpop.f32.mrb[35].mxu0  ;;  %v123_v48 = vld [vmem:[%s3803_s11 + $0x28] sm:$0xff]  ;;  %v4095_v19 = vpack.c.bf16 %v121_v6, %v119_v57  ;;  %v133_v57 = vld [vmem:[%s3803_s11 + $0x78] sm:$0xff] }
 0x1e8   : > { %v125_v9 = vld [vmem:[%s3803_s11 + $0x38] sm:$0xff]  ;;  %v131_v40 = vld [vmem:[%s3803_s11 + $0x68] sm:$0xff] }
 0x1e9   : > { %6149 = vst [vmem:[#allocation6_spill] sm:$0xff] %v4095_v19  ;;  %743 = vmatpush1.bf16.msra.mxu1 %v4095_v19 }
 0x1f8   : > { %429 = vmax.xlane.f32.xlu1 %v428_v61  ;;  %v4098_v61 = vpop.permute.xlu1 %873 }
 0x1fc   : > { %437 = vmax.xlane.f32.xlu1 %v436_v20  ;;  %v6151_v20 = vmov 0  }
 0x1fd   : > { %744 = vmatprep.subr.bf16.mxu1 %v6151_v20 }
 0x1fe   : > { %433 = vmax.xlane.f32.xlu0 %v432_v14  ;;  %v4101_v14 = vpack.c.bf16 %v125_v9, %v123_v48 }
 0x200   : > { %445 = vmax.xlane.f32.xlu1 %v444_v41  ;;  %6150 = vst [vmem:[#allocation7_spill] sm:$0xff] %v4101_v14  ;;  %745 = vmatpush1.bf16.msra.mxu1 %v4101_v14  ;;  %v4117_v14 = vpack.c.bf16 %v133_v57, %v131_v40 }
 0x201   : > { %746 = vmatprep.subr.bf16.mxu1 %v6151_v20 }
 0x202   : > { %441 = vmax.xlane.f32.xlu0 %v440_v37  ;;  %v129_v37 = vld [vmem:[%s3803_s11 + $0x58] sm:$0xff]  ;;  %6153 = vst [vmem:[#allocation9_spill] sm:$0xff] %v4117_v14 }
 0x204   : > { %453 = vmax.xlane.f32.xlu1 %v452_v60 }
 0x206   : > { %449 = vmax.xlane.f32.xlu0 %v448_v54 }
 0x20a   : > { %460 = vmax.xlane.f32.xlu0 %v459_v0  ;;  %v127_v0 = vld [vmem:[%s3803_s11 + $0x48] sm:$0xff] }
 0x20b   : > { %v4107_v54 = vpack.c.bf16 %v129_v37, %v127_v0 }
 0x20d   : > { %6152 = vst [vmem:[#allocation8_spill] sm:$0xff] %v4107_v54  ;;  %747 = vmatpush1.bf16.msra.mxu1 %v4107_v54 }
 0x20e   : > { %748 = vmatprep.subr.bf16.mxu1 %v6151_v20 }
 0x211   : > { %749 = vmatpush1.bf16.msra.mxu1 %v4117_v14 }
 0x212   : > { %750 = vmatprep.subr.bf16.mxu1 %v6151_v20 }
 0x215   : > { %879 = vrot.lane.b32.xlu1 %v3833_v12, %s3770_s13 }
 0x236   : > { %v394_v41 = vpop.xlane.xlu1 %393 }
 0x237   : > { %v462_v60 = vsub.f32 %v3966_v10, %v394_v41  ;;  %v463_v6 = vsub.f32 %v3968_v13, %v394_v41 }
 0x238   : > { %v398_v19 = vpop.xlane.xlu0 %397 }
 0x239   : > { %v496_v48 = vmul.f32 1.442695, %v462_v60  ;;  %v498_v9 = vmul.f32 1.442695, %v463_v6  ;;  %v464_v2 = vsub.f32 %v3972_v15, %v398_v19  ;;  %v465_v62 = vsub.f32 %v3974_v16, %v398_v19 }
 0x23b   : > { %3352 = vpow2.f32 %v496_v48  ;;  %v500_v0 = vmul.f32 1.442695, %v464_v2  ;;  %v502_v10 = vmul.f32 1.442695, %v465_v62 }
 0x23c   : > { %3354 = vpow2.f32 %v498_v9 }
 0x23d   : > { %3356 = vpow2.f32 %v500_v0 }
 0x23e   : > { %3358 = vpow2.f32 %v502_v10  ;;  %v402_v13 = vpop.xlane.xlu0 %401 }
 0x23f   : > { %v466_v37 = vsub.f32 %v3980_v22, %v402_v13  ;;  %v467_v15 = vsub.f32 %v3982_v25, %v402_v13 }
 0x240   : > { %v406_v16 = vpop.xlane.xlu1 %405 }
 0x241   : > { %v504_v19 = vmul.f32 1.442695, %v466_v37  ;;  %v506_v41 = vmul.f32 1.442695, %v467_v15  ;;  %v468_v2 = vsub.f32 %v3986_v28, %v406_v16  ;;  %v469_v62 = vsub.f32 %v3988_v30, %v406_v16 }
 0x243   : > { %3360 = vpow2.f32 %v504_v19  ;;  %v508_v60 = vmul.f32 1.442695, %v468_v2  ;;  %v510_v6 = vmul.f32 1.442695, %v469_v62 }
 0x244   : > { %3362 = vpow2.f32 %v506_v41 }
 0x245   : > { %v4126_v40 = vpop.eup %3352  ;;  %3364 = vpow2.f32 %v508_v60  ;;  %v135_v60 = vld [vmem:[%s3803_s11 + $0x88] sm:$0xff] }
 0x246   : > { %v4128_v57 = vpop.eup %3354  ;;  %3366 = vpow2.f32 %v510_v6  ;;  %v410_v22 = vpop.xlane.xlu0 %409 }
 0x247   : > { %v4130_v25 = vpop.eup %3356  ;;  %v470_v48 = vsub.f32 %v3994_v35, %v410_v22  ;;  %v471_v9 = vsub.f32 %v3996_v36, %v410_v22  ;;  %v564_v28 = vsel %vm390_vm1, %v4128_v57, 0.0 }
 0x248   : > { %v4136_v30 = vpop.eup %3358  ;;  %v414_v0 = vpop.xlane.xlu1 %413  ;;  %v565_v10 = vadd.f32 %v4126_v40, %v564_v28 }
 0x249   : > { %v512_v13 = vmul.f32 1.442695, %v470_v48  ;;  %v514_v37 = vmul.f32 1.442695, %v471_v9  ;;  %v472_v15 = vsub.f32 %v4000_v38, %v414_v0  ;;  %v473_v16 = vsub.f32 %v4002_v39, %v414_v0  ;;  %v137_v39 = vld [vmem:[%s3803_s11 + $0x98] sm:$0xff] }
 0x24a   : > { %566 = vadd.xlane.f32.xlu1 %v565_v10  ;;  %v568_v35 = vsel %vm390_vm1, %v4136_v30, 0.0  ;;  %v4156_v28 = vpack.c.bf16 %v137_v39, %v135_v60 }
 0x24b   : > { %3368 = vpow2.f32 %v512_v13  ;;  %v516_v36 = vmul.f32 1.442695, %v472_v15  ;;  %v518_v19 = vmul.f32 1.442695, %v473_v16  ;;  %v569_v41 = vadd.f32 %v4130_v25, %v568_v35 }
 0x24c   : > { %3370 = vpow2.f32 %v514_v37  ;;  %6154 = vst [vmem:[#allocation10_spill] sm:$0xff] %v4156_v28  ;;  %751 = vmatpush1.bf16.msra.mxu1 %v4156_v28 }
 0x24d   : > { %v4144_v2 = vpop.eup %3360  ;;  %3372 = vpow2.f32 %v516_v36  ;;  %570 = vadd.xlane.f32.xlu0 %v569_v41  ;;  %752 = vmatprep.subr.bf16.mxu1 %v6151_v20  ;;  %v141_v36 = vld [vmem:[%s3803_s11 + $0xb8] sm:$0xff] }
 0x24e   : > { %v4146_v62 = vpop.eup %3362  ;;  %3374 = vpow2.f32 %v518_v19  ;;  %v418_v38 = vpop.xlane.xlu0 %417 }
 0x24f   : > { %v4150_v6 = vpop.eup %3364  ;;  %v474_v22 = vsub.f32 %v4008_v43, %v418_v38  ;;  %v475_v48 = vsub.f32 %v4010_v44, %v418_v38  ;;  %v572_v9 = vsel %vm390_vm1, %v4146_v62, 0.0  ;;  %v139_v44 = vld [vmem:[%s3803_s11 + $0xa8] sm:$0xff] }
 0x250   : > { %v4158_v0 = vpop.eup %3366  ;;  %v422_v10 = vpop.xlane.xlu1 %421  ;;  %v573_v13 = vadd.f32 %v4144_v2, %v572_v9 }
 0x251   : > { %v520_v37 = vmul.f32 1.442695, %v474_v22  ;;  %v522_v15 = vmul.f32 1.442695, %v475_v48  ;;  %v476_v16 = vsub.f32 %v4014_v46, %v422_v10  ;;  %v477_v35 = vsub.f32 %v4016_v47, %v422_v10 }
 0x252   : > { %574 = vadd.xlane.f32.xlu1 %v573_v13  ;;  %v576_v43 = vsel %vm390_vm1, %v4158_v0, 0.0  ;;  %v4170_v46 = vpack.c.bf16 %v141_v36, %v139_v44  ;;  %v143_v13 = vld [vmem:[%s3803_s11 + $0xc8] sm:$0xff] }
 0x253   : > { %3376 = vpow2.f32 %v520_v37  ;;  %v524_v19 = vmul.f32 1.442695, %v476_v16  ;;  %v526_v41 = vmul.f32 1.442695, %v477_v35  ;;  %v577_v38 = vadd.f32 %v4150_v6, %v576_v43  ;;  %v145_v37 = vld [vmem:[%s3803_s11 + $0xd8] sm:$0xff]  ;;  %v147_v36 = vld [vmem:[%s3803_s11 + $0xe8] sm:$0xff] }
 0x254   : > { %3378 = vpow2.f32 %v522_v15  ;;  %6155 = vst [vmem:[#allocation11_spill] sm:$0xff] %v4170_v46  ;;  %753 = vmatpush1.bf16.msra.mxu1 %v4170_v46  ;;  %v4189_v35 = vpack.c.bf16 %v145_v37, %v143_v13 }
 0x255   : > { %v4172_v47 = vpop.eup %3368  ;;  %3380 = vpow2.f32 %v524_v19  ;;  %578 = vadd.xlane.f32.xlu0 %v577_v38  ;;  %754 = vmatprep.subr.bf16.mxu1 %v6151_v20  ;;  %v149_v19 = vld [vmem:[%s3803_s11 + $0xf8] sm:$0xff] }
 0x256   : > { %v4174_v60 = vpop.eup %3370  ;;  %3382 = vpow2.f32 %v526_v41  ;;  %v426_v39 = vpop.xlane.xlu0 %425  ;;  %6156 = vst [vmem:[#allocation12_spill] sm:$0xff] %v4189_v35  ;;  %v4198_v41 = vpack.c.bf16 %v149_v19, %v147_v36 }
 0x257   : > { %v4177_v22 = vpop.eup %3372  ;;  %v478_v48 = vsub.f32 %v4022_v51, %v426_v39  ;;  %v479_v9 = vsub.f32 %v4024_v52, %v426_v39  ;;  %v580_v10 = vsel %vm390_vm1, %v4174_v60, 0.0 }
 0x258   : > { %v4186_v15 = vpop.eup %3374  ;;  %v581_v16 = vadd.f32 %v4172_v47, %v580_v10  ;;  %755 = vmatpush1.bf16.msra.mxu1 %v4189_v35  ;;  %6157 = vst [vmem:[#allocation13_spill] sm:$0xff] %v4198_v41 }
 0x259   : > { %v528_v43 = vmul.f32 1.442695, %v478_v48  ;;  %v530_v51 = vmul.f32 1.442695, %v479_v9  ;;  %v584_v52 = vsel %vm390_vm1, %v4186_v15, 0.0  ;;  %756 = vmatprep.subr.bf16.mxu1 %v6151_v20 }
 0x25a   : > { %582 = vadd.xlane.f32.xlu1 %v581_v16  ;;  %v585_v44 = vadd.f32 %v4177_v22, %v584_v52  ;;  %v151_v48 = vld [vmem:[%s3803_s11 + $0x108] sm:$0x3] }
 0x25b   : > { %3384 = vpow2.f32 %v528_v43  ;;  %v4211_v13 = vpack.c.bf16 %v151_v48, %v151_v48 }
 0x25c   : > { %3386 = vpow2.f32 %v530_v51  ;;  %586 = vadd.xlane.f32.xlu0 %v585_v44  ;;  %757 = vmatpush1.bf16.msra.mxu1 %v4198_v41 }
 0x25d   : > { %v4200_v38 = vpop.eup %3376  ;;  %758 = vmatprep.subr.bf16.mxu1 %v6151_v20  ;;  %6158 = vst [vmem:[#allocation14_spill] sm:$0xff] %v4211_v13  ;;  %v740_v51 = vsel %vm738_vm4, %v4211_v13, 0 }
 0x25e   : > { %v4202_v39 = vpop.eup %3378 }
 0x25f   : > { %v4206_v9 = vpop.eup %3380  ;;  %v588_v10 = vsel %vm390_vm1, %v4202_v39, 0.0 }
 0x260   : > { %v4213_v37 = vpop.eup %3382  ;;  %v589_v16 = vadd.f32 %v4200_v38, %v588_v10  ;;  %759 = vmatpush1.bf16.msra.mxu1 %v740_v51  ;;  %v4231_v10 = vpop.permute.xlu1 %877 }
 0x261   : > { %v592_v43 = vsel %vm390_vm1, %v4213_v37, 0.0  ;;  %945 = vmatprep.subr.bf16.mxu1 %v6151_v20 }
 0x262   : > { %590 = vadd.xlane.f32.xlu1 %v589_v16  ;;  %v593_v52 = vadd.f32 %v4206_v9, %v592_v43 }
 0x264   : > { %594 = vadd.xlane.f32.xlu0 %v593_v52  ;;  %v4235_v52 = vpop.permute.xlu0 %875 }
 0x265   : > { %v4222_v44 = vpop.eup %3384 }
 0x266   : > { %v4224_v36 = vpop.eup %3386 }
 0x267   : > { %v596_v19 = vsel %vm390_vm1, %v4224_v36, 0.0 }
 0x268   : > { %v597_v48 = vadd.f32 %v4222_v44, %v596_v19 }
 0x26a   : > { %598 = vadd.xlane.f32.xlu0 %v597_v48 }
 0x273   : > { %883 = vrot.lane.b32.xlu1 %v3855_v18, %s3770_s13 }
 0x285   : > { %v430_v16 = vpop.xlane.xlu1 %429 }
 0x286   : > { %v480_v43 = vsub.f32 %v4028_v55, %v430_v16  ;;  %v481_v51 = vsub.f32 %v4031_v58, %v430_v16 }
 0x288   : > { %v532_v13 = vmul.f32 1.442695, %v480_v43  ;;  %v534_v35 = vmul.f32 1.442695, %v481_v51 }
 0x289   : > { %v438_v28 = vpop.xlane.xlu1 %437 }
 0x28a   : > { %3388 = vpow2.f32 %v532_v13 }
 0x28b   : > { %3390 = vpow2.f32 %v534_v35  ;;  %v434_v41 = vpop.xlane.xlu0 %433 }
 0x28c   : > { %v482_v19 = vsub.f32 %v4036_v63, %v434_v41  ;;  %v483_v48 = vsub.f32 %v4038_v1, %v434_v41 }
 0x28d   : > { %v446_v46 = vpop.xlane.xlu1 %445 }
 0x28e   : > { %v536_v14 = vmul.f32 1.442695, %v482_v19  ;;  %v538_v54 = vmul.f32 1.442695, %v483_v48 }
 0x290   : > { %3392 = vpow2.f32 %v536_v14 }
 0x291   : > { %3394 = vpow2.f32 %v538_v54  ;;  %v454_v55 = vpop.xlane.xlu1 %453 }
 0x292   : > { %v492_v58 = vsub.f32 %v4072_v49, %v454_v55  ;;  %v493_v16 = vsub.f32 %v4076_v50, %v454_v55 }
 0x294   : > { %v4241_v43 = vpop.eup %3388  ;;  %v556_v51 = vmul.f32 1.442695, %v492_v58  ;;  %v558_v35 = vmul.f32 1.442695, %v493_v16  ;;  %v485_v58 = vsub.f32 %v4044_v7, %v438_v28  ;;  %v442_v16 = vpop.xlane.xlu0 %441 }
 0x295   : > { %v4243_v13 = vpop.eup %3390 }
 0x296   : > { %3396 = vpow2.f32 %v556_v51  ;;  %v600_v63 = vsel %vm390_vm1, %v4243_v13, 0.0  ;;  %v484_v51 = vsub.f32 %v4042_v5, %v438_v28  ;;  %v488_v5 = vsub.f32 %v4058_v33, %v446_v46 }
 0x297   : > { %3398 = vpow2.f32 %v558_v35  ;;  %v601_v1 = vadd.f32 %v4241_v43, %v600_v63  ;;  %v542_v35 = vmul.f32 1.442695, %v485_v58  ;;  %v487_v63 = vsub.f32 %v4054_v27, %v442_v16 }
 0x299   : > { %602 = vadd.xlane.f32.xlu0 %v601_v1  ;;  %v450_v1 = vpop.xlane.xlu0 %449  ;;  %3400 = vpow2.f32 %v542_v35  ;;  %v546_v7 = vmul.f32 1.442695, %v487_v63 }
 0x29a   : > { %v4248_v14 = vpop.eup %3392 }
 0x29b   : > { %v4250_v54 = vpop.eup %3394 }
 0x29c   : > { %v604_v49 = vsel %vm390_vm1, %v4250_v54, 0.0 }
 0x29d   : > { %v605_v50 = vadd.f32 %v4248_v14, %v604_v49  ;;  %v540_v49 = vmul.f32 1.442695, %v484_v51  ;;  %v461_v58 = vpop.xlane.xlu0 %460  ;;  %v490_v51 = vsub.f32 %v4066_v42, %v450_v1 }
 0x29e   : > { %v495_v33 = vsub.f32 %v4086_v31, %v461_v58 }
 0x29f   : > { %606 = vadd.xlane.f32.xlu1 %v605_v50  ;;  %v486_v50 = vsub.f32 %v4052_v21, %v442_v16  ;;  %3402 = vpow2.f32 %v540_v49  ;;  %v548_v21 = vmul.f32 1.442695, %v488_v5  ;;  %v552_v35 = vmul.f32 1.442695, %v490_v51 }
 0x2a0   : > { %v4255_v41 = vpop.eup %3396  ;;  %3404 = vpow2.f32 %v546_v7 }
 0x2a1   : > { %v4257_v19 = vpop.eup %3398  ;;  %v544_v28 = vmul.f32 1.442695, %v486_v50 }
 0x2a2   : > { %v624_v48 = vsel %vm390_vm1, %v4257_v19, 0.0 }
 0x2a3   : > { %v625_v55 = vadd.f32 %v4255_v41, %v624_v48  ;;  %v489_v48 = vsub.f32 %v4060_v34, %v446_v46  ;;  %3406 = vpow2.f32 %v544_v28  ;;  %v494_v34 = vsub.f32 %v4082_v3, %v461_v58  ;;  %v4282_v46 = vpop.eup %3400  ;;  %v4306_v28 = vpop.permute.xlu1 %879 }
 0x2a5   : > { %626 = vadd.xlane.f32.xlu1 %v625_v55  ;;  %v550_v27 = vmul.f32 1.442695, %v489_v48  ;;  %v491_v55 = vsub.f32 %v4068_v45, %v450_v1  ;;  %v560_v42 = vmul.f32 1.442695, %v494_v34  ;;  %v562_v45 = vmul.f32 1.442695, %v495_v33 }
 0x2a6   : > { %v608_v1 = vsel %vm390_vm1, %v4282_v46, 0.0 }
 0x2a7   : > { %3408 = vpow2.f32 %v550_v27  ;;  %v554_v16 = vmul.f32 1.442695, %v491_v55 }
 0x2a8   : > { %3410 = vpow2.f32 %v548_v21 }
 0x2a9   : > { %3412 = vpow2.f32 %v554_v16  ;;  %v4286_v63 = vpop.eup %3402 }
 0x2aa   : > { %v4290_v3 = vpop.eup %3404  ;;  %3414 = vpow2.f32 %v552_v35  ;;  %v609_v31 = vadd.f32 %v4286_v63, %v608_v1 }
 0x2ab   : > { %3416 = vpow2.f32 %v560_v42  ;;  %v612_v50 = vsel %vm390_vm1, %v4290_v3, 0.0 }
 0x2ac   : > { %3418 = vpow2.f32 %v562_v45 }
 0x2ad   : > { %v4295_v49 = vpop.eup %3406 }
 0x2ae   : > { %v613_v7 = vadd.f32 %v4295_v49, %v612_v50 }
 0x2af   : > { %881 = vrot.lane.b32.xlu0 %v3850_v17, %s3770_s13 }
 0x2b1   : > { %v4299_v48 = vpop.eup %3408 }
 0x2b2   : > { %v4304_v5 = vpop.eup %3410  ;;  %v616_v27 = vsel %vm390_vm1, %v4299_v48, 0.0 }
 0x2b3   : > { %v4310_v55 = vpop.eup %3412  ;;  %v617_v51 = vadd.f32 %v4304_v5, %v616_v27 }
 0x2b4   : > { %v4314_v58 = vpop.eup %3414  ;;  %v620_v34 = vsel %vm390_vm1, %v4310_v55, 0.0 }
 0x2b5   : > { %v4317_v21 = vpop.eup %3416  ;;  %v621_v35 = vadd.f32 %v4314_v58, %v620_v34 }
 0x2b6   : > { %885 = vrot.lane.b32.xlu1 %v3872_v23, %s3770_s13  ;;  %v4321_v16 = vpop.eup %3418  ;;  %v628_v42 = vsel %vm455_vm2, %v4317_v21, 0.0 }
 0x2b7   : > { %v629_v45 = vsel %vm457_vm3, %v4321_v16, 0.0 }
 0x2ba   : > { %889 = vrot.lane.b32.xlu1 %v3885_v26, %s3770_s13 }
 0x2be   : > { %855 = vrot.lane.b32.xlu1 %v3889_v29, %s3771_s14 }
 0x2c2   : > { %1562 = vrot.lane.b32.xlu1 %v3808_v4, %s3772_s15 }
 0x2c6   : > { %857 = vrot.lane.b32.xlu1 %v3891_v32, %s3771_s14 }
 0x2ca   : > { %1564 = vrot.lane.b32.xlu1 %v3828_v11, %s3772_s15 }
 0x2ce   : > { %610 = vadd.xlane.f32.xlu0 %v609_v31  ;;  %1566 = vrot.lane.b32.xlu1 %v3819_v8, %s3772_s15  ;;  %v630_v31 = vadd.f32 %v629_v45, %v628_v42 }
 0x2d2   : > { %614 = vadd.xlane.f32.xlu0 %v613_v7  ;;  %1568 = vrot.lane.b32.xlu1 %v3833_v12, %s3772_s15 }
 0x2d6   : > { %618 = vadd.xlane.f32.xlu0 %v617_v51  ;;  %1570 = vrot.lane.b32.xlu1 %v3850_v17, %s3772_s15 }
 0x2d7   : > { %v567_v33 = vpop.xlane.xlu1 %566 }
 0x2d8   : > { %3420 = vrcp.f32 %v567_v33 }
 0x2da   : > { %v571_v1 = vpop.xlane.xlu0 %570  ;;  %622 = vadd.xlane.f32.xlu0 %v621_v35  ;;  %1572 = vrot.lane.b32.xlu1 %v3855_v18, %s3772_s15 }
 0x2db   : > { %3422 = vrcp.f32 %v571_v1 }
 0x2de   : > { %631 = vadd.xlane.f32.xlu0 %v630_v31  ;;  %1574 = vrot.lane.b32.xlu1 %v3872_v23, %s3772_s15 }
 0x2df   : > { %v575_v50 = vpop.xlane.xlu1 %574 }
 0x2e0   : > { %3424 = vrcp.f32 %v575_v50 }
 0x2e2   : > { %v579_v7 = vpop.xlane.xlu0 %578  ;;  %1576 = vrot.lane.b32.xlu1 %v3877_v24, %s3772_s15  ;;  %v3421_v27 = vpop.eup %3420 }
 0x2e3   : > { %3426 = vrcp.f32 %v579_v7  ;;  %v651_v34 = vmul.f32 %v3421_v27, %v4128_v57  ;;  %v650_v35 = vmul.f32 %v3421_v27, %v4126_v40  ;;  %v919_v40 = vsel %vm214_vm0, %v4098_v61, 0 }
 0x2e5   : > { %v3423_v51 = vpop.eup %3422 }
 0x2e6   : > { %v653_v33 = vmul.f32 %v3423_v51, %v4136_v30  ;;  %v652_v42 = vmul.f32 %v3423_v51, %v4130_v25  ;;  %1578 = vrot.lane.b32.xlu1 %v3885_v26, %s3772_s15 }
 0x2e7   : > { %v583_v45 = vpop.xlane.xlu1 %582 }
 0x2e8   : > { %3428 = vrcp.f32 %v583_v45  ;;  %v685_v1 = vpack.c.bf16 %v653_v33, %v651_v34  ;;  %v684_v31 = vpack.c.bf16 %v652_v42, %v650_v35 }
 0x2e9   : > { %v587_v50 = vpop.xlane.xlu0 %586 }
 0x2ea   : > { %3251 = vmatprep.mubr.msk.bf16.mxu1 %vm390_vm1, %v685_v1  ;;  %3430 = vrcp.f32 %v587_v50  ;;  %2242 = vrot.lane.b32.xlu1 %v3808_v4, %s3773_s16  ;;  %v3425_v57 = vpop.eup %3424 }
 0x2eb   : > { %775 = vmatmul.mubr.bf16.vlgmr.msra.gmra.mrb[0].mxu1 %v684_v31  ;;  %v655_v30 = vmul.f32 %v3425_v57, %v4146_v62  ;;  %v654_v27 = vmul.f32 %v3425_v57, %v4144_v2  ;;  %v922_v2 = vsel %vm214_vm0, %v4235_v52, 0 }
 0x2ec   : > { %946 = vmatpush1.bf16.xpose.msra.mxu1 %v919_v40 }
 0x2ed   : > { %v3427_v25 = vpop.eup %3426  ;;  %947 = vmatprep.subr.bf16.mxu1 %v6151_v20 }
 0x2ee   : > { %v657_v7 = vmul.f32 %v3427_v25, %v4158_v0  ;;  %v656_v51 = vmul.f32 %v3427_v25, %v4150_v6  ;;  %2244 = vrot.lane.b32.xlu1 %v3828_v11, %s3773_s16 }
 0x2ef   : > { %v591_v4 = vpop.xlane.xlu1 %590 }
 0x2f0   : > { %3432 = vrcp.f32 %v591_v4  ;;  %v687_v34 = vpack.c.bf16 %v657_v7, %v655_v30  ;;  %v686_v61 = vpack.c.bf16 %v656_v51, %v654_v27 }
 0x2f1   : > { %v595_v33 = vpop.xlane.xlu0 %594 }
 0x2f2   : > { %v3429_v35 = vpop.eup %3428  ;;  %3252 = vmatprep.mubr.msk.bf16.mxu1 %vm390_vm1, %v687_v34  ;;  %3434 = vrcp.f32 %v595_v33  ;;  %2246 = vrot.lane.b32.xlu1 %v3819_v8, %s3773_s16  ;;  %v6165_v34 = vld [vmem:[#allocation9_spill] sm:$0xff]  ;;  %v6170_v33 = vld [vmem:[#allocation12_spill] sm:$0xff] }
 0x2f3   : > { %783 = vmatmul.mubr.bf16.gmra.mrb[4].mxu1 %v686_v61  ;;  %v659_v11 = vmul.f32 %v3429_v35, %v4174_v60  ;;  %v658_v0 = vmul.f32 %v3429_v35, %v4172_v47  ;;  %v925_v60 = vsel %vm214_vm0, %v4231_v10, 0  ;;  %v6166_v61 = vld [vmem:[#allocation11_spill] sm:$0xff]  ;;  %v6171_v35 = vld [vmem:[#allocation14_spill] sm:$0xff] }
 0x2f4   : > { %v3431_v62 = vpop.eup %3430  ;;  %948 = vmatpush1.bf16.xpose.msra.mxu1 %v922_v2  ;;  %887 = vrot.lane.b32.xlu0 %v3877_v24, %s3770_s13 }
 0x2f5   : > { %v661_v6 = vmul.f32 %v3431_v62, %v4186_v15  ;;  %949 = vmatprep.subr.bf16.mxu1 %v6151_v20  ;;  %v660_v42 = vmul.f32 %v3431_v62, %v4177_v22 }
 0x2f6   : > { %2248 = vrot.lane.b32.xlu1 %v3833_v12, %s3773_s16 }
 0x2f7   : > { %v689_v8 = vpack.c.bf16 %v661_v6, %v659_v11  ;;  %v688_v52 = vpack.c.bf16 %v660_v42, %v658_v0 }
 0x2f8   : > { %859 = vrot.lane.b32.xlu0 %v3921_v53, %s3771_s14 }
 0x2f9   : > { %3253 = vmatprep.mubr.msk.bf16.mxu1 %vm390_vm1, %v689_v8 }
 0x2fa   : > { %v3433_v45 = vpop.eup %3432  ;;  %2250 = vrot.lane.b32.xlu1 %v3850_v17, %s3773_s16 }
 0x2fb   : > { %791 = vmatmul.mubr.bf16.gmra.mrb[8].mxu1 %v688_v52  ;;  %v663_v12 = vmul.f32 %v3433_v45, %v4202_v39  ;;  %v662_v15 = vmul.f32 %v3433_v45, %v4200_v38  ;;  %v928_v39 = vsel %vm214_vm0, %v4306_v28, 0  ;;  %v6159_v38 = vld [vmem:[#allocation2_spill] sm:$0xff] }
 0x2fc   : > { %v3435_v47 = vpop.eup %3434  ;;  %950 = vmatpush1.bf16.xpose.msra.mxu1 %v925_v60  ;;  %861 = vrot.lane.b32.xlu0 %v3928_v56, %s3771_s14 }
 0x2fd   : > { %v665_v22 = vmul.f32 %v3435_v47, %v4213_v37  ;;  %951 = vmatprep.subr.bf16.mxu1 %v6151_v20  ;;  %v664_v1 = vmul.f32 %v3435_v47, %v4206_v9  ;;  %v6162_v9 = vld [vmem:[#allocation5_spill] sm:$0xff]  ;;  %v884_v37 = vpop.permute.xlu1 %883 }
 0x2fe   : > { %2252 = vrot.lane.b32.xlu1 %v3855_v18, %s3773_s16  ;;  %v6160_v18 = vld [vmem:[#allocation3_spill] sm:$0xff]  ;;  %v934_v27 = vsel %vm214_vm0, %v884_v37, 0 }
 0x2ff   : > { %v691_v17 = vpack.c.bf16 %v665_v22, %v663_v12  ;;  %v690_v10 = vpack.c.bf16 %v664_v1, %v662_v15 }
 0x300   : > { %863 = vrot.lane.b32.xlu0 %v3935_v59, %s3771_s14 }
 0x301   : > { %3254 = vmatprep.mubr.msk.bf16.mxu1 %vm390_vm1, %v691_v17 }
 0x302   : > { %2254 = vrot.lane.b32.xlu1 %v3872_v23, %s3773_s16  ;;  %v6161_v23 = vld [vmem:[#allocation4_spill] sm:$0xff] }
 0x303   : > { %799 = vmatmul.mubr.bf16.gmra.mrb[12].mxu1 %v690_v10 }
 0x304   : > { %952 = vmatpush1.bf16.xpose.msra.mxu1 %v928_v39  ;;  %865 = vrot.lane.b32.xlu0 %v6159_v38, %s3771_s14 }
 0x305   : > { %953 = vmatprep.subr.bf16.mxu1 %v6151_v20 }
 0x306   : > { %2256 = vrot.lane.b32.xlu1 %v3877_v24, %s3773_s16  ;;  %v599_v24 = vpop.xlane.xlu0 %598 }
 0x307   : > { %3436 = vrcp.f32 %v599_v24 }
 0x308   : > { %867 = vrot.lane.b32.xlu0 %v6160_v18, %s3771_s14 }
 0x30a   : > { %2258 = vrot.lane.b32.xlu1 %v3885_v26, %s3773_s16 }
 0x30c   : > { %869 = vrot.lane.b32.xlu0 %v6161_v23, %s3771_s14 }
 0x30e   : > { %2226 = vrot.lane.b32.xlu1 %v3891_v32, %s3775_s18 }
 0x310   : > { %871 = vrot.lane.b32.xlu0 %v6162_v9, %s3771_s14 }
 0x312   : > { %2230 = vrot.lane.b32.xlu1 %v3928_v56, %s3775_s18 }
 0x314   : > { %1544 = vrot.lane.b32.xlu0 %v3889_v29, %s3774_s17 }
 0x316   : > { %2234 = vrot.lane.b32.xlu1 %v6159_v38, %s3775_s18 }
 0x318   : > { %1546 = vrot.lane.b32.xlu0 %v3891_v32, %s3774_s17  ;;  %v3437_v32 = vpop.eup %3436 }
 0x319   : > { %v666_v30 = vmul.f32 %v3437_v32, %v4222_v44  ;;  %v6163_v44 = vld [vmem:[#allocation6_spill] sm:$0xff] }
 0x31a   : > { %2238 = vrot.lane.b32.xlu1 %v6161_v23, %s3775_s18 }
 0x31c   : > { %1548 = vrot.lane.b32.xlu0 %v3921_v53, %s3774_s17 }
 0x31e   : > { %1384 = vrot.lane.b32.xlu1 %v6163_v44, %s3771_s14 }
 0x320   : > { %1550 = vrot.lane.b32.xlu0 %v3928_v56, %s3774_s17  ;;  %v667_v56 = vmul.f32 %v3437_v32, %v4224_v36 }
 0x324   : > { %1552 = vrot.lane.b32.xlu0 %v3935_v59, %s3774_s17 }
 0x326   : > { %v603_v26 = vpop.xlane.xlu0 %602 }
 0x327   : > { %3438 = vrcp.f32 %v603_v26 }
 0x328   : > { %1554 = vrot.lane.b32.xlu0 %v6159_v38, %s3774_s17 }
 0x32a   : > { %v882_v28 = vpop.permute.xlu0 %881 }
 0x32b   : > { %v931_v31 = vsel %vm214_vm0, %v882_v28, 0 }
 0x32c   : > { %954 = vmatpush1.bf16.xpose.msra.mxu1 %v931_v31  ;;  %1556 = vrot.lane.b32.xlu0 %v6160_v18, %s3774_s17  ;;  %v607_v50 = vpop.xlane.xlu1 %606 }
 0x32d   : > { %955 = vmatprep.subr.bf16.mxu1 %v6151_v20  ;;  %3440 = vrcp.f32 %v607_v50 }
 0x330   : > { %1558 = vrot.lane.b32.xlu0 %v6161_v23, %s3774_s17 }
 0x331   : > { %v3439_v57 = vpop.eup %3438 }
 0x332   : > { %v627_v40 = vpop.xlane.xlu1 %626  ;;  %v669_v25 = vmul.f32 %v3439_v57, %v4243_v13  ;;  %v668_v7 = vmul.f32 %v3439_v57, %v4241_v43  ;;  %v6164_v13 = vld [vmem:[#allocation8_spill] sm:$0xff] }
 0x333   : > { %1388 = vrot.lane.b32.xlu1 %v6164_v13, %s3771_s14 }
 0x334   : > { %956 = vmatpush1.bf16.xpose.msra.mxu1 %v934_v27  ;;  %v693_v51 = vpack.c.bf16 %v669_v25, %v667_v56  ;;  %v692_v4 = vpack.c.bf16 %v668_v7, %v666_v30  ;;  %1560 = vrot.lane.b32.xlu0 %v6162_v9, %s3774_s17 }
 0x335   : > { %957 = vmatprep.subr.bf16.mxu1 %v6151_v20 }
 0x336   : > { %3255 = vmatprep.mubr.msk.bf16.mxu1 %vm390_vm1, %v693_v51  ;;  %v886_v36 = vpop.permute.xlu1 %885 }
 0x337   : > { %807 = vmatmul.mubr.bf16.gmra.mrb[16].mxu1 %v692_v4  ;;  %v937_v43 = vsel %vm214_vm0, %v886_v36, 0  ;;  %1390 = vrot.lane.b32.xlu1 %v6165_v34, %s3771_s14  ;;  %v3441_v6 = vpop.eup %3440 }
 0x338   : > { %2224 = vrot.lane.b32.xlu0 %v3889_v29, %s3775_s18  ;;  %v6167_v29 = vld [vmem:[#allocation13_spill] sm:$0xff]  ;;  %v671_v8 = vmul.f32 %v3441_v6, %v4250_v54  ;;  %v670_v45 = vmul.f32 %v3441_v6, %v4248_v14 }
 0x33b   : > { %1394 = vrot.lane.b32.xlu1 %v6166_v61, %s3771_s14 }
 0x33c   : > { %958 = vmatpush1.bf16.xpose.msra.mxu1 %v937_v43  ;;  %2228 = vrot.lane.b32.xlu0 %v3921_v53, %s3775_s18  ;;  %v6168_v53 = vld [vmem:[#allocation7_spill] sm:$0xff] }
 0x33d   : > { %959 = vmatprep.subr.bf16.mxu1 %v6151_v20 }
 0x33f   : > { %1398 = vrot.lane.b32.xlu1 %v6167_v29, %s3771_s14 }
 0x340   : > { %2232 = vrot.lane.b32.xlu0 %v3935_v59, %s3775_s18  ;;  %v6169_v59 = vld [vmem:[#allocation10_spill] sm:$0xff] }
 0x343   : > { %2066 = vrot.lane.b32.xlu1 %v6168_v53, %s3774_s17 }
 0x344   : > { %2236 = vrot.lane.b32.xlu0 %v6160_v18, %s3775_s18 }
 0x347   : > { %2070 = vrot.lane.b32.xlu1 %v6165_v34, %s3774_s17 }
 0x348   : > { %2240 = vrot.lane.b32.xlu0 %v6162_v9, %s3775_s18 }
 0x34b   : > { %2076 = vrot.lane.b32.xlu1 %v6170_v33, %s3774_s17 }
 0x34c   : > { %1386 = vrot.lane.b32.xlu0 %v6168_v53, %s3771_s14 }
 0x34f   : > { %2080 = vrot.lane.b32.xlu1 %v6171_v35, %s3774_s17 }
 0x350   : > { %1392 = vrot.lane.b32.xlu0 %v6169_v59, %s3771_s14 }
 0x353   : > { %2744 = vrot.lane.b32.xlu1 %v6163_v44, %s3775_s18 }
 0x354   : > { %1396 = vrot.lane.b32.xlu0 %v6170_v33, %s3771_s14 }
 0x357   : > { %2748 = vrot.lane.b32.xlu1 %v6164_v13, %s3775_s18 }
 0x358   : > { %1400 = vrot.lane.b32.xlu0 %v6171_v35, %s3771_s14 }
 0x35b   : > { %v611_v2 = vpop.xlane.xlu0 %610  ;;  %2752 = vrot.lane.b32.xlu1 %v6169_v59, %s3775_s18 }
 0x35c   : > { %3442 = vrcp.f32 %v611_v2  ;;  %2064 = vrot.lane.b32.xlu0 %v6163_v44, %s3774_s17 }
 0x35f   : > { %v615_v62 = vpop.xlane.xlu0 %614 }
 0x360   : > { %2068 = vrot.lane.b32.xlu0 %v6164_v13, %s3774_s17  ;;  %3444 = vrcp.f32 %v615_v62 }
 0x363   : > { %v619_v11 = vpop.xlane.xlu0 %618 }
 0x364   : > { %3446 = vrcp.f32 %v619_v11  ;;  %2072 = vrot.lane.b32.xlu0 %v6169_v59, %s3774_s17 }
 0x365   : > { %3448 = vrcp.f32 %v627_v40 }
 0x366   : > { %v3443_v0 = vpop.eup %3442 }
 0x367   : > { %v623_v42 = vpop.xlane.xlu0 %622  ;;  %v673_v52 = vmul.f32 %v3443_v0, %v4282_v46  ;;  %v672_v60 = vmul.f32 %v3443_v0, %v4286_v63 }
 0x368   : > { %3450 = vrcp.f32 %v623_v42  ;;  %2074 = vrot.lane.b32.xlu0 %v6166_v61, %s3774_s17 }
 0x369   : > { %v695_v47 = vpack.c.bf16 %v673_v52, %v671_v8  ;;  %v694_v12 = vpack.c.bf16 %v672_v60, %v670_v45 }
 0x36a   : > { %v3445_v15 = vpop.eup %3444 }
 0x36b   : > { %3256 = vmatprep.mubr.msk.bf16.mxu1 %vm390_vm1, %v695_v47  ;;  %v632_v22 = vpop.xlane.xlu0 %631  ;;  %v675_v14 = vmul.f32 %v3445_v15, %v4290_v3  ;;  %v674_v63 = vmul.f32 %v3445_v15, %v4295_v49 }
 0x36c   : > { %3452 = vrcp.f32 %v632_v22  ;;  %815 = vmatmul.mubr.bf16.gmra.mrb[20].mxu1 %v694_v12  ;;  %2078 = vrot.lane.b32.xlu0 %v6167_v29, %s3774_s17 }
 0x36e   : > { %v3447_v54 = vpop.eup %3446 }
 0x36f   : > { %v677_v46 = vmul.f32 %v3447_v54, %v4299_v48  ;;  %v676_v1 = vmul.f32 %v3447_v54, %v4304_v5  ;;  %v888_v17 = vpop.permute.xlu0 %887  ;;  %v3449_v10 = vpop.eup %3448 }
 0x370   : > { %v940_v39 = vsel %vm214_vm0, %v888_v17, 0  ;;  %2746 = vrot.lane.b32.xlu0 %v6168_v53, %s3775_s18  ;;  %v681_v49 = vmul.f32 %v3449_v10, %v4257_v19  ;;  %v890_v48 = vpop.permute.xlu1 %889  ;;  %v680_v28 = vmul.f32 %v3449_v10, %v4255_v41 }
 0x371   : > { %v697_v38 = vpack.c.bf16 %v677_v46, %v675_v14  ;;  %v696_v18 = vpack.c.bf16 %v676_v1, %v674_v63  ;;  %960 = vmatpush1.bf16.xpose.msra.mxu1 %v940_v39  ;;  %v943_v26 = vsel %vm214_vm0, %v890_v48, 0 }
 0x372   : > { %v3451_v23 = vpop.eup %3450  ;;  %961 = vmatprep.subr.bf16.mxu1 %v6151_v20 }
 0x373   : > { %3257 = vmatprep.mubr.msk.bf16.mxu1 %vm390_vm1, %v697_v38  ;;  %v679_v3 = vmul.f32 %v3451_v23, %v4310_v55  ;;  %v678_v24 = vmul.f32 %v3451_v23, %v4314_v58  ;;  %v860_v56 = vpop.permute.xlu0 %859 }
 0x374   : > { %823 = vmatmul.mubr.bf16.gmra.mrb[24].mxu1 %v696_v18  ;;  %2750 = vrot.lane.b32.xlu0 %v6165_v34, %s3775_s18  ;;  %v856_v31 = vpop.permute.xlu1 %855 }
 0x375   : > { %v699_v5 = vpack.c.bf16 %v681_v49, %v679_v3  ;;  %v698_v55 = vpack.c.bf16 %v680_v28, %v678_v24 }
 0x376   : > { %v3453_v9 = vpop.eup %3452 }
 0x377   : > { %3258 = vmatprep.mubr.msk.bf16.mxu1 %vm390_vm1, %v699_v5  ;;  %v683_v37 = vmul.f32 %v3453_v9, %v4321_v16  ;;  %v682_v50 = vmul.f32 %v3453_v9, %v4317_v21  ;;  %v862_v7 = vpop.permute.xlu0 %861 }
 0x378   : > { %v1563_v32 = vpop.permute.xlu1 %1562 }
 0x379   : > { %962 = vmatpush1.bf16.xpose.msra.mxu1 %v943_v26  ;;  %v701_v19 = vpack.c.bf16 %v683_v37, %v683_v37  ;;  %v700_v58 = vpack.c.bf16 %v682_v50, %v682_v50  ;;  %v1608_v16 = vsel %vm214_vm0, %v1563_v32, 0 }
 0x37a   : > { %1634 = vmatprep.subr.bf16.mxu1 %v6151_v20 }
 0x37b   : > { %v864_v4 = vpop.permute.xlu0 %863 }
 0x37c   : > { %831 = vmatmul.mubr.bf16.gmra.mrb[28].mxu1 %v698_v55  ;;  %v858_v57 = vpop.permute.xlu1 %857 }
 0x37d   : > { %3259 = vmatprep.mubr.msk.bf16.mxu1 %vm390_vm1, %v701_v19 }
 0x37f   : > { %v866_v43 = vpop.permute.xlu0 %865 }
 0x380   : > { %v1565_v41 = vpop.permute.xlu1 %1564 }
 0x381   : > { %v1611_v40 = vsel %vm214_vm0, %v1565_v41, 0 }
 0x383   : > { %v868_v53 = vpop.permute.xlu0 %867 }
 0x384   : > { %839 = vmatmul.mubr.bf16.gmra.mrb[32].mxu1 %v700_v58  ;;  %v1567_v21 = vpop.permute.xlu1 %1566 }
 0x385   : > { %977 = vmatprep.mubr.bf16.mxu1 %v6151_v20  ;;  %v1614_v25 = vsel %vm214_vm0, %v1567_v21, 0 }
 0x387   : > { %v870_v42 = vpop.permute.xlu0 %869 }
 0x388   : > { %v1569_v30 = vpop.permute.xlu1 %1568 }
 0x389   : > { %v1617_v27 = vsel %vm214_vm0, %v1569_v30, 0 }
 0x38b   : > { %v872_v22 = vpop.permute.xlu0 %871 }
 0x38c   : > { %3260 = vmatmul.mubr.msk.bf16.vlgmr.msra.gmra.mrb[36].mxu1 %vm214_vm0, %v856_v31  ;;  %v1571_v51 = vpop.permute.xlu1 %1570 }
 0x38d   : > { %1635 = vmatpush1.bf16.xpose.msra.mxu1 %v1608_v16  ;;  %987 = vmatprep.mubr.bf16.mxu1 %v6151_v20  ;;  %v1620_v36 = vsel %vm214_vm0, %v1571_v51, 0 }
 0x38e   : > { %1636 = vmatprep.subr.bf16.mxu1 %v6151_v20 }
 0x38f   : > { %v1545_v17 = vpop.permute.xlu0 %1544 }
 0x390   : > { %v1573_v44 = vpop.permute.xlu1 %1572 }
 0x391   : > { %v1623_v13 = vsel %vm214_vm0, %v1573_v44, 0 }
 0x393   : > { %v1547_v3 = vpop.permute.xlu0 %1546 }
 0x394   : > { %3261 = vmatmul.mubr.msk.bf16.gmra.mrb[40].mxu1 %vm214_vm0, %v858_v57  ;;  %v1575_v34 = vpop.permute.xlu1 %1574 }
 0x395   : > { %1637 = vmatpush1.bf16.xpose.msra.mxu1 %v1611_v40  ;;  %997 = vmatprep.mubr.bf16.mxu1 %v6151_v20  ;;  %v1626_v59 = vsel %vm214_vm0, %v1575_v34, 0 }
 0x396   : > { %1638 = vmatprep.subr.bf16.mxu1 %v6151_v20 }
 0x397   : > { %v1549_v9 = vpop.permute.xlu0 %1548 }
 0x398   : > { %v1577_v11 = vpop.permute.xlu1 %1576 }
 0x399   : > { %v1629_v8 = vsel %vm214_vm0, %v1577_v11, 0 }
 0x39b   : > { %v1551_v26 = vpop.permute.xlu0 %1550 }
 0x39c   : > { %3262 = vmatmul.mubr.msk.bf16.gmra.mrb[44].mxu1 %vm214_vm0, %v860_v56  ;;  %v1579_v60 = vpop.permute.xlu1 %1578 }
 0x39d   : > { %1639 = vmatpush1.bf16.xpose.msra.mxu1 %v1614_v25  ;;  %1007 = vmatprep.mubr.bf16.mxu1 %v6151_v20  ;;  %v1632_v15 = vsel %vm214_vm0, %v1579_v60, 0 }
 0x39e   : > { %1640 = vmatprep.subr.bf16.mxu1 %v6151_v20 }
 0x39f   : > { %v1553_v55 = vpop.permute.xlu0 %1552 }
 0x3a0   : > { %v2243_v46 = vpop.permute.xlu1 %2242 }
 0x3a1   : > { %v2288_v10 = vsel %vm214_vm0, %v2243_v46, 0 }
 0x3a3   : > { %v1555_v31 = vpop.permute.xlu0 %1554 }
 0x3a4   : > { %3263 = vmatmul.mubr.msk.bf16.gmra.mrb[48].mxu1 %vm214_vm0, %v862_v7  ;;  %v2245_v18 = vpop.permute.xlu1 %2244 }
 0x3a5   : > { %1641 = vmatpush1.bf16.xpose.msra.mxu1 %v1617_v27  ;;  %1017 = vmatprep.mubr.bf16.mxu1 %v6151_v20  ;;  %v2291_v48 = vsel %vm214_vm0, %v2245_v18, 0 }
 0x3a6   : > { %1642 = vmatprep.subr.bf16.mxu1 %v6151_v20 }
 0x3a7   : > { %v1557_v32 = vpop.permute.xlu0 %1556 }
 0x3a8   : > { %v2247_v5 = vpop.permute.xlu1 %2246 }
 0x3a9   : > { %v2294_v37 = vsel %vm214_vm0, %v2247_v5, 0 }
 0x3ab   : > { %v1559_v16 = vpop.permute.xlu0 %1558 }
 0x3ac   : > { %3264 = vmatmul.mubr.msk.bf16.gmra.mrb[52].mxu1 %vm214_vm0, %v864_v4  ;;  %v2249_v24 = vpop.permute.xlu1 %2248 }
 0x3ad   : > { %1643 = vmatpush1.bf16.xpose.msra.mxu1 %v1620_v36  ;;  %1027 = vmatprep.mubr.bf16.mxu1 %v6151_v20  ;;  %v2297_v50 = vsel %vm214_vm0, %v2249_v24, 0 }
 0x3ae   : > { %1644 = vmatprep.subr.bf16.mxu1 %v6151_v20 }
 0x3af   : > { %v1561_v21 = vpop.permute.xlu0 %1560 }
 0x3b0   : > { %v2251_v28 = vpop.permute.xlu1 %2250 }
 0x3b1   : > { %v2300_v41 = vsel %vm214_vm0, %v2251_v28, 0 }
 0x3b3   : > { %v2225_v25 = vpop.permute.xlu0 %2224 }
 0x3b4   : > { %3265 = vmatmul.mubr.msk.bf16.gmra.mrb[56].mxu1 %vm214_vm0, %v866_v43  ;;  %v2253_v19 = vpop.permute.xlu1 %2252 }
 0x3b5   : > { %1645 = vmatpush1.bf16.xpose.msra.mxu1 %v1623_v13  ;;  %1037 = vmatprep.mubr.bf16.mxu1 %v6151_v20  ;;  %v2303_v30 = vsel %vm214_vm0, %v2253_v19, 0 }
 0x3b6   : > { %1646 = vmatprep.subr.bf16.mxu1 %v6151_v20 }
 0x3b7   : > { %v2229_v27 = vpop.permute.xlu0 %2228 }
 0x3b8   : > { %v2255_v58 = vpop.permute.xlu1 %2254 }
 0x3b9   : > { %v2306_v36 = vsel %vm214_vm0, %v2255_v58, 0 }
 0x3bb   : > { %v4600_v4 = vpop.permute.xlu0 %2232 }
 0x3bc   : > { %3266 = vmatmul.mubr.msk.bf16.gmra.mrb[60].mxu1 %vm214_vm0, %v868_v53  ;;  %v2257_v57 = vpop.permute.xlu1 %2256 }
 0x3bd   : > { %1647 = vmatpush1.bf16.xpose.msra.mxu1 %v1626_v59  ;;  %1047 = vmatprep.mubr.bf16.mxu1 %v6151_v20  ;;  %v2309_v59 = vsel %vm214_vm0, %v2257_v57, 0 }
 0x3be   : > { %v4547_v2 = vpop.f32.mrb[0].mxu1  ;;  %1648 = vmatprep.subr.bf16.mxu1 %v6151_v20 }
 0x3bf   : > { %6172 = vst [vmem:[#allocation2_spill] sm:$0xff] %v4547_v2  ;;  %v778_v62 = vpop.f32.mrb[1].mxu1  ;;  %v4606_v43 = vpop.permute.xlu0 %2236 }
 0x3c0   : > { %v4550_v6 = vpop.f32.mrb[2].mxu1  ;;  %v2259_v40 = vpop.permute.xlu1 %2258 }
 0x3c1   : > { %6173 = vst [vmem:[#allocation3_spill] sm:$0xff] %v4550_v6  ;;  %v781_v0 = vpop.f32.mrb[3].mxu1 }
 0x3c3   : > { %v4610_v34 = vpop.permute.xlu0 %2240 }
 0x3c4   : > { %3267 = vmatmul.mubr.msk.bf16.gmra.mrb[64].mxu1 %vm214_vm0, %v870_v42  ;;  %v2227_v56 = vpop.permute.xlu1 %2226 }
 0x3c5   : > { %1649 = vmatpush1.bf16.xpose.msra.mxu1 %v1629_v8  ;;  %1057 = vmatprep.mubr.bf16.mxu1 %v6151_v20 }
 0x3c6   : > { %v4555_v52 = vpop.f32.mrb[4].mxu1  ;;  %1650 = vmatprep.subr.bf16.mxu1 %v6151_v20 }
 0x3c7   : > { %6174 = vst [vmem:[#allocation4_spill] sm:$0xff] %v4555_v52  ;;  %v786_v45 = vpop.f32.mrb[5].mxu1  ;;  %v1387_v0 = vpop.permute.xlu0 %1386 }
 0x3c8   : > { %v4558_v47 = vpop.f32.mrb[6].mxu1  ;;  %v4593_v7 = vpop.permute.xlu1 %2230  ;;  %v2312_v45 = vsel %vm214_vm0, %v2259_v40, 0 }
 0x3c9   : > { %6175 = vst [vmem:[#allocation5_spill] sm:$0xff] %v4558_v47  ;;  %v789_v12 = vpop.f32.mrb[7].mxu1 }
 0x3cb   : > { %v1393_v12 = vpop.permute.xlu0 %1392 }
 0x3cc   : > { %3268 = vmatmul.mubr.msk.bf16.gmra.mrb[68].mxu1 %vm214_vm0, %v872_v22  ;;  %v4598_v51 = vpop.permute.xlu1 %2234 }
 0x3cd   : > { %1651 = vmatpush1.bf16.xpose.msra.mxu1 %v1632_v15  ;;  %1666 = vmatprep.mubr.bf16.mxu1 %v6151_v20 }
 0x3ce   : > { %v4563_v54 = vpop.f32.mrb[8].mxu1  ;;  %2314 = vmatprep.subr.bf16.mxu1 %v6151_v20 }
 0x3cf   : > { %6176 = vst [vmem:[#allocation6_spill] sm:$0xff] %v4563_v54  ;;  %v794_v14 = vpop.f32.mrb[9].mxu1  ;;  %v1397_v15 = vpop.permute.xlu0 %1396 }
 0x3d0   : > { %v4566_v63 = vpop.f32.mrb[10].mxu1  ;;  %v4603_v44 = vpop.permute.xlu1 %2238 }
 0x3d1   : > { %6177 = vst [vmem:[#allocation8_spill] sm:$0xff] %v4566_v63  ;;  %v797_v1 = vpop.f32.mrb[11].mxu1 }
 0x3d3   : > { %v1401_v46 = vpop.permute.xlu0 %1400 }
 0x3d4   : > { %3278 = vmatmul.mubr.msk.bf16.vlgmr.msra.gmra.mrb[72].mxu1 %vm214_vm0, %v1545_v17  ;;  %v1385_v13 = vpop.permute.xlu1 %1384  ;;  %v1438_v17 = vsel %vm738_vm4, %v1401_v46, 0 }
 0x3d5   : > { %2315 = vmatpush1.bf16.xpose.msra.mxu1 %v2288_v10  ;;  %1676 = vmatprep.mubr.bf16.mxu1 %v6151_v20 }
 0x3d6   : > { %v4571_v39 = vpop.f32.mrb[12].mxu1  ;;  %2316 = vmatprep.subr.bf16.mxu1 %v6151_v20  ;;  %1441 = vmatpush1.bf16.msra.mxu0 %v1385_v13 }
 0x3d7   : > { %6178 = vst [vmem:[#allocation9_spill] sm:$0xff] %v4571_v39  ;;  %v802_v38 = vpop.f32.mrb[13].mxu1  ;;  %1442 = vmatprep.subr.bf16.mxu0 %v6151_v20  ;;  %v4638_v10 = vpop.permute.xlu0 %2064 }
 0x3d8   : > { %v4574_v23 = vpop.f32.mrb[14].mxu1  ;;  %v1389_v8 = vpop.permute.xlu1 %1388  ;;  %6183 = vst [vmem:[#allocation16_spill] sm:$0xff] %v4638_v10 }
 0x3d9   : > { %6179 = vst [vmem:[#allocation11_spill] sm:$0xff] %v4574_v23  ;;  %v805_v49 = vpop.f32.mrb[15].mxu1 }
 0x3da   : > { %1443 = vmatpush1.bf16.msra.mxu0 %v1387_v0 }
 0x3db   : > { %1444 = vmatprep.subr.bf16.mxu0 %v6151_v20  ;;  %v4644_v18 = vpop.permute.xlu0 %2068 }
 0x3dc   : > { %3279 = vmatmul.mubr.msk.bf16.gmra.mrb[76].mxu1 %vm214_vm0, %v1547_v3  ;;  %v1391_v60 = vpop.permute.xlu1 %1390  ;;  %6185 = vst [vmem:[#allocation18_spill] sm:$0xff] %v4644_v18 }
 0x3dd   : > { %2317 = vmatpush1.bf16.xpose.msra.mxu1 %v2291_v48  ;;  %1686 = vmatprep.mubr.bf16.mxu1 %v6151_v20 }
 0x3de   : > { %2318 = vmatprep.subr.bf16.mxu1 %v6151_v20  ;;  %1445 = vmatpush1.bf16.msra.mxu0 %v1389_v8 }
 0x3df   : > { %1446 = vmatprep.subr.bf16.mxu0 %v6151_v20  ;;  %v4650_v49 = vpop.permute.xlu0 %2072 }
 0x3e0   : > { %v1395_v22 = vpop.permute.xlu1 %1394  ;;  %6187 = vst [vmem:[#allocation20_spill] sm:$0xff] %v4650_v49 }
 0x3e2   : > { %1447 = vmatpush1.bf16.msra.mxu0 %v1391_v60 }
 0x3e3   : > { %1448 = vmatprep.subr.bf16.mxu0 %v6151_v20  ;;  %v4656_v5 = vpop.permute.xlu0 %2074 }
 0x3e4   : > { %3280 = vmatmul.mubr.msk.bf16.gmra.mrb[80].mxu1 %vm214_vm0, %v1549_v9  ;;  %v1399_v14 = vpop.permute.xlu1 %1398  ;;  %6189 = vst [vmem:[#allocation22_spill] sm:$0xff] %v4656_v5 }
 0x3e5   : > { %2319 = vmatpush1.bf16.xpose.msra.mxu1 %v2294_v37  ;;  %1696 = vmatprep.mubr.bf16.mxu1 %v6151_v20 }
 0x3e6   : > { %2320 = vmatprep.subr.bf16.mxu1 %v6151_v20  ;;  %1449 = vmatpush1.bf16.msra.mxu0 %v1393_v12 }
 0x3e7   : > { %1450 = vmatprep.subr.bf16.mxu0 %v6151_v20  ;;  %v4661_v24 = vpop.permute.xlu0 %2078 }
 0x3e8   : > { %v4635_v1 = vpop.permute.xlu1 %2066  ;;  %6191 = vst [vmem:[#allocation24_spill] sm:$0xff] %v4661_v24 }
 0x3e9   : > { %6182 = vst [vmem:[#allocation15_spill] sm:$0xff] %v4635_v1 }
 0x3ea   : > { %1451 = vmatpush1.bf16.msra.mxu0 %v1395_v22 }
 0x3eb   : > { %1452 = vmatprep.subr.bf16.mxu0 %v6151_v20 }
 0x3ec   : > { %3281 = vmatmul.mubr.msk.bf16.gmra.mrb[84].mxu1 %vm214_vm0, %v1551_v26  ;;  %v4642_v38 = vpop.permute.xlu1 %2070  ;;  %v4667_v26 = vpop.permute.xlu0 %2746 }
 0x3ed   : > { %2321 = vmatpush1.bf16.xpose.msra.mxu1 %v2297_v50  ;;  %1706 = vmatprep.mubr.bf16.mxu1 %v6151_v20  ;;  %6184 = vst [vmem:[#allocation17_spill] sm:$0xff] %v4642_v38  ;;  %6192 = vst [vmem:[#allocation25_spill] sm:$0xff] %v4667_v26 }
 0x3ee   : > { %2322 = vmatprep.subr.bf16.mxu1 %v6151_v20  ;;  %1453 = vmatpush1.bf16.msra.mxu0 %v1397_v15 }
 0x3ef   : > { %1454 = vmatprep.subr.bf16.mxu0 %v6151_v20 }
 0x3f0   : > { %v4648_v3 = vpop.permute.xlu1 %2076  ;;  %v4680_v50 = vpop.permute.xlu0 %2750 }
 0x3f1   : > { %6186 = vst [vmem:[#allocation19_spill] sm:$0xff] %v4648_v3  ;;  %6196 = vst [vmem:[#allocation29_spill] sm:$0xff] %v4680_v50 }
 0x3f2   : > { %1455 = vmatpush1.bf16.msra.mxu0 %v1399_v14 }
 0x3f3   : > { %1456 = vmatprep.subr.bf16.mxu0 %v6151_v20 }
 0x3f4   : > { %3282 = vmatmul.mubr.msk.bf16.gmra.mrb[88].mxu1 %vm214_vm0, %v1553_v55  ;;  %v4654_v48 = vpop.permute.xlu1 %2080 }
 0x3f5   : > { %2323 = vmatpush1.bf16.xpose.msra.mxu1 %v2300_v41  ;;  %1716 = vmatprep.mubr.bf16.mxu1 %v6151_v20  ;;  %6188 = vst [vmem:[#allocation21_spill] sm:$0xff] %v4654_v48 }
 0x3f6   : > { %2324 = vmatprep.subr.bf16.mxu1 %v6151_v20  ;;  %1457 = vmatpush1.bf16.msra.mxu0 %v1438_v17 }
 0x3f7   : > { %2120 = vmatprep.subr.bf16.mxu0 %v6151_v20 }
 0x3f8   : > { %v4659_v9 = vpop.permute.xlu1 %2744 }
 0x3f9   : > { %6190 = vst [vmem:[#allocation23_spill] sm:$0xff] %v4659_v9 }
 0x3fc   : > { %3283 = vmatmul.mubr.msk.bf16.gmra.mrb[92].mxu1 %vm214_vm0, %v1555_v31  ;;  %v4671_v37 = vpop.permute.xlu1 %2748 }
 0x3fd   : > { %2325 = vmatpush1.bf16.xpose.msra.mxu1 %v2303_v30  ;;  %1726 = vmatprep.mubr.bf16.mxu1 %v6151_v20  ;;  %6193 = vst [vmem:[#allocation26_spill] sm:$0xff] %v4671_v37 }
 0x3fe   : > { %2326 = vmatprep.subr.bf16.mxu1 %v6151_v20 }
 0x400   : > { %v4686_v58 = vpop.permute.xlu1 %2752 }
 0x401   : > { %6197 = vst [vmem:[#allocation30_spill] sm:$0xff] %v4686_v58 }
 0x404   : > { %3284 = vmatmul.mubr.msk.bf16.gmra.mrb[96].mxu1 %vm214_vm0, %v1557_v32 }
 0x405   : > { %2327 = vmatpush1.bf16.xpose.msra.mxu1 %v2306_v36  ;;  %1736 = vmatprep.mubr.bf16.mxu1 %v6151_v20 }
 0x406   : > { %2328 = vmatprep.subr.bf16.mxu1 %v6151_v20 }
 0x40a   : > { %v4613_v53 = vpop.f32.mrb[16].mxu1 }
 0x40b   : > { %6180 = vst [vmem:[#allocation7_spill] sm:$0xff] %v4613_v53  ;;  %v810_v62 = vpop.f32.mrb[17].mxu1 }
 0x40c   : > { %v4616_v11 = vpop.f32.mrb[18].mxu1  ;;  %3285 = vmatmul.mubr.msk.bf16.gmra.mrb[100].mxu1 %vm214_vm0, %v1559_v16 }
 0x40d   : > { %6181 = vst [vmem:[#allocation10_spill] sm:$0xff] %v4616_v11  ;;  %v813_v42 = vpop.f32.mrb[19].mxu1  ;;  %2329 = vmatpush1.bf16.xpose.msra.mxu1 %v2309_v59  ;;  %1746 = vmatprep.mubr.bf16.mxu1 %v6151_v20 }
 0x40e   : > { %2330 = vmatprep.subr.bf16.mxu1 %v6151_v20 }
 0x414   : > { %3286 = vmatmul.mubr.msk.bf16.gmra.mrb[104].mxu1 %vm214_vm0, %v1561_v21 }
 0x415   : > { %2331 = vmatpush1.bf16.xpose.msra.mxu1 %v2312_v45  ;;  %2346 = vmatprep.mubr.bf16.mxu1 %v6151_v20 }
 0x416   : > { %3316 = vmatprep.subr.bf16.mxu1 %v6151_v20 }
 0x41c   : > { %3296 = vmatmul.mubr.msk.bf16.vlgmr.msra.gmra.mrb[108].mxu1 %vm214_vm0, %v2225_v25 }
 0x41d   : > { %2356 = vmatprep.mubr.bf16.mxu1 %v6151_v20  ;;  %3325 = vmatpush1.bf16.msra.mxu1 %v4659_v9 }
 0x41e   : > { %3317 = vmatprep.subr.bf16.mxu1 %v6151_v20 }
 0x421   : > { %3326 = vmatpush1.bf16.msra.mxu1 %v4667_v26 }
 0x422   : > { %3318 = vmatprep.subr.bf16.mxu1 %v6151_v20 }
 0x424   : > { %3297 = vmatmul.mubr.msk.bf16.gmra.mrb[112].mxu1 %vm214_vm0, %v2227_v56 }
 0x425   : > { %2366 = vmatprep.mubr.bf16.mxu1 %v6151_v20  ;;  %3327 = vmatpush1.bf16.msra.mxu1 %v4671_v37 }
 0x426   : > { %3319 = vmatprep.subr.bf16.mxu1 %v6151_v20 }
 0x429   : > { %3328 = vmatpush1.bf16.msra.mxu1 %v4680_v50 }
 0x42a   : > { %3320 = vmatprep.subr.bf16.mxu1 %v6151_v20 }
 0x42c   : > { %3298 = vmatmul.mubr.msk.bf16.gmra.mrb[116].mxu1 %vm214_vm0, %v2229_v27 }
 0x42d   : > { %2376 = vmatprep.mubr.bf16.mxu1 %v6151_v20  ;;  %3329 = vmatpush1.bf16.msra.mxu1 %v4686_v58 }
 0x42e   : > { %3321 = vmatprep.subr.bf16.mxu1 %v6151_v20 }
 0x434   : > { %3299 = vmatmul.mubr.msk.bf16.gmra.mrb[120].mxu1 %vm214_vm0, %v4593_v7 }
 0x435   : > { %2386 = vmatprep.mubr.bf16.mxu1 %v6151_v20 }
 0x43c   : > { %3300 = vmatmul.mubr.msk.bf16.gmra.mrb[124].mxu1 %vm214_vm0, %v4600_v4 }
 0x43d   : > { %2396 = vmatprep.mubr.bf16.mxu1 %v6151_v20 }
 0x43f   : > { %v4674_v28 = vpop.f32.mrb[20].mxu1 }
 0x440   : > { %6194 = vst [vmem:[#allocation27_spill] sm:$0xff] %v4674_v28  ;;  %v818_v55 = vpop.f32.mrb[21].mxu1 }
 0x441   : > { %v4676_v19 = vpop.f32.mrb[22].mxu1 }
 0x442   : > { %6195 = vst [vmem:[#allocation28_spill] sm:$0xff] %v4676_v19  ;;  %v821_v31 = vpop.f32.mrb[23].mxu1 }
 0x444   : > { %3301 = vmatmul.mubr.msk.bf16.gmra.mrb[128].mxu1 %vm214_vm0, %v4598_v51 }
 0x445   : > { %2406 = vmatprep.mubr.bf16.mxu1 %v6151_v20 }
 0x447   : > { %v4689_v32 = vpop.f32.mrb[24].mxu1 }
 0x448   : > { %6198 = vst [vmem:[#allocation31_spill] sm:$0xff] %v4689_v32  ;;  %v826_v57 = vpop.f32.mrb[25].mxu1 }
 0x449   : > { %v4691_v16 = vpop.f32.mrb[26].mxu1 }
 0x44a   : > { %6199 = vst [vmem:[#allocation32_spill] sm:$0xff] %v4691_v16  ;;  %v829_v41 = vpop.f32.mrb[27].mxu1 }
 0x44c   : > { %3302 = vmatmul.mubr.msk.bf16.gmra.mrb[132].mxu1 %vm214_vm0, %v4606_v43 }
 0x44d   : > { %2416 = vmatprep.mubr.bf16.mxu1 %v6151_v20 }
 0x44f   : > { %v4698_v40 = vpop.f32.mrb[28].mxu1 }
 0x450   : > { %6200 = vst [vmem:[#allocation33_spill] sm:$0xff] %v4698_v40  ;;  %v834_v21 = vpop.f32.mrb[29].mxu1 }
 0x451   : > { %v4700_v56 = vpop.f32.mrb[30].mxu1 }
 0x452   : > { %6201 = vst [vmem:[#allocation34_spill] sm:$0xff] %v4700_v56  ;;  %v837_v25 = vpop.f32.mrb[31].mxu1 }
 0x454   : > { %3303 = vmatmul.mubr.msk.bf16.gmra.mrb[136].mxu1 %vm214_vm0, %v4603_v44 }
 0x455   : > { %2426 = vmatprep.mubr.bf16.mxu1 %v6151_v20 }
 0x457   : > { %v4705_v30 = vpop.f32.mrb[32].mxu1 }
 0x458   : > { %6202 = vst [vmem:[#allocation35_spill] sm:$0xff] %v4705_v30  ;;  %v842_v7 = vpop.f32.mrb[33].mxu1 }
 0x459   : > { %v843_v27 = vpop.f32.mrb[34].mxu1 }
 0x45a   : > { %v844_v51 = vpop.f32.mrb[35].mxu1 }
 0x45c   : > { %3304 = vmatmul.mubr.msk.bf16.gmra.mrb[140].mxu1 %vm214_vm0, %v4610_v34 }
 0x45f   : > { %v4709_v4 = vpop.f32.mrb[36].mxu1 }
 0x460   : > { %v4711_v36 = vpop.f32.mrb[37].mxu1 }
 0x461   : > { %v1066_v43 = vsel %vm390_vm1, %v4711_v36, -inf  ;;  %v4715_v13 = vpop.f32.mrb[38].mxu1 }
 0x462   : > { %v1067_v44 = vmax.f32 %v4709_v4, %v1066_v43  ;;  %v4718_v59 = vpop.f32.mrb[39].mxu1 }
 0x463   : > { %v1070_v62 = vsel %vm390_vm1, %v4718_v59, -inf }
 0x464   : > { %v1071_v0 = vmax.f32 %v4715_v13, %v1070_v62  ;;  %1068 = vmax.xlane.f32.xlu1 %v1067_v44 }
 0x466   : > { %1072 = vmax.xlane.f32.xlu0 %v1071_v0 }
 0x467   : > { %v4723_v34 = vpop.f32.mrb[40].mxu1 }
 0x468   : > { %v4725_v42 = vpop.f32.mrb[41].mxu1 }
 0x469   : > { %v1074_v8 = vsel %vm390_vm1, %v4725_v42, -inf  ;;  %v4729_v45 = vpop.f32.mrb[42].mxu1 }
 0x46a   : > { %v1075_v60 = vmax.f32 %v4723_v34, %v1074_v8  ;;  %v4732_v12 = vpop.f32.mrb[43].mxu1 }
 0x46b   : > { %v1078_v22 = vsel %vm390_vm1, %v4732_v12, -inf }
 0x46c   : > { %v1079_v15 = vmax.f32 %v4729_v45, %v1078_v22  ;;  %1076 = vmax.xlane.f32.xlu0 %v1075_v60 }
 0x46e   : > { %1080 = vmax.xlane.f32.xlu1 %v1079_v15 }
 0x46f   : > { %v4737_v14 = vpop.f32.mrb[44].mxu1 }
 0x470   : > { %v4739_v46 = vpop.f32.mrb[45].mxu1 }
 0x471   : > { %v1082_v17 = vsel %vm390_vm1, %v4739_v46, -inf  ;;  %v4743_v55 = vpop.f32.mrb[46].mxu1 }
 0x472   : > { %v1083_v31 = vmax.f32 %v4737_v14, %v1082_v17  ;;  %v4746_v57 = vpop.f32.mrb[47].mxu1 }
 0x473   : > { %v1086_v41 = vsel %vm390_vm1, %v4746_v57, -inf }
 0x474   : > { %v1087_v21 = vmax.f32 %v4743_v55, %v1086_v41  ;;  %1084 = vmax.xlane.f32.xlu0 %v1083_v31 }
 0x476   : > { %1088 = vmax.xlane.f32.xlu1 %v1087_v21 }
 0x477   : > { %v4751_v25 = vpop.f32.mrb[48].mxu1 }
 0x478   : > { %v4753_v7 = vpop.f32.mrb[49].mxu1 }
 0x479   : > { %v1090_v27 = vsel %vm390_vm1, %v4753_v7, -inf  ;;  %v4757_v51 = vpop.f32.mrb[50].mxu1 }
 0x47a   : > { %v1091_v43 = vmax.f32 %v4751_v25, %v1090_v27  ;;  %v4760_v44 = vpop.f32.mrb[51].mxu1 }
 0x47b   : > { %v1094_v62 = vsel %vm390_vm1, %v4760_v44, -inf }
 0x47c   : > { %v1095_v0 = vmax.f32 %v4757_v51, %v1094_v62  ;;  %1092 = vmax.xlane.f32.xlu0 %v1091_v43 }
 0x47e   : > { %1096 = vmax.xlane.f32.xlu1 %v1095_v0 }
 0x47f   : > { %v4765_v8 = vpop.f32.mrb[52].mxu1 }
 0x480   : > { %v4767_v60 = vpop.f32.mrb[53].mxu1 }
 0x481   : > { %v1098_v22 = vsel %vm390_vm1, %v4767_v60, -inf  ;;  %v4771_v15 = vpop.f32.mrb[54].mxu1 }
 0x482   : > { %v1099_v17 = vmax.f32 %v4765_v8, %v1098_v22  ;;  %v4774_v31 = vpop.f32.mrb[55].mxu1 }
 0x483   : > { %v1102_v41 = vsel %vm390_vm1, %v4774_v31, -inf }
 0x484   : > { %v1103_v21 = vmax.f32 %v4771_v15, %v1102_v41  ;;  %1100 = vmax.xlane.f32.xlu0 %v1099_v17 }
 0x486   : > { %1104 = vmax.xlane.f32.xlu1 %v1103_v21 }
 0x487   : > { %v4779_v27 = vpop.f32.mrb[56].mxu1 }
 0x488   : > { %v4781_v43 = vpop.f32.mrb[57].mxu1 }
 0x489   : > { %v1106_v62 = vsel %vm390_vm1, %v4781_v43, -inf  ;;  %v4785_v0 = vpop.f32.mrb[58].mxu1 }
 0x48a   : > { %v1107_v22 = vmax.f32 %v4779_v27, %v1106_v62  ;;  %v4788_v6 = vpop.f32.mrb[59].mxu1 }
 0x48b   : > { %v1110_v30 = vsel %vm390_vm1, %v4788_v6, -inf }
 0x48c   : > { %v1111_v41 = vmax.f32 %v4785_v0, %v1110_v30  ;;  %1108 = vmax.xlane.f32.xlu0 %v1107_v22 }
 0x48e   : > { %1112 = vmax.xlane.f32.xlu1 %v1111_v41 }
 0x48f   : > { %v4793_v17 = vpop.f32.mrb[60].mxu1 }
 0x490   : > { %v4795_v21 = vpop.f32.mrb[61].mxu1 }
 0x491   : > { %v1114_v56 = vsel %vm390_vm1, %v4795_v21, -inf  ;;  %v4799_v40 = vpop.f32.mrb[62].mxu1 }
 0x492   : > { %v1115_v62 = vmax.f32 %v4793_v17, %v1114_v56  ;;  %v4802_v16 = vpop.f32.mrb[63].mxu1 }
 0x493   : > { %v1118_v32 = vsel %vm390_vm1, %v4802_v16, -inf }
 0x494   : > { %v1119_v30 = vmax.f32 %v4799_v40, %v1118_v32  ;;  %1116 = vmax.xlane.f32.xlu0 %v1115_v62 }
 0x496   : > { %1120 = vmax.xlane.f32.xlu1 %v1119_v30 }
 0x497   : > { %v4807_v22 = vpop.f32.mrb[64].mxu1 }
 0x498   : > { %v4809_v41 = vpop.f32.mrb[65].mxu1 }
 0x499   : > { %v1122_v19 = vsel %vm390_vm1, %v4809_v41, -inf  ;;  %v4813_v28 = vpop.f32.mrb[66].mxu1 }
 0x49a   : > { %v1123_v56 = vmax.f32 %v4807_v22, %v1122_v19  ;;  %v4816_v11 = vpop.f32.mrb[67].mxu1 }
 0x49b   : > { %v1126_v53 = vsel %vm390_vm1, %v4816_v11, -inf }
 0x49c   : > { %v1127_v32 = vmax.f32 %v4813_v28, %v1126_v53  ;;  %1124 = vmax.xlane.f32.xlu0 %v1123_v56 }
 0x49e   : > { %1128 = vmax.xlane.f32.xlu1 %v1127_v32 }
 0x49f   : > { %v4821_v62 = vpop.f32.mrb[68].mxu1 }
 0x4a0   : > { %v1130_v30 = vsel %vm455_vm2, %v4821_v62, -inf  ;;  %v4825_v23 = vpop.f32.mrb[69].mxu1 }
 0x4a1   : > { %v1131_v39 = vsel %vm457_vm3, %v4825_v23, -inf  ;;  %v1063_v19 = vpop.f32.mrb[70].mxu1 }
 0x4a2   : > { %v1132_v63 = vmax.f32 %v1130_v30, %v1131_v39  ;;  %v1064_v54 = vpop.f32.mrb[71].mxu1 }
 0x4a4   : > { %1133 = vmax.xlane.f32.xlu0 %v1132_v63 }
 0x4a7   : > { %v4829_v47 = vpop.f32.mrb[72].mxu1 }
 0x4a8   : > { %v4831_v52 = vpop.f32.mrb[73].mxu1 }
 0x4a9   : > { %v1755_v53 = vsel %vm390_vm1, %v4831_v52, -inf  ;;  %v4835_v56 = vpop.f32.mrb[74].mxu1 }
 0x4aa   : > { %v1756_v32 = vmax.f32 %v4829_v47, %v1755_v53  ;;  %v4838_v2 = vpop.f32.mrb[75].mxu1 }
 0x4ab   : > { %v1759_v58 = vsel %vm390_vm1, %v4838_v2, -inf }
 0x4ac   : > { %v1760_v39 = vmax.f32 %v4835_v56, %v1759_v58  ;;  %1757 = vmax.xlane.f32.xlu1 %v1756_v32 }
 0x4ae   : > { %1761 = vmax.xlane.f32.xlu0 %v1760_v39 }
 0x4af   : > { %v4843_v54 = vpop.f32.mrb[76].mxu1 }
 0x4b0   : > { %v4845_v63 = vpop.f32.mrb[77].mxu1 }
 0x4b1   : > { %v1763_v30 = vsel %vm390_vm1, %v4845_v63, -inf  ;;  %v4849_v19 = vpop.f32.mrb[78].mxu1 }
 0x4b2   : > { %v1764_v53 = vmax.f32 %v4843_v54, %v1763_v30  ;;  %v4852_v50 = vpop.f32.mrb[79].mxu1 }
 0x4b3   : > { %v1767_v37 = vsel %vm390_vm1, %v4852_v50, -inf }
 0x4b4   : > { %v1768_v58 = vmax.f32 %v4849_v19, %v1767_v37  ;;  %1765 = vmax.xlane.f32.xlu1 %v1764_v53 }
 0x4b6   : > { %1769 = vmax.xlane.f32.xlu0 %v1768_v58 }
 0x4b7   : > { %v4857_v32 = vpop.f32.mrb[80].mxu1 }
 0x4b8   : > { %v4859_v39 = vpop.f32.mrb[81].mxu1 }
 0x4b9   : > { %v1771_v26 = vsel %vm390_vm1, %v4859_v39, -inf  ;;  %v4863_v9 = vpop.f32.mrb[82].mxu1 }
 0x4ba   : > { %v1772_v30 = vmax.f32 %v4857_v32, %v1771_v26  ;;  %v4866_v48 = vpop.f32.mrb[83].mxu1 }
 0x4bb   : > { %v1775_v35 = vsel %vm390_vm1, %v4866_v48, -inf }
 0x4bc   : > { %1773 = vmax.xlane.f32.xlu0 %v1772_v30  ;;  %v1776_v37 = vmax.f32 %v4863_v9, %v1775_v35 }
 0x4bf   : > { %v4871_v53 = vpop.f32.mrb[84].mxu1 }
 0x4c0   : > { %1777 = vmax.xlane.f32.xlu0 %v1776_v37  ;;  %v4873_v58 = vpop.f32.mrb[85].mxu1 }
 0x4c1   : > { %v1779_v24 = vsel %vm390_vm1, %v4873_v58, -inf  ;;  %v4877_v3 = vpop.f32.mrb[86].mxu1 }
 0x4c2   : > { %6203 = vst [vmem:[#allocation36_spill] sm:$0xff] %v4877_v3  ;;  %v1780_v26 = vmax.f32 %v4871_v53, %v1779_v24  ;;  %v4880_v5 = vpop.f32.mrb[87].mxu1 }
 0x4c3   : > { %6204 = vst [vmem:[#allocation37_spill] sm:$0xff] %v4880_v5  ;;  %v1783_v49 = vsel %vm390_vm1, %v4880_v5, -inf }
 0x4c4   : > { %1781 = vmax.xlane.f32.xlu0 %v1780_v26  ;;  %v1784_v35 = vmax.f32 %v4877_v3, %v1783_v49 }
 0x4c7   : > { %v4885_v30 = vpop.f32.mrb[88].mxu1 }
 0x4c8   : > { %6205 = vst [vmem:[#allocation38_spill] sm:$0xff] %v4885_v30  ;;  %1785 = vmax.xlane.f32.xlu0 %v1784_v35  ;;  %v4887_v37 = vpop.f32.mrb[89].mxu1 }
 0x4c9   : > { %6206 = vst [vmem:[#allocation39_spill] sm:$0xff] %v4887_v37  ;;  %v1787_v29 = vsel %vm390_vm1, %v4887_v37, -inf  ;;  %v4891_v38 = vpop.f32.mrb[90].mxu1 }
 0x4ca   : > { %6207 = vst [vmem:[#allocation40_spill] sm:$0xff] %v4891_v38  ;;  %v1788_v24 = vmax.f32 %v4885_v30, %v1787_v29  ;;  %v4894_v18 = vpop.f32.mrb[91].mxu1 }
 0x4cb   : > { %6208 = vst [vmem:[#allocation41_spill] sm:$0xff] %v4894_v18  ;;  %v1791_v1 = vsel %vm390_vm1, %v4894_v18, -inf }
 0x4cc   : > { %v1792_v26 = vmax.f32 %v4891_v38, %v1791_v1  ;;  %1789 = vmax.xlane.f32.xlu0 %v1788_v24 }
 0x4ce   : > { %1793 = vmax.xlane.f32.xlu1 %v1792_v26 }
 0x4cf   : > { %v4899_v49 = vpop.f32.mrb[92].mxu1 }
 0x4d0   : > { %6209 = vst [vmem:[#allocation42_spill] sm:$0xff] %v4899_v49  ;;  %v4901_v35 = vpop.f32.mrb[93].mxu1 }
 0x4d1   : > { %6210 = vst [vmem:[#allocation43_spill] sm:$0xff] %v4901_v35  ;;  %v1795_v20 = vsel %vm390_vm1, %v4901_v35, -inf  ;;  %v4905_v10 = vpop.f32.mrb[94].mxu1 }
 0x4d2   : > { %6211 = vst [vmem:[#allocation44_spill] sm:$0xff] %v4905_v10  ;;  %v1796_v29 = vmax.f32 %v4899_v49, %v1795_v20  ;;  %v4908_v33 = vpop.f32.mrb[95].mxu1 }
 0x4d3   : > { %6212 = vst [vmem:[#allocation45_spill] sm:$0xff] %v4908_v33  ;;  %v1799_v18 = vsel %vm390_vm1, %v4908_v33, -inf }
 0x4d4   : > { %v1800_v1 = vmax.f32 %v4905_v10, %v1799_v18  ;;  %1797 = vmax.xlane.f32.xlu0 %v1796_v29 }
 0x4d6   : > { %1801 = vmax.xlane.f32.xlu1 %v1800_v1 }
 0x4d7   : > { %v4913_v24 = vpop.f32.mrb[96].mxu1 }
 0x4d8   : > { %6213 = vst [vmem:[#allocation46_spill] sm:$0xff] %v4913_v24  ;;  %v4915_v26 = vpop.f32.mrb[97].mxu1 }
 0x4d9   : > { %6214 = vst [vmem:[#allocation47_spill] sm:$0xff] %v4915_v26  ;;  %v1803_v35 = vsel %vm390_vm1, %v4915_v26, -inf  ;;  %v4919_v38 = vpop.f32.mrb[98].mxu1 }
 0x4da   : > { %6215 = vst [vmem:[#allocation48_spill] sm:$0xff] %v4919_v38  ;;  %v1804_v20 = vmax.f32 %v4913_v24, %v1803_v35  ;;  %v4922_v49 = vpop.f32.mrb[99].mxu1 }
 0x4db   : > { %6216 = vst [vmem:[#allocation49_spill] sm:$0xff] %v4922_v49  ;;  %v1807_v33 = vsel %vm390_vm1, %v4922_v49, -inf }
 0x4dc   : > { %v1808_v18 = vmax.f32 %v4919_v38, %v1807_v33  ;;  %1805 = vmax.xlane.f32.xlu0 %v1804_v20 }
 0x4de   : > { %1809 = vmax.xlane.f32.xlu1 %v1808_v18 }
 0x4df   : > { %v4927_v29 = vpop.f32.mrb[100].mxu1 }
 0x4e0   : > { %6217 = vst [vmem:[#allocation50_spill] sm:$0xff] %v4927_v29  ;;  %v4929_v1 = vpop.f32.mrb[101].mxu1 }
 0x4e1   : > { %6218 = vst [vmem:[#allocation51_spill] sm:$0xff] %v4929_v1  ;;  %v1811_v26 = vsel %vm390_vm1, %v4929_v1, -inf  ;;  %v4933_v10 = vpop.f32.mrb[102].mxu1 }
 0x4e2   : > { %6219 = vst [vmem:[#allocation52_spill] sm:$0xff] %v4933_v10  ;;  %v1812_v35 = vmax.f32 %v4927_v29, %v1811_v26  ;;  %v4936_v24 = vpop.f32.mrb[103].mxu1 }
 0x4e3   : > { %6220 = vst [vmem:[#allocation53_spill] sm:$0xff] %v4936_v24  ;;  %v1815_v49 = vsel %vm390_vm1, %v4936_v24, -inf }
 0x4e4   : > { %1813 = vmax.xlane.f32.xlu1 %v1812_v35  ;;  %v1816_v33 = vmax.f32 %v4933_v10, %v1815_v49 }
 0x4e7   : > { %v4941_v20 = vpop.f32.mrb[104].mxu1 }
 0x4e8   : > { %6221 = vst [vmem:[#allocation54_spill] sm:$0xff] %v4941_v20  ;;  %v1819_v18 = vsel %vm455_vm2, %v4941_v20, -inf  ;;  %1817 = vmax.xlane.f32.xlu1 %v1816_v33  ;;  %v4945_v38 = vpop.f32.mrb[105].mxu1 }
 0x4e9   : > { %6222 = vst [vmem:[#allocation55_spill] sm:$0xff] %v4945_v38  ;;  %v1820_v1 = vsel %vm457_vm3, %v4945_v38, -inf  ;;  %v1752_v26 = vpop.f32.mrb[106].mxu1 }
 0x4ea   : > { %v1821_v29 = vmax.f32 %v1819_v18, %v1820_v1  ;;  %v1753_v30 = vpop.f32.mrb[107].mxu1 }
 0x4ec   : > { %1822 = vmax.xlane.f32.xlu0 %v1821_v29 }
 0x4ef   : > { %v4949_v37 = vpop.f32.mrb[108].mxu1 }
 0x4f0   : > { %v4951_v35 = vpop.f32.mrb[109].mxu1 }
 0x4f1   : > { %6223 = vst [vmem:[#allocation56_spill] sm:$0xff] %v4951_v35  ;;  %v2435_v49 = vsel %vm390_vm1, %v4951_v35, -inf  ;;  %v1069_v10 = vpop.xlane.xlu1 %1068  ;;  %v4955_v24 = vpop.f32.mrb[110].mxu1 }
 0x4f2   : > { %v2436_v33 = vmax.f32 %v4949_v37, %v2435_v49  ;;  %v1135_v20 = vsub.f32 %v4709_v4, %v1069_v10  ;;  %v1136_v38 = vsub.f32 %v4711_v36, %v1069_v10  ;;  %v4960_v26 = vpop.f32.mrb[111].mxu1 }
 0x4f3   : > { %v2439_v30 = vsel %vm390_vm1, %v4960_v26, -inf  ;;  %v1073_v29 = vpop.xlane.xlu0 %1072 }
 0x4f4   : > { %v1169_v1 = vmul.f32 1.442695, %v1135_v20  ;;  %v1171_v18 = vmul.f32 1.442695, %v1136_v38  ;;  %v2440_v3 = vmax.f32 %v4955_v24, %v2439_v30  ;;  %v1137_v35 = vsub.f32 %v4715_v13, %v1073_v29  ;;  %2437 = vmax.xlane.f32.xlu1 %v2436_v33 }
 0x4f5   : > { %v1138_v5 = vsub.f32 %v4718_v59, %v1073_v29 }
 0x4f6   : > { %3454 = vpow2.f32 %v1169_v1  ;;  %v1173_v49 = vmul.f32 1.442695, %v1137_v35  ;;  %2441 = vmax.xlane.f32.xlu0 %v2440_v3 }
 0x4f7   : > { %3456 = vpow2.f32 %v1171_v18  ;;  %v1175_v10 = vmul.f32 1.442695, %v1138_v5  ;;  %v4967_v4 = vpop.f32.mrb[112].mxu1 }
 0x4f8   : > { %3458 = vpow2.f32 %v1173_v49  ;;  %v4969_v36 = vpop.f32.mrb[113].mxu1 }
 0x4f9   : > { %6224 = vst [vmem:[#allocation57_spill] sm:$0xff] %v4969_v36  ;;  %3460 = vpow2.f32 %v1175_v10  ;;  %v2443_v38 = vsel %vm390_vm1, %v4969_v36, -inf  ;;  %v4973_v20 = vpop.f32.mrb[114].mxu1  ;;  %v1077_v13 = vpop.xlane.xlu0 %1076 }
 0x4fa   : > { %6225 = vst [vmem:[#allocation58_spill] sm:$0xff] %v4973_v20  ;;  %v2444_v33 = vmax.f32 %v4967_v4, %v2443_v38  ;;  %v1139_v59 = vsub.f32 %v4723_v34, %v1077_v13  ;;  %v1140_v3 = vsub.f32 %v4725_v42, %v1077_v13  ;;  %v4978_v35 = vpop.f32.mrb[115].mxu1 }
 0x4fb   : > { %6226 = vst [vmem:[#allocation59_spill] sm:$0xff] %v4978_v35  ;;  %v2447_v5 = vsel %vm390_vm1, %v4978_v35, -inf  ;;  %v1081_v30 = vpop.xlane.xlu1 %1080 }
 0x4fc   : > { %v1177_v29 = vmul.f32 1.442695, %v1139_v59  ;;  %v1179_v1 = vmul.f32 1.442695, %v1140_v3  ;;  %v2448_v18 = vmax.f32 %v4973_v20, %v2447_v5  ;;  %2445 = vmax.xlane.f32.xlu1 %v2444_v33  ;;  %v1141_v49 = vsub.f32 %v4729_v45, %v1081_v30 }
 0x4fd   : > { %v1142_v10 = vsub.f32 %v4732_v12, %v1081_v30 }
 0x4fe   : > { %3462 = vpow2.f32 %v1177_v29  ;;  %2449 = vmax.xlane.f32.xlu0 %v2448_v18  ;;  %v1181_v59 = vmul.f32 1.442695, %v1141_v49 }
 0x4ff   : > { %3464 = vpow2.f32 %v1179_v1  ;;  %v1183_v34 = vmul.f32 1.442695, %v1142_v10  ;;  %v4985_v42 = vpop.f32.mrb[116].mxu1 }
 0x500   : > { %v4987_v38 = vpop.eup %3454  ;;  %v4989_v13 = vpop.f32.mrb[117].mxu1 }
 0x501   : > { %6227 = vst [vmem:[#allocation60_spill] sm:$0xff] %v4989_v13  ;;  %v4991_v35 = vpop.eup %3456  ;;  %v1085_v3 = vpop.xlane.xlu0 %1084  ;;  %v2451_v33 = vsel %vm390_vm1, %v4989_v13, -inf  ;;  %3466 = vpow2.f32 %v1183_v34 }
 0x502   : > { %6228 = vst [vmem:[#allocation61_spill] sm:$0xff] %v4991_v35  ;;  %v4995_v45 = vpop.f32.mrb[118].mxu1  ;;  %v4997_v12 = vpop.eup %3458  ;;  %v1143_v5 = vsub.f32 %v4737_v14, %v1085_v3  ;;  %v1144_v30 = vsub.f32 %v4739_v46, %v1085_v3  ;;  %v1237_v29 = vsel %vm390_vm1, %v4991_v35, 0.0  ;;  %v2452_v1 = vmax.f32 %v4985_v42, %v2451_v33 }
 0x503   : > { %6229 = vst [vmem:[#allocation62_spill] sm:$0xff] %v4995_v45  ;;  %v5004_v18 = vpop.f32.mrb[119].mxu1  ;;  %v5006_v49 = vpop.eup %3460  ;;  %v1238_v13 = vadd.f32 %v4987_v38, %v1237_v29  ;;  %3468 = vpow2.f32 %v1181_v59 }
 0x504   : > { %6230 = vst [vmem:[#allocation63_spill] sm:$0xff] %v5004_v18  ;;  %6231 = vst [vmem:[#allocation64_spill] sm:$0xff] %v5006_v49  ;;  %v1089_v10 = vpop.xlane.xlu1 %1088  ;;  %v2455_v20 = vsel %vm390_vm1, %v5004_v18, -inf  ;;  %v1185_v36 = vmul.f32 1.442695, %v1143_v5  ;;  %v1241_v3 = vsel %vm390_vm1, %v5006_v49, 0.0 }
 0x505   : > { %v1187_v14 = vmul.f32 1.442695, %v1144_v30  ;;  %v1146_v46 = vsub.f32 %v4746_v57, %v1089_v10  ;;  %1239 = vadd.xlane.f32.xlu1 %v1238_v13  ;;  %v2456_v33 = vmax.f32 %v4995_v45, %v2455_v20  ;;  %v1242_v34 = vadd.f32 %v4997_v12, %v1241_v3 }
 0x506   : > { %3470 = vpow2.f32 %v1185_v36  ;;  %v1145_v57 = vsub.f32 %v4743_v55, %v1089_v10 }
 0x507   : > { %3472 = vpow2.f32 %v1187_v14  ;;  %v5016_v35 = vpop.f32.mrb[120].mxu1  ;;  %1243 = vadd.xlane.f32.xlu0 %v1242_v34  ;;  %v1191_v13 = vmul.f32 1.442695, %v1146_v46 }
 0x508   : > { %v5018_v29 = vpop.eup %3462  ;;  %v5020_v5 = vpop.f32.mrb[121].mxu1 }
 0x509   : > { %6232 = vst [vmem:[#allocation65_spill] sm:$0xff] %v5018_v29  ;;  %v5022_v59 = vpop.eup %3464  ;;  %2453 = vmax.xlane.f32.xlu1 %v2452_v1  ;;  %v1093_v30 = vpop.xlane.xlu0 %1092  ;;  %v2459_v36 = vsel %vm390_vm1, %v5020_v5, -inf  ;;  %3474 = vpow2.f32 %v1191_v13 }
 0x50a   : > { %v5027_v20 = vpop.f32.mrb[122].mxu1  ;;  %v1147_v14 = vsub.f32 %v4751_v25, %v1093_v30  ;;  %v1148_v3 = vsub.f32 %v4753_v7, %v1093_v30  ;;  %v2460_v34 = vmax.f32 %v5016_v35, %v2459_v36  ;;  %v1245_v45 = vsel %vm390_vm1, %v5022_v59, 0.0 }
 0x50b   : > { %6233 = vst [vmem:[#allocation66_spill] sm:$0xff] %v5027_v20  ;;  %v5034_v18 = vpop.f32.mrb[123].mxu1  ;;  %v1246_v55 = vadd.f32 %v5018_v29, %v1245_v45  ;;  %v5039_v49 = vpop.eup %3466  ;;  %v1189_v7 = vmul.f32 1.442695, %v1145_v57 }
 0x50c   : > { %6234 = vst [vmem:[#allocation67_spill] sm:$0xff] %v5034_v18  ;;  %v2463_v1 = vsel %vm390_vm1, %v5034_v18, -inf  ;;  %v1193_v10 = vmul.f32 1.442695, %v1147_v14  ;;  %v1195_v46 = vmul.f32 1.442695, %v1148_v3  ;;  %v1097_v29 = vpop.xlane.xlu1 %1096 }
 0x50d   : > { %6235 = vst [vmem:[#allocation68_spill] sm:$0xff] %v5039_v49  ;;  %2457 = vmax.xlane.f32.xlu1 %v2456_v33  ;;  %1247 = vadd.xlane.f32.xlu0 %v1246_v55  ;;  %v2464_v25 = vmax.f32 %v5027_v20, %v2463_v1  ;;  %v5042_v30 = vpop.eup %3468  ;;  %v1249_v14 = vsel %vm390_vm1, %v5039_v49, 0.0 }
 0x50e   : > { %3476 = vpow2.f32 %v1193_v10  ;;  %v1250_v18 = vadd.f32 %v5042_v30, %v1249_v14 }
 0x50f   : > { %3478 = vpow2.f32 %v1195_v46  ;;  %v5044_v36 = vpop.f32.mrb[124].mxu1  ;;  %v1150_v46 = vsub.f32 %v4760_v44, %v1097_v29 }
 0x510   : > { %6236 = vst [vmem:[#allocation69_spill] sm:$0xff] %v5044_v36  ;;  %v5046_v45 = vpop.eup %3470  ;;  %v5050_v3 = vpop.f32.mrb[125].mxu1  ;;  %3480 = vpow2.f32 %v1189_v7 }
 0x511   : > { %6237 = vst [vmem:[#allocation70_spill] sm:$0xff] %v5046_v45  ;;  %6238 = vst [vmem:[#allocation71_spill] sm:$0xff] %v5050_v3  ;;  %v5052_v13 = vpop.eup %3472  ;;  %2461 = vmax.xlane.f32.xlu1 %v2460_v34  ;;  %v2467_v33 = vsel %vm390_vm1, %v5050_v3, -inf  ;;  %v5056_v57 = vpop.f32.mrb[126].mxu1 }
 0x512   : > { %6239 = vst [vmem:[#allocation72_spill] sm:$0xff] %v5052_v13  ;;  %6240 = vst [vmem:[#allocation73_spill] sm:$0xff] %v5056_v57  ;;  %v1253_v55 = vsel %vm390_vm1, %v5052_v13, 0.0  ;;  %v2468_v1 = vmax.f32 %v5044_v36, %v2467_v33  ;;  %v5061_v10 = vpop.f32.mrb[127].mxu1  ;;  %v1101_v3 = vpop.xlane.xlu0 %1100  ;;  %v1149_v13 = vsub.f32 %v4757_v51, %v1097_v29  ;;  %v1199_v33 = vmul.f32 1.442695, %v1150_v46 }
 0x513   : > { %6241 = vst [vmem:[#allocation74_spill] sm:$0xff] %v5061_v10  ;;  %v1254_v20 = vadd.f32 %v5046_v45, %v1253_v55  ;;  %v2471_v34 = vsel %vm390_vm1, %v5061_v10, -inf  ;;  %v5070_v49 = vpop.eup %3474  ;;  %v1152_v36 = vsub.f32 %v4767_v60, %v1101_v3  ;;  %v1151_v29 = vsub.f32 %v4765_v8, %v1101_v3 }
 0x514   : > { %v2472_v7 = vmax.f32 %v5056_v57, %v2471_v34  ;;  %v1197_v51 = vmul.f32 1.442695, %v1149_v13  ;;  %3482 = vpow2.f32 %v1199_v33  ;;  %v1105_v13 = vpop.xlane.xlu1 %1104  ;;  %v1257_v8 = vsel %vm390_vm1, %v5070_v49, 0.0 }
 0x515   : > { %1251 = vadd.xlane.f32.xlu1 %v1250_v18  ;;  %1255 = vadd.xlane.f32.xlu0 %v1254_v20  ;;  %v1203_v57 = vmul.f32 1.442695, %v1152_v36  ;;  %v1201_v33 = vmul.f32 1.442695, %v1151_v29  ;;  %v1154_v36 = vsub.f32 %v4774_v31, %v1105_v13 }
 0x516   : > { %3484 = vpow2.f32 %v1197_v51 }
 0x517   : > { %v5073_v44 = vpop.f32.mrb[128].mxu1  ;;  %3486 = vpow2.f32 %v1203_v57  ;;  %v1207_v31 = vmul.f32 1.442695, %v1154_v36 }
 0x518   : > { %6242 = vst [vmem:[#allocation75_spill] sm:$0xff] %v5073_v44  ;;  %v5075_v14 = vpop.eup %3476  ;;  %v5077_v55 = vpop.f32.mrb[129].mxu1  ;;  %3488 = vpow2.f32 %v1201_v33 }
 0x519   : > { %6243 = vst [vmem:[#allocation76_spill] sm:$0xff] %v5075_v14  ;;  %6244 = vst [vmem:[#allocation77_spill] sm:$0xff] %v5077_v55  ;;  %v5079_v45 = vpop.eup %3478  ;;  %2465 = vmax.xlane.f32.xlu1 %v2464_v25  ;;  %v2475_v18 = vsel %vm390_vm1, %v5077_v55, -inf  ;;  %v5083_v20 = vpop.f32.mrb[130].mxu1  ;;  %3490 = vpow2.f32 %v1207_v31 }
 0x51a   : > { %6245 = vst [vmem:[#allocation78_spill] sm:$0xff] %v5079_v45  ;;  %v1261_v60 = vsel %vm390_vm1, %v5079_v45, 0.0  ;;  %v2476_v46 = vmax.f32 %v5073_v44, %v2475_v18  ;;  %v5089_v34 = vpop.f32.mrb[131].mxu1  ;;  %v5096_v55 = vpop.eup %3480 }
 0x51b   : > { %6246 = vst [vmem:[#allocation79_spill] sm:$0xff] %v5089_v34  ;;  %v1262_v10 = vadd.f32 %v5075_v14, %v1261_v60  ;;  %v5094_v25 = vsel %vm390_vm1, %v5089_v34, -inf  ;;  %6247 = vst [vmem:[#allocation80_spill] sm:$0xff] %v5096_v55  ;;  %v1258_v18 = vadd.f32 %v5096_v55, %v1257_v8  ;;  %v1113_v8 = vpop.xlane.xlu1 %1112  ;;  %v5124_v33 = vpop.xlane.xlu0 %1108 }
 0x51d   : > { %2469 = vmax.xlane.f32.xlu1 %v2468_v1  ;;  %1263 = vadd.xlane.f32.xlu0 %v1262_v10  ;;  %v1153_v10 = vsub.f32 %v4771_v15, %v1105_v13  ;;  %v1158_v15 = vsub.f32 %v4788_v6, %v1113_v8  ;;  %v1157_v6 = vsub.f32 %v4785_v0, %v1113_v8 }
 0x51e   : > { %v5120_v3 = vpop.eup %3482 }
 0x51f   : > { %v5104_v60 = vpop.f32.mrb[132].mxu1  ;;  %6251 = vst [vmem:[#allocation84_spill] sm:$0xff] %v5120_v3  ;;  %v1265_v36 = vsel %vm390_vm1, %v5120_v3, 0.0  ;;  %v1215_v14 = vmul.f32 1.442695, %v1158_v15 }
 0x520   : > { %6248 = vst [vmem:[#allocation81_spill] sm:$0xff] %v5104_v60  ;;  %v5106_v34 = vpop.f32.mrb[133].mxu1  ;;  %v5129_v13 = vpop.eup %3484 }
 0x521   : > { %6249 = vst [vmem:[#allocation82_spill] sm:$0xff] %v5106_v34  ;;  %1259 = vadd.xlane.f32.xlu1 %v1258_v18  ;;  %v2483_v44 = vsel %vm390_vm1, %v5106_v34, -inf  ;;  %v5110_v1 = vpop.f32.mrb[134].mxu1  ;;  %v1205_v34 = vmul.f32 1.442695, %v1153_v10  ;;  %v1117_v45 = vpop.xlane.xlu0 %1116  ;;  %v1266_v3 = vadd.f32 %v5129_v13, %v1265_v36 }
 0x522   : > { %v2484_v51 = vmax.f32 %v5104_v60, %v2483_v44  ;;  %v5114_v57 = vpop.f32.mrb[135].mxu1  ;;  %v5135_v60 = vpop.eup %3486  ;;  %v1160_v8 = vsub.f32 %v4795_v21, %v1117_v45  ;;  %v1159_v21 = vsub.f32 %v4793_v17, %v1117_v45 }
 0x523   : > { %6250 = vst [vmem:[#allocation83_spill] sm:$0xff] %v5114_v57  ;;  %v5118_v29 = vsel %vm390_vm1, %v5114_v57, -inf  ;;  %6254 = vst [vmem:[#allocation87_spill] sm:$0xff] %v5135_v60  ;;  %3492 = vpow2.f32 %v1205_v34  ;;  %v1213_v34 = vmul.f32 1.442695, %v1157_v6 }
 0x524   : > { %3494 = vpow2.f32 %v1215_v14  ;;  %v1219_v6 = vmul.f32 1.442695, %v1160_v8  ;;  %v1217_v17 = vmul.f32 1.442695, %v1159_v21 }
 0x525   : > { %2473 = vmax.xlane.f32.xlu1 %v2472_v7  ;;  %3496 = vpow2.f32 %v1213_v34 }
 0x526   : > { %3498 = vpow2.f32 %v1219_v6 }
 0x527   : > { %v5127_v44 = vpop.f32.mrb[136].mxu1  ;;  %3500 = vpow2.f32 %v1217_v17 }
 0x528   : > { %6252 = vst [vmem:[#allocation85_spill] sm:$0xff] %v5127_v44  ;;  %v5133_v57 = vpop.f32.mrb[137].mxu1 }
 0x529   : > { %6253 = vst [vmem:[#allocation86_spill] sm:$0xff] %v5133_v57  ;;  %2477 = vmax.xlane.f32.xlu1 %v2476_v46  ;;  %v2491_v7 = vsel %vm390_vm1, %v5133_v57, -inf  ;;  %v5139_v10 = vpop.f32.mrb[138].mxu1  ;;  %v5150_v46 = vpop.eup %3488  ;;  %v1269_v57 = vsel %vm390_vm1, %v5135_v60, 0.0 }
 0x52a   : > { %6255 = vst [vmem:[#allocation88_spill] sm:$0xff] %v5139_v10  ;;  %v2492_v31 = vmax.f32 %v5127_v44, %v2491_v7  ;;  %v5143_v18 = vpop.f32.mrb[139].mxu1  ;;  %6257 = vst [vmem:[#allocation90_spill] sm:$0xff] %v5150_v46  ;;  %v1125_v15 = vpop.xlane.xlu0 %1124  ;;  %v1270_v36 = vadd.f32 %v5150_v46, %v1269_v57 }
 0x52b   : > { %6256 = vst [vmem:[#allocation89_spill] sm:$0xff] %v5143_v18  ;;  %v5148_v55 = vsel %vm390_vm1, %v5143_v18, -inf  ;;  %v5166_v60 = vpop.eup %3490  ;;  %v1163_v34 = vsub.f32 %v4807_v22, %v1125_v15 }
 0x52c   : > { %v2496_v0 = vmax.f32 %v5139_v10, %v5148_v55  ;;  %6260 = vst [vmem:[#allocation93_spill] sm:$0xff] %v5166_v60 }
 0x52d   : > { %1267 = vadd.xlane.f32.xlu1 %v1266_v3 }
 0x52f   : > { %v5158_v7 = vpop.f32.mrb[140].mxu1 }
 0x530   : > { %6258 = vst [vmem:[#allocation91_spill] sm:$0xff] %v5158_v7  ;;  %v5162_v18 = vsel %vm455_vm2, %v5158_v7, -inf  ;;  %v5164_v44 = vpop.f32.mrb[141].mxu1  ;;  %v1164_v7 = vsub.f32 %v4809_v41, %v1125_v15  ;;  %v1156_v15 = vsub.f32 %v4781_v43, %v5124_v33 }
 0x531   : > { %6259 = vst [vmem:[#allocation92_spill] sm:$0xff] %v5164_v44  ;;  %1271 = vadd.xlane.f32.xlu1 %v1270_v36  ;;  %v5170_v55 = vsel %vm457_vm3, %v5164_v44, -inf  ;;  %v2432_v14 = vpop.f32.mrb[142].mxu1  ;;  %v1134_v10 = vpop.xlane.xlu0 %1133  ;;  %v1273_v44 = vsel %vm390_vm1, %v5166_v60, 0.0 }
 0x532   : > { %v2433_v57 = vpop.f32.mrb[143].mxu1  ;;  %v5178_v36 = vpop.eup %3492  ;;  %v1167_v45 = vsub.f32 %v4821_v62, %v1134_v10  ;;  %v1227_v14 = vmul.f32 1.442695, %v1164_v7  ;;  %v1168_v8 = vsub.f32 %v4825_v23, %v1134_v10 }
 0x533   : > { %2754 = vrot.lane.b32.xlu0 %v6166_v61, %s3775_s18  ;;  %v1274_v41 = vadd.f32 %v5178_v36, %v1273_v44  ;;  %v5186_v57 = vpop.eup %3494  ;;  %v1225_v61 = vmul.f32 1.442695, %v1163_v34 }
 0x534   : > { %v1233_v3 = vmul.f32 1.442695, %v1167_v45  ;;  %3502 = vpow2.f32 %v1227_v14  ;;  %v1235_v46 = vmul.f32 1.442695, %v1168_v8  ;;  %v5188_v22 = vpop.eup %3496  ;;  %v1281_v62 = vsel %vm390_vm1, %v5186_v57, 0.0 }
 0x535   : > { %2485 = vmax.xlane.f32.xlu1 %v2484_v51  ;;  %3504 = vpow2.f32 %v1225_v61  ;;  %v1282_v10 = vadd.f32 %v5188_v22, %v1281_v62  ;;  %v5197_v7 = vpop.eup %3498 }
 0x536   : > { %3506 = vpow2.f32 %v1233_v3  ;;  %v1211_v3 = vmul.f32 1.442695, %v1156_v15  ;;  %v1285_v43 = vsel %vm390_vm1, %v5197_v7, 0.0 }
 0x537   : > { %3508 = vpow2.f32 %v1235_v46 }
 0x539   : > { %1275 = vadd.xlane.f32.xlu1 %v1274_v41 }
 0x53b   : > { %v1762_v60 = vpop.xlane.xlu0 %1761 }
 0x53c   : > { %v1827_v51 = vsub.f32 %v4838_v2, %v1762_v60  ;;  %v1826_v23 = vsub.f32 %v4835_v56, %v1762_v60  ;;  %v1155_v2 = vsub.f32 %v4779_v27, %v5124_v33  ;;  %v1121_v56 = vpop.xlane.xlu1 %1120 }
 0x53d   : > { %2493 = vmax.xlane.f32.xlu1 %v2492_v31  ;;  %v5201_v31 = vpop.eup %3500  ;;  %v1162_v14 = vsub.f32 %v4802_v16, %v1121_v56 }
 0x53e   : > { %v1864_v44 = vmul.f32 1.442695, %v1827_v51  ;;  %v1862_v21 = vmul.f32 1.442695, %v1826_v23  ;;  %v5207_v34 = vpop.eup %3502  ;;  %v1209_v33 = vmul.f32 1.442695, %v1155_v2  ;;  %v1286_v8 = vadd.f32 %v5201_v31, %v1285_v43 }
 0x53f   : > { %v5209_v27 = vpop.eup %3504  ;;  %v1161_v51 = vsub.f32 %v4799_v40, %v1121_v56  ;;  %v1223_v23 = vmul.f32 1.442695, %v1162_v14 }
 0x540   : > { %3510 = vpow2.f32 %v1864_v44  ;;  %v5213_v41 = vpop.eup %3506 }
 0x541   : > { %1283 = vadd.xlane.f32.xlu1 %v1282_v10  ;;  %3512 = vpow2.f32 %v1862_v21  ;;  %v5217_v61 = vpop.eup %3508  ;;  %v1221_v56 = vmul.f32 1.442695, %v1161_v51 }
 0x542   : > { %3514 = vpow2.f32 %v1211_v3  ;;  %v1302_v40 = vsel %vm457_vm3, %v5217_v61, 0.0 }
 0x543   : > { %v1770_v6 = vpop.xlane.xlu0 %1769 }
 0x544   : > { %v1830_v60 = vsub.f32 %v4849_v19, %v1770_v6  ;;  %v1831_v46 = vsub.f32 %v4852_v50, %v1770_v6  ;;  %v1129_v50 = vpop.xlane.xlu1 %1128  ;;  %v1293_v19 = vsel %vm390_vm1, %v5207_v34, 0.0  ;;  %v1301_v6 = vsel %vm455_vm2, %v5213_v41, 0.0 }
 0x545   : > { %2497 = vmax.xlane.f32.xlu1 %v2496_v0  ;;  %v1166_v44 = vsub.f32 %v4816_v11, %v1129_v50  ;;  %v1294_v10 = vadd.f32 %v5209_v27, %v1293_v19 }
 0x546   : > { %v1870_v17 = vmul.f32 1.442695, %v1830_v60  ;;  %v1872_v45 = vmul.f32 1.442695, %v1831_v46  ;;  %v1303_v46 = vadd.f32 %v1302_v40, %v1301_v6 }
 0x547   : > { %v1231_v11 = vmul.f32 1.442695, %v1166_v44 }
 0x548   : > { %3516 = vpow2.f32 %v1872_v45  ;;  %v1758_v15 = vpop.xlane.xlu1 %1757 }
 0x549   : > { %1287 = vadd.xlane.f32.xlu1 %v1286_v8  ;;  %v1774_v0 = vpop.xlane.xlu0 %1773  ;;  %3518 = vpow2.f32 %v1870_v17  ;;  %v1825_v60 = vsub.f32 %v4831_v52, %v1758_v15  ;;  %v6261_v8 = vmax.f32 %v5083_v20, %v5094_v25 }
 0x54a   : > { %v1832_v62 = vsub.f32 %v4857_v32, %v1774_v0  ;;  %v1833_v16 = vsub.f32 %v4859_v39, %v1774_v0  ;;  %3520 = vpow2.f32 %v1209_v33  ;;  %v5228_v3 = vpop.eup %3510  ;;  %v1165_v32 = vsub.f32 %v4813_v28, %v1129_v50 }
 0x54b   : > { %v5234_v43 = vpop.eup %3512  ;;  %v1930_v17 = vsel %vm390_vm1, %v5228_v3, 0.0  ;;  %v1824_v0 = vsub.f32 %v4829_v47, %v1758_v15  ;;  %v1860_v51 = vmul.f32 1.442695, %v1825_v60  ;;  %v6262_v47 = vmax.f32 %v5110_v1, %v5118_v29 }
 0x54c   : > { %v1874_v21 = vmul.f32 1.442695, %v1832_v62  ;;  %v1876_v2 = vmul.f32 1.442695, %v1833_v16  ;;  %v1229_v45 = vmul.f32 1.442695, %v1165_v32  ;;  %v1766_v33 = vpop.xlane.xlu1 %1765  ;;  %v5238_v14 = vpop.eup %3514  ;;  %v1931_v62 = vadd.f32 %v5234_v43, %v1930_v17 }
 0x54d   : > { %1295 = vadd.xlane.f32.xlu1 %v1294_v10  ;;  %v5231_v39 = vpop.xlane.xlu0 %1777  ;;  %v1858_v15 = vmul.f32 1.442695, %v1824_v0  ;;  %v6265_v0 = vmax.f32 %v5162_v18, %v5170_v55 }
 0x54e   : > { %3522 = vpow2.f32 %v1874_v21  ;;  %v1835_v32 = vsub.f32 %v4866_v48, %v5231_v39 }
 0x54f   : > { %3524 = vpow2.f32 %v1876_v2 }
 0x550   : > { %3526 = vpow2.f32 %v1223_v23  ;;  %v1829_v23 = vsub.f32 %v4845_v63, %v1766_v33  ;;  %v1828_v63 = vsub.f32 %v4843_v54, %v1766_v33  ;;  %v1880_v48 = vmul.f32 1.442695, %v1835_v32  ;;  %v6264_v33 = vld [vmem:[#allocation37_spill] sm:$0xff] }
 0x551   : > { %1304 = vadd.xlane.f32.xlu1 %v1303_v46  ;;  %v1782_v28 = vpop.xlane.xlu0 %1781  ;;  %3528 = vpow2.f32 %v1221_v56  ;;  %v1834_v46 = vsub.f32 %v4863_v9, %v5231_v39 }
 0x552   : > { %2481 = vmax.xlane.f32.xlu0 %v6261_v8  ;;  %v1836_v52 = vsub.f32 %v4871_v53, %v1782_v28  ;;  %v1837_v50 = vsub.f32 %v4873_v58, %v1782_v28  ;;  %v5245_v19 = vpop.eup %3516  ;;  %3530 = vpow2.f32 %v1231_v11  ;;  %v1277_v58 = vsel %vm390_vm1, %v5238_v14, 0.0 }
 0x553   : > { %v5249_v16 = vpop.eup %3518  ;;  %v1938_v25 = vsel %vm390_vm1, %v5245_v19, 0.0  ;;  %3532 = vpow2.f32 %v1229_v45  ;;  %v1868_v40 = vmul.f32 1.442695, %v1829_v23  ;;  %v1866_v60 = vmul.f32 1.442695, %v1828_v63 }
 0x554   : > { %v1882_v44 = vmul.f32 1.442695, %v1836_v52  ;;  %v1884_v10 = vmul.f32 1.442695, %v1837_v50  ;;  %v5254_v53 = vpop.eup %3520  ;;  %v1939_v2 = vadd.f32 %v5249_v16, %v1938_v25  ;;  %v1878_v39 = vmul.f32 1.442695, %v1834_v46 }
 0x555   : > { %1932 = vadd.xlane.f32.xlu1 %v1931_v62  ;;  %v1786_v21 = vpop.xlane.xlu0 %1785  ;;  %v1278_v56 = vadd.f32 %v5254_v53, %v1277_v58 }
 0x556   : > { %3534 = vpow2.f32 %v1882_v44  ;;  %2489 = vmax.xlane.f32.xlu0 %v6262_v47  ;;  %v1839_v28 = vsub.f32 %v6264_v33, %v1786_v21 }
 0x557   : > { %3536 = vpow2.f32 %v1884_v10  ;;  %v6268_v10 = vld [vmem:[#allocation39_spill] sm:$0xff] }
 0x558   : > { %v5263_v6 = vpop.eup %3522  ;;  %3538 = vpow2.f32 %v1860_v51  ;;  %v6266_v51 = vld [vmem:[#allocation36_spill] sm:$0xff]  ;;  %v1888_v44 = vmul.f32 1.442695, %v1839_v28 }
 0x559   : > { %6263 = vst [vmem:[#allocation94_spill] sm:$0xff] %v5263_v6  ;;  %v5268_v11 = vpop.eup %3524  ;;  %1940 = vadd.xlane.f32.xlu1 %v1939_v2  ;;  %3540 = vpow2.f32 %v1858_v15  ;;  %v1790_v52 = vpop.xlane.xlu0 %1789  ;;  %v1838_v62 = vsub.f32 %v6266_v51, %v1786_v21  ;;  %v6270_v2 = vld [vmem:[#allocation38_spill] sm:$0xff]  ;;  %v6273_v51 = vld [vmem:[#allocation43_spill] sm:$0xff] }
 0x55a   : > { %v5270_v29 = vpop.eup %3526  ;;  %1279 = vadd.xlane.f32.xlu0 %v1278_v56  ;;  %v1942_v54 = vsel %vm390_vm1, %v5268_v11, 0.0  ;;  %3542 = vpow2.f32 %v1868_v40  ;;  %v1841_v25 = vsub.f32 %v6268_v10, %v1790_v52  ;;  %v1840_v40 = vsub.f32 %v6270_v2, %v1790_v52 }
 0x55b   : > { %v1943_v17 = vadd.f32 %v5263_v6, %v1942_v54  ;;  %v5277_v45 = vpop.eup %3528  ;;  %v1289_v50 = vsel %vm390_vm1, %v5270_v29, 0.0  ;;  %3544 = vpow2.f32 %v1866_v60  ;;  %v1794_v15 = vpop.xlane.xlu1 %1793  ;;  %v1886_v21 = vmul.f32 1.442695, %v1838_v62  ;;  %v6271_v54 = vld [vmem:[#allocation41_spill] sm:$0xff] }
 0x55c   : > { %v5280_v8 = vpop.eup %3530  ;;  %3546 = vpow2.f32 %v1880_v48  ;;  %v1290_v58 = vadd.f32 %v5277_v45, %v1289_v50  ;;  %v1892_v56 = vmul.f32 1.442695, %v1841_v25  ;;  %v1843_v60 = vsub.f32 %v6271_v54, %v1794_v15  ;;  %v6272_v50 = vld [vmem:[#allocation40_spill] sm:$0xff] }
 0x55d   : > { %1944 = vadd.xlane.f32.xlu1 %v1943_v17  ;;  %v5287_v9 = vpop.eup %3532  ;;  %v1297_v18 = vsel %vm390_vm1, %v5280_v8, 0.0  ;;  %3548 = vpow2.f32 %v1878_v39  ;;  %v1890_v52 = vmul.f32 1.442695, %v1840_v40 }
 0x55e   : > { %2502 = vmax.xlane.f32.xlu0 %v6265_v0  ;;  %3550 = vpow2.f32 %v1888_v44  ;;  %v1298_v46 = vadd.f32 %v5287_v9, %v1297_v18  ;;  %v1842_v0 = vsub.f32 %v6272_v50, %v1794_v15  ;;  %v1896_v39 = vmul.f32 1.442695, %v1843_v60  ;;  %v6275_v15 = vld [vmem:[#allocation45_spill] sm:$0xff] }
 0x55f   : > { %3552 = vpow2.f32 %v1886_v21 }
 0x560   : > { %v5290_v23 = vpop.eup %3534  ;;  %3554 = vpow2.f32 %v1892_v56  ;;  %v1894_v21 = vmul.f32 1.442695, %v1842_v0  ;;  %v6278_v0 = vld [vmem:[#allocation47_spill] sm:$0xff] }
 0x561   : > { %6267 = vst [vmem:[#allocation37_spill] sm:$0xff] %v5290_v23  ;;  %v5294_v47 = vpop.eup %3536  ;;  %v1798_v48 = vpop.xlane.xlu0 %1797  ;;  %3556 = vpow2.f32 %v1890_v52 }
 0x562   : > { %6269 = vst [vmem:[#allocation36_spill] sm:$0xff] %v5294_v47  ;;  %v5298_v55 = vpop.eup %3538  ;;  %1291 = vadd.xlane.f32.xlu0 %v1290_v58  ;;  %v1950_v63 = vsel %vm390_vm1, %v5294_v47, 0.0  ;;  %v1845_v62 = vsub.f32 %v6273_v51, %v1798_v48  ;;  %3558 = vpow2.f32 %v1896_v39  ;;  %v6277_v51 = vld [vmem:[#allocation44_spill] sm:$0xff] }
 0x563   : > { %v1951_v32 = vadd.f32 %v5290_v23, %v1950_v63  ;;  %v5306_v17 = vpop.eup %3540  ;;  %v1926_v33 = vsel %vm390_vm1, %v5298_v55, 0.0  ;;  %v1802_v44 = vpop.xlane.xlu1 %1801  ;;  %v6274_v63 = vld [vmem:[#allocation42_spill] sm:$0xff]  ;;  %3560 = vpow2.f32 %v1894_v21  ;;  %v6282_v21 = vld [vmem:[#allocation49_spill] sm:$0xff] }
 0x564   : > { %v5310_v28 = vpop.eup %3542  ;;  %v1927_v10 = vadd.f32 %v5306_v17, %v1926_v33  ;;  %v1844_v2 = vsub.f32 %v6274_v63, %v1798_v48  ;;  %v1847_v40 = vsub.f32 %v6275_v15, %v1802_v44  ;;  %v1846_v48 = vsub.f32 %v6277_v51, %v1802_v44  ;;  %v6281_v23 = vld [vmem:[#allocation46_spill] sm:$0xff] }
 0x565   : > { %1952 = vadd.xlane.f32.xlu1 %v1951_v32  ;;  %v5315_v25 = vpop.eup %3544  ;;  %v1934_v58 = vsel %vm390_vm1, %v5310_v28, 0.0  ;;  %v1900_v32 = vmul.f32 1.442695, %v1845_v62 }
 0x566   : > { %1299 = vadd.xlane.f32.xlu0 %v1298_v46  ;;  %v5319_v18 = vpop.eup %3546  ;;  %v1935_v56 = vadd.f32 %v5315_v25, %v1934_v58  ;;  %v1898_v50 = vmul.f32 1.442695, %v1844_v2  ;;  %v1904_v52 = vmul.f32 1.442695, %v1847_v40  ;;  %v1902_v2 = vmul.f32 1.442695, %v1846_v48 }
 0x567   : > { %v5324_v54 = vpop.eup %3548  ;;  %v1946_v46 = vsel %vm390_vm1, %v5319_v18, 0.0  ;;  %3562 = vpow2.f32 %v1900_v32  ;;  %v6284_v48 = vld [vmem:[#allocation48_spill] sm:$0xff] }
 0x568   : > { %v5328_v33 = vpop.eup %3550  ;;  %3564 = vpow2.f32 %v1898_v50 }
 0x569   : > { %v1806_v60 = vpop.xlane.xlu0 %1805  ;;  %6276 = vst [vmem:[#allocation39_spill] sm:$0xff] %v5328_v33  ;;  %v5333_v58 = vpop.eup %3552  ;;  %v1954_v63 = vsel %vm390_vm1, %v5328_v33, 0.0  ;;  %3566 = vpow2.f32 %v1904_v52  ;;  %v6286_v52 = vld [vmem:[#allocation51_spill] sm:$0xff] }
 0x56a   : > { %1928 = vadd.xlane.f32.xlu0 %v1927_v10  ;;  %v1849_v39 = vsub.f32 %v6278_v0, %v1806_v60  ;;  %v1947_v10 = vadd.f32 %v5324_v54, %v1946_v46  ;;  %6279 = vst [vmem:[#allocation38_spill] sm:$0xff] %v5333_v58  ;;  %v5337_v15 = vpop.eup %3554  ;;  %v1848_v44 = vsub.f32 %v6281_v23, %v1806_v60  ;;  %3568 = vpow2.f32 %v1902_v2  ;;  %v6285_v23 = vld [vmem:[#allocation12_spill] sm:$0xff] }
 0x56b   : > { %v1810_v62 = vpop.xlane.xlu1 %1809  ;;  %6280 = vst [vmem:[#allocation41_spill] sm:$0xff] %v5337_v15  ;;  %v5342_v51 = vpop.eup %3556  ;;  %v1958_v0 = vsel %vm390_vm1, %v5337_v15, 0.0 }
 0x56c   : > { %v1851_v40 = vsub.f32 %v6282_v21, %v1810_v62  ;;  %v1908_v32 = vmul.f32 1.442695, %v1849_v39  ;;  %6283 = vst [vmem:[#allocation40_spill] sm:$0xff] %v5342_v51  ;;  %v5346_v47 = vpop.eup %3558  ;;  %v1906_v50 = vmul.f32 1.442695, %v1848_v44  ;;  %v1850_v6 = vsub.f32 %v6284_v48, %v1810_v62  ;;  %v6288_v44 = vld [vmem:[#allocation50_spill] sm:$0xff] }
 0x56d   : > { %v1962_v15 = vsel %vm390_vm1, %v5346_v47, 0.0 }
 0x56e   : > { %1936 = vadd.xlane.f32.xlu0 %v1935_v56  ;;  %v1955_v56 = vadd.f32 %v5333_v58, %v1954_v63  ;;  %v1912_v60 = vmul.f32 1.442695, %v1851_v40  ;;  %3570 = vpow2.f32 %v1908_v32  ;;  %v5353_v63 = vpop.eup %3560  ;;  %v1910_v62 = vmul.f32 1.442695, %v1850_v6  ;;  %v6289_v40 = vld [vmem:[#allocation54_spill] sm:$0xff] }
 0x56f   : > { %3572 = vpow2.f32 %v1906_v50  ;;  %v1963_v58 = vadd.f32 %v5353_v63, %v1962_v15 }
 0x570   : > { %3574 = vpow2.f32 %v1912_v60 }
 0x571   : > { %v1814_v46 = vpop.xlane.xlu1 %1813  ;;  %v5357_v2 = vpop.eup %3562  ;;  %3576 = vpow2.f32 %v1910_v62 }
 0x572   : > { %1948 = vadd.xlane.f32.xlu0 %v1947_v10  ;;  %v1853_v39 = vsub.f32 %v6286_v52, %v1814_v46  ;;  %v1959_v10 = vadd.f32 %v5342_v51, %v1958_v0  ;;  %6287 = vst [vmem:[#allocation43_spill] sm:$0xff] %v5357_v2  ;;  %v1852_v48 = vsub.f32 %v6288_v44, %v1814_v46  ;;  %v6291_v52 = vld [vmem:[#allocation55_spill] sm:$0xff]  ;;  %v1966_v50 = vsel %vm390_vm1, %v5357_v2, 0.0  ;;  %v6293_v46 = vld [vmem:[#allocation53_spill] sm:$0xff]  ;;  %v6295_v2 = vld [vmem:[#allocation52_spill] sm:$0xff] }
 0x574   : > { %v1914_v6 = vmul.f32 1.442695, %v1852_v48 }
 0x575   : > { %v1818_v0 = vpop.xlane.xlu1 %1817 }
 0x576   : > { %2756 = vrot.lane.b32.xlu1 %v6285_v23, %s3775_s18  ;;  %1956 = vadd.xlane.f32.xlu0 %v1955_v56  ;;  %v5361_v56 = vpop.eup %3564  ;;  %v1916_v23 = vmul.f32 1.442695, %v1853_v39  ;;  %v1855_v60 = vsub.f32 %v6293_v46, %v1818_v0  ;;  %v1854_v62 = vsub.f32 %v6295_v2, %v1818_v0 }
 0x577   : > { %6290 = vst [vmem:[#allocation42_spill] sm:$0xff] %v5361_v56  ;;  %v5365_v33 = vpop.eup %3566 }
 0x578   : > { %6292 = vst [vmem:[#allocation45_spill] sm:$0xff] %v5365_v33  ;;  %v5370_v44 = vpop.eup %3568  ;;  %3578 = vpow2.f32 %v1916_v23  ;;  %v1970_v15 = vsel %vm390_vm1, %v5365_v33, 0.0  ;;  %v1918_v0 = vmul.f32 1.442695, %v1854_v62 }
 0x579   : > { %v1823_v21 = vpop.xlane.xlu0 %1822  ;;  %3580 = vpow2.f32 %v1914_v6 }
 0x57a   : > { %1960 = vadd.xlane.f32.xlu0 %v1959_v10  ;;  %v1856_v32 = vsub.f32 %v6289_v40, %v1823_v21  ;;  %v1857_v51 = vsub.f32 %v6291_v52, %v1823_v21  ;;  %v1967_v40 = vadd.f32 %v5361_v56, %v1966_v50  ;;  %v5375_v52 = vpop.eup %3570 }
 0x57b   : > { %6294 = vst [vmem:[#allocation44_spill] sm:$0xff] %v5375_v52  ;;  %v5379_v46 = vpop.eup %3572  ;;  %v1974_v2 = vsel %vm390_vm1, %v5375_v52, 0.0 }
 0x57c   : > { %v1922_v10 = vmul.f32 1.442695, %v1856_v32  ;;  %v1924_v39 = vmul.f32 1.442695, %v1857_v51  ;;  %v1971_v32 = vadd.f32 %v5370_v44, %v1970_v15  ;;  %6296 = vst [vmem:[#allocation47_spill] sm:$0xff] %v5379_v46  ;;  %v6297_v51 = vld [vmem:[#allocation56_spill] sm:$0xff]  ;;  %v5384_v33 = vpop.eup %3574  ;;  %v1975_v15 = vadd.f32 %v5379_v46, %v1974_v2 }
 0x57e   : > { %1964 = vadd.xlane.f32.xlu0 %v1963_v58  ;;  %v1920_v58 = vmul.f32 1.442695, %v1855_v60  ;;  %3582 = vpow2.f32 %v1922_v10 }
 0x57f   : > { %3584 = vpow2.f32 %v1924_v39 }
 0x580   : > { %3586 = vpow2.f32 %v1920_v58 }
 0x581   : > { %v2438_v21 = vpop.xlane.xlu1 %2437 }
 0x582   : > { %1968 = vadd.xlane.f32.xlu0 %v1967_v40  ;;  %v2505_v23 = vsub.f32 %v6297_v51, %v2438_v21  ;;  %v2504_v6 = vsub.f32 %v4949_v37, %v2438_v21  ;;  %v5389_v40 = vpop.eup %3576 }
 0x583   : > { %v2442_v48 = vpop.xlane.xlu0 %2441 }
 0x584   : > { %v2506_v50 = vsub.f32 %v4955_v24, %v2442_v48  ;;  %v2507_v56 = vsub.f32 %v4960_v26, %v2442_v48  ;;  %v2540_v39 = vmul.f32 1.442695, %v2505_v23  ;;  %v1978_v24 = vsel %vm390_vm1, %v5384_v33, 0.0  ;;  %v5394_v48 = vpop.eup %3578 }
 0x585   : > { %6298 = vst [vmem:[#allocation46_spill] sm:$0xff] %v5394_v48  ;;  %v2538_v62 = vmul.f32 1.442695, %v2504_v6  ;;  %v1979_v58 = vadd.f32 %v5389_v40, %v1978_v24  ;;  %v5399_v51 = vpop.eup %3580 }
 0x586   : > { %v2544_v60 = vmul.f32 1.442695, %v2507_v56  ;;  %1972 = vadd.xlane.f32.xlu0 %v1971_v32  ;;  %v2542_v10 = vmul.f32 1.442695, %v2506_v50  ;;  %v6299_v56 = vld [vmem:[#allocation57_spill] sm:$0xff]  ;;  %6300 = vst [vmem:[#allocation49_spill] sm:$0xff] %v5399_v51 }
 0x587   : > { %v6301_v50 = vld [vmem:[#allocation58_spill] sm:$0xff] }
 0x588   : > { %3588 = vpow2.f32 %v2544_v60  ;;  %v6302_v60 = vld [vmem:[#allocation59_spill] sm:$0xff]  ;;  %v5403_v52 = vpop.eup %3582 }
 0x589   : > { %v2446_v26 = vpop.xlane.xlu1 %2445  ;;  %3590 = vpow2.f32 %v1918_v0  ;;  %6303 = vst [vmem:[#allocation48_spill] sm:$0xff] %v5403_v52  ;;  %v5407_v0 = vpop.eup %3584  ;;  %v1990_v24 = vsel %vm455_vm2, %v5403_v52, 0.0 }
 0x58a   : > { %v2508_v37 = vsub.f32 %v4967_v4, %v2446_v26  ;;  %v2509_v21 = vsub.f32 %v6299_v56, %v2446_v26  ;;  %1976 = vadd.xlane.f32.xlu0 %v1975_v15  ;;  %3592 = vpow2.f32 %v2542_v10  ;;  %v1982_v4 = vsel %vm390_vm1, %v5394_v48, 0.0  ;;  %6304 = vst [vmem:[#allocation12_spill] sm:$0xff] %v5407_v0  ;;  %v5414_v56 = vpop.eup %3586 }
 0x58b   : > { %v2450_v32 = vpop.xlane.xlu0 %2449  ;;  %3594 = vpow2.f32 %v2540_v39  ;;  %v1983_v39 = vadd.f32 %v5399_v51, %v1982_v4  ;;  %v1991_v26 = vsel %vm457_vm3, %v5407_v0, 0.0  ;;  %6305 = vst [vmem:[#allocation51_spill] sm:$0xff] %v5414_v56 }
 0x58c   : > { %v2548_v23 = vmul.f32 1.442695, %v2509_v21  ;;  %v2510_v2 = vsub.f32 %v6301_v50, %v2450_v32  ;;  %v2511_v46 = vsub.f32 %v6302_v60, %v2450_v32  ;;  %3596 = vpow2.f32 %v2538_v62 }
 0x58d   : > { %v2546_v6 = vmul.f32 1.442695, %v2508_v37  ;;  %v1992_v37 = vadd.f32 %v1991_v26, %v1990_v24 }
 0x58e   : > { %v2550_v10 = vmul.f32 1.442695, %v2510_v2  ;;  %v2552_v15 = vmul.f32 1.442695, %v2511_v46  ;;  %1980 = vadd.xlane.f32.xlu0 %v1979_v58  ;;  %3598 = vpow2.f32 %v2548_v23  ;;  %v1986_v23 = vsel %vm390_vm1, %v5414_v56, 0.0  ;;  %v6340_v56 = vld [vmem:[#allocation19_spill] sm:$0xff] }
 0x590   : > { %3600 = vpow2.f32 %v2550_v10 }
 0x591   : > { %3602 = vpow2.f32 %v2552_v15 }
 0x592   : > { %3604 = vpow2.f32 %v2546_v6  ;;  %v1240_v21 = vpop.xlane.xlu1 %1239  ;;  %1984 = vadd.xlane.f32.xlu0 %v1983_v39  ;;  %v5416_v62 = vpop.eup %3588  ;;  %v6310_v6 = vld [vmem:[#allocation60_spill] sm:$0xff] }
 0x593   : > { %6306 = vst [vmem:[#allocation50_spill] sm:$0xff] %v5416_v62  ;;  %3606 = vrcp.f32 %v1240_v21  ;;  %v5418_v46 = vpop.eup %3590  ;;  %v2610_v50 = vsel %vm390_vm1, %v5416_v62, 0.0 }
 0x594   : > { %6307 = vst [vmem:[#allocation54_spill] sm:$0xff] %v5418_v46  ;;  %v5420_v32 = vpop.eup %3592  ;;  %v1244_v58 = vpop.xlane.xlu0 %1243  ;;  %v1987_v39 = vadd.f32 %v5418_v46, %v1986_v23 }
 0x595   : > { %6308 = vst [vmem:[#allocation55_spill] sm:$0xff] %v5420_v32  ;;  %v5426_v2 = vpop.eup %3594  ;;  %3608 = vrcp.f32 %v1244_v58  ;;  %v2611_v24 = vadd.f32 %v5420_v32, %v2610_v50 }
 0x596   : > { %6309 = vst [vmem:[#allocation53_spill] sm:$0xff] %v5426_v2  ;;  %v2454_v60 = vpop.xlane.xlu1 %2453  ;;  %1993 = vadd.xlane.f32.xlu0 %v1992_v37  ;;  %v5430_v15 = vpop.eup %3596  ;;  %v2606_v62 = vsel %vm390_vm1, %v5426_v2, 0.0 }
 0x597   : > { %v2512_v4 = vsub.f32 %v4985_v42, %v2454_v60  ;;  %v2513_v10 = vsub.f32 %v6310_v6, %v2454_v60  ;;  %6311 = vst [vmem:[#allocation52_spill] sm:$0xff] %v5430_v15  ;;  %v2607_v23 = vadd.f32 %v5430_v15, %v2606_v62 }
 0x598   : > { %v5434_v26 = vpop.eup %3598 }
 0x599   : > { %6312 = vst [vmem:[#allocation56_spill] sm:$0xff] %v5434_v26  ;;  %v2554_v21 = vmul.f32 1.442695, %v2512_v4  ;;  %v2556_v52 = vmul.f32 1.442695, %v2513_v10  ;;  %v2614_v10 = vsel %vm390_vm1, %v5434_v26, 0.0 }
 0x59a   : > { %v5438_v58 = vpop.eup %3600  ;;  %v5440_v37 = vpop.xlane.xlu1 %2457  ;;  %1988 = vadd.xlane.f32.xlu1 %v1987_v39  ;;  %2612 = vadd.xlane.f32.xlu0 %v2611_v24  ;;  %v6317_v26 = vld [vmem:[#allocation64_spill] sm:$0xff] }
 0x59b   : > { %6313 = vst [vmem:[#allocation57_spill] sm:$0xff] %v5438_v58  ;;  %v5442_v42 = vpop.eup %3602  ;;  %3610 = vpow2.f32 %v2554_v21  ;;  %v1248_v39 = vpop.xlane.xlu0 %1247 }
 0x59c   : > { %6314 = vst [vmem:[#allocation58_spill] sm:$0xff] %v5442_v42  ;;  %v5444_v60 = vpop.eup %3604  ;;  %3612 = vpow2.f32 %v2556_v52  ;;  %v2618_v50 = vsel %vm390_vm1, %v5442_v42, 0.0  ;;  %v6316_v42 = vld [vmem:[#allocation61_spill] sm:$0xff] }
 0x59d   : > { %6315 = vst [vmem:[#allocation59_spill] sm:$0xff] %v5444_v60  ;;  %v3607_v4 = vpop.eup %3606  ;;  %v2619_v6 = vadd.f32 %v5438_v58, %v2618_v50  ;;  %v2615_v15 = vadd.f32 %v5444_v60, %v2614_v10  ;;  %3614 = vrcp.f32 %v1248_v39 }
 0x59e   : > { %v2462_v32 = vpop.xlane.xlu1 %2461  ;;  %2608 = vadd.xlane.f32.xlu1 %v2607_v23  ;;  %v1323_v62 = vmul.f32 %v3607_v4, %v4987_v38  ;;  %v1324_v2 = vmul.f32 %v3607_v4, %v6316_v42  ;;  %v6320_v4 = vld [vmem:[#allocation16_spill] sm:$0xff] }
 0x59f   : > { %v2516_v24 = vsub.f32 %v5016_v35, %v2462_v32  ;;  %v2517_v21 = vsub.f32 %v5020_v5, %v2462_v32  ;;  %2620 = vadd.xlane.f32.xlu0 %v2619_v6  ;;  %v3609_v52 = vpop.eup %3608 }
 0x5a0   : > { %v1325_v50 = vmul.f32 %v3609_v52, %v4997_v12  ;;  %v1326_v0 = vmul.f32 %v3609_v52, %v6317_v26  ;;  %v6321_v26 = vmov 0  }
 0x5a1   : > { %v2562_v58 = vmul.f32 1.442695, %v2516_v24  ;;  %v2564_v51 = vmul.f32 1.442695, %v2517_v21 }
 0x5a2   : > { %v1252_v23 = vpop.xlane.xlu1 %1251  ;;  %2616 = vadd.xlane.f32.xlu1 %v2615_v15  ;;  %v1358_v35 = vpack.c.bf16 %v1326_v0, %v1324_v2  ;;  %v1357_v5 = vpack.c.bf16 %v1325_v50, %v1323_v62  ;;  %v1256_v42 = vpop.xlane.xlu0 %1255  ;;  %v6325_v62 = vld [vmem:[#allocation18_spill] sm:$0xff] }
 0x5a3   : > { %3616 = vpow2.f32 %v2562_v58  ;;  %v6322_v58 = vld [vmem:[#allocation15_spill] sm:$0xff] }
 0x5a4   : > { %3618 = vpow2.f32 %v2564_v51  ;;  %3269 = vmatprep.mubr.msk.bf16.mxu0 %vm390_vm1, %v1358_v35  ;;  %v6326_v35 = vld [vmem:[#allocation65_spill] sm:$0xff] }
 0x5a5   : > { %v5459_v32 = vpop.eup %3610  ;;  %3620 = vrcp.f32 %v1252_v23  ;;  %1473 = vmatmul.mubr.bf16.vlgmr.msra.gmra.mrb[36].mxu0 %v1357_v5 }
 0x5a6   : > { %6318 = vst [vmem:[#allocation60_spill] sm:$0xff] %v5459_v32  ;;  %v5462_v38 = vpop.eup %3612  ;;  %v5464_v12 = vpop.xlane.xlu1 %2465  ;;  %2121 = vmatpush1.bf16.msra.mxu0 %v6320_v4  ;;  %3622 = vrcp.f32 %v1256_v42 }
 0x5a7   : > { %6319 = vst [vmem:[#allocation61_spill] sm:$0xff] %v5462_v38  ;;  %v2622_v15 = vsel %vm390_vm1, %v5462_v38, 0.0  ;;  %2122 = vmatprep.subr.bf16.mxu0 %v6321_v26  ;;  %v3615_v6 = vpop.eup %3614  ;;  %v6338_v38 = vld [vmem:[#allocation67_spill] sm:$0xff] }
 0x5a8   : > { %v2623_v51 = vadd.f32 %v5459_v32, %v2622_v15  ;;  %v1328_v23 = vmul.f32 %v3615_v6, %v5022_v59  ;;  %v1327_v5 = vmul.f32 %v3615_v6, %v6326_v35  ;;  %v6327_v15 = vld [vmem:[#allocation68_spill] sm:$0xff]  ;;  %v6328_v32 = vld [vmem:[#allocation17_spill] sm:$0xff]  ;;  %v6332_v35 = vld [vmem:[#allocation62_spill] sm:$0xff]  ;;  %v2519_v60 = vsub.f32 %v6338_v38, %v5464_v12 }
 0x5a9   : > { %v6329_v59 = vld [vmem:[#allocation13_spill] sm:$0xff] }
 0x5aa   : > { %2624 = vadd.xlane.f32.xlu1 %v2623_v51  ;;  %v5471_v0 = vpop.xlane.xlu1 %2469  ;;  %v1264_v2 = vpop.xlane.xlu0 %1263  ;;  %2123 = vmatpush1.bf16.msra.mxu0 %v6322_v58 }
 0x5ab   : > { %2124 = vmatprep.subr.bf16.mxu0 %v6321_v26 }
 0x5ad   : > { %v5475_v10 = vpop.eup %3616 }
 0x5ae   : > { %6323 = vst [vmem:[#allocation64_spill] sm:$0xff] %v5475_v10  ;;  %v5477_v39 = vpop.eup %3618  ;;  %v1260_v24 = vpop.xlane.xlu1 %1259  ;;  %2125 = vmatpush1.bf16.msra.mxu0 %v6325_v62 }
 0x5af   : > { %6324 = vst [vmem:[#allocation16_spill] sm:$0xff] %v5477_v39  ;;  %v5479_v21 = vpop.permute.xlu0 %2754  ;;  %v3621_v52 = vpop.eup %3620  ;;  %v2630_v50 = vsel %vm390_vm1, %v5477_v39, 0.0  ;;  %2126 = vmatprep.subr.bf16.mxu0 %v6321_v26  ;;  %3624 = vrcp.f32 %v1260_v24 }
 0x5b0   : > { %3330 = vmatpush1.bf16.msra.mxu1 %v5479_v21  ;;  %v2631_v4 = vadd.f32 %v5475_v10, %v2630_v50  ;;  %v1330_v51 = vmul.f32 %v3621_v52, %v6327_v15  ;;  %v1329_v58 = vmul.f32 %v3621_v52, %v5042_v30  ;;  %v6330_v30 = vld [vmem:[#allocation20_spill] sm:$0xff]  ;;  %v3623_v24 = vpop.eup %3622  ;;  %v6331_v52 = vld [vmem:[#allocation63_spill] sm:$0xff]  ;;  %3626 = vrcp.f32 %v1264_v2  ;;  %v6334_v15 = vld [vmem:[#allocation22_spill] sm:$0xff] }
 0x5b1   : > { %3322 = vmatprep.subr.bf16.mxu1 %v6321_v26  ;;  %v2515_v50 = vsub.f32 %v6331_v52, %v5440_v37  ;;  %v6337_v52 = vld [vmem:[#allocation80_spill] sm:$0xff] }
 0x5b2   : > { %2632 = vadd.xlane.f32.xlu1 %v2631_v4  ;;  %v5492_v42 = vpop.xlane.xlu1 %2473  ;;  %v1360_v62 = vpack.c.bf16 %v1330_v51, %v1328_v23  ;;  %v1359_v39 = vpack.c.bf16 %v1329_v58, %v1327_v5  ;;  %2127 = vmatpush1.bf16.msra.mxu0 %v6328_v32  ;;  %v2514_v5 = vsub.f32 %v6332_v35, %v5440_v37  ;;  %v6335_v51 = vld [vmem:[#allocation72_spill] sm:$0xff] }
 0x5b3   : > { %2128 = vmatprep.subr.bf16.mxu0 %v6321_v26  ;;  %v1332_v58 = vmul.f32 %v3623_v24, %v6335_v51  ;;  %v2560_v37 = vmul.f32 1.442695, %v2515_v50  ;;  %v6343_v50 = vld [vmem:[#allocation69_spill] sm:$0xff] }
 0x5b4   : > { %3270 = vmatprep.mubr.msk.bf16.mxu0 %vm390_vm1, %v1360_v62  ;;  %v2558_v46 = vmul.f32 1.442695, %v2514_v5  ;;  %v6345_v5 = vld [vmem:[#allocation74_spill] sm:$0xff] }
 0x5b5   : > { %1481 = vmatmul.mubr.bf16.gmra.mrb[40].mxu0 %v1359_v39  ;;  %2758 = vrot.lane.b32.xlu0 %v6329_v59, %s3775_s18  ;;  %v6333_v39 = vld [vmem:[#allocation66_spill] sm:$0xff] }
 0x5b6   : > { %v5499_v6 = vpop.xlane.xlu1 %2477  ;;  %2129 = vmatpush1.bf16.msra.mxu0 %v6330_v30  ;;  %v2518_v4 = vsub.f32 %v6333_v39, %v5464_v12  ;;  %v6336_v59 = vld [vmem:[#allocation70_spill] sm:$0xff] }
 0x5b7   : > { %2130 = vmatprep.subr.bf16.mxu0 %v6321_v26  ;;  %v1331_v30 = vmul.f32 %v3623_v24, %v6336_v59  ;;  %v6341_v24 = vld [vmem:[#allocation24_spill] sm:$0xff] }
 0x5b8   : > { %v2566_v51 = vmul.f32 1.442695, %v2518_v4  ;;  %v6347_v59 = vld [vmem:[#allocation84_spill] sm:$0xff] }
 0x5b9   : > { %v3625_v32 = vpop.eup %3624 }
 0x5ba   : > { %v1268_v23 = vpop.xlane.xlu1 %1267  ;;  %2131 = vmatpush1.bf16.msra.mxu0 %v6334_v15  ;;  %v1334_v62 = vmul.f32 %v3625_v32, %v5070_v49  ;;  %v1333_v10 = vmul.f32 %v3625_v32, %v6337_v52  ;;  %v6339_v15 = vld [vmem:[#allocation71_spill] sm:$0xff]  ;;  %v2568_v49 = vmul.f32 1.442695, %v2519_v60  ;;  %v6344_v60 = vld [vmem:[#allocation21_spill] sm:$0xff]  ;;  %v6348_v52 = vld [vmem:[#allocation76_spill] sm:$0xff] }
 0x5bb   : > { %2132 = vmatprep.subr.bf16.mxu0 %v6321_v26  ;;  %3628 = vrcp.f32 %v1268_v23  ;;  %v2521_v48 = vsub.f32 %v6339_v15, %v5471_v0  ;;  %v2520_v23 = vsub.f32 %v6343_v50, %v5471_v0  ;;  %v2118_v32 = vsel %vm738_vm4, %v6344_v60, 0  ;;  %v6351_v50 = vld [vmem:[#allocation75_spill] sm:$0xff] }
 0x5bc   : > { %v1362_v39 = vpack.c.bf16 %v1334_v62, %v1332_v58  ;;  %v1361_v2 = vpack.c.bf16 %v1333_v10, %v1331_v30  ;;  %3630 = vpow2.f32 %v2560_v37  ;;  %v6342_v10 = vld [vmem:[#allocation14_spill] sm:$0xff]  ;;  %v2524_v60 = vsub.f32 %v6351_v50, %v5499_v6 }
 0x5bd   : > { %3632 = vpow2.f32 %v2558_v46  ;;  %v2572_v12 = vmul.f32 1.442695, %v2521_v48  ;;  %v2523_v46 = vsub.f32 %v6345_v5, %v5492_v42  ;;  %v6346_v58 = vld [vmem:[#allocation78_spill] sm:$0xff]  ;;  %v2570_v0 = vmul.f32 1.442695, %v2520_v23 }
 0x5be   : > { %v1272_v35 = vpop.xlane.xlu1 %1271  ;;  %2133 = vmatpush1.bf16.msra.mxu0 %v6340_v56  ;;  %3271 = vmatprep.mubr.msk.bf16.mxu0 %vm390_vm1, %v1362_v39  ;;  %3634 = vpow2.f32 %v2566_v51  ;;  %v3627_v56 = vpop.eup %3626  ;;  %v6350_v51 = vld [vmem:[#allocation77_spill] sm:$0xff] }
 0x5bf   : > { %2134 = vmatprep.subr.bf16.mxu0 %v6321_v26  ;;  %1489 = vmatmul.mubr.bf16.gmra.mrb[44].mxu0 %v1361_v2  ;;  %3636 = vpow2.f32 %v2568_v49  ;;  %v1336_v62 = vmul.f32 %v3627_v56, %v6346_v58  ;;  %v1335_v37 = vmul.f32 %v3627_v56, %v6348_v52  ;;  %v6349_v2 = vld [vmem:[#allocation73_spill] sm:$0xff]  ;;  %v2525_v49 = vsub.f32 %v6350_v51, %v5499_v6 }
 0x5c0   : > { %3638 = vrcp.f32 %v1272_v35  ;;  %v2522_v15 = vsub.f32 %v6349_v2, %v5492_v42  ;;  %v2576_v35 = vmul.f32 1.442695, %v2523_v46  ;;  %v6352_v42 = vld [vmem:[#allocation86_spill] sm:$0xff]  ;;  %v2578_v6 = vmul.f32 1.442695, %v2524_v60 }
 0x5c1   : > { %3640 = vpow2.f32 %v2572_v12  ;;  %v2580_v46 = vmul.f32 1.442695, %v2525_v49 }
 0x5c2   : > { %v5522_v38 = vpop.xlane.xlu1 %2485  ;;  %2135 = vmatpush1.bf16.msra.mxu0 %v6341_v24  ;;  %v2574_v23 = vmul.f32 1.442695, %v2522_v15  ;;  %v6355_v15 = vld [vmem:[#allocation87_spill] sm:$0xff] }
 0x5c3   : > { %2760 = vrot.lane.b32.xlu1 %v6342_v10, %s3775_s18  ;;  %2136 = vmatprep.subr.bf16.mxu0 %v6321_v26 }
 0x5c5   : > { %v3629_v4 = vpop.eup %3628 }
 0x5c6   : > { %v1276_v48 = vpop.xlane.xlu1 %1275  ;;  %2137 = vmatpush1.bf16.msra.mxu0 %v2118_v32  ;;  %v1338_v30 = vmul.f32 %v3629_v4, %v6347_v59  ;;  %v1337_v39 = vmul.f32 %v3629_v4, %v5129_v13  ;;  %v5545_v56 = vpop.eup %3630  ;;  %v6353_v59 = vld [vmem:[#allocation85_spill] sm:$0xff] }
 0x5c7   : > { %2800 = vmatprep.subr.bf16.mxu0 %v6321_v26  ;;  %3642 = vrcp.f32 %v1276_v48  ;;  %v5548_v13 = vpop.eup %3632  ;;  %v2626_v58 = vsel %vm390_vm1, %v5545_v56, 0.0 }
 0x5c8   : > { %v1364_v24 = vpack.c.bf16 %v1338_v30, %v1336_v62  ;;  %v1363_v10 = vpack.c.bf16 %v1337_v39, %v1335_v37  ;;  %3644 = vpow2.f32 %v2570_v0  ;;  %v5551_v5 = vpop.eup %3634  ;;  %v2627_v0 = vadd.f32 %v5548_v13, %v2626_v58 }
 0x5c9   : > { %3646 = vpow2.f32 %v2576_v35  ;;  %v5555_v4 = vpop.eup %3636 }
 0x5ca   : > { %v2494_v12 = vpop.xlane.xlu1 %2493  ;;  %3272 = vmatprep.mubr.msk.bf16.mxu0 %vm390_vm1, %v1364_v24  ;;  %v3639_v62 = vpop.eup %3638  ;;  %3648 = vpow2.f32 %v2574_v23  ;;  %v2634_v51 = vsel %vm390_vm1, %v5555_v4, 0.0  ;;  %v6356_v24 = vld [vmem:[#allocation93_spill] sm:$0xff] }
 0x5cb   : > { %v2533_v32 = vsub.f32 %v6352_v42, %v2494_v12  ;;  %1497 = vmatmul.mubr.bf16.gmra.mrb[48].mxu0 %v1363_v10  ;;  %v2532_v30 = vsub.f32 %v6353_v59, %v2494_v12  ;;  %v5560_v52 = vpop.eup %3640  ;;  %3650 = vpow2.f32 %v2580_v46  ;;  %v1340_v35 = vmul.f32 %v3639_v62, %v6355_v15  ;;  %v6357_v12 = vld [vmem:[#allocation90_spill] sm:$0xff] }
 0x5cc   : > { %6354 = vst [vmem:[#allocation15_spill] sm:$0xff] %v5560_v52  ;;  %3652 = vpow2.f32 %v2578_v6  ;;  %v1339_v50 = vmul.f32 %v3639_v62, %v6357_v12  ;;  %v2635_v46 = vadd.f32 %v5551_v5, %v2634_v51  ;;  %v2638_v58 = vsel %vm390_vm1, %v5560_v52, 0.0 }
 0x5cd   : > { %v2596_v37 = vmul.f32 1.442695, %v2533_v32  ;;  %v2594_v49 = vmul.f32 1.442695, %v2532_v30 }
 0x5ce   : > { %v5553_v48 = vpop.xlane.xlu1 %1283 }
 0x5cf   : > { %3654 = vpow2.f32 %v2596_v37  ;;  %v6361_v37 = vld [vmem:[#allocation82_spill] sm:$0xff] }
 0x5d0   : > { %3656 = vpow2.f32 %v2594_v49 }
 0x5d1   : > { %v3643_v2 = vpop.eup %3642 }
 0x5d2   : > { %v2498_v39 = vpop.xlane.xlu1 %2497  ;;  %v1342_v10 = vmul.f32 %v3643_v2, %v6356_v24  ;;  %v1341_v60 = vmul.f32 %v3643_v2, %v5178_v36  ;;  %v5570_v6 = vpop.eup %3644 }
 0x5d3   : > { %6358 = vst [vmem:[#allocation18_spill] sm:$0xff] %v5570_v6  ;;  %v5574_v59 = vpop.eup %3646  ;;  %v2639_v36 = vadd.f32 %v5570_v6, %v2638_v58 }
 0x5d4   : > { %2628 = vadd.xlane.f32.xlu0 %v2627_v0  ;;  %v1366_v42 = vpack.c.bf16 %v1342_v10, %v1340_v35  ;;  %v1365_v32 = vpack.c.bf16 %v1341_v60, %v1339_v50  ;;  %6359 = vst [vmem:[#allocation65_spill] sm:$0xff] %v5574_v59  ;;  %v5578_v30 = vpop.eup %3648  ;;  %v2529_v0 = vsub.f32 %v6361_v37, %v5522_v38  ;;  %v2642_v2 = vsel %vm390_vm1, %v5574_v59, 0.0  ;;  %v6363_v10 = vld [vmem:[#allocation81_spill] sm:$0xff] }
 0x5d5   : > { %6360 = vst [vmem:[#allocation68_spill] sm:$0xff] %v5578_v30  ;;  %v5584_v15 = vpop.eup %3650  ;;  %v2643_v49 = vadd.f32 %v5578_v30, %v2642_v2  ;;  %v2528_v12 = vsub.f32 %v6363_v10, %v5522_v38 }
 0x5d6   : > { %v1288_v23 = vpop.xlane.xlu1 %1287  ;;  %3273 = vmatprep.mubr.msk.bf16.mxu0 %vm390_vm1, %v1366_v42  ;;  %6362 = vst [vmem:[#allocation17_spill] sm:$0xff] %v5584_v15  ;;  %v5586_v35 = vpop.eup %3652  ;;  %v2588_v50 = vmul.f32 1.442695, %v2529_v0  ;;  %v2646_v42 = vsel %vm390_vm1, %v5584_v15, 0.0  ;;  %v6366_v15 = vld [vmem:[#allocation88_spill] sm:$0xff] }
 0x5d7   : > { %1505 = vmatmul.mubr.bf16.gmra.mrb[52].mxu0 %v1365_v32  ;;  %v2647_v38 = vadd.f32 %v5586_v35, %v2646_v42  ;;  %v2586_v10 = vmul.f32 1.442695, %v2528_v12 }
 0x5d8   : > { %2636 = vadd.xlane.f32.xlu0 %v2635_v46  ;;  %v6364_v46 = vld [vmem:[#allocation79_spill] sm:$0xff]  ;;  %3658 = vpow2.f32 %v2588_v50 }
 0x5d9   : > { %v5591_v24 = vpop.eup %3654  ;;  %v6368_v50 = vld [vmem:[#allocation91_spill] sm:$0xff] }
 0x5da   : > { %v1296_v62 = vpop.xlane.xlu1 %1295  ;;  %v5600_v6 = vpop.eup %3656  ;;  %v2662_v0 = vsel %vm390_vm1, %v5591_v24, 0.0 }
 0x5dc   : > { %2640 = vadd.xlane.f32.xlu0 %v2639_v36  ;;  %v6365_v36 = vld [vmem:[#allocation89_spill] sm:$0xff] }
 0x5dd   : > { %v2535_v37 = vsub.f32 %v6365_v36, %v2498_v39 }
 0x5de   : > { %v5588_v51 = vpop.xlane.xlu1 %1304 }
 0x5df   : > { %v2482_v60 = vpop.xlane.xlu0 %2481 }
 0x5e0   : > { %v2526_v32 = vsub.f32 %v5083_v20, %v2482_v60  ;;  %v2527_v58 = vsub.f32 %v6364_v46, %v2482_v60  ;;  %2644 = vadd.xlane.f32.xlu0 %v2643_v49  ;;  %v2534_v20 = vsub.f32 %v6366_v15, %v2498_v39  ;;  %v2600_v49 = vmul.f32 1.442695, %v2535_v37  ;;  %v6367_v60 = vld [vmem:[#allocation83_spill] sm:$0xff] }
 0x5e2   : > { %v2582_v2 = vmul.f32 1.442695, %v2526_v32  ;;  %v2584_v30 = vmul.f32 1.442695, %v2527_v58  ;;  %v5602_v59 = vpop.xlane.xlu1 %1932  ;;  %v2663_v32 = vadd.f32 %v5600_v6, %v2662_v0  ;;  %v2598_v58 = vmul.f32 1.442695, %v2534_v20  ;;  %v5616_v0 = vpop.eup %3658 }
 0x5e3   : > { %v2490_v52 = vpop.xlane.xlu0 %2489  ;;  %6370 = vst [vmem:[#allocation13_spill] sm:$0xff] %v5616_v0 }
 0x5e4   : > { %3660 = vpow2.f32 %v2582_v2  ;;  %2648 = vadd.xlane.f32.xlu0 %v2647_v38  ;;  %v2531_v46 = vsub.f32 %v6367_v60, %v2490_v52  ;;  %v2530_v42 = vsub.f32 %v5110_v1, %v2490_v52  ;;  %v6369_v2 = vld [vmem:[#allocation92_spill] sm:$0xff] }
 0x5e5   : > { %3662 = vpow2.f32 %v2584_v30 }
 0x5e6   : > { %3664 = vpow2.f32 %v2586_v10  ;;  %v5612_v12 = vpop.xlane.xlu1 %1940  ;;  %v2592_v39 = vmul.f32 1.442695, %v2531_v46  ;;  %v2590_v15 = vmul.f32 1.442695, %v2530_v42 }
 0x5e7   : > { %2664 = vadd.xlane.f32.xlu1 %v2663_v32  ;;  %v1280_v36 = vpop.xlane.xlu0 %1279  ;;  %3666 = vrcp.f32 %v5553_v48 }
 0x5e8   : > { %3668 = vpow2.f32 %v2600_v49 }
 0x5e9   : > { %3670 = vrcp.f32 %v1280_v36 }
 0x5ea   : > { %3672 = vpow2.f32 %v2598_v58  ;;  %v5620_v48 = vpop.xlane.xlu1 %1944 }
 0x5eb   : > { %v2503_v30 = vpop.xlane.xlu0 %2502  ;;  %3674 = vrcp.f32 %v1288_v23 }
 0x5ec   : > { %v2536_v37 = vsub.f32 %v6368_v50, %v2503_v30  ;;  %v2537_v38 = vsub.f32 %v6369_v2, %v2503_v30  ;;  %3676 = vpow2.f32 %v2592_v39 }
 0x5ed   : > { %3678 = vrcp.f32 %v1296_v62  ;;  %v2654_v62 = vsel %vm390_vm1, %v5616_v0, 0.0 }
 0x5ee   : > { %v5618_v1 = vpop.eup %3660  ;;  %v2602_v52 = vmul.f32 1.442695, %v2536_v37  ;;  %v2604_v10 = vmul.f32 1.442695, %v2537_v38  ;;  %3680 = vpow2.f32 %v2590_v15 }
 0x5ef   : > { %v5622_v20 = vpop.eup %3662  ;;  %v1292_v49 = vpop.xlane.xlu0 %1291 }
 0x5f0   : > { %3682 = vpow2.f32 %v2602_v52  ;;  %v2650_v23 = vsel %vm390_vm1, %v5622_v20, 0.0  ;;  %v5626_v60 = vpop.eup %3664 }
 0x5f1   : > { %6371 = vst [vmem:[#allocation20_spill] sm:$0xff] %v5626_v60  ;;  %3684 = vpow2.f32 %v2604_v10  ;;  %v2651_v46 = vadd.f32 %v5618_v1, %v2650_v23  ;;  %v3667_v32 = vpop.eup %3666  ;;  %v2655_v15 = vadd.f32 %v5626_v60, %v2654_v62 }
 0x5f2   : > { %3686 = vrcp.f32 %v1292_v49  ;;  %v5631_v58 = vpop.xlane.xlu1 %1952  ;;  %v5633_v42 = vpop.eup %3668  ;;  %v1346_v37 = vmul.f32 %v3667_v32, %v5186_v57  ;;  %v1345_v38 = vmul.f32 %v3667_v32, %v5188_v22 }
 0x5f3   : > { %2652 = vadd.xlane.f32.xlu0 %v2651_v46  ;;  %v1300_v36 = vpop.xlane.xlu0 %1299  ;;  %v3671_v39 = vpop.eup %3670  ;;  %v2666_v10 = vsel %vm390_vm1, %v5633_v42, 0.0 }
 0x5f4   : > { %3688 = vrcp.f32 %v1300_v36  ;;  %v5636_v30 = vpop.eup %3672  ;;  %v1344_v50 = vmul.f32 %v3671_v39, %v5238_v14  ;;  %v1343_v2 = vmul.f32 %v3671_v39, %v5254_v53 }
 0x5f5   : > { %v3675_v52 = vpop.eup %3674  ;;  %3690 = vrcp.f32 %v5588_v51  ;;  %v2667_v22 = vadd.f32 %v5636_v30, %v2666_v10 }
 0x5f6   : > { %v5644_v49 = vpop.permute.xlu1 %2756  ;;  %v5646_v23 = vpop.eup %3676  ;;  %v1368_v46 = vpack.c.bf16 %v1346_v37, %v1344_v50  ;;  %v1367_v36 = vpack.c.bf16 %v1345_v38, %v1343_v2  ;;  %v1348_v51 = vmul.f32 %v3675_v52, %v5197_v7  ;;  %v1347_v38 = vmul.f32 %v3675_v52, %v5201_v31 }
 0x5f7   : > { %6372 = vst [vmem:[#allocation63_spill] sm:$0xff] %v5646_v23  ;;  %2656 = vadd.xlane.f32.xlu0 %v2655_v15  ;;  %v1929_v62 = vpop.xlane.xlu0 %1928  ;;  %3331 = vmatpush1.bf16.msra.mxu1 %v5644_v49  ;;  %v3679_v14 = vpop.eup %3678  ;;  %v2658_v32 = vsel %vm390_vm1, %v5646_v23, 0.0 }
 0x5f8   : > { %3323 = vmatprep.subr.bf16.mxu1 %v6321_v26  ;;  %v5651_v57 = vpop.eup %3680  ;;  %3274 = vmatprep.mubr.msk.bf16.mxu0 %vm390_vm1, %v1368_v46  ;;  %v1352_v7 = vmul.f32 %v3679_v14, %v5207_v34  ;;  %3692 = vrcp.f32 %v1929_v62  ;;  %v1351_v34 = vmul.f32 %v3679_v14, %v5209_v27 }
 0x5f9   : > { %1513 = vmatmul.mubr.bf16.gmra.mrb[56].mxu0 %v1367_v36  ;;  %v2659_v37 = vadd.f32 %v5651_v57, %v2658_v32  ;;  %3694 = vrcp.f32 %v5602_v59 }
 0x5fa   : > { %v5655_v53 = vpop.eup %3682 }
 0x5fb   : > { %v5659_v39 = vpop.eup %3684  ;;  %2668 = vadd.xlane.f32.xlu0 %v2667_v22  ;;  %v1937_v15 = vpop.xlane.xlu0 %1936  ;;  %v2670_v36 = vsel %vm455_vm2, %v5655_v53, 0.0 }
 0x5fc   : > { %v3687_v50 = vpop.eup %3686  ;;  %v2671_v60 = vsel %vm457_vm3, %v5659_v39, 0.0  ;;  %3696 = vrcp.f32 %v1937_v15 }
 0x5fd   : > { %v1350_v2 = vmul.f32 %v3687_v50, %v5270_v29  ;;  %v1349_v10 = vmul.f32 %v3687_v50, %v5277_v45  ;;  %v2672_v31 = vadd.f32 %v2671_v60, %v2670_v36  ;;  %3698 = vrcp.f32 %v5612_v12 }
 0x5fe   : > { %v3689_v46 = vpop.eup %3688 }
 0x5ff   : > { %2660 = vadd.xlane.f32.xlu0 %v2659_v37  ;;  %v1370_v22 = vpack.c.bf16 %v1350_v2, %v1348_v51  ;;  %v1949_v23 = vpop.xlane.xlu0 %1948  ;;  %v1369_v0 = vpack.c.bf16 %v1349_v10, %v1347_v38  ;;  %v1354_v32 = vmul.f32 %v3689_v46, %v5280_v8  ;;  %v3691_v45 = vpop.eup %3690  ;;  %v1353_v50 = vmul.f32 %v3689_v46, %v5287_v9 }
 0x600   : > { %v1356_v51 = vmul.f32 %v3691_v45, %v5217_v61  ;;  %v1355_v2 = vmul.f32 %v3691_v45, %v5213_v41  ;;  %3700 = vrcp.f32 %v1949_v23 }
 0x601   : > { %3275 = vmatprep.mubr.msk.bf16.mxu0 %vm390_vm1, %v1370_v22  ;;  %v1372_v29 = vpack.c.bf16 %v1354_v32, %v1352_v7  ;;  %v1371_v62 = vpack.c.bf16 %v1353_v50, %v1351_v34  ;;  %3702 = vrcp.f32 %v5620_v48  ;;  %v6373_v48 = vld [vmem:[#allocation23_spill] sm:$0xff] }
 0x602   : > { %1521 = vmatmul.mubr.bf16.gmra.mrb[60].mxu0 %v1369_v0  ;;  %v1374_v37 = vpack.c.bf16 %v1356_v51, %v1356_v51  ;;  %v3693_v60 = vpop.eup %3692  ;;  %v1373_v27 = vpack.c.bf16 %v1355_v2, %v1355_v2  ;;  %v6375_v51 = vld [vmem:[#allocation26_spill] sm:$0xff] }
 0x603   : > { %2673 = vadd.xlane.f32.xlu0 %v2672_v31  ;;  %3276 = vmatprep.mubr.msk.bf16.mxu0 %vm390_vm1, %v1372_v29  ;;  %v1957_v52 = vpop.xlane.xlu0 %1956  ;;  %v3695_v0 = vpop.eup %3694  ;;  %v2013_v9 = vmul.f32 %v3693_v60, %v5298_v55  ;;  %v2012_v46 = vmul.f32 %v3693_v60, %v5306_v17  ;;  %v6374_v31 = vld [vmem:[#allocation25_spill] sm:$0xff] }
 0x604   : > { %v2015_v61 = vmul.f32 %v3695_v0, %v5228_v3  ;;  %v2014_v55 = vmul.f32 %v3695_v0, %v5234_v43  ;;  %3704 = vrcp.f32 %v1957_v52  ;;  %v6378_v60 = vld [vmem:[#allocation29_spill] sm:$0xff] }
 0x605   : > { %3706 = vrcp.f32 %v5631_v58 }
 0x606   : > { %v2047_v14 = vpack.c.bf16 %v2015_v61, %v2013_v9  ;;  %v3697_v15 = vpop.eup %3696  ;;  %v2046_v23 = vpack.c.bf16 %v2014_v55, %v2012_v46 }
 0x607   : > { %v1961_v8 = vpop.xlane.xlu0 %1960  ;;  %v3699_v10 = vpop.eup %3698  ;;  %v2017_v41 = vmul.f32 %v3697_v15, %v5310_v28  ;;  %v2016_v43 = vmul.f32 %v3697_v15, %v5315_v25 }
 0x608   : > { %v2019_v3 = vmul.f32 %v3699_v10, %v5245_v19  ;;  %v2018_v19 = vmul.f32 %v3699_v10, %v5249_v16  ;;  %v6381_v10 = vld [vmem:[#allocation38_spill] sm:$0xff] }
 0x60a   : > { %1529 = vmatmul.mubr.bf16.gmra.mrb[64].mxu0 %v1371_v62  ;;  %v2049_v22 = vpack.c.bf16 %v2019_v3, %v2017_v41  ;;  %v3701_v7 = vpop.eup %3700  ;;  %v2048_v45 = vpack.c.bf16 %v2018_v19, %v2016_v43  ;;  %v6377_v62 = vld [vmem:[#allocation94_spill] sm:$0xff]  ;;  %v6382_v41 = vld [vmem:[#allocation37_spill] sm:$0xff] }
 0x60b   : > { %3277 = vmatprep.mubr.msk.bf16.mxu0 %vm390_vm1, %v1374_v37  ;;  %v1965_v59 = vpop.xlane.xlu0 %1964  ;;  %v3703_v17 = vpop.eup %3702  ;;  %v2023_v28 = vmul.f32 %v3701_v7, %v5319_v18  ;;  %v2022_v18 = vmul.f32 %v3701_v7, %v5324_v54  ;;  %v6380_v54 = vld [vmem:[#allocation30_spill] sm:$0xff] }
 0x60c   : > { %v2021_v58 = vmul.f32 %v3703_v17, %v5268_v11  ;;  %3708 = vrcp.f32 %v1965_v59  ;;  %v6376_v11 = vld [vmem:[#allocation39_spill] sm:$0xff]  ;;  %v2020_v37 = vmul.f32 %v3703_v17, %v6377_v62  ;;  %v6388_v62 = vld [vmem:[#allocation44_spill] sm:$0xff] }
 0x60d   : > { %3710 = vrcp.f32 %v1961_v8  ;;  %v6379_v8 = vld [vmem:[#allocation36_spill] sm:$0xff] }
 0x60e   : > { %v2051_v52 = vpack.c.bf16 %v2023_v28, %v2021_v58  ;;  %v3705_v50 = vpop.eup %3704  ;;  %v2050_v2 = vpack.c.bf16 %v2022_v18, %v2020_v37  ;;  %v6385_v28 = vld [vmem:[#allocation40_spill] sm:$0xff]  ;;  %v6386_v58 = vld [vmem:[#allocation43_spill] sm:$0xff]  ;;  %v6387_v18 = vld [vmem:[#allocation42_spill] sm:$0xff] }
 0x60f   : > { %v1969_v38 = vpop.xlane.xlu0 %1968  ;;  %v3707_v16 = vpop.eup %3706  ;;  %v2027_v34 = vmul.f32 %v3705_v50, %v6376_v11  ;;  %v2026_v46 = vmul.f32 %v3705_v50, %v6381_v10 }
 0x610   : > { %v2025_v0 = vmul.f32 %v3707_v16, %v6379_v8  ;;  %v2024_v55 = vmul.f32 %v3707_v16, %v6382_v41  ;;  %v6393_v41 = vld [vmem:[#allocation12_spill] sm:$0xff] }
 0x612   : > { %1537 = vmatmul.mubr.bf16.gmra.mrb[68].mxu0 %v1373_v27  ;;  %v2053_v9 = vpack.c.bf16 %v2027_v34, %v2025_v0 }
 0x613   : > { %3287 = vmatprep.mubr.msk.bf16.mxu0 %vm390_vm1, %v2047_v14  ;;  %v1973_v12 = vpop.xlane.xlu0 %1972 }
 0x614   : > { %3712 = vrcp.f32 %v1973_v12 }
 0x615   : > { %3714 = vrcp.f32 %v1969_v38  ;;  %v6383_v38 = vld [vmem:[#allocation41_spill] sm:$0xff] }
 0x616   : > { %v3709_v61 = vpop.eup %3708 }
 0x617   : > { %v1977_v36 = vpop.xlane.xlu0 %1976  ;;  %v3711_v14 = vpop.eup %3710  ;;  %v2031_v12 = vmul.f32 %v3709_v61, %v5346_v47 }
 0x618   : > { %v2029_v3 = vmul.f32 %v3711_v14, %v6383_v38  ;;  %v2028_v19 = vmul.f32 %v3711_v14, %v6385_v28  ;;  %v6394_v38 = vld [vmem:[#allocation49_spill] sm:$0xff] }
 0x61a   : > { %2153 = vmatmul.mubr.bf16.vlgmr.msra.gmra.mrb[72].mxu0 %v2046_v23  ;;  %v2052_v23 = vpack.c.bf16 %v2026_v46, %v2024_v55 }
 0x61b   : > { %2801 = vmatpush1.bf16.msra.mxu0 %v6373_v48  ;;  %3288 = vmatprep.mubr.msk.bf16.mxu0 %vm390_vm1, %v2049_v22  ;;  %v1981_v32 = vpop.xlane.xlu0 %1980  ;;  %v2055_v48 = vpack.c.bf16 %v2031_v12, %v2029_v3 }
 0x61c   : > { %2802 = vmatprep.subr.bf16.mxu0 %v6321_v26  ;;  %3716 = vrcp.f32 %v1981_v32  ;;  %v6384_v32 = vld [vmem:[#allocation45_spill] sm:$0xff] }
 0x61d   : > { %3718 = vrcp.f32 %v1977_v36 }
 0x61e   : > { %v3713_v17 = vpop.eup %3712 }
 0x61f   : > { %2803 = vmatpush1.bf16.msra.mxu0 %v6374_v31  ;;  %v5697_v29 = vpop.xlane.xlu0 %1984  ;;  %v3715_v47 = vpop.eup %3714  ;;  %v2035_v43 = vmul.f32 %v3713_v17, %v6384_v32  ;;  %v6397_v32 = vld [vmem:[#allocation50_spill] sm:$0xff] }
 0x620   : > { %2804 = vmatprep.subr.bf16.mxu0 %v6321_v26  ;;  %v2033_v36 = vmul.f32 %v3715_v47, %v6386_v58  ;;  %v2032_v11 = vmul.f32 %v3715_v47, %v6387_v18  ;;  %v6396_v47 = vld [vmem:[#allocation53_spill] sm:$0xff] }
 0x622   : > { %2161 = vmatmul.mubr.bf16.gmra.mrb[76].mxu0 %v2048_v45 }
 0x623   : > { %2805 = vmatpush1.bf16.msra.mxu0 %v6375_v51  ;;  %3289 = vmatprep.mubr.msk.bf16.mxu0 %vm390_vm1, %v2051_v52  ;;  %v5703_v25 = vpop.xlane.xlu0 %1993  ;;  %v2034_v51 = vmul.f32 %v3713_v17, %v5370_v44 }
 0x624   : > { %2806 = vmatprep.subr.bf16.mxu0 %v6321_v26 }
 0x626   : > { %v3717_v52 = vpop.eup %3716 }
 0x627   : > { %2807 = vmatpush1.bf16.msra.mxu0 %v6378_v60  ;;  %v5710_v59 = vpop.xlane.xlu0 %2612  ;;  %v1989_v27 = vpop.xlane.xlu1 %1988  ;;  %v2039_v16 = vmul.f32 %v3717_v52, %v5384_v33  ;;  %v6389_v33 = vld [vmem:[#allocation51_spill] sm:$0xff] }
 0x628   : > { %2808 = vmatprep.subr.bf16.mxu0 %v6321_v26  ;;  %3720 = vrcp.f32 %v1989_v27 }
 0x629   : > { %3722 = vrcp.f32 %v5697_v29 }
 0x62a   : > { %2169 = vmatmul.mubr.bf16.gmra.mrb[80].mxu0 %v2050_v2  ;;  %3724 = vrcp.f32 %v5703_v25  ;;  %v2038_v2 = vmul.f32 %v3717_v52, %v5389_v40  ;;  %v6392_v40 = vld [vmem:[#allocation54_spill] sm:$0xff]  ;;  %v6400_v52 = vld [vmem:[#allocation55_spill] sm:$0xff] }
 0x62b   : > { %2809 = vmatpush1.bf16.msra.mxu0 %v6380_v54  ;;  %3290 = vmatprep.mubr.msk.bf16.mxu0 %vm390_vm1, %v2053_v9  ;;  %v2609_v7 = vpop.xlane.xlu1 %2608  ;;  %v6391_v54 = vld [vmem:[#allocation46_spill] sm:$0xff] }
 0x62c   : > { %2810 = vmatprep.subr.bf16.mxu0 %v6321_v26  ;;  %v5717_v15 = vpop.xlane.xlu0 %2620  ;;  %3726 = vrcp.f32 %v2609_v7 }
 0x62d   : > { %3728 = vrcp.f32 %v5710_v59  ;;  %v6395_v59 = vld [vmem:[#allocation48_spill] sm:$0xff] }
 0x62f   : > { %2811 = vmatpush1.bf16.msra.mxu0 %v5479_v21  ;;  %v2030_v21 = vmul.f32 %v3709_v61, %v5353_v63  ;;  %v2617_v31 = vpop.xlane.xlu1 %2616  ;;  %v3719_v63 = vpop.eup %3718  ;;  %v6390_v61 = vld [vmem:[#allocation47_spill] sm:$0xff] }
 0x630   : > { %2812 = vmatprep.subr.bf16.mxu0 %v6321_v26  ;;  %v2759_v22 = vpop.permute.xlu0 %2758  ;;  %v2037_v37 = vmul.f32 %v3719_v63, %v6388_v62  ;;  %v2036_v27 = vmul.f32 %v3719_v63, %v6390_v61  ;;  %3730 = vrcp.f32 %v2617_v31 }
 0x631   : > { %3332 = vmatpush1.bf16.msra.mxu1 %v2759_v22  ;;  %v2054_v45 = vpack.c.bf16 %v2030_v21, %v2028_v19  ;;  %3732 = vrcp.f32 %v5717_v15  ;;  %v6399_v15 = vld [vmem:[#allocation56_spill] sm:$0xff] }
 0x632   : > { %2177 = vmatmul.mubr.bf16.gmra.mrb[84].mxu0 %v2052_v23  ;;  %3324 = vmatprep.subr.bf16.mxu1 %v6321_v26  ;;  %v2059_v60 = vpack.c.bf16 %v2039_v16, %v2037_v37  ;;  %v3721_v8 = vpop.eup %3720  ;;  %v2058_v14 = vpack.c.bf16 %v2038_v2, %v2036_v27  ;;  %v6402_v37 = vld [vmem:[#allocation59_spill] sm:$0xff] }
 0x633   : > { %2813 = vmatpush1.bf16.msra.mxu0 %v5644_v49  ;;  %3291 = vmatprep.mubr.msk.bf16.mxu0 %vm390_vm1, %v2055_v48  ;;  %v2057_v49 = vpack.c.bf16 %v2035_v43, %v2033_v36  ;;  %v3723_v0 = vpop.eup %3722  ;;  %v2043_v9 = vmul.f32 %v3721_v8, %v6389_v33  ;;  %v2042_v12 = vmul.f32 %v3721_v8, %v6392_v40  ;;  %v6398_v36 = vld [vmem:[#allocation52_spill] sm:$0xff]  ;;  %v6403_v8 = vld [vmem:[#allocation57_spill] sm:$0xff] }
 0x634   : > { %2814 = vmatprep.subr.bf16.mxu0 %v6321_v26  ;;  %v2041_v25 = vmul.f32 %v3723_v0, %v6391_v54  ;;  %v3725_v46 = vpop.eup %3724  ;;  %v2040_v3 = vmul.f32 %v3723_v0, %v6394_v38  ;;  %v6405_v54 = vld [vmem:[#allocation60_spill] sm:$0xff] }
 0x635   : > { %v2045_v55 = vmul.f32 %v3725_v46, %v6393_v41  ;;  %v2044_v17 = vmul.f32 %v3725_v46, %v6395_v59  ;;  %v6408_v59 = vld [vmem:[#allocation15_spill] sm:$0xff] }
 0x636   : > { %v2061_v10 = vpack.c.bf16 %v2043_v9, %v2041_v25  ;;  %v2060_v23 = vpack.c.bf16 %v2042_v12, %v2040_v3  ;;  %v3727_v48 = vpop.eup %3726  ;;  %v6404_v9 = vld [vmem:[#allocation61_spill] sm:$0xff]  ;;  %v6406_v12 = vld [vmem:[#allocation16_spill] sm:$0xff] }
 0x637   : > { %2815 = vmatpush1.bf16.msra.mxu0 %v2759_v22  ;;  %v2625_v50 = vpop.xlane.xlu1 %2624  ;;  %v2063_v22 = vpack.c.bf16 %v2045_v55, %v2045_v55  ;;  %v3729_v7 = vpop.eup %3728  ;;  %v2693_v21 = vmul.f32 %v3727_v48, %v6396_v47  ;;  %v2062_v28 = vpack.c.bf16 %v2044_v17, %v2044_v17  ;;  %v6409_v47 = vld [vmem:[#allocation65_spill] sm:$0xff] }
 0x638   : > { %2816 = vmatprep.subr.bf16.mxu0 %v6321_v26  ;;  %v2056_v26 = vpack.c.bf16 %v2034_v51, %v2032_v11  ;;  %v2695_v43 = vmul.f32 %v3729_v7, %v6397_v32  ;;  %v2694_v63 = vmul.f32 %v3729_v7, %v6400_v52  ;;  %v6401_v51 = vld [vmem:[#allocation58_spill] sm:$0xff]  ;;  %3734 = vrcp.f32 %v2625_v50 }
 0x63a   : > { %2185 = vmatmul.mubr.bf16.gmra.mrb[88].mxu0 %v2054_v45  ;;  %v2727_v19 = vpack.c.bf16 %v2695_v43, %v2693_v21  ;;  %v3731_v58 = vpop.eup %3730  ;;  %v2692_v45 = vmul.f32 %v3727_v48, %v6398_v36 }
 0x63b   : > { %3292 = vmatprep.mubr.msk.bf16.mxu0 %vm390_vm1, %v2057_v49  ;;  %v3733_v31 = vpop.eup %3732  ;;  %v2697_v49 = vmul.f32 %v3731_v58, %v6399_v15 }
 0x63c   : > { %v2699_v16 = vmul.f32 %v3733_v31, %v6401_v51  ;;  %v2726_v18 = vpack.c.bf16 %v2694_v63, %v2692_v45 }
 0x63e   : > { %v2729_v11 = vpack.c.bf16 %v2699_v16, %v2697_v49 }
 0x63f   : > { %v2633_v34 = vpop.xlane.xlu1 %2632 }
 0x642   : > { %2193 = vmatmul.mubr.bf16.gmra.mrb[92].mxu0 %v2056_v26  ;;  %v2696_v26 = vmul.f32 %v3731_v58, %v6402_v37 }
 0x643   : > { %3293 = vmatprep.mubr.msk.bf16.mxu0 %vm390_vm1, %v2059_v60  ;;  %v2761_v29 = vpop.permute.xlu1 %2760 }
 0x644   : > { %v2798_v44 = vsel %vm738_vm4, %v2761_v29, 0  ;;  %v2698_v29 = vmul.f32 %v3733_v31, %v6403_v8  ;;  %v6411_v31 = vld [vmem:[#allocation18_spill] sm:$0xff] }
 0x645   : > { %2817 = vmatpush1.bf16.msra.mxu0 %v2798_v44  ;;  %3333 = vmatpush1.bf16.msra.mxu1 %v2798_v44  ;;  %v3735_v44 = vpop.eup %3734 }
 0x646   : > { %v2728_v0 = vpack.c.bf16 %v2698_v29, %v2696_v26  ;;  %v2701_v61 = vmul.f32 %v3735_v44, %v6404_v9  ;;  %v2700_v25 = vmul.f32 %v3735_v44, %v6405_v54 }
 0x64a   : > { %2201 = vmatmul.mubr.bf16.gmra.mrb[96].mxu0 %v2058_v14 }
 0x64b   : > { %3294 = vmatprep.mubr.msk.bf16.mxu0 %vm390_vm1, %v2061_v10 }
 0x652   : > { %2209 = vmatmul.mubr.bf16.gmra.mrb[100].mxu0 %v2060_v23  ;;  %v6407_v23 = vld [vmem:[#allocation64_spill] sm:$0xff] }
 0x653   : > { %3295 = vmatprep.mubr.msk.bf16.mxu0 %vm390_vm1, %v2063_v22 }
 0x65a   : > { %2217 = vmatmul.mubr.bf16.gmra.mrb[104].mxu0 %v2062_v28 }
 0x65b   : > { %3305 = vmatprep.mubr.msk.bf16.mxu0 %vm390_vm1, %v2727_v19  ;;  %v6410_v19 = vld [vmem:[#allocation68_spill] sm:$0xff] }
 0x661   : > { %v2629_v62 = vpop.xlane.xlu0 %2628 }
 0x662   : > { %2833 = vmatmul.mubr.bf16.vlgmr.msra.gmra.mrb[108].mxu0 %v2726_v18  ;;  %3736 = vrcp.f32 %v2629_v62 }
 0x663   : > { %3306 = vmatprep.mubr.msk.bf16.mxu0 %vm390_vm1, %v2729_v11  ;;  %3738 = vrcp.f32 %v2633_v34 }
 0x665   : > { %v2637_v60 = vpop.xlane.xlu0 %2636 }
 0x666   : > { %3740 = vrcp.f32 %v2637_v60  ;;  %v6412_v60 = vld [vmem:[#allocation17_spill] sm:$0xff] }
 0x669   : > { %v2641_v2 = vpop.xlane.xlu0 %2640 }
 0x66a   : > { %2841 = vmatmul.mubr.bf16.gmra.mrb[112].mxu0 %v2728_v0  ;;  %3742 = vrcp.f32 %v2641_v2 }
 0x66c   : > { %v3737_v33 = vpop.eup %3736 }
 0x66d   : > { %v2645_v50 = vpop.xlane.xlu0 %2644  ;;  %v2703_v27 = vmul.f32 %v3737_v33, %v5545_v56  ;;  %v2702_v34 = vmul.f32 %v3737_v33, %v5548_v13  ;;  %v3739_v14 = vpop.eup %3738 }
 0x66e   : > { %3744 = vrcp.f32 %v2645_v50  ;;  %v2705_v41 = vmul.f32 %v3739_v14, %v6406_v12  ;;  %v2704_v13 = vmul.f32 %v3739_v14, %v6407_v23 }
 0x66f   : > { %v2731_v10 = vpack.c.bf16 %v2703_v27, %v2701_v61  ;;  %v2730_v46 = vpack.c.bf16 %v2702_v34, %v2700_v25 }
 0x670   : > { %v3741_v40 = vpop.eup %3740 }
 0x671   : > { %3307 = vmatprep.mubr.msk.bf16.mxu0 %vm390_vm1, %v2731_v10  ;;  %v2707_v55 = vmul.f32 %v3741_v40, %v5555_v4  ;;  %v2706_v3 = vmul.f32 %v3741_v40, %v5551_v5  ;;  %v2649_v28 = vpop.xlane.xlu0 %2648 }
 0x672   : > { %2849 = vmatmul.mubr.bf16.gmra.mrb[116].mxu0 %v2730_v46  ;;  %3746 = vrcp.f32 %v2649_v28 }
 0x673   : > { %v2733_v38 = vpack.c.bf16 %v2707_v55, %v2705_v41  ;;  %v2732_v48 = vpack.c.bf16 %v2706_v3, %v2704_v13  ;;  %v6413_v41 = vld [vmem:[#allocation13_spill] sm:$0xff]  ;;  %v6414_v55 = vld [vmem:[#allocation63_spill] sm:$0xff] }
 0x674   : > { %v3743_v56 = vpop.eup %3742  ;;  %v2665_v49 = vpop.xlane.xlu1 %2664 }
 0x675   : > { %3308 = vmatprep.mubr.msk.bf16.mxu0 %vm390_vm1, %v2733_v38  ;;  %v2709_v17 = vmul.f32 %v3743_v56, %v6408_v59  ;;  %v2708_v36 = vmul.f32 %v3743_v56, %v6411_v31  ;;  %v6415_v38 = vld [vmem:[#allocation20_spill] sm:$0xff] }
 0x678   : > { %v3745_v22 = vpop.eup %3744  ;;  %v1474_v7 = vpop.f32.mrb[36].mxu0 }
 0x679   : > { %v2711_v21 = vmul.f32 %v3745_v22, %v6409_v47  ;;  %2921 = vrot.lane.b32.xlu0 %v1474_v7, %s3773_s16  ;;  %v1476_v32 = vpop.f32.mrb[37].mxu0  ;;  %v2710_v58 = vmul.f32 %v3745_v22, %v6410_v19 }
 0x67a   : > { %2857 = vmatmul.mubr.bf16.gmra.mrb[120].mxu0 %v2732_v48  ;;  %v1477_v4 = vpop.f32.mrb[38].mxu0 }
 0x67b   : > { %v2735_v43 = vpack.c.bf16 %v2711_v21, %v2709_v17  ;;  %2923 = vrot.lane.b32.xlu1 %v1477_v4, %s3773_s16  ;;  %v1479_v5 = vpop.f32.mrb[39].mxu0  ;;  %v2734_v15 = vpack.c.bf16 %v2710_v58, %v2708_v36 }
 0x67c   : > { %v3747_v16 = vpop.eup %3746 }
 0x67d   : > { %3309 = vmatprep.mubr.msk.bf16.mxu0 %vm390_vm1, %v2735_v43  ;;  %v2713_v8 = vmul.f32 %v3747_v16, %v6412_v60  ;;  %v2712_v0 = vmul.f32 %v3747_v16, %v5586_v35 }
 0x680   : > { %v2653_v45 = vpop.xlane.xlu0 %2652 }
 0x681   : > { %3748 = vrcp.f32 %v2653_v45 }
 0x682   : > { %2865 = vmatmul.mubr.bf16.gmra.mrb[124].mxu0 %v2734_v15  ;;  %3750 = vrcp.f32 %v2665_v49 }
 0x684   : > { %v2657_v52 = vpop.xlane.xlu0 %2656 }
 0x688   : > { %v1482_v63 = vpop.f32.mrb[40].mxu0  ;;  %v2669_v51 = vpop.xlane.xlu0 %2668 }
 0x689   : > { %3752 = vrcp.f32 %v2669_v51  ;;  %2925 = vrot.lane.b32.xlu0 %v1482_v63, %s3773_s16  ;;  %v1484_v18 = vpop.f32.mrb[41].mxu0 }
 0x68a   : > { %v1485_v11 = vpop.f32.mrb[42].mxu0  ;;  %3754 = vrcp.f32 %v2657_v52 }
 0x68b   : > { %v3749_v62 = vpop.eup %3748  ;;  %v1487_v37 = vpop.f32.mrb[43].mxu0 }
 0x68c   : > { %v2661_v26 = vpop.xlane.xlu0 %2660  ;;  %v2715_v29 = vmul.f32 %v3749_v62, %v5622_v20  ;;  %v2714_v2 = vmul.f32 %v3749_v62, %v5618_v1  ;;  %v3751_v9 = vpop.eup %3750  ;;  %v6416_v62 = vld [vmem:[#allocation2_spill] sm:$0xff] }
 0x68d   : > { %3756 = vrcp.f32 %v2661_v26  ;;  %2927 = vrot.lane.b32.xlu0 %v1485_v11, %s3773_s16  ;;  %v2720_v27 = vmul.f32 %v3751_v9, %v5600_v6  ;;  %v2721_v35 = vmul.f32 %v3751_v9, %v5591_v24  ;;  %v6417_v9 = vld [vmem:[#allocation4_spill] sm:$0xff] }
 0x68e   : > { %v2737_v44 = vpack.c.bf16 %v2715_v29, %v2713_v8  ;;  %v2736_v33 = vpack.c.bf16 %v2714_v2, %v2712_v0 }
 0x690   : > { %3310 = vmatprep.mubr.msk.bf16.mxu0 %vm390_vm1, %v2737_v44  ;;  %v2674_v50 = vpop.xlane.xlu0 %2673 }
 0x691   : > { %3758 = vrcp.f32 %v2674_v50  ;;  %2873 = vmatmul.mubr.bf16.gmra.mrb[128].mxu0 %v2736_v33 }
 0x692   : > { %v1490_v54 = vpop.f32.mrb[44].mxu0 }
 0x693   : > { %v3753_v61 = vpop.eup %3752  ;;  %2929 = vrot.lane.b32.xlu0 %v1490_v54, %s3773_s16  ;;  %v1492_v34 = vpop.f32.mrb[45].mxu0 }
 0x694   : > { %v2722_v20 = vmul.f32 %v3753_v61, %v5636_v30  ;;  %v2723_v1 = vmul.f32 %v3753_v61, %v5633_v42  ;;  %v3755_v25 = vpop.eup %3754  ;;  %v1493_v14 = vpop.f32.mrb[46].mxu0 }
 0x695   : > { %v1495_v12 = vpop.f32.mrb[47].mxu0  ;;  %v2717_v6 = vmul.f32 %v3755_v25, %v6413_v41  ;;  %v2716_v3 = vmul.f32 %v3755_v25, %v6415_v38 }
 0x696   : > { %v2741_v10 = vpack.c.bf16 %v2723_v1, %v2721_v35  ;;  %v2740_v46 = vpack.c.bf16 %v2722_v20, %v2720_v27  ;;  %v6418_v1 = vld [vmem:[#allocation5_spill] sm:$0xff]  ;;  %v6419_v12 = vld [vmem:[#allocation6_spill] sm:$0xff] }
 0x697   : > { %v3757_v40 = vpop.eup %3756  ;;  %2931 = vrot.lane.b32.xlu0 %v1493_v14, %s3773_s16 }
 0x698   : > { %3312 = vmatprep.mubr.msk.bf16.mxu1 %vm390_vm1, %v2741_v10  ;;  %v2719_v30 = vmul.f32 %v3757_v40, %v6414_v55  ;;  %v2718_v24 = vmul.f32 %v3757_v40, %v5651_v57 }
 0x699   : > { %2889 = vmatmul.mubr.bf16.vlgmr.msra.gmra.mrb[144].mxu1 %v2740_v46 }
 0x69a   : > { %v2739_v42 = vpack.c.bf16 %v2719_v30, %v2717_v6  ;;  %v2738_v56 = vpack.c.bf16 %v2718_v24, %v2716_v3  ;;  %v6420_v30 = vld [vmem:[#allocation8_spill] sm:$0xff] }
 0x69b   : > { %v3759_v23 = vpop.eup %3758 }
 0x69c   : > { %3311 = vmatprep.mubr.msk.bf16.mxu0 %vm390_vm1, %v2739_v42  ;;  %v2725_v13 = vmul.f32 %v3759_v23, %v5659_v39  ;;  %v2724_v22 = vmul.f32 %v3759_v23, %v5655_v53 }
 0x69d   : > { %2881 = vmatmul.mubr.bf16.gmra.mrb[132].mxu0 %v2738_v56 }
 0x69e   : > { %v2743_v48 = vpack.c.bf16 %v2725_v13, %v2725_v13  ;;  %v2742_v7 = vpack.c.bf16 %v2724_v22, %v2724_v22  ;;  %v1498_v59 = vpop.f32.mrb[48].mxu0  ;;  %v6421_v22 = vld [vmem:[#allocation9_spill] sm:$0xff] }
 0x69f   : > { %2933 = vrot.lane.b32.xlu1 %v1498_v59, %s3773_s16  ;;  %v1500_v57 = vpop.f32.mrb[49].mxu0 }
 0x6a0   : > { %3313 = vmatprep.mubr.msk.bf16.mxu1 %vm390_vm1, %v2743_v48  ;;  %v1501_v17 = vpop.f32.mrb[50].mxu0  ;;  %v6422_v57 = vld [vmem:[#allocation11_spill] sm:$0xff] }
 0x6a1   : > { %2897 = vmatmul.mubr.bf16.gmra.mrb[148].mxu1 %v2742_v7  ;;  %2935 = vrot.lane.b32.xlu0 %v1501_v17, %s3773_s16  ;;  %v1503_v47 = vpop.f32.mrb[51].mxu0 }
 0x6aa   : > { %v1506_v21 = vpop.f32.mrb[52].mxu0 }
 0x6ab   : > { %2937 = vrot.lane.b32.xlu1 %v1506_v21, %s3773_s16  ;;  %v1508_v39 = vpop.f32.mrb[53].mxu0 }
 0x6ac   : > { %v1509_v32 = vpop.f32.mrb[54].mxu0 }
 0x6ad   : > { %2939 = vrot.lane.b32.xlu0 %v1509_v32, %s3773_s16  ;;  %v1511_v53 = vpop.f32.mrb[55].mxu0 }
 0x6cc   : > { %v1514_v4 = vpop.f32.mrb[56].mxu0 }
 0x6cd   : > { %2941 = vrot.lane.b32.xlu1 %v1514_v4, %s3773_s16  ;;  %v1516_v43 = vpop.f32.mrb[57].mxu0 }
 0x6ce   : > { %v1517_v28 = vpop.f32.mrb[58].mxu0 }
 0x6cf   : > { %2943 = vrot.lane.b32.xlu0 %v1517_v28, %s3773_s16  ;;  %v1519_v5 = vpop.f32.mrb[59].mxu0  ;;  %v6423_v28 = vld [vmem:[#allocation7_spill] sm:$0xff] }
 0x6d5   : > { %v1522_v19 = vpop.f32.mrb[60].mxu0 }
 0x6d6   : > { %2945 = vrot.lane.b32.xlu1 %v1522_v19, %s3773_s16  ;;  %v1524_v58 = vpop.f32.mrb[61].mxu0 }
 0x6d7   : > { %v1525_v31 = vpop.f32.mrb[62].mxu0 }
 0x6d8   : > { %2947 = vrot.lane.b32.xlu0 %v1525_v31, %s3773_s16  ;;  %v1527_v36 = vpop.f32.mrb[63].mxu0  ;;  %v6424_v31 = vld [vmem:[#allocation10_spill] sm:$0xff] }
 0x6dd   : > { %v1530_v45 = vpop.f32.mrb[64].mxu0 }
 0x6de   : > { %2949 = vrot.lane.b32.xlu1 %v1530_v45, %s3773_s16  ;;  %v1532_v15 = vpop.f32.mrb[65].mxu0 }
 0x6df   : > { %v1533_v49 = vpop.f32.mrb[66].mxu0 }
 0x6e0   : > { %2951 = vrot.lane.b32.xlu0 %v1533_v49, %s3773_s16  ;;  %v1535_v52 = vpop.f32.mrb[67].mxu0 }
 0x6e5   : > { %v1538_v63 = vpop.f32.mrb[68].mxu0 }
 0x6e6   : > { %2953 = vrot.lane.b32.xlu1 %v1538_v63, %s3773_s16  ;;  %v1540_v51 = vpop.f32.mrb[69].mxu0 }
 0x6e7   : > { %v1541_v16 = vpop.f32.mrb[70].mxu0 }
 0x6e8   : > { %v1542_v18 = vpop.f32.mrb[71].mxu0 }
 0x6eb   : > { %v2922_v11 = vpop.permute.xlu0 %2921 }
 0x6ec   : > { %v5817_v37 = vsel %vm214_vm0, %v6416_v62, %v2922_v11 }
 0x6ed   : > { %v2154_v26 = vpop.f32.mrb[72].mxu0  ;;  %v5844_v42 = vpop.permute.xlu1 %2923 }
 0x6ee   : > { %2989 = vrot.lane.b32.xlu0 %v2154_v26, %s3772_s15  ;;  %v2156_v60 = vpop.f32.mrb[73].mxu0 }
 0x6ef   : > { %v2157_v8 = vpop.f32.mrb[74].mxu0 }
 0x6f0   : > { %2991 = vrot.lane.b32.xlu1 %v2157_v8, %s3772_s15  ;;  %v2159_v29 = vpop.f32.mrb[75].mxu0 }
 0x6f5   : > { %v2162_v0 = vpop.f32.mrb[76].mxu0 }
 0x6f6   : > { %2993 = vrot.lane.b32.xlu0 %v2162_v0, %s3772_s15  ;;  %v2164_v2 = vpop.f32.mrb[77].mxu0 }
 0x6f7   : > { %v2165_v44 = vpop.f32.mrb[78].mxu0 }
 0x6f8   : > { %2995 = vrot.lane.b32.xlu1 %v2165_v44, %s3772_s15  ;;  %v2167_v33 = vpop.f32.mrb[79].mxu0 }
 0x6f9   : > { %v6425_v33 = vld [vmem:[#allocation27_spill] sm:$0xff] }
 0x6fb   : > { %v2926_v50 = vpop.permute.xlu0 %2925 }
 0x6fc   : > { %v5825_v61 = vsel %vm214_vm0, %v6417_v9, %v2926_v50 }
 0x6fd   : > { %v2170_v27 = vpop.f32.mrb[80].mxu0 }
 0x6fe   : > { %2997 = vrot.lane.b32.xlu0 %v2170_v27, %s3772_s15  ;;  %v2172_v20 = vpop.f32.mrb[81].mxu0  ;;  %v6426_v27 = vld [vmem:[#allocation28_spill] sm:$0xff] }
 0x6ff   : > { %v2928_v54 = vpop.permute.xlu0 %2927  ;;  %v2173_v35 = vpop.f32.mrb[82].mxu0 }
 0x700   : > { %v5830_v25 = vsel %vm214_vm0, %v6418_v1, %v2928_v54  ;;  %2999 = vrot.lane.b32.xlu1 %v2173_v35, %s3772_s15  ;;  %v2175_v34 = vpop.f32.mrb[83].mxu0 }
 0x705   : > { %v2178_v14 = vpop.f32.mrb[84].mxu0  ;;  %v2930_v46 = vpop.permute.xlu0 %2929 }
 0x706   : > { %3001 = vrot.lane.b32.xlu0 %v2178_v14, %s3772_s15  ;;  %v2180_v10 = vpop.f32.mrb[85].mxu0  ;;  %v5836_v41 = vsel %vm214_vm0, %v6419_v12, %v2930_v46  ;;  %v6428_v12 = vld [vmem:[#allocation32_spill] sm:$0xff] }
 0x707   : > { %v2181_v40 = vpop.f32.mrb[86].mxu0  ;;  %v6427_v10 = vld [vmem:[#allocation31_spill] sm:$0xff] }
 0x708   : > { %3003 = vrot.lane.b32.xlu1 %v2181_v40, %s3772_s15  ;;  %v2183_v6 = vpop.f32.mrb[87].mxu0 }
 0x709   : > { %v2932_v55 = vpop.permute.xlu0 %2931 }
 0x70a   : > { %v5841_v38 = vsel %vm214_vm0, %v6420_v30, %v2932_v55 }
 0x70d   : > { %v2186_v3 = vpop.f32.mrb[88].mxu0 }
 0x70e   : > { %3005 = vrot.lane.b32.xlu0 %v2186_v3, %s3772_s15  ;;  %v2188_v24 = vpop.f32.mrb[89].mxu0 }
 0x70f   : > { %v2189_v56 = vpop.f32.mrb[90].mxu0 }
 0x710   : > { %3007 = vrot.lane.b32.xlu1 %v2189_v56, %s3772_s15  ;;  %v2191_v23 = vpop.f32.mrb[91].mxu0 }
 0x711   : > { %v2934_v13 = vpop.permute.xlu1 %2933  ;;  %v6429_v23 = vld [vmem:[#allocation33_spill] sm:$0xff] }
 0x712   : > { %v5849_v48 = vsel %vm214_vm0, %v6421_v22, %v2934_v13 }
 0x713   : > { %v2936_v7 = vpop.permute.xlu0 %2935 }
 0x714   : > { %v5853_v17 = vsel %vm214_vm0, %v6422_v57, %v2936_v7  ;;  %v6430_v7 = vld [vmem:[#allocation34_spill] sm:$0xff] }
 0x715   : > { %v2194_v59 = vpop.f32.mrb[92].mxu0 }
 0x716   : > { %3009 = vrot.lane.b32.xlu0 %v2194_v59, %s3772_s15  ;;  %v2196_v47 = vpop.f32.mrb[93].mxu0 }
 0x717   : > { %v2197_v21 = vpop.f32.mrb[94].mxu0 }
 0x718   : > { %3011 = vrot.lane.b32.xlu1 %v2197_v21, %s3772_s15  ;;  %v2199_v39 = vpop.f32.mrb[95].mxu0 }
 0x71d   : > { %v2202_v32 = vpop.f32.mrb[96].mxu0  ;;  %v2938_v4 = vpop.permute.xlu1 %2937 }
 0x71e   : > { %3013 = vrot.lane.b32.xlu0 %v2202_v32, %s3772_s15  ;;  %v2204_v53 = vpop.f32.mrb[97].mxu0  ;;  %v5860_v5 = vsel %vm214_vm0, %v6423_v28, %v2938_v4 }
 0x71f   : > { %v2205_v43 = vpop.f32.mrb[98].mxu0  ;;  %v2940_v58 = vpop.permute.xlu0 %2939  ;;  %v6431_v53 = vld [vmem:[#allocation35_spill] sm:$0xff] }
 0x720   : > { %3015 = vrot.lane.b32.xlu1 %v2205_v43, %s3772_s15  ;;  %v2207_v19 = vpop.f32.mrb[99].mxu0  ;;  %v5865_v36 = vsel %vm214_vm0, %v6424_v31, %v2940_v58 }
 0x725   : > { %v2210_v45 = vpop.f32.mrb[100].mxu0 }
 0x726   : > { %3017 = vrot.lane.b32.xlu0 %v2210_v45, %s3772_s15  ;;  %v2212_v15 = vpop.f32.mrb[101].mxu0 }
 0x727   : > { %v2213_v49 = vpop.f32.mrb[102].mxu0 }
 0x728   : > { %3019 = vrot.lane.b32.xlu1 %v2213_v49, %s3772_s15  ;;  %v2215_v52 = vpop.f32.mrb[103].mxu0 }
 0x72d   : > { %v2218_v63 = vpop.f32.mrb[104].mxu0 }
 0x72e   : > { %3021 = vrot.lane.b32.xlu0 %v2218_v63, %s3772_s15  ;;  %v2220_v51 = vpop.f32.mrb[105].mxu0 }
 0x72f   : > { %v2221_v16 = vpop.f32.mrb[106].mxu0 }
 0x730   : > { %v2222_v18 = vpop.f32.mrb[107].mxu0 }
 0x735   : > { %v2834_v11 = vpop.f32.mrb[108].mxu0 }
 0x736   : > { %3057 = vrot.lane.b32.xlu1 %v2834_v11, %s3770_s13  ;;  %v2836_v62 = vpop.f32.mrb[109].mxu0 }
 0x737   : > { %v2837_v26 = vpop.f32.mrb[110].mxu0 }
 0x738   : > { %3059 = vrot.lane.b32.xlu0 %v2837_v26, %s3770_s13  ;;  %v2839_v60 = vpop.f32.mrb[111].mxu0 }
 0x73d   : > { %v2842_v8 = vpop.f32.mrb[112].mxu0 }
 0x73e   : > { %3061 = vrot.lane.b32.xlu1 %v2842_v8, %s3770_s13  ;;  %v2844_v29 = vpop.f32.mrb[113].mxu0 }
 0x73f   : > { %v2845_v0 = vpop.f32.mrb[114].mxu0  ;;  %v2942_v2 = vpop.permute.xlu1 %2941 }
 0x740   : > { %3063 = vrot.lane.b32.xlu0 %v2845_v0, %s3770_s13  ;;  %v2847_v44 = vpop.f32.mrb[115].mxu0  ;;  %v5876_v50 = vsel %vm214_vm0, %v6425_v33, %v2942_v2 }
 0x741   : > { %v2944_v9 = vpop.permute.xlu0 %2943 }
 0x742   : > { %v5880_v20 = vsel %vm214_vm0, %v6426_v27, %v2944_v9 }
 0x745   : > { %v2850_v54 = vpop.f32.mrb[116].mxu0 }
 0x746   : > { %3065 = vrot.lane.b32.xlu1 %v2850_v54, %s3770_s13  ;;  %v2852_v35 = vpop.f32.mrb[117].mxu0 }
 0x747   : > { %v2853_v1 = vpop.f32.mrb[118].mxu0 }
 0x748   : > { %v2946_v34 = vpop.permute.xlu1 %2945  ;;  %3067 = vrot.lane.b32.xlu0 %v2853_v1, %s3770_s13  ;;  %v2855_v14 = vpop.f32.mrb[119].mxu0 }
 0x749   : > { %v3120_v46 = vsel %vm214_vm0, %v6427_v10, %v2946_v34 }
 0x74a   : > { %v2948_v40 = vpop.permute.xlu0 %2947 }
 0x74b   : > { %v3121_v6 = vsel %vm214_vm0, %v6428_v12, %v2948_v40 }
 0x74d   : > { %v2858_v55 = vpop.f32.mrb[120].mxu0 }
 0x74e   : > { %3069 = vrot.lane.b32.xlu1 %v2858_v55, %s3770_s13  ;;  %v2860_v30 = vpop.f32.mrb[121].mxu0 }
 0x74f   : > { %v2861_v3 = vpop.f32.mrb[122].mxu0 }
 0x750   : > { %v2950_v24 = vpop.permute.xlu1 %2949  ;;  %3071 = vrot.lane.b32.xlu0 %v2861_v3, %s3770_s13  ;;  %v2863_v56 = vpop.f32.mrb[123].mxu0 }
 0x751   : > { %v3122_v13 = vsel %vm214_vm0, %v6429_v23, %v2950_v24  ;;  %v6432_v23 = vld [vmem:[#allocation3_spill] sm:$0xff] }
 0x752   : > { %v2952_v22 = vpop.permute.xlu0 %2951 }
 0x753   : > { %v3123_v59 = vsel %vm214_vm0, %v6430_v7, %v2952_v22 }
 0x755   : > { %v2866_v57 = vpop.f32.mrb[124].mxu0 }
 0x756   : > { %3073 = vrot.lane.b32.xlu1 %v2866_v57, %s3770_s13  ;;  %v2868_v47 = vpop.f32.mrb[125].mxu0 }
 0x757   : > { %v2869_v21 = vpop.f32.mrb[126].mxu0 }
 0x758   : > { %v2954_v39 = vpop.permute.xlu1 %2953  ;;  %3075 = vrot.lane.b32.xlu0 %v2869_v21, %s3770_s13  ;;  %v2871_v32 = vpop.f32.mrb[127].mxu0 }
 0x759   : > { %v3124_v4 = vsel %vm214_vm0, %v6431_v53, %v2954_v39 }
 0x760   : > { %v2990_v60 = vpop.permute.xlu0 %2989 }
 0x762   : > { %v2992_v8 = vpop.permute.xlu1 %2991 }
 0x764   : > { %v2874_v43 = vpop.f32.mrb[128].mxu0 }
 0x765   : > { %3077 = vrot.lane.b32.xlu1 %v2874_v43, %s3770_s13  ;;  %v2876_v28 = vpop.f32.mrb[129].mxu0 }
 0x766   : > { %v2877_v19 = vpop.f32.mrb[130].mxu0 }
 0x767   : > { %3079 = vrot.lane.b32.xlu0 %v2877_v19, %s3770_s13  ;;  %v2879_v58 = vpop.f32.mrb[131].mxu0 }
 0x768   : > { %v2994_v29 = vpop.permute.xlu0 %2993 }
 0x76a   : > { %v2996_v0 = vpop.permute.xlu1 %2995 }
 0x76c   : > { %v2890_v31 = vpop.f32.mrb[144].mxu1 }
 0x76d   : > { %v2892_v45 = vpop.f32.mrb[145].mxu1 }
 0x76e   : > { %v2893_v15 = vpop.f32.mrb[146].mxu1 }
 0x76f   : > { %v2895_v49 = vpop.f32.mrb[147].mxu1 }
 0x770   : > { %v2882_v52 = vpop.f32.mrb[132].mxu0  ;;  %v2998_v2 = vpop.permute.xlu0 %2997 }
 0x771   : > { %3081 = vrot.lane.b32.xlu1 %v2882_v52, %s3770_s13  ;;  %v2884_v63 = vpop.f32.mrb[133].mxu0  ;;  %v3130_v53 = vsel %vm3125_vm5, %v5836_v41, %v2998_v2 }
 0x772   : > { %v2885_v51 = vpop.f32.mrb[134].mxu0  ;;  %v3000_v44 = vpop.permute.xlu1 %2999 }
 0x773   : > { %3083 = vrot.lane.b32.xlu0 %v2885_v51, %s3770_s13  ;;  %v2887_v16 = vpop.f32.mrb[135].mxu0  ;;  %v3131_v43 = vsel %vm3125_vm5, %v5841_v38, %v3000_v44 }
 0x774   : > { %v2898_v18 = vpop.f32.mrb[148].mxu1 }
 0x775   : > { %v2900_v11 = vpop.f32.mrb[149].mxu1  ;;  %3085 = vrot.lane.b32.xlu1 %v2890_v31, %s3770_s13 }
 0x776   : > { %v2901_v62 = vpop.f32.mrb[150].mxu1 }
 0x777   : > { %v2902_v26 = vpop.f32.mrb[151].mxu1  ;;  %3087 = vrot.lane.b32.xlu0 %v2893_v15, %s3770_s13 }
 0x778   : > { %v3002_v33 = vpop.permute.xlu0 %3001 }
 0x779   : > { %3089 = vrot.lane.b32.xlu1 %v2898_v18, %s3770_s13  ;;  %v3132_v19 = vsel %vm3125_vm5, %v5849_v48, %v3002_v33 }
 0x77a   : > { %v3004_v9 = vpop.permute.xlu1 %3003 }
 0x77b   : > { %v3133_v31 = vsel %vm3125_vm5, %v5853_v17, %v3004_v9 }
 0x780   : > { %v3006_v27 = vpop.permute.xlu0 %3005 }
 0x781   : > { %v3134_v15 = vsel %vm3125_vm5, %v5860_v5, %v3006_v27 }
 0x782   : > { %v3008_v54 = vpop.permute.xlu1 %3007 }
 0x783   : > { %v3135_v52 = vsel %vm3125_vm5, %v5865_v36, %v3008_v54 }
 0x788   : > { %v3010_v35 = vpop.permute.xlu0 %3009 }
 0x789   : > { %v3136_v51 = vsel %vm3125_vm5, %v5876_v50, %v3010_v35 }
 0x78a   : > { %v3012_v1 = vpop.permute.xlu1 %3011 }
 0x78b   : > { %v3137_v18 = vsel %vm3125_vm5, %v5880_v20, %v3012_v1 }
 0x790   : > { %v3014_v34 = vpop.permute.xlu0 %3013 }
 0x791   : > { %v5906_v14 = vsel %vm3125_vm5, %v3120_v46, %v3014_v34  ;;  %v3126_v46 = vsel %vm3125_vm5, %v5817_v37, %v2990_v60  ;;  %v3128_v37 = vsel %vm3125_vm5, %v5825_v61, %v2994_v29 }
 0x792   : > { %v3016_v10 = vpop.permute.xlu1 %3015 }
 0x793   : > { %v5909_v40 = vsel %vm3125_vm5, %v3121_v6, %v3016_v10 }
 0x798   : > { %v3018_v12 = vpop.permute.xlu0 %3017 }
 0x799   : > { %v5912_v55 = vsel %vm3125_vm5, %v3122_v13, %v3018_v12  ;;  %v3109_v13 = vsel %vm214_vm0, %v6432_v23, %v5844_v42  ;;  %v3129_v42 = vsel %vm3125_vm5, %v5830_v25, %v2996_v0 }
 0x79a   : > { %v3020_v30 = vpop.permute.xlu1 %3019  ;;  %v3127_v7 = vsel %vm3125_vm5, %v3109_v13, %v2992_v8 }
 0x79b   : > { %v5915_v3 = vsel %vm3125_vm5, %v3123_v59, %v3020_v30 }
 0x7a0   : > { %v3022_v24 = vpop.permute.xlu0 %3021 }
 0x7a1   : > { %v5918_v56 = vsel %vm3125_vm5, %v3124_v4, %v3022_v24 }
 0x7a8   : > { %v3058_v6 = vpop.permute.xlu1 %3057 }
 0x7a9   : > { %v3144_v22 = vsel %vm3143_vm6, %v3126_v46, %v3058_v6 }
 0x7aa   : > { %3162 = vst.msk [vmem:[%s5924_s22] sm:$0xff] %vm3161_vm7, %v3144_v22  ;;  %v3060_v59 = vpop.permute.xlu0 %3059 }
 0x7ab   : > { %v3145_v57 = vsel %vm3143_vm6, %v3127_v7, %v3060_v59 }
 0x7ac   : > { %3163 = vst.msk [vmem:[%s5924_s22 + $0x8] sm:$0xff] %vm3161_vm7, %v3145_v57 }
 0x7b0   : > { %v3062_v47 = vpop.permute.xlu1 %3061 }
 0x7b1   : > { %v3146_v21 = vsel %vm3143_vm6, %v3128_v37, %v3062_v47 }
 0x7b2   : > { %3164 = vst.msk [vmem:[%s5924_s22 + $0x10] sm:$0xff] %vm3161_vm7, %v3146_v21  ;;  %v3064_v39 = vpop.permute.xlu0 %3063 }
 0x7b3   : > { %v3147_v32 = vsel %vm3143_vm6, %v3129_v42, %v3064_v39 }
 0x7b4   : > { %3165 = vst.msk [vmem:[%s5924_s22 + $0x18] sm:$0xff] %vm3161_vm7, %v3147_v32 }
 0x7b8   : > { %v3066_v4 = vpop.permute.xlu1 %3065 }
 0x7b9   : > { %v3148_v61 = vsel %vm3143_vm6, %v3130_v53, %v3066_v4 }
 0x7ba   : > { %3166 = vst.msk [vmem:[%s5924_s22 + $0x20] sm:$0xff] %vm3161_vm7, %v3148_v61  ;;  %v3068_v25 = vpop.permute.xlu0 %3067 }
 0x7bb   : > { %v3149_v28 = vsel %vm3143_vm6, %v3131_v43, %v3068_v25 }
 0x7bc   : > { %3167 = vst.msk [vmem:[%s5924_s22 + $0x28] sm:$0xff] %vm3161_vm7, %v3149_v28 }
 0x7c0   : > { %v3070_v58 = vpop.permute.xlu1 %3069 }
 0x7c1   : > { %v3150_v41 = vsel %vm3143_vm6, %v3132_v19, %v3070_v58 }
 0x7c2   : > { %3168 = vst.msk [vmem:[%s5924_s22 + $0x30] sm:$0xff] %vm3161_vm7, %v3150_v41  ;;  %v3072_v38 = vpop.permute.xlu0 %3071 }
 0x7c3   : > { %v3151_v45 = vsel %vm3143_vm6, %v3133_v31, %v3072_v38 }
 0x7c4   : > { %3169 = vst.msk [vmem:[%s5924_s22 + $0x38] sm:$0xff] %vm3161_vm7, %v3151_v45 }
 0x7c8   : > { %v3074_v49 = vpop.permute.xlu1 %3073 }
 0x7c9   : > { %v3152_v48 = vsel %vm3143_vm6, %v3134_v15, %v3074_v49 }
 0x7ca   : > { %3170 = vst.msk [vmem:[%s5924_s22 + $0x40] sm:$0xff] %vm3161_vm7, %v3152_v48  ;;  %v3076_v17 = vpop.permute.xlu0 %3075 }
 0x7cb   : > { %v3153_v63 = vsel %vm3143_vm6, %v3135_v52, %v3076_v17 }
 0x7cc   : > { %3171 = vst.msk [vmem:[%s5924_s22 + $0x48] sm:$0xff] %vm3161_vm7, %v3153_v63 }
 0x7d7   : > { %v3078_v5 = vpop.permute.xlu1 %3077 }
 0x7d8   : > { %v3154_v16 = vsel %vm3143_vm6, %v3136_v51, %v3078_v5 }
 0x7d9   : > { %3172 = vst.msk [vmem:[%s5924_s22 + $0x50] sm:$0xff] %vm3161_vm7, %v3154_v16  ;;  %v3080_v36 = vpop.permute.xlu0 %3079 }
 0x7da   : > { %v3155_v11 = vsel %vm3143_vm6, %v3137_v18, %v3080_v36 }
 0x7db   : > { %3173 = vst.msk [vmem:[%s5924_s22 + $0x58] sm:$0xff] %vm3161_vm7, %v3155_v11 }
 0x7e3   : > { %v3082_v62 = vpop.permute.xlu1 %3081 }
 0x7e4   : > { %v3156_v50 = vsel %vm3143_vm6, %v5906_v14, %v3082_v62 }
 0x7e5   : > { %3174 = vst.msk [vmem:[%s5924_s22 + $0x60] sm:$0xff] %vm3161_vm7, %v3156_v50  ;;  %v3084_v26 = vpop.permute.xlu0 %3083 }
 0x7e6   : > { %v3157_v60 = vsel %vm3143_vm6, %v5909_v40, %v3084_v26 }
 0x7e7   : > { %3175 = vst.msk [vmem:[%s5924_s22 + $0x68] sm:$0xff] %vm3161_vm7, %v3157_v60  ;;  %v3086_v20 = vpop.permute.xlu1 %3085 }
 0x7e8   : > { %v3158_v8 = vsel %vm3143_vm6, %v5912_v55, %v3086_v20 }
 0x7e9   : > { %3176 = vst.msk [vmem:[%s5924_s22 + $0x70] sm:$0xff] %vm3161_vm7, %v3158_v8  ;;  %v3088_v29 = vpop.permute.xlu0 %3087 }
 0x7ea   : > { %v3159_v0 = vsel %vm3143_vm6, %v5915_v3, %v3088_v29 }
 0x7eb   : > { %3177 = vst.msk [vmem:[%s5924_s22 + $0x78] sm:$0xff] %vm3161_vm7, %v3159_v0  ;;  %v3090_v2 = vpop.permute.xlu1 %3089 }
 0x7ec   : > { %v3160_v44 = vsel %vm3143_vm6, %v5918_v56, %v3090_v2 }
 0x7ed   : > { %3179 = vst.msk [vmem:[%s5924_s22 + $0x80] sm:$0x3] %vm3178_vm8, %v3160_v44 }
 0x7ee PF: > { %s11_s6 = sadd.s32 1, %s3766_s6  }
 0x7ef   : > { %p8_p4 = scmp.ge.s32.totalorder %s11_s6, 4  }
 0x7f1   :  { %10 = sbr.rel (!%p8_p4) target bundleno = 1 (0x1), region = 54 }

// kernel: forward.21
= control target key start
LH: loop header
LB: loop body
LE: loop exit
PB: predicated region body
PF: predicated region fallthrough
CT: control target
= control target key end

     0   :  { %s2073_s18 = smov 0   ;;  %s3334_s0 = inlined_call_operand.vmem [shape: f32[512,64], index: 0, kind: input, shape index: {}]   ;;  %s3335_s1 = inlined_call_operand.vmem [shape: f32[1,64], index: 1, kind: input, shape index: {}]   ;;  %s3336_s2 = inlined_call_operand.vmem [shape: f32[1,64], index: 2, kind: input, shape index: {}]   ;;  %s3337_s3 = inlined_call_operand.vmem [shape: bf16[64,256], index: 3, kind: input, shape index: {}]   ;;  %s3338_s4 = inlined_call_operand.vmem [shape: f32[1,256], index: 4, kind: input, shape index: {}]   ;;  %s3339_s5 = inlined_call_operand.vmem [shape: f32[512,256], index: 5, kind: output, shape index: {}]  }
   0x1 LB: > { %s1774_s19 = sadd.s32 4294967295, %s2040_s18   ;;  %p1778_p0 = scmp.ge.s32.totalorder %s2040_s18, 1  ;;  %s2040_s18 = sphi %s2073_s18, %s15_s18  }
   0x2   : > { %p188_p1 = scmp.lt.s32.totalorder %s2040_s18, 3 }
   0x4   : > { %p189_p2 = pnand %p1778_p0, %p188_p1 }
   0x6   : > { %192 = sbr.rel (%p189_p2) target bundleno = 728 (0x2d8), region = 40 }
   0xd   : > { %s1779_s20 = sshll.u32 %s1774_s19, 5  ;;  %vm263_vm0 = vcmask 523264  }
   0xe   : > { %p218_p3 = scmp.lt.s32.totalorder %s1779_s20, 63 }
  0x10   : > { %s3345_s20 = smov (!%p218_p3, %s1779_s20), 63 }
  0x11   : > { %s1780_s21 = sshll.u32 %s3345_s20, 3 }
  0x12   : > { %s2087_s24 = scalar_lea.vmem %s3334_s0, %s1780_s21 }
  0x13   : > { %v2090_v0 = vld [vmem:[%s2087_s24] sm:$0xff]  ;;  %v2096_v2 = vld [vmem:[%s2087_s24 + $0x8] sm:$0xff]  ;;  %v2110_v8 = vld [vmem:[%s2087_s24 + $0x10] sm:$0xff] }
  0x14   : > { %v2093_v1 = vld [vmem:[%s2087_s24 + $0x80] sm:$0xff]  ;;  %v264_v3 = vsel %vm263_vm0, %v2090_v0, 0.0  ;;  %v2103_v5 = vld [vmem:[%s2087_s24 + $0x88] sm:$0xff]  ;;  %v267_v6 = vsel %vm263_vm0, %v2096_v2, 0.0  ;;  %v2113_v9 = vld [vmem:[%s2087_s24 + $0x18] sm:$0xff]  ;;  %v270_v10 = vsel %vm263_vm0, %v2110_v8, 0.0 }
  0x15   : > { %v312_v4 = vsel %vm263_vm0, %v2093_v1, 0.0  ;;  %265 = vadd.xlane.f32.xlu0 %v264_v3  ;;  %v315_v7 = vsel %vm263_vm0, %v2103_v5, 0.0  ;;  %v273_v11 = vsel %vm263_vm0, %v2113_v9, 0.0  ;;  %v2120_v12 = vld [vmem:[%s2087_s24 + $0x90] sm:$0xff]  ;;  %v2123_v13 = vld [vmem:[%s2087_s24 + $0x98] sm:$0xff]  ;;  %v2130_v16 = vld [vmem:[%s2087_s24 + $0x20] sm:$0xff] }
  0x16   : > { %313 = vadd.xlane.f32.xlu1 %v312_v4  ;;  %v318_v14 = vsel %vm263_vm0, %v2120_v12, 0.0  ;;  %v321_v15 = vsel %vm263_vm0, %v2123_v13, 0.0  ;;  %v2133_v17 = vld [vmem:[%s2087_s24 + $0x28] sm:$0xff]  ;;  %v276_v18 = vsel %vm263_vm0, %v2130_v16, 0.0  ;;  %v2140_v20 = vld [vmem:[%s2087_s24 + $0xa0] sm:$0xff]  ;;  %v2150_v24 = vld [vmem:[%s2087_s24 + $0x30] sm:$0xff] }
  0x17   : > { %v279_v19 = vsel %vm263_vm0, %v2133_v17, 0.0  ;;  %v2143_v21 = vld [vmem:[%s2087_s24 + $0xa8] sm:$0xff]  ;;  %v324_v22 = vsel %vm263_vm0, %v2140_v20, 0.0  ;;  %v2153_v25 = vld [vmem:[%s2087_s24 + $0x38] sm:$0xff]  ;;  %v282_v26 = vsel %vm263_vm0, %v2150_v24, 0.0  ;;  %v2160_v28 = vld [vmem:[%s2087_s24 + $0xb0] sm:$0xff] }
  0x18   : > { %v327_v23 = vsel %vm263_vm0, %v2143_v21, 0.0  ;;  %v285_v27 = vsel %vm263_vm0, %v2153_v25, 0.0  ;;  %v2163_v29 = vld [vmem:[%s2087_s24 + $0xb8] sm:$0xff]  ;;  %v330_v30 = vsel %vm263_vm0, %v2160_v28, 0.0  ;;  %v2170_v32 = vld [vmem:[%s2087_s24 + $0x40] sm:$0xff]  ;;  %v2173_v33 = vld [vmem:[%s2087_s24 + $0x48] sm:$0xff] }
  0x19   : > { %268 = vadd.xlane.f32.xlu0 %v267_v6  ;;  %v333_v31 = vsel %vm263_vm0, %v2163_v29, 0.0  ;;  %v288_v34 = vsel %vm263_vm0, %v2170_v32, 0.0  ;;  %v291_v35 = vsel %vm263_vm0, %v2173_v33, 0.0  ;;  %v2180_v36 = vld [vmem:[%s2087_s24 + $0xc0] sm:$0xff]  ;;  %v2183_v37 = vld [vmem:[%s2087_s24 + $0xc8] sm:$0xff]  ;;  %v2190_v40 = vld [vmem:[%s2087_s24 + $0x50] sm:$0xff] }
  0x1a   : > { %316 = vadd.xlane.f32.xlu1 %v315_v7  ;;  %v336_v38 = vsel %vm263_vm0, %v2180_v36, 0.0  ;;  %v339_v39 = vsel %vm263_vm0, %v2183_v37, 0.0  ;;  %v2193_v41 = vld [vmem:[%s2087_s24 + $0x58] sm:$0xff]  ;;  %v294_v42 = vsel %vm263_vm0, %v2190_v40, 0.0  ;;  %v2200_v44 = vld [vmem:[%s2087_s24 + $0xd0] sm:$0xff]  ;;  %v2210_v48 = vld [vmem:[%s2087_s24 + $0x60] sm:$0xff] }
  0x1b   : > { %v297_v43 = vsel %vm263_vm0, %v2193_v41, 0.0  ;;  %v2203_v45 = vld [vmem:[%s2087_s24 + $0xd8] sm:$0xff]  ;;  %v342_v46 = vsel %vm263_vm0, %v2200_v44, 0.0  ;;  %v2213_v49 = vld [vmem:[%s2087_s24 + $0x68] sm:$0xff]  ;;  %v300_v50 = vsel %vm263_vm0, %v2210_v48, 0.0  ;;  %v2220_v52 = vld [vmem:[%s2087_s24 + $0xe0] sm:$0xff] }
  0x1c   : > { %v345_v47 = vsel %vm263_vm0, %v2203_v45, 0.0  ;;  %v303_v51 = vsel %vm263_vm0, %v2213_v49, 0.0  ;;  %v2223_v53 = vld [vmem:[%s2087_s24 + $0xe8] sm:$0xff]  ;;  %v348_v54 = vsel %vm263_vm0, %v2220_v52, 0.0  ;;  %v2230_v56 = vld [vmem:[%s2087_s24 + $0x70] sm:$0xff]  ;;  %v2233_v57 = vld [vmem:[%s2087_s24 + $0x78] sm:$0xff] }
  0x1d   : > { %271 = vadd.xlane.f32.xlu0 %v270_v10  ;;  %v351_v55 = vsel %vm263_vm0, %v2223_v53, 0.0  ;;  %v306_v58 = vsel %vm263_vm0, %v2230_v56, 0.0  ;;  %v309_v59 = vsel %vm263_vm0, %v2233_v57, 0.0  ;;  %v2240_v60 = vld [vmem:[%s2087_s24 + $0xf0] sm:$0xff]  ;;  %v2243_v61 = vld [vmem:[%s2087_s24 + $0xf8] sm:$0xff]  ;;  %s1812_s24 = sshll.u32 %s3345_s20, 4 }
  0x1e   : > { %274 = vadd.xlane.f32.xlu1 %v273_v11  ;;  %v354_v62 = vsel %vm263_vm0, %v2240_v60, 0.0  ;;  %v357_v63 = vsel %vm263_vm0, %v2243_v61, 0.0  ;;  %s2717_s26 = scalar_lea.vmem %s3339_s5, %s1812_s24 }
  0x21   : > { %319 = vadd.xlane.f32.xlu0 %v318_v14 }
  0x22   : > { %322 = vadd.xlane.f32.xlu1 %v321_v15 }
  0x25   : > { %277 = vadd.xlane.f32.xlu0 %v276_v18 }
  0x26   : > { %280 = vadd.xlane.f32.xlu1 %v279_v19 }
  0x29   : > { %325 = vadd.xlane.f32.xlu0 %v324_v22 }
  0x2a   : > { %328 = vadd.xlane.f32.xlu1 %v327_v23 }
  0x2d   : > { %283 = vadd.xlane.f32.xlu0 %v282_v26 }
  0x2e   : > { %286 = vadd.xlane.f32.xlu1 %v285_v27 }
  0x31   : > { %331 = vadd.xlane.f32.xlu0 %v330_v30 }
  0x32   : > { %334 = vadd.xlane.f32.xlu1 %v333_v31 }
  0x35   : > { %289 = vadd.xlane.f32.xlu0 %v288_v34 }
  0x36   : > { %292 = vadd.xlane.f32.xlu1 %v291_v35 }
  0x39   : > { %337 = vadd.xlane.f32.xlu0 %v336_v38 }
  0x3a   : > { %340 = vadd.xlane.f32.xlu1 %v339_v39 }
  0x3d   : > { %295 = vadd.xlane.f32.xlu0 %v294_v42 }
  0x3e   : > { %298 = vadd.xlane.f32.xlu1 %v297_v43 }
  0x41   : > { %343 = vadd.xlane.f32.xlu0 %v342_v46 }
  0x42   : > { %346 = vadd.xlane.f32.xlu1 %v345_v47 }
  0x45   : > { %301 = vadd.xlane.f32.xlu0 %v300_v50 }
  0x46   : > { %304 = vadd.xlane.f32.xlu1 %v303_v51 }
  0x49   : > { %349 = vadd.xlane.f32.xlu0 %v348_v54 }
  0x4a   : > { %352 = vadd.xlane.f32.xlu1 %v351_v55 }
  0x4d   : > { %307 = vadd.xlane.f32.xlu0 %v306_v58 }
  0x4e   : > { %310 = vadd.xlane.f32.xlu1 %v309_v59 }
  0x51   : > { %355 = vadd.xlane.f32.xlu0 %v354_v62 }
  0x52   : > { %358 = vadd.xlane.f32.xlu1 %v357_v63 }
  0xa2   : > { %v266_v3 = vpop.xlane.xlu0 %265 }
  0xa3   : > { %v314_v4 = vpop.xlane.xlu1 %313  ;;  %v361_v6 = vmul.f32 0.015625, %v266_v3 }
  0xa4   : > { %v377_v7 = vmul.f32 0.015625, %v314_v4 }
  0xa5   : > { %v2250_v10 = vsub.f32 %v2090_v0, %v361_v6 }
  0xa6   : > { %v2253_v11 = vsub.f32 %v2093_v1, %v377_v7  ;;  %v269_v14 = vpop.xlane.xlu0 %268 }
  0xa7   : > { %v317_v15 = vpop.xlane.xlu1 %316  ;;  %v362_v18 = vmul.f32 0.015625, %v269_v14  ;;  %v425_v22 = vmul.f32 %v2250_v10, %v2250_v10 }
  0xa8   : > { %v378_v19 = vmul.f32 0.015625, %v317_v15  ;;  %v441_v23 = vmul.f32 %v2253_v11, %v2253_v11 }
  0xa9   : > { %v2260_v26 = vsub.f32 %v2096_v2, %v362_v18  ;;  %v457_v0 = vsel %vm263_vm0, %v425_v22, 0.0 }
  0xaa   : > { %v2263_v27 = vsub.f32 %v2103_v5, %v378_v19  ;;  %458 = vadd.xlane.f32.xlu0 %v457_v0  ;;  %v272_v1 = vpop.xlane.xlu0 %271  ;;  %v505_v31 = vsel %vm263_vm0, %v441_v23, 0.0 }
  0xab   : > { %v275_v30 = vpop.xlane.xlu1 %274  ;;  %v363_v34 = vmul.f32 0.015625, %v272_v1  ;;  %v426_v38 = vmul.f32 %v2260_v26, %v2260_v26 }
  0xac   : > { %v364_v35 = vmul.f32 0.015625, %v275_v30  ;;  %v442_v39 = vmul.f32 %v2263_v27, %v2263_v27 }
  0xad   : > { %v2272_v2 = vsub.f32 %v2110_v8, %v363_v34  ;;  %v460_v42 = vsel %vm263_vm0, %v426_v38, 0.0 }
  0xae   : > { %v2275_v5 = vsub.f32 %v2113_v9, %v364_v35  ;;  %506 = vadd.xlane.f32.xlu0 %v505_v31  ;;  %461 = vadd.xlane.f32.xlu1 %v460_v42  ;;  %v320_v43 = vpop.xlane.xlu0 %319  ;;  %v508_v47 = vsel %vm263_vm0, %v442_v39, 0.0 }
  0xaf   : > { %v323_v46 = vpop.xlane.xlu1 %322  ;;  %v379_v50 = vmul.f32 0.015625, %v320_v43  ;;  %v427_v54 = vmul.f32 %v2272_v2, %v2272_v2 }
  0xb0   : > { %v380_v51 = vmul.f32 0.015625, %v323_v46  ;;  %v428_v8 = vmul.f32 %v2275_v5, %v2275_v5 }
  0xb1   : > { %v2284_v55 = vsub.f32 %v2120_v12, %v379_v50  ;;  %v463_v58 = vsel %vm263_vm0, %v427_v54, 0.0 }
  0xb2   : > { %v2287_v9 = vsub.f32 %v2123_v13, %v380_v51  ;;  %509 = vadd.xlane.f32.xlu1 %v508_v47  ;;  %464 = vadd.xlane.f32.xlu0 %v463_v58  ;;  %v278_v59 = vpop.xlane.xlu0 %277  ;;  %v466_v63 = vsel %vm263_vm0, %v428_v8, 0.0 }
  0xb3   : > { %v281_v62 = vpop.xlane.xlu1 %280  ;;  %v365_v3 = vmul.f32 0.015625, %v278_v59  ;;  %v443_v6 = vmul.f32 %v2284_v55, %v2284_v55 }
  0xb4   : > { %v366_v4 = vmul.f32 0.015625, %v281_v62  ;;  %v444_v12 = vmul.f32 %v2287_v9, %v2287_v9 }
  0xb5   : > { %v2296_v7 = vsub.f32 %v2130_v16, %v365_v3  ;;  %v511_v14 = vsel %vm263_vm0, %v443_v6, 0.0  ;;  %v1830_v6 = vld [vmem:[%s3337_s3 + $0x4] ss:$8 sps:$4 sm:$0xff]  }
  0xb6   : > { %v2299_v13 = vsub.f32 %v2133_v17, %v366_v4  ;;  %467 = vadd.xlane.f32.xlu1 %v466_v63  ;;  %512 = vadd.xlane.f32.xlu0 %v511_v14  ;;  %v326_v15 = vpop.xlane.xlu0 %325  ;;  %v514_v19 = vsel %vm263_vm0, %v444_v12, 0.0 }
  0xb7   : > { %v329_v18 = vpop.xlane.xlu1 %328  ;;  %v381_v22 = vmul.f32 0.015625, %v326_v15  ;;  %v429_v0 = vmul.f32 %v2296_v7, %v2296_v7  ;;  %v1832_v15 = vld [vmem:[%s3337_s3] ss:$8 sps:$4 sm:$0xff]   ;;  %883 = vmatprep.subr.bf16.mxu0 %v1830_v6  ;;  %1813 = vmatprep.subr.bf16.mxu1 %v1830_v6  ;;  %v1839_v6 = vld [vmem:[%s3337_s3 + $0x34] ss:$8 sps:$4 sm:$0xff]  }
  0xb8   : > { %v382_v23 = vmul.f32 0.015625, %v329_v18  ;;  %v430_v16 = vmul.f32 %v2299_v13, %v2299_v13  ;;  %884 = vmatpush1.bf16.msra.mxu0 %v1832_v15  ;;  %1817 = vmatpush1.bf16.msra.mxu1 %v1832_v15 }
  0xb9   : > { %v2308_v1 = vsub.f32 %v2140_v20, %v381_v22  ;;  %v469_v30 = vsel %vm263_vm0, %v429_v0, 0.0 }
  0xba   : > { %v2311_v17 = vsub.f32 %v2143_v21, %v382_v23  ;;  %515 = vadd.xlane.f32.xlu1 %v514_v19  ;;  %470 = vadd.xlane.f32.xlu0 %v469_v30  ;;  %v284_v31 = vpop.xlane.xlu0 %283  ;;  %v472_v35 = vsel %vm263_vm0, %v430_v16, 0.0  ;;  %v1833_v30 = vld [vmem:[%s3337_s3 + $0x14] ss:$8 sps:$4 sm:$0xff]  }
  0xbb   : > { %v287_v34 = vpop.xlane.xlu1 %286  ;;  %v367_v38 = vmul.f32 0.015625, %v284_v31  ;;  %v445_v42 = vmul.f32 %v2308_v1, %v2308_v1  ;;  %885 = vmatprep.subr.bf16.mxu0 %v1833_v30  ;;  %1814 = vmatprep.subr.bf16.mxu1 %v1833_v30 }
  0xbc   : > { %v368_v39 = vmul.f32 0.015625, %v287_v34  ;;  %v446_v20 = vmul.f32 %v2311_v17, %v2311_v17 }
  0xbd   : > { %v2320_v43 = vsub.f32 %v2150_v24, %v367_v38  ;;  %v517_v46 = vsel %vm263_vm0, %v445_v42, 0.0 }
  0xbe   : > { %v2323_v21 = vsub.f32 %v2153_v25, %v368_v39  ;;  %473 = vadd.xlane.f32.xlu1 %v472_v35  ;;  %518 = vadd.xlane.f32.xlu0 %v517_v46  ;;  %v332_v47 = vpop.xlane.xlu0 %331  ;;  %v520_v51 = vsel %vm263_vm0, %v446_v20, 0.0  ;;  %v1835_v35 = vld [vmem:[%s3337_s3 + $0x10] ss:$8 sps:$4 sm:$0xff]  }
  0xbf   : > { %v335_v50 = vpop.xlane.xlu1 %334  ;;  %v383_v54 = vmul.f32 0.015625, %v332_v47  ;;  %v431_v58 = vmul.f32 %v2320_v43, %v2320_v43  ;;  %886 = vmatpush1.bf16.msra.mxu0 %v1835_v35  ;;  %1818 = vmatpush1.bf16.msra.mxu1 %v1835_v35 }
  0xc0   : > { %v384_v8 = vmul.f32 0.015625, %v335_v50  ;;  %v432_v24 = vmul.f32 %v2323_v21, %v2323_v21  ;;  %v1836_v50 = vld [vmem:[%s3337_s3 + $0x24] ss:$8 sps:$4 sm:$0xff]  }
  0xc1   : > { %v2332_v59 = vsub.f32 %v2160_v28, %v383_v54  ;;  %v475_v62 = vsel %vm263_vm0, %v431_v58, 0.0  ;;  %887 = vmatprep.subr.bf16.mxu0 %v1836_v50  ;;  %1815 = vmatprep.subr.bf16.mxu1 %v1836_v50 }
  0xc2   : > { %v2335_v25 = vsub.f32 %v2163_v29, %v384_v8  ;;  %521 = vadd.xlane.f32.xlu1 %v520_v51  ;;  %476 = vadd.xlane.f32.xlu0 %v475_v62  ;;  %v290_v63 = vpop.xlane.xlu0 %289  ;;  %v478_v4 = vsel %vm263_vm0, %v432_v24, 0.0  ;;  %v1838_v8 = vld [vmem:[%s3337_s3 + $0x20] ss:$8 sps:$4 sm:$0xff]  }
  0xc3   : > { %v293_v3 = vpop.xlane.xlu1 %292  ;;  %v369_v12 = vmul.f32 0.015625, %v290_v63  ;;  %v447_v28 = vmul.f32 %v2332_v59, %v2332_v59  ;;  %888 = vmatpush1.bf16.msra.mxu0 %v1838_v8  ;;  %1819 = vmatpush1.bf16.msra.mxu1 %v1838_v8 }
  0xc4   : > { %v370_v14 = vmul.f32 0.015625, %v293_v3  ;;  %v448_v29 = vmul.f32 %v2335_v25, %v2335_v25  ;;  %889 = vmatprep.subr.bf16.mxu0 %v1839_v6  ;;  %1816 = vmatprep.subr.bf16.mxu1 %v1839_v6 }
  0xc5   : > { %v2350_v18 = vsub.f32 %v2170_v32, %v369_v12  ;;  %v523_v22 = vsel %vm263_vm0, %v447_v28, 0.0  ;;  %v1841_v28 = vld [vmem:[%s3337_s3 + $0x30] ss:$8 sps:$4 sm:$0xff]  }
  0xc6   : > { %v2353_v19 = vsub.f32 %v2173_v33, %v370_v14  ;;  %479 = vadd.xlane.f32.xlu1 %v478_v4  ;;  %524 = vadd.xlane.f32.xlu0 %v523_v22  ;;  %v338_v23 = vpop.xlane.xlu0 %337  ;;  %v526_v16 = vsel %vm263_vm0, %v448_v29, 0.0 }
  0xc7   : > { %v341_v0 = vpop.xlane.xlu1 %340  ;;  %v385_v31 = vmul.f32 0.015625, %v338_v23  ;;  %v433_v33 = vmul.f32 %v2350_v18, %v2350_v18  ;;  %890 = vmatpush1.bf16.msra.mxu0 %v1841_v28  ;;  %1820 = vmatpush1.bf16.msra.mxu1 %v1841_v28 }
  0xc8   : > { %v386_v32 = vmul.f32 0.015625, %v341_v0  ;;  %v434_v34 = vmul.f32 %v2353_v19, %v2353_v19 }
  0xc9   : > { %v2368_v38 = vsub.f32 %v2180_v36, %v385_v31  ;;  %v481_v42 = vsel %vm263_vm0, %v433_v33, 0.0 }
  0xca   : > { %v2371_v39 = vsub.f32 %v2183_v37, %v386_v32  ;;  %527 = vadd.xlane.f32.xlu1 %v526_v16  ;;  %482 = vadd.xlane.f32.xlu0 %v481_v42  ;;  %v296_v20 = vpop.xlane.xlu0 %295  ;;  %v484_v47 = vsel %vm263_vm0, %v434_v34, 0.0 }
  0xcb   : > { %v299_v46 = vpop.xlane.xlu1 %298  ;;  %v371_v51 = vmul.f32 0.015625, %v296_v20  ;;  %v449_v37 = vmul.f32 %v2368_v38, %v2368_v38 }
  0xcc   : > { %v372_v36 = vmul.f32 0.015625, %v299_v46  ;;  %v450_v54 = vmul.f32 %v2371_v39, %v2371_v39 }
  0xcd   : > { %v2386_v58 = vsub.f32 %v2190_v40, %v371_v51  ;;  %v529_v62 = vsel %vm263_vm0, %v449_v37, 0.0 }
  0xce   : > { %v2389_v24 = vsub.f32 %v2193_v41, %v372_v36  ;;  %485 = vadd.xlane.f32.xlu1 %v484_v47  ;;  %530 = vadd.xlane.f32.xlu0 %v529_v62  ;;  %v344_v63 = vpop.xlane.xlu0 %343  ;;  %v532_v4 = vsel %vm263_vm0, %v450_v54, 0.0 }
  0xcf   : > { %v347_v3 = vpop.xlane.xlu1 %346  ;;  %v387_v12 = vmul.f32 0.015625, %v344_v63  ;;  %v435_v41 = vmul.f32 %v2386_v58, %v2386_v58 }
  0xd0   : > { %v388_v40 = vmul.f32 0.015625, %v347_v3  ;;  %v436_v14 = vmul.f32 %v2389_v24, %v2389_v24 }
  0xd1   : > { %v2404_v29 = vsub.f32 %v2200_v44, %v387_v12  ;;  %v487_v22 = vsel %vm263_vm0, %v435_v41, 0.0 }
  0xd2   : > { %v2407_v15 = vsub.f32 %v2203_v45, %v388_v40  ;;  %533 = vadd.xlane.f32.xlu1 %v532_v4  ;;  %488 = vadd.xlane.f32.xlu0 %v487_v22  ;;  %v302_v23 = vpop.xlane.xlu0 %301  ;;  %v490_v16 = vsel %vm263_vm0, %v436_v14, 0.0  ;;  %v2042_v45 = vmov 0  }
  0xd3   : > { %v305_v0 = vpop.xlane.xlu1 %304  ;;  %v373_v30 = vmul.f32 0.015625, %v302_v23  ;;  %v451_v32 = vmul.f32 %v2404_v29, %v2404_v29  ;;  %915 = vmatprep.mubr.bf16.mxu0 %v2042_v45  ;;  %995 = vmatprep.mubr.bf16.mxu1 %v2042_v45 }
  0xd4   : > { %v374_v31 = vmul.f32 0.015625, %v305_v0  ;;  %v452_v44 = vmul.f32 %v2407_v15, %v2407_v15 }
  0xd5   : > { %v2418_v33 = vsub.f32 %v2210_v48, %v373_v30  ;;  %v535_v35 = vsel %vm263_vm0, %v451_v32, 0.0 }
  0xd6   : > { %v2421_v34 = vsub.f32 %v2213_v49, %v374_v31  ;;  %491 = vadd.xlane.f32.xlu1 %v490_v16  ;;  %536 = vadd.xlane.f32.xlu0 %v535_v35  ;;  %v350_v42 = vpop.xlane.xlu0 %349  ;;  %v538_v46 = vsel %vm263_vm0, %v452_v44, 0.0 }
  0xd7   : > { %v353_v20 = vpop.xlane.xlu1 %352  ;;  %v389_v47 = vmul.f32 0.015625, %v350_v42  ;;  %v437_v51 = vmul.f32 %v2418_v33, %v2418_v33 }
  0xd8   : > { %v390_v50 = vmul.f32 0.015625, %v353_v20  ;;  %v438_v48 = vmul.f32 %v2421_v34, %v2421_v34 }
  0xd9   : > { %v2430_v36 = vsub.f32 %v2220_v52, %v389_v47  ;;  %v493_v37 = vsel %vm263_vm0, %v437_v51, 0.0 }
  0xda   : > { %v2433_v49 = vsub.f32 %v2223_v53, %v390_v50  ;;  %539 = vadd.xlane.f32.xlu1 %v538_v46  ;;  %494 = vadd.xlane.f32.xlu0 %v493_v37  ;;  %v308_v54 = vpop.xlane.xlu0 %307  ;;  %v496_v62 = vsel %vm263_vm0, %v438_v48, 0.0 }
  0xdb   : > { %v311_v8 = vpop.xlane.xlu1 %310  ;;  %v375_v63 = vmul.f32 0.015625, %v308_v54  ;;  %v453_v4 = vmul.f32 %v2430_v36, %v2430_v36 }
  0xdc   : > { %v376_v3 = vmul.f32 0.015625, %v311_v8  ;;  %v454_v52 = vmul.f32 %v2433_v49, %v2433_v49 }
  0xdd   : > { %v2442_v6 = vsub.f32 %v2230_v56, %v375_v63  ;;  %v541_v12 = vsel %vm263_vm0, %v453_v4, 0.0 }
  0xde   : > { %v2445_v53 = vsub.f32 %v2233_v57, %v376_v3  ;;  %497 = vadd.xlane.f32.xlu1 %v496_v62  ;;  %542 = vadd.xlane.f32.xlu0 %v541_v12  ;;  %v356_v40 = vpop.xlane.xlu0 %355  ;;  %v544_v14 = vsel %vm263_vm0, %v454_v52, 0.0 }
  0xdf   : > { %v359_v41 = vpop.xlane.xlu1 %358  ;;  %v391_v28 = vmul.f32 0.015625, %v356_v40  ;;  %v439_v23 = vmul.f32 %v2442_v6, %v2442_v6 }
  0xe0   : > { %v392_v22 = vmul.f32 0.015625, %v359_v41  ;;  %v440_v56 = vmul.f32 %v2445_v53, %v2445_v53 }
  0xe1   : > { %v2454_v0 = vsub.f32 %v2240_v60, %v391_v28  ;;  %v499_v16 = vsel %vm263_vm0, %v439_v23, 0.0 }
  0xe2   : > { %v2457_v57 = vsub.f32 %v2243_v61, %v392_v22  ;;  %545 = vadd.xlane.f32.xlu1 %v544_v14  ;;  %500 = vadd.xlane.f32.xlu0 %v499_v16  ;;  %v502_v30 = vsel %vm263_vm0, %v440_v56, 0.0 }
  0xe3   : > { %v455_v31 = vmul.f32 %v2454_v0, %v2454_v0 }
  0xe4   : > { %v456_v32 = vmul.f32 %v2457_v57, %v2457_v57 }
  0xe5   : > { %v547_v44 = vsel %vm263_vm0, %v455_v31, 0.0  ;;  %v2471_v31 = vld [vmem:[%s3335_s1] ss:$0 sm:$0xff] }
  0xe6   : > { %503 = vadd.xlane.f32.xlu1 %v502_v30  ;;  %548 = vadd.xlane.f32.xlu0 %v547_v44  ;;  %v550_v60 = vsel %vm263_vm0, %v456_v32, 0.0 }
  0xea   : > { %551 = vadd.xlane.f32.xlu1 %v550_v60 }
 0x137   : > { %v459_v61 = vpop.xlane.xlu0 %458 }
 0x138   : > { %v553_v35 = vmul.f32 0.015625, %v459_v61 }
 0x13a   : > { %v585_v42 = vadd.f32 1e-06, %v553_v35 }
 0x13b   : > { %v462_v20 = vpop.xlane.xlu1 %461  ;;  %v507_v46 = vpop.xlane.xlu0 %506 }
 0x13c   : > { %1842 = vrsqrt.f32 %v585_v42  ;;  %v554_v47 = vmul.f32 0.015625, %v462_v20  ;;  %v569_v50 = vmul.f32 0.015625, %v507_v46 }
 0x13e   : > { %v586_v51 = vadd.f32 1e-06, %v554_v47  ;;  %v601_v48 = vadd.f32 1e-06, %v569_v50 }
 0x13f   : > { %v510_v37 = vpop.xlane.xlu1 %509  ;;  %v465_v54 = vpop.xlane.xlu0 %464 }
 0x140   : > { %1844 = vrsqrt.f32 %v586_v51  ;;  %v570_v8 = vmul.f32 0.015625, %v510_v37  ;;  %v555_v62 = vmul.f32 0.015625, %v465_v54  ;;  %v2479_v51 = vld [vmem:[%s3336_s2] ss:$0 sm:$0xff] }
 0x141   : > { %1846 = vrsqrt.f32 %v601_v48 }
 0x142   : > { %v602_v63 = vadd.f32 1e-06, %v570_v8  ;;  %v587_v3 = vadd.f32 1e-06, %v555_v62 }
 0x143   : > { %v468_v4 = vpop.xlane.xlu1 %467  ;;  %v513_v52 = vpop.xlane.xlu0 %512 }
 0x144   : > { %1848 = vrsqrt.f32 %v602_v63  ;;  %v556_v12 = vmul.f32 0.015625, %v468_v4  ;;  %v571_v40 = vmul.f32 0.015625, %v513_v52 }
 0x145   : > { %1850 = vrsqrt.f32 %v587_v3 }
 0x146   : > { %v1843_v41 = vpop.eup %1842  ;;  %v588_v14 = vadd.f32 1e-06, %v556_v12  ;;  %v603_v28 = vadd.f32 1e-06, %v571_v40 }
 0x147   : > { %v649_v22 = vmul.f32 %v1843_v41, %v2250_v10  ;;  %v516_v23 = vpop.xlane.xlu1 %515  ;;  %v471_v56 = vpop.xlane.xlu0 %470 }
 0x148   : > { %1852 = vrsqrt.f32 %v588_v14  ;;  %v572_v16 = vmul.f32 0.015625, %v516_v23  ;;  %v557_v30 = vmul.f32 0.015625, %v471_v56 }
 0x149   : > { %1854 = vrsqrt.f32 %v603_v28  ;;  %v688_v10 = vmul.f32 %v2471_v31, %v649_v22 }
 0x14a   : > { %v1845_v32 = vpop.eup %1844  ;;  %v604_v44 = vadd.f32 1e-06, %v572_v16  ;;  %v589_v60 = vadd.f32 1e-06, %v557_v30 }
 0x14b   : > { %v1847_v61 = vpop.eup %1846  ;;  %v650_v35 = vmul.f32 %v1845_v32, %v2260_v26  ;;  %v474_v42 = vpop.xlane.xlu1 %473 }
 0x14c   : > { %v519_v20 = vpop.xlane.xlu0 %518  ;;  %v665_v46 = vmul.f32 %v1847_v61, %v2253_v11  ;;  %1856 = vrsqrt.f32 %v604_v44  ;;  %v558_v47 = vmul.f32 0.015625, %v474_v42  ;;  %v727_v11 = vadd.f32 %v2479_v51, %v688_v10 }
 0x14d   : > { %v573_v50 = vmul.f32 0.015625, %v519_v20  ;;  %1858 = vrsqrt.f32 %v589_v60  ;;  %v689_v48 = vmul.f32 %v2471_v31, %v650_v35 }
 0x14e   : > { %v1849_v37 = vpop.eup %1848  ;;  %v590_v54 = vadd.f32 1e-06, %v558_v47  ;;  %v704_v52 = vmul.f32 %v2471_v31, %v665_v46 }
 0x14f   : > { %v605_v26 = vadd.f32 1e-06, %v573_v50  ;;  %v1851_v8 = vpop.eup %1850  ;;  %v666_v62 = vmul.f32 %v1849_v37, %v2263_v27  ;;  %v522_v63 = vpop.xlane.xlu1 %521  ;;  %v728_v4 = vadd.f32 %v2479_v51, %v689_v48 }
 0x150   : > { %v477_v3 = vpop.xlane.xlu0 %476  ;;  %v651_v12 = vmul.f32 %v1851_v8, %v2272_v2  ;;  %1860 = vrsqrt.f32 %v590_v54  ;;  %v574_v40 = vmul.f32 0.015625, %v522_v63  ;;  %v743_v44 = vadd.f32 %v2479_v51, %v704_v52 }
 0x151   : > { %v559_v41 = vmul.f32 0.015625, %v477_v3  ;;  %1862 = vrsqrt.f32 %v605_v26  ;;  %v759_v14 = vpack.c.bf16 %v728_v4, %v727_v11  ;;  %v705_v28 = vmul.f32 %v2471_v31, %v666_v62 }
 0x152   : > { %v1853_v22 = vpop.eup %1852  ;;  %v606_v23 = vadd.f32 1e-06, %v574_v40  ;;  %v690_v60 = vmul.f32 %v2471_v31, %v651_v12 }
 0x153   : > { %v591_v27 = vadd.f32 1e-06, %v559_v41  ;;  %v1855_v56 = vpop.eup %1854  ;;  %v652_v16 = vmul.f32 %v1853_v22, %v2275_v5  ;;  %v480_v30 = vpop.xlane.xlu1 %479  ;;  %1794 = vmatmul.mubr.msk.bf16.vlgmr.msra.gmra.mrb[0].mxu0 %vm263_vm0, %v759_v14  ;;  %v744_v2 = vadd.f32 %v2479_v51, %v705_v28 }
 0x154   : > { %v525_v32 = vpop.xlane.xlu0 %524  ;;  %v667_v61 = vmul.f32 %v1855_v56, %v2284_v55  ;;  %1864 = vrsqrt.f32 %v606_v23  ;;  %v560_v35 = vmul.f32 0.015625, %v480_v30  ;;  %925 = vmatprep.mubr.bf16.mxu0 %v2042_v45  ;;  %v729_v55 = vadd.f32 %v2479_v51, %v690_v60 }
 0x155   : > { %v575_v42 = vmul.f32 0.015625, %v525_v32  ;;  %1866 = vrsqrt.f32 %v591_v27  ;;  %v767_v20 = vpack.c.bf16 %v744_v2, %v743_v44  ;;  %v691_v5 = vmul.f32 %v2471_v31, %v652_v16 }
 0x156   : > { %v1857_v10 = vpop.eup %1856  ;;  %v592_v46 = vadd.f32 1e-06, %v560_v35  ;;  %v706_v8 = vmul.f32 %v2471_v31, %v667_v61 }
 0x157   : > { %v607_v47 = vadd.f32 1e-06, %v575_v42  ;;  %v1859_v50 = vpop.eup %1858  ;;  %v668_v48 = vmul.f32 %v1857_v10, %v2287_v9  ;;  %v528_v37 = vpop.xlane.xlu1 %527  ;;  %1802 = vmatmul.mubr.msk.bf16.vlgmr.msra.gmra.mrb[0].mxu1 %vm263_vm0, %v767_v20  ;;  %v730_v26 = vadd.f32 %v2479_v51, %v691_v5 }
 0x158   : > { %v483_v54 = vpop.xlane.xlu0 %482  ;;  %v653_v62 = vmul.f32 %v1859_v50, %v2296_v7  ;;  %1868 = vrsqrt.f32 %v592_v46  ;;  %v576_v63 = vmul.f32 0.015625, %v528_v37  ;;  %1005 = vmatprep.mubr.bf16.mxu1 %v2042_v45  ;;  %v745_v7 = vadd.f32 %v2479_v51, %v706_v8 }
 0x159   : > { %v561_v3 = vmul.f32 0.015625, %v483_v54  ;;  %1870 = vrsqrt.f32 %v607_v47  ;;  %v760_v11 = vpack.c.bf16 %v730_v26, %v729_v55  ;;  %v707_v9 = vmul.f32 %v2471_v31, %v668_v48 }
 0x15a   : > { %v1861_v4 = vpop.eup %1860  ;;  %v608_v52 = vadd.f32 1e-06, %v576_v63  ;;  %v692_v23 = vmul.f32 %v2471_v31, %v653_v62 }
 0x15b   : > { %v593_v12 = vadd.f32 1e-06, %v561_v3  ;;  %v1863_v40 = vpop.eup %1862  ;;  %v654_v41 = vmul.f32 %v1861_v4, %v2299_v13  ;;  %v486_v14 = vpop.xlane.xlu1 %485  ;;  %1795 = vmatmul.mubr.msk.bf16.gmra.mrb[4].mxu0 %vm263_vm0, %v760_v11  ;;  %v746_v22 = vadd.f32 %v2479_v51, %v707_v9 }
 0x15c   : > { %v531_v28 = vpop.xlane.xlu0 %530  ;;  %v669_v27 = vmul.f32 %v1863_v40, %v2308_v1  ;;  %1872 = vrsqrt.f32 %v608_v52  ;;  %v562_v56 = vmul.f32 0.015625, %v486_v14  ;;  %935 = vmatprep.mubr.bf16.mxu0 %v2042_v45  ;;  %v731_v1 = vadd.f32 %v2479_v51, %v692_v23 }
 0x15d   : > { %v577_v16 = vmul.f32 0.015625, %v531_v28  ;;  %1874 = vrsqrt.f32 %v593_v12  ;;  %v768_v30 = vpack.c.bf16 %v746_v22, %v745_v7  ;;  %v693_v13 = vmul.f32 %v2471_v31, %v654_v41 }
 0x15e   : > { %v1865_v32 = vpop.eup %1864  ;;  %v594_v44 = vadd.f32 1e-06, %v562_v56  ;;  %v708_v5 = vmul.f32 %v2471_v31, %v669_v27 }
 0x15f   : > { %v609_v2 = vadd.f32 1e-06, %v577_v16  ;;  %v1867_v60 = vpop.eup %1866  ;;  %v670_v61 = vmul.f32 %v1865_v32, %v2311_v17  ;;  %v534_v35 = vpop.xlane.xlu1 %533  ;;  %1803 = vmatmul.mubr.msk.bf16.gmra.mrb[4].mxu1 %vm263_vm0, %v768_v30  ;;  %v732_v20 = vadd.f32 %v2479_v51, %v693_v13 }
 0x160   : > { %v489_v42 = vpop.xlane.xlu0 %488  ;;  %v655_v10 = vmul.f32 %v1867_v60, %v2320_v43  ;;  %1876 = vrsqrt.f32 %v594_v44  ;;  %v578_v46 = vmul.f32 0.015625, %v534_v35  ;;  %1015 = vmatprep.mubr.bf16.mxu1 %v2042_v45  ;;  %v747_v43 = vadd.f32 %v2479_v51, %v708_v5 }
 0x161   : > { %v563_v47 = vmul.f32 0.015625, %v489_v42  ;;  %1878 = vrsqrt.f32 %v609_v2  ;;  %v761_v50 = vpack.c.bf16 %v732_v20, %v731_v1  ;;  %v709_v17 = vmul.f32 %v2471_v31, %v670_v61 }
 0x162   : > { %v1869_v48 = vpop.eup %1868  ;;  %v610_v37 = vadd.f32 1e-06, %v578_v46  ;;  %v694_v3 = vmul.f32 %v2471_v31, %v655_v10 }
 0x163   : > { %v595_v54 = vadd.f32 1e-06, %v563_v47  ;;  %v1871_v55 = vpop.eup %1870  ;;  %v656_v26 = vmul.f32 %v1869_v48, %v2323_v21  ;;  %v492_v8 = vpop.xlane.xlu1 %491  ;;  %1796 = vmatmul.mubr.msk.bf16.gmra.mrb[8].mxu0 %vm263_vm0, %v761_v50  ;;  %v748_v63 = vadd.f32 %v2479_v51, %v709_v17 }
 0x164   : > { %v537_v62 = vpop.xlane.xlu0 %536  ;;  %v671_v11 = vmul.f32 %v1871_v55, %v2332_v59  ;;  %1880 = vrsqrt.f32 %v610_v37  ;;  %v564_v9 = vmul.f32 0.015625, %v492_v8  ;;  %945 = vmatprep.mubr.bf16.mxu0 %v2042_v45  ;;  %v733_v59 = vadd.f32 %v2479_v51, %v694_v3 }
 0x165   : > { %v579_v4 = vmul.f32 0.015625, %v537_v62  ;;  %1882 = vrsqrt.f32 %v595_v54  ;;  %v769_v52 = vpack.c.bf16 %v748_v63, %v747_v43  ;;  %v695_v21 = vmul.f32 %v2471_v31, %v656_v26 }
 0x166   : > { %v1873_v12 = vpop.eup %1872  ;;  %v596_v40 = vadd.f32 1e-06, %v564_v9  ;;  %v710_v27 = vmul.f32 %v2471_v31, %v671_v11 }
 0x167   : > { %v611_v41 = vadd.f32 1e-06, %v579_v4  ;;  %v1875_v14 = vpop.eup %1874  ;;  %v672_v28 = vmul.f32 %v1873_v12, %v2335_v25  ;;  %v540_v7 = vpop.xlane.xlu1 %539  ;;  %1804 = vmatmul.mubr.msk.bf16.gmra.mrb[8].mxu1 %vm263_vm0, %v769_v52  ;;  %v734_v23 = vadd.f32 %v2479_v51, %v695_v21 }
 0x168   : > { %v495_v22 = vpop.xlane.xlu0 %494  ;;  %v657_v56 = vmul.f32 %v1875_v14, %v2350_v18  ;;  %1884 = vrsqrt.f32 %v596_v40  ;;  %v580_v16 = vmul.f32 0.015625, %v540_v7  ;;  %1025 = vmatprep.mubr.bf16.mxu1 %v2042_v45  ;;  %v749_v18 = vadd.f32 %v2479_v51, %v710_v27 }
 0x169   : > { %v565_v30 = vmul.f32 0.015625, %v495_v22  ;;  %1886 = vrsqrt.f32 %v611_v41  ;;  %v762_v13 = vpack.c.bf16 %v734_v23, %v733_v59  ;;  %v711_v25 = vmul.f32 %v2471_v31, %v672_v28 }
 0x16a   : > { %v1877_v32 = vpop.eup %1876  ;;  %v612_v44 = vadd.f32 1e-06, %v580_v16  ;;  %v696_v20 = vmul.f32 %v2471_v31, %v657_v56 }
 0x16b   : > { %v597_v2 = vadd.f32 1e-06, %v565_v30  ;;  %v1879_v60 = vpop.eup %1878  ;;  %v658_v61 = vmul.f32 %v1877_v32, %v2353_v19  ;;  %v498_v35 = vpop.xlane.xlu1 %497  ;;  %1797 = vmatmul.mubr.msk.bf16.gmra.mrb[12].mxu0 %vm263_vm0, %v762_v13  ;;  %v750_v1 = vadd.f32 %v2479_v51, %v711_v25 }
 0x16c   : > { %v543_v42 = vpop.xlane.xlu0 %542  ;;  %v673_v5 = vmul.f32 %v1879_v60, %v2368_v38  ;;  %1888 = vrsqrt.f32 %v612_v44  ;;  %v566_v10 = vmul.f32 0.015625, %v498_v35  ;;  %955 = vmatprep.mubr.bf16.mxu0 %v2042_v45  ;;  %v735_v38 = vadd.f32 %v2479_v51, %v696_v20 }
 0x16d   : > { %v581_v46 = vmul.f32 0.015625, %v543_v42  ;;  %1890 = vrsqrt.f32 %v597_v2  ;;  %v770_v47 = vpack.c.bf16 %v750_v1, %v749_v18  ;;  %v697_v19 = vmul.f32 %v2471_v31, %v658_v61 }
 0x16e   : > { %v1881_v50 = vpop.eup %1880  ;;  %v598_v17 = vadd.f32 1e-06, %v566_v10  ;;  %v712_v62 = vmul.f32 %v2471_v31, %v673_v5 }
 0x16f   : > { %v613_v48 = vadd.f32 1e-06, %v581_v46  ;;  %v1883_v37 = vpop.eup %1882  ;;  %v674_v54 = vmul.f32 %v1881_v50, %v2371_v39  ;;  %v546_v55 = vpop.xlane.xlu1 %545  ;;  %1805 = vmatmul.mubr.msk.bf16.gmra.mrb[12].mxu1 %vm263_vm0, %v770_v47  ;;  %v736_v8 = vadd.f32 %v2479_v51, %v697_v19 }
 0x170   : > { %v501_v26 = vpop.xlane.xlu0 %500  ;;  %v659_v43 = vmul.f32 %v1883_v37, %v2386_v58  ;;  %1892 = vrsqrt.f32 %v598_v17  ;;  %v582_v63 = vmul.f32 0.015625, %v546_v55  ;;  %1035 = vmatprep.mubr.bf16.mxu1 %v2042_v45  ;;  %v751_v58 = vadd.f32 %v2479_v51, %v712_v62 }
 0x171   : > { %v567_v3 = vmul.f32 0.015625, %v501_v26  ;;  %1894 = vrsqrt.f32 %v613_v48  ;;  %v763_v11 = vpack.c.bf16 %v736_v8, %v735_v38  ;;  %v713_v39 = vmul.f32 %v2471_v31, %v674_v54 }
 0x172   : > { %v1885_v9 = vpop.eup %1884  ;;  %v614_v4 = vadd.f32 1e-06, %v582_v63  ;;  %v698_v28 = vmul.f32 %v2471_v31, %v659_v43 }
 0x173   : > { %v599_v52 = vadd.f32 1e-06, %v567_v3  ;;  %v1887_v21 = vpop.eup %1886  ;;  %v660_v12 = vmul.f32 %v1885_v9, %v2389_v24  ;;  %v504_v40 = vpop.xlane.xlu1 %503  ;;  %1798 = vmatmul.mubr.msk.bf16.gmra.mrb[16].mxu0 %vm263_vm0, %v763_v11  ;;  %v752_v14 = vadd.f32 %v2479_v51, %v713_v39 }
 0x174   : > { %v549_v41 = vpop.xlane.xlu0 %548  ;;  %v675_v7 = vmul.f32 %v1887_v21, %v2404_v29  ;;  %1896 = vrsqrt.f32 %v614_v4  ;;  %v568_v22 = vmul.f32 0.015625, %v504_v40  ;;  %965 = vmatprep.mubr.bf16.mxu0 %v2042_v45  ;;  %v737_v29 = vadd.f32 %v2479_v51, %v698_v28 }
 0x175   : > { %v583_v59 = vmul.f32 0.015625, %v549_v41  ;;  %1898 = vrsqrt.f32 %v599_v52  ;;  %v771_v23 = vpack.c.bf16 %v752_v14, %v751_v58  ;;  %v699_v24 = vmul.f32 %v2471_v31, %v660_v12  ;;  %v783_v14 = vld [vmem:[%s3338_s4] sm:$0x3] }
 0x176   : > { %v1889_v27 = vpop.eup %1888  ;;  %v600_v56 = vadd.f32 1e-06, %v568_v22  ;;  %v714_v44 = vmul.f32 %v2471_v31, %v675_v7  ;;  %v785_v40 = vlaneseq }
 0x177   : > { %v615_v16 = vadd.f32 1e-06, %v583_v59  ;;  %v1891_v30 = vpop.eup %1890  ;;  %v676_v13 = vmul.f32 %v1889_v27, %v2407_v15  ;;  %v552_v25 = vpop.xlane.xlu1 %551  ;;  %1806 = vmatmul.mubr.msk.bf16.gmra.mrb[16].mxu1 %vm263_vm0, %v771_v23  ;;  %v738_v32 = vadd.f32 %v2479_v51, %v699_v24 }
 0x178   : > { %v661_v2 = vmul.f32 %v1891_v30, %v2418_v33  ;;  %1900 = vrsqrt.f32 %v600_v56  ;;  %v584_v60 = vmul.f32 0.015625, %v552_v25  ;;  %1045 = vmatprep.mubr.bf16.mxu1 %v2042_v45  ;;  %v753_v20 = vadd.f32 %v2479_v51, %v714_v44 }
 0x179   : > { %1902 = vrsqrt.f32 %v615_v16  ;;  %v764_v61 = vpack.c.bf16 %v738_v32, %v737_v29  ;;  %v715_v35 = vmul.f32 %v2471_v31, %v676_v13  ;;  %v786_v41 = vshrl.u32 %v785_v40, 7 }
 0x17a   : > { %v1893_v15 = vpop.eup %1892  ;;  %v616_v42 = vadd.f32 1e-06, %v584_v60  ;;  %v700_v33 = vmul.f32 %v2471_v31, %v661_v2 }
 0x17b   : > { %v1895_v18 = vpop.eup %1894  ;;  %v662_v1 = vmul.f32 %v1893_v15, %v2421_v34  ;;  %1799 = vmatmul.mubr.msk.bf16.gmra.mrb[20].mxu0 %vm263_vm0, %v764_v61  ;;  %v754_v5 = vadd.f32 %v2479_v51, %v715_v35  ;;  %v787_v58 = vsub.s32 0, %v786_v41 }
 0x17c   : > { %v677_v10 = vmul.f32 %v1895_v18, %v2430_v36  ;;  %1904 = vrsqrt.f32 %v616_v42  ;;  %975 = vmatprep.mubr.bf16.mxu0 %v2042_v45  ;;  %v739_v17 = vadd.f32 %v2479_v51, %v700_v33 }
 0x17d   : > { %v772_v46 = vpack.c.bf16 %v754_v5, %v753_v20  ;;  %v701_v47 = vmul.f32 %v2471_v31, %v662_v1  ;;  %v2606_v28 = vrot.slane %v783_v14, %v787_v58 }
 0x17e   : > { %v1897_v19 = vpop.eup %1896  ;;  %v716_v37 = vmul.f32 %v2471_v31, %v677_v10 }
 0x17f   : > { %v1899_v50 = vpop.eup %1898  ;;  %v678_v34 = vmul.f32 %v1897_v19, %v2433_v49  ;;  %1807 = vmatmul.mubr.msk.bf16.gmra.mrb[20].mxu1 %vm263_vm0, %v772_v46  ;;  %v740_v48 = vadd.f32 %v2479_v51, %v701_v47 }
 0x180   : > { %v663_v36 = vmul.f32 %v1899_v50, %v2442_v6  ;;  %1055 = vmatprep.mubr.bf16.mxu1 %v2042_v45  ;;  %v755_v49 = vadd.f32 %v2479_v51, %v716_v37 }
 0x181   : > { %v765_v54 = vpack.c.bf16 %v740_v48, %v739_v17  ;;  %v717_v55 = vmul.f32 %v2471_v31, %v678_v34 }
 0x182   : > { %v1901_v26 = vpop.eup %1900  ;;  %v702_v43 = vmul.f32 %v2471_v31, %v663_v36 }
 0x183   : > { %v1903_v38 = vpop.eup %1902  ;;  %v664_v8 = vmul.f32 %v1901_v26, %v2445_v53  ;;  %1800 = vmatmul.mubr.msk.bf16.gmra.mrb[24].mxu0 %vm263_vm0, %v765_v54  ;;  %v756_v62 = vadd.f32 %v2479_v51, %v717_v55 }
 0x184   : > { %v679_v63 = vmul.f32 %v1903_v38, %v2454_v0  ;;  %985 = vmatprep.mubr.bf16.mxu0 %v2042_v45  ;;  %v741_v53 = vadd.f32 %v2479_v51, %v702_v43 }
 0x185   : > { %v773_v6 = vpack.c.bf16 %v756_v62, %v755_v49  ;;  %v703_v3 = vmul.f32 %v2471_v31, %v664_v8 }
 0x186   : > { %v1905_v11 = vpop.eup %1904  ;;  %v718_v4 = vmul.f32 %v2471_v31, %v679_v63 }
 0x187   : > { %v680_v39 = vmul.f32 %v1905_v11, %v2457_v57  ;;  %1808 = vmatmul.mubr.msk.bf16.gmra.mrb[24].mxu1 %vm263_vm0, %v773_v6  ;;  %v742_v9 = vadd.f32 %v2479_v51, %v703_v3 }
 0x188   : > { %1065 = vmatprep.mubr.bf16.mxu1 %v2042_v45  ;;  %v757_v21 = vadd.f32 %v2479_v51, %v718_v4  ;;  %v791_v45 = vsub.s32 1, %v786_v41 }
 0x189   : > { %v766_v52 = vpack.c.bf16 %v742_v9, %v741_v53  ;;  %v719_v0 = vmul.f32 %v2471_v31, %v680_v39 }
 0x18a   : > { %v2608_v31 = vrot.slane %v783_v14, %v791_v45 }
 0x18b   : > { %1801 = vmatmul.mubr.msk.bf16.gmra.mrb[28].mxu0 %vm263_vm0, %v766_v52  ;;  %v758_v12 = vadd.f32 %v2479_v51, %v719_v0 }
 0x18d   : > { %v774_v57 = vpack.c.bf16 %v758_v12, %v757_v21 }
 0x18f   : > { %1809 = vmatmul.mubr.msk.bf16.gmra.mrb[28].mxu1 %vm263_vm0, %v774_v57 }
 0x226   : > { %v917_v7 = vpop.f32.mrb[0].mxu0 }
 0x227   : > { %v918_v22 = vadd.f32 %v917_v7, %v2606_v28  ;;  %v919_v59 = vpop.f32.mrb[1].mxu0 }
 0x228   : > { %v920_v51 = vadd.f32 %v919_v59, %v2608_v31  ;;  %v921_v23 = vpop.f32.mrb[2].mxu0 }
 0x229   : > { %v1140_v24 = vmul.f32 0.044715, %v918_v22  ;;  %v2613_v27 = vadd.f32 %v921_v23, %v2606_v28  ;;  %v923_v56 = vpop.f32.mrb[3].mxu0  ;;  %v2645_v3 = vmul.f32 0.5, %v918_v22 }
 0x22a   : > { %v1141_v16 = vmul.f32 0.044715, %v920_v51  ;;  %v2616_v30 = vadd.f32 %v923_v56, %v2608_v31  ;;  %v997_v13 = vpop.f32.mrb[0].mxu1  ;;  %v1077_v7 = vmul.f32 0.5, %v920_v51 }
 0x22b   : > { %v1204_v25 = vmul.f32 %v1140_v24, %v918_v22  ;;  %v1142_v29 = vmul.f32 0.044715, %v2613_v27  ;;  %v2620_v32 = vadd.f32 %v997_v13, %v2606_v28  ;;  %v999_v44 = vpop.f32.mrb[1].mxu1  ;;  %v1078_v24 = vmul.f32 0.5, %v2613_v27 }
 0x22c   : > { %v1205_v2 = vmul.f32 %v1141_v16, %v920_v51  ;;  %v1143_v60 = vmul.f32 0.044715, %v2616_v30  ;;  %v2624_v61 = vadd.f32 %v999_v44, %v2608_v31  ;;  %v1001_v35 = vpop.f32.mrb[2].mxu1 }
 0x22d   : > { %v1268_v15 = vmul.f32 %v1204_v25, %v918_v22  ;;  %v1206_v42 = vmul.f32 %v1142_v29, %v2613_v27  ;;  %v1172_v18 = vmul.f32 0.044715, %v2620_v32  ;;  %v1003_v1 = vpop.f32.mrb[3].mxu1  ;;  %v2633_v50 = vadd.f32 %v1001_v35, %v2606_v28 }
 0x22e   : > { %v1269_v20 = vmul.f32 %v1205_v2, %v920_v51  ;;  %v1207_v5 = vmul.f32 %v1143_v60, %v2616_v30  ;;  %v1173_v33 = vmul.f32 0.044715, %v2624_v61  ;;  %v927_v10 = vpop.f32.mrb[4].mxu0  ;;  %v2640_v38 = vadd.f32 %v1003_v1, %v2608_v31 }
 0x22f   : > { %v1332_v46 = vadd.f32 %v1268_v15, %v918_v22  ;;  %v1270_v47 = vmul.f32 %v1206_v42, %v2613_v27  ;;  %v1236_v19 = vmul.f32 %v1172_v18, %v2620_v32  ;;  %v929_v34 = vpop.f32.mrb[5].mxu0  ;;  %v1174_v63 = vmul.f32 0.044715, %v2633_v50 }
 0x230   : > { %v1333_v17 = vadd.f32 %v1269_v20, %v920_v51  ;;  %v1271_v48 = vmul.f32 %v1207_v5, %v2616_v30  ;;  %v1237_v37 = vmul.f32 %v1173_v33, %v2624_v61  ;;  %v931_v36 = vpop.f32.mrb[6].mxu0  ;;  %v1175_v12 = vmul.f32 0.044715, %v2640_v38 }
 0x231   : > { %v1396_v54 = vmul.f32 0.7978846, %v1332_v46  ;;  %v1334_v55 = vadd.f32 %v1270_v47, %v2613_v27  ;;  %v1300_v26 = vmul.f32 %v1236_v19, %v2620_v32  ;;  %v933_v8 = vpop.f32.mrb[7].mxu0  ;;  %v1238_v52 = vmul.f32 %v1174_v63, %v2633_v50 }
 0x232   : > { %v1397_v49 = vmul.f32 0.7978846, %v1333_v17  ;;  %v1335_v62 = vadd.f32 %v1271_v48, %v2616_v30  ;;  %v1301_v43 = vmul.f32 %v1237_v37, %v2624_v61  ;;  %v1007_v6 = vpop.f32.mrb[4].mxu1  ;;  %v2654_v57 = vadd.f32 %v927_v10, %v2606_v28 }
 0x233   : > { %1906 = vtanh.f32 %v1396_v54  ;;  %v1398_v11 = vmul.f32 0.7978846, %v1334_v55  ;;  %v1364_v39 = vadd.f32 %v1300_v26, %v2620_v32  ;;  %v1009_v53 = vpop.f32.mrb[5].mxu1  ;;  %v1302_v58 = vmul.f32 %v1238_v52, %v2633_v50 }
 0x234   : > { %1908 = vtanh.f32 %v1397_v49  ;;  %v1399_v9 = vmul.f32 0.7978846, %v1335_v62  ;;  %v1365_v4 = vadd.f32 %v1301_v43, %v2624_v61  ;;  %v2650_v0 = vpop.f32.mrb[6].mxu1  ;;  %v2660_v14 = vadd.f32 %v929_v34, %v2608_v31 }
 0x235   : > { %1910 = vtanh.f32 %v1398_v11  ;;  %v1428_v21 = vmul.f32 0.7978846, %v1364_v39  ;;  %v2656_v40 = vpop.f32.mrb[7].mxu1  ;;  %v1239_v22 = vmul.f32 %v1175_v12, %v2640_v38  ;;  %v1144_v59 = vmul.f32 0.044715, %v2654_v57 }
 0x236   : > { %1912 = vtanh.f32 %v1399_v9  ;;  %v1429_v41 = vmul.f32 0.7978846, %v1365_v4  ;;  %v2662_v45 = vpop.f32.mrb[8].mxu0  ;;  %v1366_v56 = vadd.f32 %v1302_v58, %v2633_v50  ;;  %v1145_v16 = vmul.f32 0.044715, %v2660_v14 }
 0x237   : > { %1914 = vtanh.f32 %v1428_v21  ;;  %v2666_v23 = vpop.f32.mrb[9].mxu0  ;;  %v1303_v25 = vmul.f32 %v1239_v22, %v2640_v38  ;;  %v1208_v51 = vmul.f32 %v1144_v59, %v2654_v57  ;;  %v2676_v29 = vadd.f32 %v931_v36, %v2606_v28 }
 0x238   : > { %1916 = vtanh.f32 %v1429_v41  ;;  %v2671_v13 = vpop.f32.mrb[10].mxu0  ;;  %v2679_v44 = vadd.f32 %v933_v8, %v2608_v31  ;;  %v1079_v27 = vmul.f32 0.5, %v2616_v30  ;;  %v1430_v60 = vmul.f32 0.7978846, %v1366_v56 }
 0x239   : > { %v2681_v2 = vpop.f32.mrb[11].mxu0  ;;  %v1209_v35 = vmul.f32 %v1145_v16, %v2660_v14  ;;  %v2686_v15 = vadd.f32 %v1007_v6, %v2606_v28  ;;  %v1108_v18 = vmul.f32 0.5, %v2620_v32  ;;  %v1367_v1 = vadd.f32 %v1303_v25, %v2640_v38 }
 0x23a   : > { %v2688_v42 = vpop.f32.mrb[8].mxu1  ;;  %v1272_v20 = vmul.f32 %v1208_v51, %v2654_v57  ;;  %v1146_v5 = vmul.f32 0.044715, %v2676_v29  ;;  %v1109_v30 = vmul.f32 0.5, %v2624_v61  ;;  %1918 = vtanh.f32 %v1430_v60 }
 0x23b   : > { %v2694_v33 = vpop.f32.mrb[9].mxu1  ;;  %v1273_v10 = vmul.f32 %v1209_v35, %v2660_v14  ;;  %v1147_v46 = vmul.f32 0.044715, %v2679_v44  ;;  %v1431_v32 = vmul.f32 0.7978846, %v1367_v1  ;;  %v2705_v48 = vadd.f32 %v1009_v53, %v2608_v31 }
 0x23c   : > { %v2700_v47 = vpop.f32.mrb[10].mxu1  ;;  %v1336_v34 = vadd.f32 %v1272_v20, %v2654_v57  ;;  %v1210_v17 = vmul.f32 %v1146_v5, %v2676_v29  ;;  %v1176_v26 = vmul.f32 0.044715, %v2686_v15 }
 0x23d   : > { %v1907_v19 = vpop.eup %1906  ;;  %v2707_v37 = vpop.f32.mrb[11].mxu1  ;;  %v1337_v54 = vadd.f32 %v1273_v10, %v2660_v14  ;;  %v1211_v55 = vmul.f32 %v1147_v46, %v2679_v44  ;;  %1920 = vtanh.f32 %v1431_v32  ;;  %v1177_v10 = vmul.f32 0.044715, %v2705_v48 }
 0x23e   : > { %v1909_v36 = vpop.eup %1908  ;;  %v1524_v61 = vadd.f32 1.0, %v1907_v19  ;;  %v2712_v8 = vpop.f32.mrb[12].mxu0  ;;  %v1400_v43 = vmul.f32 0.7978846, %v1336_v34  ;;  %v1274_v63 = vmul.f32 %v1210_v17, %v2676_v29  ;;  %v1240_v35 = vmul.f32 %v1176_v26, %v2686_v15 }
 0x23f   : > { %v1911_v49 = vpop.eup %1910  ;;  %v1525_v62 = vadd.f32 1.0, %v1909_v36  ;;  %v2720_v6 = vpop.f32.mrb[13].mxu0  ;;  %v1401_v9 = vmul.f32 0.7978846, %v1337_v54  ;;  %v1275_v4 = vmul.f32 %v1211_v55, %v2679_v44  ;;  %v2746_v32 = vadd.f32 %v2650_v0, %v2606_v28 }
 0x240   : > { %v1913_v11 = vpop.eup %1912  ;;  %v1588_v39 = vmul.f32 %v1524_v61, %v2645_v3  ;;  %v1526_v53 = vadd.f32 1.0, %v1911_v49  ;;  %v2724_v52 = vpop.f32.mrb[14].mxu0  ;;  %1922 = vtanh.f32 %v1400_v43  ;;  %v1338_v58 = vadd.f32 %v1274_v63, %v2676_v29 }
 0x241   : > { %v1915_v21 = vpop.eup %1914  ;;  %v1589_v12 = vmul.f32 %v1525_v62, %v1077_v7  ;;  %v1527_v41 = vadd.f32 1.0, %v1913_v11  ;;  %v2727_v22 = vpop.f32.mrb[15].mxu0  ;;  %1924 = vtanh.f32 %v1401_v9  ;;  %v1339_v16 = vadd.f32 %v1275_v4, %v2679_v44 }
 0x242   : > { %v1917_v59 = vpop.eup %1916  ;;  %1652 = vst [vmem:[%s2717_s26] sm:$0xff] %v1588_v39  ;;  %v1590_v56 = vmul.f32 %v1526_v53, %v1078_v24  ;;  %v1556_v3 = vadd.f32 1.0, %v1915_v21  ;;  %v2731_v25 = vpop.f32.mrb[12].mxu1  ;;  %v1402_v60 = vmul.f32 0.7978846, %v1338_v58  ;;  %v1110_v24 = vmul.f32 0.5, %v2633_v50 }
 0x243   : > { %1653 = vst [vmem:[%s2717_s26 + $0x8] sm:$0xff] %v1589_v12  ;;  %v1591_v51 = vmul.f32 %v1527_v41, %v1079_v27  ;;  %v1557_v7 = vadd.f32 1.0, %v1917_v59  ;;  %v2735_v1 = vpop.f32.mrb[13].mxu1  ;;  %v1403_v5 = vmul.f32 0.7978846, %v1339_v16  ;;  %v1304_v27 = vmul.f32 %v1240_v35, %v2686_v15 }
 0x244   : > { %1654 = vst [vmem:[%s2717_s26 + $0x10] sm:$0xff] %v1590_v56  ;;  %v1620_v20 = vmul.f32 %v1556_v3, %v1108_v18  ;;  %v2740_v46 = vpop.f32.mrb[14].mxu1  ;;  %1926 = vtanh.f32 %v1402_v60  ;;  %v1919_v18 = vpop.eup %1918  ;;  %v1241_v50 = vmul.f32 %v1177_v10, %v2705_v48  ;;  %v2754_v17 = vadd.f32 %v2656_v40, %v2608_v31 }
 0x245   : > { %1655 = vst [vmem:[%s2717_s26 + $0x18] sm:$0xff] %v1591_v51  ;;  %v1621_v19 = vmul.f32 %v1557_v7, %v1109_v30  ;;  %v2748_v34 = vpop.f32.mrb[15].mxu1  ;;  %1928 = vtanh.f32 %v1403_v5  ;;  %v2758_v30 = vadd.f32 %v2662_v45, %v2606_v28  ;;  %v1558_v0 = vadd.f32 1.0, %v1919_v18 }
 0x246   : > { %1684 = vst [vmem:[%s2717_s26 + $0x100] sm:$0xff] %v1620_v20  ;;  %v2760_v36 = vpop.f32.mrb[16].mxu0  ;;  %v1111_v61 = vmul.f32 0.5, %v2640_v38  ;;  %v1368_v54 = vadd.f32 %v1304_v27, %v2686_v15  ;;  %v1178_v55 = vmul.f32 0.044715, %v2746_v32  ;;  %v1080_v49 = vmul.f32 0.5, %v2654_v57 }
 0x247   : > { %1685 = vst [vmem:[%s2717_s26 + $0x108] sm:$0xff] %v1621_v19  ;;  %v2766_v26 = vpop.f32.mrb[17].mxu0  ;;  %v1081_v40 = vmul.f32 0.5, %v2660_v14  ;;  %v1305_v45 = vmul.f32 %v1241_v50, %v2705_v48  ;;  %v1179_v62 = vmul.f32 0.044715, %v2754_v17  ;;  %v1921_v63 = vpop.eup %1920  ;;  %v1622_v11 = vmul.f32 %v1558_v0, %v1110_v24 }
 0x248   : > { %v2772_v43 = vpop.f32.mrb[18].mxu0  ;;  %v1432_v38 = vmul.f32 0.7978846, %v1368_v54  ;;  %v1242_v39 = vmul.f32 %v1178_v55, %v2746_v32  ;;  %v1148_v53 = vmul.f32 0.044715, %v2758_v30  ;;  %v1559_v4 = vadd.f32 1.0, %v1921_v63 }
 0x249   : > { %v2776_v9 = vpop.f32.mrb[19].mxu0  ;;  %v1369_v57 = vadd.f32 %v1305_v45, %v2705_v48  ;;  %v1243_v14 = vmul.f32 %v1179_v62, %v2754_v17  ;;  %v2782_v21 = vadd.f32 %v2666_v23, %v2608_v31  ;;  %1686 = vst [vmem:[%s2717_s26 + $0x110] sm:$0xff] %v1622_v11  ;;  %v2791_v56 = vadd.f32 %v2671_v13, %v2606_v28 }
 0x24a   : > { %v2784_v12 = vpop.f32.mrb[16].mxu1  ;;  %v1923_v41 = vpop.eup %1922  ;;  %1930 = vtanh.f32 %v1432_v38  ;;  %v1306_v58 = vmul.f32 %v1242_v39, %v2746_v32  ;;  %v1212_v59 = vmul.f32 %v1148_v53, %v2758_v30  ;;  %v1623_v51 = vmul.f32 %v1559_v4, %v1111_v61 }
 0x24b   : > { %v2793_v3 = vpop.f32.mrb[17].mxu1  ;;  %v1925_v16 = vpop.eup %1924  ;;  %v1528_v23 = vadd.f32 1.0, %v1923_v41  ;;  %v1433_v7 = vmul.f32 0.7978846, %v1369_v57  ;;  %v1307_v60 = vmul.f32 %v1243_v14, %v2754_v17  ;;  %v1082_v24 = vmul.f32 0.5, %v2676_v29 }
 0x24c   : > { %v2796_v35 = vpop.f32.mrb[18].mxu1  ;;  %v1529_v20 = vadd.f32 1.0, %v1925_v16  ;;  %v1370_v5 = vadd.f32 %v1306_v58, %v2746_v32  ;;  %v1276_v10 = vmul.f32 %v1212_v59, %v2758_v30  ;;  %1687 = vst [vmem:[%s2717_s26 + $0x118] sm:$0xff] %v1623_v51  ;;  %v1149_v18 = vmul.f32 0.044715, %v2782_v21 }
 0x24d   : > { %v2801_v13 = vpop.f32.mrb[19].mxu1  ;;  %v1592_v19 = vmul.f32 %v1528_v23, %v1080_v49  ;;  %1932 = vtanh.f32 %v1433_v7  ;;  %v1371_v27 = vadd.f32 %v1307_v60, %v2754_v17  ;;  %v1083_v29 = vmul.f32 0.5, %v2679_v44 }
 0x24e   : > { %v2806_v50 = vpop.f32.mrb[20].mxu0  ;;  %v1927_v0 = vpop.eup %1926  ;;  %v1593_v61 = vmul.f32 %v1529_v20, %v1081_v40  ;;  %v1434_v54 = vmul.f32 0.7978846, %v1370_v5  ;;  %v1340_v55 = vadd.f32 %v1276_v10, %v2758_v30  ;;  %v1213_v11 = vmul.f32 %v1149_v18, %v2782_v21 }
 0x24f   : > { %v2810_v45 = vpop.f32.mrb[21].mxu0  ;;  %v1929_v62 = vpop.eup %1928  ;;  %1656 = vst [vmem:[%s2717_s26 + $0x20] sm:$0xff] %v1592_v19  ;;  %v1530_v49 = vadd.f32 1.0, %v1927_v0  ;;  %v1435_v63 = vmul.f32 0.7978846, %v1371_v27  ;;  %v2820_v53 = vadd.f32 %v2681_v2, %v2608_v31  ;;  %v2836_v7 = vadd.f32 %v2688_v42, %v2606_v28 }
 0x250   : > { %v1150_v38 = vmul.f32 0.044715, %v2791_v56  ;;  %v2815_v39 = vpop.f32.mrb[22].mxu0  ;;  %1657 = vst [vmem:[%s2717_s26 + $0x28] sm:$0xff] %v1593_v61  ;;  %v1531_v40 = vadd.f32 1.0, %v1929_v62  ;;  %1934 = vtanh.f32 %v1434_v54  ;;  %v1277_v14 = vmul.f32 %v1213_v11, %v2782_v21 }
 0x251   : > { %v1404_v44 = vmul.f32 0.7978846, %v1340_v55  ;;  %v2822_v4 = vpop.f32.mrb[23].mxu0  ;;  %v1594_v57 = vmul.f32 %v1530_v49, %v1082_v24  ;;  %1936 = vtanh.f32 %v1435_v63  ;;  %v1151_v16 = vmul.f32 0.044715, %v2820_v53 }
 0x252   : > { %v1214_v41 = vmul.f32 %v1150_v38, %v2791_v56  ;;  %v2826_v58 = vpop.f32.mrb[20].mxu1  ;;  %v1595_v59 = vmul.f32 %v1531_v40, %v1083_v29  ;;  %v1341_v2 = vadd.f32 %v1277_v14, %v2782_v21  ;;  %v2840_v60 = vadd.f32 %v2694_v33, %v2608_v31 }
 0x253   : > { %1938 = vtanh.f32 %v1404_v44  ;;  %v2829_v51 = vpop.f32.mrb[21].mxu1  ;;  %1658 = vst [vmem:[%s2717_s26 + $0x30] sm:$0xff] %v1594_v57  ;;  %v1112_v5 = vmul.f32 0.5, %v2686_v15  ;;  %v1113_v10 = vmul.f32 0.5, %v2705_v48  ;;  %v1215_v19 = vmul.f32 %v1151_v16, %v2820_v53 }
 0x254   : > { %v1278_v23 = vmul.f32 %v1214_v41, %v2791_v56  ;;  %v2842_v20 = vpop.f32.mrb[22].mxu1  ;;  %v1931_v24 = vpop.eup %1930  ;;  %1659 = vst [vmem:[%s2717_s26 + $0x38] sm:$0xff] %v1595_v59  ;;  %v2850_v27 = vadd.f32 %v2700_v47, %v2606_v28  ;;  %v1405_v0 = vmul.f32 0.7978846, %v1341_v2  ;;  %v2857_v61 = vadd.f32 %v2707_v37, %v2608_v31 }
 0x255   : > { %v2852_v42 = vpop.f32.mrb[23].mxu1  ;;  %v1560_v18 = vadd.f32 1.0, %v1931_v24  ;;  %v1114_v15 = vmul.f32 0.5, %v2746_v32  ;;  %v1279_v48 = vmul.f32 %v1215_v19, %v2820_v53  ;;  %v1180_v47 = vmul.f32 0.044715, %v2836_v7 }
 0x256   : > { %v1342_v33 = vadd.f32 %v1278_v23, %v2791_v56  ;;  %v2859_v29 = vpop.f32.mrb[24].mxu0  ;;  %v1181_v54 = vmul.f32 0.044715, %v2840_v60  ;;  %v1115_v63 = vmul.f32 0.5, %v2754_v17  ;;  %1940 = vtanh.f32 %v1405_v0 }
 0x257   : > { %v2865_v55 = vpop.f32.mrb[25].mxu0  ;;  %v1933_v62 = vpop.eup %1932  ;;  %v1624_v49 = vmul.f32 %v1560_v18, %v1112_v5  ;;  %v1343_v32 = vadd.f32 %v1279_v48, %v2820_v53  ;;  %v1244_v40 = vmul.f32 %v1180_v47, %v2836_v7  ;;  %v1182_v14 = vmul.f32 0.044715, %v2850_v27 }
 0x258   : > { %v1406_v37 = vmul.f32 0.7978846, %v1342_v33  ;;  %v2868_v11 = vpop.f32.mrb[26].mxu0  ;;  %v1561_v38 = vadd.f32 1.0, %v1933_v62  ;;  %v1245_v44 = vmul.f32 %v1181_v54, %v2840_v60  ;;  %v1183_v41 = vmul.f32 0.044715, %v2857_v61 }
 0x259   : > { %v2873_v57 = vpop.f32.mrb[27].mxu0  ;;  %1688 = vst [vmem:[%s2717_s26 + $0x120] sm:$0xff] %v1624_v49  ;;  %v2880_v17 = vadd.f32 %v2712_v8, %v2606_v28  ;;  %v1407_v23 = vmul.f32 0.7978846, %v1343_v32  ;;  %v1308_v24 = vmul.f32 %v1244_v40, %v2836_v7  ;;  %v1084_v33 = vmul.f32 0.5, %v2758_v30 }
 0x25a   : > { %1942 = vtanh.f32 %v1406_v37  ;;  %v2882_v59 = vpop.f32.mrb[24].mxu1  ;;  %v1935_v16 = vpop.eup %1934  ;;  %v1625_v2 = vmul.f32 %v1561_v38, %v1113_v10  ;;  %v1309_v5 = vmul.f32 %v1245_v44, %v2840_v60  ;;  %v1246_v48 = vmul.f32 %v1182_v14, %v2850_v27 }
 0x25b   : > { %v2886_v19 = vpop.f32.mrb[25].mxu1  ;;  %v1937_v18 = vpop.eup %1936  ;;  %v1562_v0 = vadd.f32 1.0, %v1935_v16  ;;  %v1247_v8 = vmul.f32 %v1183_v41, %v2857_v61  ;;  %1944 = vtanh.f32 %v1407_v23  ;;  %v1372_v62 = vadd.f32 %v1308_v24, %v2836_v7 }
 0x25c   : > { %v2891_v47 = vpop.f32.mrb[26].mxu1  ;;  %1689 = vst [vmem:[%s2717_s26 + $0x128] sm:$0xff] %v1625_v2  ;;  %v1563_v10 = vadd.f32 1.0, %v1937_v18  ;;  %v1373_v49 = vadd.f32 %v1309_v5, %v2840_v60  ;;  %v1310_v32 = vmul.f32 %v1246_v48, %v2850_v27  ;;  %v1152_v2 = vmul.f32 0.044715, %v2880_v17 }
 0x25d   : > { %v1939_v54 = vpop.eup %1938  ;;  %v2896_v37 = vpop.f32.mrb[27].mxu1  ;;  %v1626_v38 = vmul.f32 %v1562_v0, %v1114_v15  ;;  %v1311_v40 = vmul.f32 %v1247_v8, %v2857_v61  ;;  %v1436_v41 = vmul.f32 0.7978846, %v1372_v62  ;;  %v2908_v15 = vadd.f32 %v2720_v6, %v2608_v31 }
 0x25e   : > { %v1532_v30 = vadd.f32 1.0, %v1939_v54  ;;  %v2900_v44 = vpop.f32.mrb[28].mxu0  ;;  %v1627_v14 = vmul.f32 %v1563_v10, %v1115_v63  ;;  %v1437_v16 = vmul.f32 0.7978846, %v1373_v49  ;;  %v1374_v24 = vadd.f32 %v1310_v32, %v2850_v27 }
 0x25f   : > { %1690 = vst [vmem:[%s2717_s26 + $0x130] sm:$0xff] %v1626_v38  ;;  %v1375_v5 = vadd.f32 %v1311_v40, %v2857_v61  ;;  %v2910_v18 = vpop.f32.mrb[29].mxu0  ;;  %1946 = vtanh.f32 %v1436_v41  ;;  %v1216_v63 = vmul.f32 %v1152_v2, %v2880_v17  ;;  %v2916_v0 = vadd.f32 %v2724_v52, %v2606_v28 }
 0x260   : > { %v1596_v23 = vmul.f32 %v1532_v30, %v1084_v33  ;;  %1691 = vst [vmem:[%s2717_s26 + $0x138] sm:$0xff] %v1627_v14  ;;  %v2920_v33 = vadd.f32 %v2727_v22, %v2608_v31  ;;  %v2922_v48 = vpop.f32.mrb[30].mxu0  ;;  %v1941_v8 = vpop.eup %1940  ;;  %v1085_v6 = vmul.f32 0.5, %v2782_v21  ;;  %1948 = vtanh.f32 %v1437_v16 }
 0x261   : > { %v1438_v54 = vmul.f32 0.7978846, %v1374_v24  ;;  %v1439_v10 = vmul.f32 0.7978846, %v1375_v5  ;;  %v2926_v62 = vpop.f32.mrb[31].mxu0  ;;  %v1533_v49 = vadd.f32 1.0, %v1941_v8  ;;  %v1280_v52 = vmul.f32 %v1216_v63, %v2880_v17 }
 0x262   : > { %1660 = vst [vmem:[%s2717_s26 + $0x40] sm:$0xff] %v1596_v23  ;;  %v1086_v38 = vmul.f32 0.5, %v2791_v56  ;;  %v1153_v30 = vmul.f32 0.044715, %v2908_v15  ;;  %v2931_v22 = vpop.f32.mrb[28].mxu1  ;;  %v1087_v40 = vmul.f32 0.5, %v2820_v53  ;;  %v2946_v63 = vadd.f32 %v2731_v25, %v2606_v28 }
 0x263   : > { %1950 = vtanh.f32 %v1438_v54  ;;  %v1154_v21 = vmul.f32 0.044715, %v2916_v0  ;;  %v1155_v14 = vmul.f32 0.044715, %v2920_v33  ;;  %v2936_v41 = vpop.f32.mrb[29].mxu1  ;;  %v1597_v16 = vmul.f32 %v1533_v49, %v1085_v6 }
 0x264   : > { %v1943_v32 = vpop.eup %1942  ;;  %1952 = vtanh.f32 %v1439_v10  ;;  %v1344_v56 = vadd.f32 %v1280_v52, %v2880_v17  ;;  %v2939_v23 = vpop.f32.mrb[30].mxu1  ;;  %v1217_v24 = vmul.f32 %v1153_v30, %v2908_v15  ;;  %v2953_v49 = vadd.f32 %v2735_v1, %v2608_v31 }
 0x265   : > { %v1534_v2 = vadd.f32 1.0, %v1943_v32  ;;  %3340 = vst [vmem:[#allocation2_spill] sm:$0xff] %v2939_v23  ;;  %v1218_v53 = vmul.f32 %v1154_v21, %v2916_v0  ;;  %v1219_v5 = vmul.f32 %v1155_v14, %v2920_v33  ;;  %v2948_v8 = vpop.f32.mrb[31].mxu1  ;;  %v1945_v6 = vpop.eup %1944  ;;  %1661 = vst [vmem:[%s2717_s26 + $0x48] sm:$0xff] %v1597_v16  ;;  %v2957_v52 = vadd.f32 %v2740_v46, %v2606_v28 }
 0x266   : > { %3341 = vst [vmem:[#allocation3_spill] sm:$0xff] %v2948_v8  ;;  %v1408_v10 = vmul.f32 0.7978846, %v1344_v56  ;;  %v1535_v30 = vadd.f32 1.0, %v1945_v6  ;;  %v1281_v32 = vmul.f32 %v1217_v24, %v2908_v15  ;;  %v1117_v14 = vmul.f32 0.5, %v2840_v60 }
 0x267   : > { %v1598_v54 = vmul.f32 %v1534_v2, %v1086_v38  ;;  %v1282_v25 = vmul.f32 %v1218_v53, %v2916_v0  ;;  %v1283_v21 = vmul.f32 %v1219_v5, %v2920_v33  ;;  %v1116_v38 = vmul.f32 0.5, %v2836_v7 }
 0x268   : > { %1954 = vtanh.f32 %v1408_v10  ;;  %v1184_v1 = vmul.f32 0.044715, %v2946_v63  ;;  %v1599_v16 = vmul.f32 %v1535_v30, %v1087_v40  ;;  %v1345_v46 = vadd.f32 %v1281_v32, %v2908_v15 }
 0x269   : > { %1662 = vst [vmem:[%s2717_s26 + $0x50] sm:$0xff] %v1598_v54  ;;  %v1346_v2 = vadd.f32 %v1282_v25, %v2916_v0  ;;  %v1347_v56 = vadd.f32 %v1283_v21, %v2920_v33  ;;  %v1947_v24 = vpop.eup %1946  ;;  %v1118_v53 = vmul.f32 0.5, %v2850_v27  ;;  %v1185_v6 = vmul.f32 0.044715, %v2953_v49 }
 0x26a   : > { %v1248_v5 = vmul.f32 %v1184_v1, %v2946_v63  ;;  %v1186_v7 = vmul.f32 0.044715, %v2957_v52  ;;  %v1949_v60 = vpop.eup %1948  ;;  %1663 = vst [vmem:[%s2717_s26 + $0x58] sm:$0xff] %v1599_v16  ;;  %v1564_v54 = vadd.f32 1.0, %v1947_v24  ;;  %v1409_v10 = vmul.f32 0.7978846, %v1345_v46 }
 0x26b   : > { %v1410_v40 = vmul.f32 0.7978846, %v1346_v2  ;;  %v2976_v30 = vadd.f32 %v2748_v34, %v2608_v31  ;;  %v1565_v32 = vadd.f32 1.0, %v1949_v60  ;;  %v1411_v25 = vmul.f32 0.7978846, %v1347_v56 }
 0x26c   : > { %v1312_v27 = vmul.f32 %v1248_v5, %v2946_v63  ;;  %v1249_v21 = vmul.f32 %v1185_v6, %v2953_v49  ;;  %v1628_v8 = vmul.f32 %v1564_v54, %v1116_v38  ;;  %v1119_v23 = vmul.f32 0.5, %v2857_v61 }
 0x26d   : > { %v1951_v1 = vpop.eup %1950  ;;  %1956 = vtanh.f32 %v1409_v10  ;;  %v1250_v16 = vmul.f32 %v1186_v7, %v2957_v52  ;;  %v1629_v2 = vmul.f32 %v1565_v32, %v1117_v14  ;;  %v1187_v7 = vmul.f32 0.044715, %v2976_v30 }
 0x26e   : > { %v1953_v46 = vpop.eup %1952  ;;  %v1566_v24 = vadd.f32 1.0, %v1951_v1  ;;  %1958 = vtanh.f32 %v1410_v40  ;;  %v1376_v34 = vadd.f32 %v1312_v27, %v2946_v63  ;;  %1692 = vst [vmem:[%s2717_s26 + $0x140] sm:$0xff] %v1628_v8  ;;  %v1313_v5 = vmul.f32 %v1249_v21, %v2953_v49 }
 0x26f   : > { %v1567_v56 = vadd.f32 1.0, %v1953_v46  ;;  %1960 = vtanh.f32 %v1411_v25  ;;  %v1314_v6 = vmul.f32 %v1250_v16, %v2957_v52  ;;  %1693 = vst [vmem:[%s2717_s26 + $0x148] sm:$0xff] %v1629_v2  ;;  %v2990_v14 = vadd.f32 %v2760_v36, %v2606_v28 }
 0x270   : > { %v1630_v61 = vmul.f32 %v1566_v24, %v1118_v53  ;;  %v1440_v38 = vmul.f32 0.7978846, %v1376_v34  ;;  %v1377_v54 = vadd.f32 %v1313_v5, %v2953_v49  ;;  %v2996_v10 = vadd.f32 %v2766_v26, %v2608_v31 }
 0x271   : > { %v1631_v60 = vmul.f32 %v1567_v56, %v1119_v23  ;;  %v1378_v8 = vadd.f32 %v1314_v6, %v2957_v52  ;;  %v1088_v53 = vmul.f32 0.5, %v2880_v17  ;;  %v1251_v32 = vmul.f32 %v1187_v7, %v2976_v30 }
 0x272   : > { %v1955_v40 = vpop.eup %1954  ;;  %1694 = vst [vmem:[%s2717_s26 + $0x150] sm:$0xff] %v1630_v61  ;;  %1962 = vtanh.f32 %v1440_v38  ;;  %v1156_v25 = vmul.f32 0.044715, %v2990_v14  ;;  %v1089_v23 = vmul.f32 0.5, %v2908_v15  ;;  %v1441_v27 = vmul.f32 0.7978846, %v1377_v54 }
 0x273   : > { %1695 = vst [vmem:[%s2717_s26 + $0x158] sm:$0xff] %v1631_v60  ;;  %v1536_v36 = vadd.f32 1.0, %v1955_v40  ;;  %v1442_v21 = vmul.f32 0.7978846, %v1378_v8  ;;  %v1315_v1 = vmul.f32 %v1251_v32, %v2976_v30  ;;  %v1157_v16 = vmul.f32 0.044715, %v2996_v10 }
 0x274   : > { %v1220_v26 = vmul.f32 %v1156_v25, %v2990_v14  ;;  %v3009_v17 = vadd.f32 %v2772_v43, %v2606_v28  ;;  %v1090_v2 = vmul.f32 0.5, %v2916_v0  ;;  %1964 = vtanh.f32 %v1441_v27 }
 0x275   : > { %v1600_v46 = vmul.f32 %v1536_v36, %v1088_v53  ;;  %v3014_v15 = vadd.f32 %v2776_v9, %v2608_v31  ;;  %1966 = vtanh.f32 %v1442_v21  ;;  %v1379_v24 = vadd.f32 %v1315_v1, %v2976_v30 }
 0x276   : > { %v1284_v34 = vmul.f32 %v1220_v26, %v2990_v14  ;;  %v1221_v56 = vmul.f32 %v1157_v16, %v2996_v10  ;;  %v1091_v43 = vmul.f32 0.5, %v2920_v33  ;;  %v1158_v6 = vmul.f32 0.044715, %v3009_v17 }
 0x277   : > { %v1957_v5 = vpop.eup %1956  ;;  %1664 = vst [vmem:[%s2717_s26 + $0x60] sm:$0xff] %v1600_v46  ;;  %v1159_v0 = vmul.f32 0.044715, %v3014_v15  ;;  %v3025_v61 = vadd.f32 %v2784_v12, %v2606_v28  ;;  %v1443_v7 = vmul.f32 0.7978846, %v1379_v24  ;;  %v1120_v33 = vmul.f32 0.5, %v2946_v63 }
 0x278   : > { %v1959_v9 = vpop.eup %1958  ;;  %v1537_v38 = vadd.f32 1.0, %v1957_v5  ;;  %v1348_v60 = vadd.f32 %v1284_v34, %v2990_v14  ;;  %v1285_v54 = vmul.f32 %v1221_v56, %v2996_v10  ;;  %v1222_v53 = vmul.f32 %v1158_v6, %v3009_v17 }
 0x279   : > { %v1961_v8 = vpop.eup %1960  ;;  %v1538_v40 = vadd.f32 1.0, %v1959_v9  ;;  %v1223_v32 = vmul.f32 %v1159_v0, %v3014_v15  ;;  %1968 = vtanh.f32 %v1443_v7  ;;  %v1188_v46 = vmul.f32 0.044715, %v3025_v61 }
 0x27a   : > { %v1601_v25 = vmul.f32 %v1537_v38, %v1089_v23  ;;  %v1539_v12 = vadd.f32 1.0, %v1961_v8  ;;  %v1412_v36 = vmul.f32 0.7978846, %v1348_v60  ;;  %v1349_v21 = vadd.f32 %v1285_v54, %v2996_v10 }
 0x27b   : > { %v1602_v27 = vmul.f32 %v1538_v40, %v1090_v2  ;;  %v1286_v1 = vmul.f32 %v1222_v53, %v3009_v17  ;;  %v1287_v26 = vmul.f32 %v1223_v32, %v3014_v15  ;;  %v3039_v23 = vadd.f32 %v2793_v3, %v2608_v31 }
 0x27c   : > { %v1963_v16 = vpop.eup %1962  ;;  %1665 = vst [vmem:[%s2717_s26 + $0x68] sm:$0xff] %v1601_v25  ;;  %v1603_v63 = vmul.f32 %v1539_v12, %v1091_v43  ;;  %1970 = vtanh.f32 %v1412_v36  ;;  %v1413_v34 = vmul.f32 0.7978846, %v1349_v21  ;;  %v1121_v5 = vmul.f32 0.5, %v2953_v49 }
 0x27d   : > { %1666 = vst [vmem:[%s2717_s26 + $0x70] sm:$0xff] %v1602_v27  ;;  %v1568_v24 = vadd.f32 1.0, %v1963_v16  ;;  %v1350_v2 = vadd.f32 %v1286_v1, %v3009_v17  ;;  %v1351_v56 = vadd.f32 %v1287_v26, %v3014_v15  ;;  %v1252_v43 = vmul.f32 %v1188_v46, %v3025_v61 }
 0x27e   : > { %1667 = vst [vmem:[%s2717_s26 + $0x78] sm:$0xff] %v1603_v63  ;;  %v1189_v6 = vmul.f32 0.044715, %v3039_v23  ;;  %v3050_v0 = vadd.f32 %v2796_v35, %v2606_v28  ;;  %v1965_v3 = vpop.eup %1964  ;;  %1972 = vtanh.f32 %v1413_v34  ;;  %v1122_v8 = vmul.f32 0.5, %v2957_v52 }
 0x27f   : > { %v1632_v9 = vmul.f32 %v1568_v24, %v1120_v33  ;;  %v1414_v38 = vmul.f32 0.7978846, %v1350_v2  ;;  %v1415_v7 = vmul.f32 0.7978846, %v1351_v56  ;;  %v1967_v60 = vpop.eup %1966  ;;  %v1569_v54 = vadd.f32 1.0, %v1965_v3 }
 0x280   : > { %v1316_v40 = vmul.f32 %v1252_v43, %v3025_v61  ;;  %v1253_v49 = vmul.f32 %v1189_v6, %v3039_v23  ;;  %v1570_v53 = vadd.f32 1.0, %v1967_v60  ;;  %v1190_v35 = vmul.f32 0.044715, %v3050_v0 }
 0x281   : > { %1696 = vst [vmem:[%s2717_s26 + $0x160] sm:$0xff] %v1632_v9  ;;  %1974 = vtanh.f32 %v1414_v38  ;;  %v3059_v33 = vadd.f32 %v2801_v13, %v2608_v31  ;;  %v1633_v32 = vmul.f32 %v1569_v54, %v1121_v5  ;;  %v1123_v36 = vmul.f32 0.5, %v2976_v30 }
 0x282   : > { %1976 = vtanh.f32 %v1415_v7  ;;  %v1380_v25 = vadd.f32 %v1316_v40, %v3025_v61  ;;  %v1317_v52 = vmul.f32 %v1253_v49, %v3039_v23  ;;  %v1634_v12 = vmul.f32 %v1570_v53, %v1122_v8 }
 0x283   : > { %v1254_v27 = vmul.f32 %v1190_v35, %v3050_v0  ;;  %v1191_v21 = vmul.f32 0.044715, %v3059_v33  ;;  %v1969_v1 = vpop.eup %1968  ;;  %1697 = vst [vmem:[%s2717_s26 + $0x168] sm:$0xff] %v1633_v32  ;;  %v3070_v13 = vadd.f32 %v2806_v50, %v2606_v28  ;;  %v3074_v63 = vadd.f32 %v2810_v45, %v2608_v31 }
 0x284   : > { %v1444_v26 = vmul.f32 0.7978846, %v1380_v25  ;;  %v1381_v16 = vadd.f32 %v1317_v52, %v3039_v23  ;;  %1698 = vst [vmem:[%s2717_s26 + $0x170] sm:$0xff] %v1634_v12  ;;  %v1571_v46 = vadd.f32 1.0, %v1969_v1  ;;  %v1092_v30 = vmul.f32 0.5, %v2990_v14 }
 0x285   : > { %v1318_v24 = vmul.f32 %v1254_v27, %v3050_v0  ;;  %v1255_v34 = vmul.f32 %v1191_v21, %v3059_v33  ;;  %v1160_v5 = vmul.f32 0.044715, %v3070_v13  ;;  %v3083_v50 = vadd.f32 %v2815_v39, %v2606_v28 }
 0x286   : > { %v1971_v2 = vpop.eup %1970  ;;  %1978 = vtanh.f32 %v1444_v26  ;;  %v1445_v56 = vmul.f32 0.7978846, %v1381_v16  ;;  %v1635_v45 = vmul.f32 %v1571_v46, %v1123_v36  ;;  %v1093_v3 = vmul.f32 0.5, %v2996_v10 }
 0x287   : > { %v1540_v43 = vadd.f32 1.0, %v1971_v2  ;;  %v1382_v6 = vadd.f32 %v1318_v24, %v3050_v0  ;;  %v1319_v14 = vmul.f32 %v1255_v34, %v3059_v33  ;;  %v1224_v9 = vmul.f32 %v1160_v5, %v3070_v13 }
 0x288   : > { %1980 = vtanh.f32 %v1445_v56  ;;  %v1161_v38 = vmul.f32 0.044715, %v3074_v63  ;;  %v1973_v7 = vpop.eup %1972  ;;  %1699 = vst [vmem:[%s2717_s26 + $0x178] sm:$0xff] %v1635_v45  ;;  %v1094_v39 = vmul.f32 0.5, %v3009_v17  ;;  %v1162_v10 = vmul.f32 0.044715, %v3083_v50 }
 0x289   : > { %v1604_v60 = vmul.f32 %v1540_v43, %v1092_v30  ;;  %v1446_v54 = vmul.f32 0.7978846, %v1382_v6  ;;  %v1383_v8 = vadd.f32 %v1319_v14, %v3059_v33  ;;  %v1541_v40 = vadd.f32 1.0, %v1973_v7 }
 0x28a   : > { %v1288_v49 = vmul.f32 %v1224_v9, %v3070_v13  ;;  %v1225_v53 = vmul.f32 %v1161_v38, %v3074_v63  ;;  %v3099_v25 = vadd.f32 %v2822_v4, %v2608_v31  ;;  %v3103_v17 = vadd.f32 %v2826_v58, %v2606_v28 }
 0x28b   : > { %v1975_v35 = vpop.eup %1974  ;;  %1668 = vst [vmem:[%s2717_s26 + $0x80] sm:$0xff] %v1604_v60  ;;  %1982 = vtanh.f32 %v1446_v54  ;;  %v1447_v32 = vmul.f32 0.7978846, %v1383_v8  ;;  %v1605_v12 = vmul.f32 %v1541_v40, %v1093_v3  ;;  %v1095_v1 = vmul.f32 0.5, %v3014_v15 }
 0x28c   : > { %v1977_v52 = vpop.eup %1976  ;;  %v1542_v36 = vadd.f32 1.0, %v1975_v35  ;;  %v1352_v27 = vadd.f32 %v1288_v49, %v3070_v13  ;;  %v1289_v21 = vmul.f32 %v1225_v53, %v3074_v63  ;;  %v1226_v16 = vmul.f32 %v1162_v10, %v3083_v50 }
 0x28d   : > { %v1543_v26 = vadd.f32 1.0, %v1977_v52  ;;  %1984 = vtanh.f32 %v1447_v32  ;;  %1669 = vst [vmem:[%s2717_s26 + $0x88] sm:$0xff] %v1605_v12  ;;  %v1163_v30 = vmul.f32 0.044715, %v3099_v25  ;;  %v1124_v34 = vmul.f32 0.5, %v3025_v61 }
 0x28e   : > { %v1606_v4 = vmul.f32 %v1542_v36, %v1094_v39  ;;  %v1416_v46 = vmul.f32 0.7978846, %v1352_v27  ;;  %v1353_v58 = vadd.f32 %v1289_v21, %v3074_v63  ;;  %v1290_v2 = vmul.f32 %v1226_v16, %v3083_v50 }
 0x28f   : > { %v1607_v24 = vmul.f32 %v1543_v26, %v1095_v1  ;;  %v1192_v56 = vmul.f32 0.044715, %v3103_v17  ;;  %v1227_v45 = vmul.f32 %v1163_v30, %v3099_v25  ;;  %v3119_v43 = vadd.f32 %v2829_v51, %v2608_v31 }
 0x290   : > { %v1979_v15 = vpop.eup %1978  ;;  %1670 = vst [vmem:[%s2717_s26 + $0x90] sm:$0xff] %v1606_v4  ;;  %1986 = vtanh.f32 %v1416_v46  ;;  %v1417_v5 = vmul.f32 0.7978846, %v1353_v58  ;;  %v1354_v14 = vadd.f32 %v1290_v2, %v3083_v50  ;;  %v3126_v3 = vadd.f32 %v2842_v20, %v2606_v28 }
 0x291   : > { %1671 = vst [vmem:[%s2717_s26 + $0x98] sm:$0xff] %v1607_v24  ;;  %v1572_v6 = vadd.f32 1.0, %v1979_v15  ;;  %v1256_v61 = vmul.f32 %v1192_v56, %v3103_v17  ;;  %v1125_v38 = vmul.f32 0.5, %v3039_v23  ;;  %v1291_v7 = vmul.f32 %v1227_v45, %v3099_v25 }
 0x292   : > { %v1981_v9 = vpop.eup %1980  ;;  %1988 = vtanh.f32 %v1417_v5  ;;  %v1193_v51 = vmul.f32 0.044715, %v3119_v43  ;;  %v1418_v54 = vmul.f32 0.7978846, %v1354_v14  ;;  %v1126_v40 = vmul.f32 0.5, %v3050_v0 }
 0x293   : > { %v1636_v60 = vmul.f32 %v1572_v6, %v1124_v34  ;;  %v1573_v39 = vadd.f32 1.0, %v1981_v9  ;;  %v1320_v8 = vmul.f32 %v1256_v61, %v3103_v17  ;;  %v1355_v49 = vadd.f32 %v1291_v7, %v3099_v25 }
 0x294   : > { %v1257_v20 = vmul.f32 %v1193_v51, %v3119_v43  ;;  %v1194_v53 = vmul.f32 0.044715, %v3126_v3  ;;  %1990 = vtanh.f32 %v1418_v54  ;;  %v3140_v32 = vadd.f32 %v2852_v42, %v2608_v31 }
 0x295   : > { %v1983_v23 = vpop.eup %1982  ;;  %1700 = vst [vmem:[%s2717_s26 + $0x180] sm:$0xff] %v1636_v60  ;;  %v1637_v10 = vmul.f32 %v1573_v39, %v1125_v38  ;;  %v1384_v35 = vadd.f32 %v1320_v8, %v3103_v17  ;;  %v1419_v12 = vmul.f32 0.7978846, %v1355_v49  ;;  %v1127_v21 = vmul.f32 0.5, %v3059_v33 }
 0x296   : > { %v1574_v52 = vadd.f32 1.0, %v1983_v23  ;;  %v1321_v0 = vmul.f32 %v1257_v20, %v3119_v43  ;;  %v1258_v36 = vmul.f32 %v1194_v53, %v3126_v3  ;;  %v1195_v26 = vmul.f32 0.044715, %v3140_v32 }
 0x297   : > { %v1985_v27 = vpop.eup %1984  ;;  %1701 = vst [vmem:[%s2717_s26 + $0x188] sm:$0xff] %v1637_v10  ;;  %v1448_v1 = vmul.f32 0.7978846, %v1384_v35  ;;  %v3149_v16 = vadd.f32 %v2859_v29, %v2606_v28  ;;  %1992 = vtanh.f32 %v1419_v12  ;;  %v1096_v58 = vmul.f32 0.5, %v3070_v13 }
 0x298   : > { %v1638_v42 = vmul.f32 %v1574_v52, %v1126_v40  ;;  %v1575_v4 = vadd.f32 1.0, %v1985_v27  ;;  %v1385_v46 = vadd.f32 %v1321_v0, %v3119_v43  ;;  %v1322_v30 = vmul.f32 %v1258_v36, %v3126_v3 }
 0x299   : > { %1994 = vtanh.f32 %v1448_v1  ;;  %v1259_v33 = vmul.f32 %v1195_v26, %v3140_v32  ;;  %v1164_v29 = vmul.f32 0.044715, %v3149_v16  ;;  %v3159_v56 = vadd.f32 %v2865_v55, %v2608_v31 }
 0x29a   : > { %v1987_v24 = vpop.eup %1986  ;;  %1702 = vst [vmem:[%s2717_s26 + $0x190] sm:$0xff] %v1638_v42  ;;  %v1639_v34 = vmul.f32 %v1575_v4, %v1127_v21  ;;  %v1449_v2 = vmul.f32 0.7978846, %v1385_v46  ;;  %v1386_v5 = vadd.f32 %v1322_v30, %v3126_v3  ;;  %v3165_v45 = vadd.f32 %v2868_v11, %v2606_v28 }
 0x29b   : > { %v1544_v15 = vadd.f32 1.0, %v1987_v24  ;;  %v1323_v13 = vmul.f32 %v1259_v33, %v3140_v32  ;;  %v1097_v14 = vmul.f32 0.5, %v3074_v63  ;;  %v1228_v61 = vmul.f32 %v1164_v29, %v3149_v16 }
 0x29c   : > { %v1989_v6 = vpop.eup %1988  ;;  %1703 = vst [vmem:[%s2717_s26 + $0x198] sm:$0xff] %v1639_v34  ;;  %1996 = vtanh.f32 %v1449_v2  ;;  %v1165_v55 = vmul.f32 0.044715, %v3159_v56  ;;  %v1450_v7 = vmul.f32 0.7978846, %v1386_v5  ;;  %v1098_v60 = vmul.f32 0.5, %v3083_v50 }
 0x29d   : > { %v1608_v9 = vmul.f32 %v1544_v15, %v1096_v58  ;;  %v1545_v38 = vadd.f32 1.0, %v1989_v6  ;;  %v1387_v51 = vadd.f32 %v1323_v13, %v3140_v32  ;;  %v1292_v11 = vmul.f32 %v1228_v61, %v3149_v16 }
 0x29e   : > { %v1229_v39 = vmul.f32 %v1165_v55, %v3159_v56  ;;  %v1166_v54 = vmul.f32 0.044715, %v3165_v45  ;;  %v1991_v63 = vpop.eup %1990  ;;  %1998 = vtanh.f32 %v1450_v7  ;;  %v3179_v49 = vadd.f32 %v2873_v57, %v2608_v31 }
 0x29f   : > { %1672 = vst [vmem:[%s2717_s26 + $0xa0] sm:$0xff] %v1608_v9  ;;  %v1609_v8 = vmul.f32 %v1545_v38, %v1097_v14  ;;  %v1451_v40 = vmul.f32 0.7978846, %v1387_v51  ;;  %v1546_v20 = vadd.f32 1.0, %v1991_v63  ;;  %v1356_v53 = vadd.f32 %v1292_v11, %v3149_v16 }
 0x2a0   : > { %v1293_v50 = vmul.f32 %v1229_v39, %v3159_v56  ;;  %v1230_v23 = vmul.f32 %v1166_v54, %v3165_v45  ;;  %v1099_v10 = vmul.f32 0.5, %v3099_v25  ;;  %v1167_v35 = vmul.f32 0.044715, %v3179_v49 }
 0x2a1   : > { %1673 = vst [vmem:[%s2717_s26 + $0xa8] sm:$0xff] %v1609_v8  ;;  %2000 = vtanh.f32 %v1451_v40  ;;  %v3189_v52 = vadd.f32 %v2882_v59, %v2606_v28  ;;  %v1993_v57 = vpop.eup %1992  ;;  %v1610_v12 = vmul.f32 %v1546_v20, %v1098_v60  ;;  %v1420_v0 = vmul.f32 0.7978846, %v1356_v53 }
 0x2a2   : > { %v1357_v36 = vadd.f32 %v1293_v50, %v3159_v56  ;;  %v1294_v27 = vmul.f32 %v1230_v23, %v3165_v45  ;;  %v1547_v1 = vadd.f32 1.0, %v1993_v57  ;;  %v1128_v26 = vmul.f32 0.5, %v3103_v17 }
 0x2a3   : > { %v1995_v21 = vpop.eup %1994  ;;  %v1231_v25 = vmul.f32 %v1167_v35, %v3179_v49  ;;  %v1196_v42 = vmul.f32 0.044715, %v3189_v52  ;;  %1674 = vst [vmem:[%s2717_s26 + $0xb0] sm:$0xff] %v1610_v12  ;;  %2002 = vtanh.f32 %v1420_v0  ;;  %v3202_v17 = vadd.f32 %v2886_v19, %v2608_v31 }
 0x2a4   : > { %v1576_v4 = vadd.f32 1.0, %v1995_v21  ;;  %v1421_v59 = vmul.f32 0.7978846, %v1357_v36  ;;  %v1358_v46 = vadd.f32 %v1294_v27, %v3165_v45  ;;  %v1611_v58 = vmul.f32 %v1547_v1, %v1099_v10 }
 0x2a5   : > { %v1295_v30 = vmul.f32 %v1231_v25, %v3179_v49  ;;  %v1260_v33 = vmul.f32 %v1196_v42, %v3189_v52  ;;  %v3206_v29 = vadd.f32 %v2891_v47, %v2606_v28  ;;  %v1129_v15 = vmul.f32 0.5, %v3119_v43 }
 0x2a6   : > { %v1997_v24 = vpop.eup %1996  ;;  %v1640_v34 = vmul.f32 %v1576_v4, %v1128_v26  ;;  %2004 = vtanh.f32 %v1421_v59  ;;  %v1422_v2 = vmul.f32 0.7978846, %v1358_v46  ;;  %1675 = vst [vmem:[%s2717_s26 + $0xb8] sm:$0xff] %v1611_v58  ;;  %v1130_v19 = vmul.f32 0.5, %v3126_v3 }
 0x2a7   : > { %v1577_v5 = vadd.f32 1.0, %v1997_v24  ;;  %v1359_v13 = vadd.f32 %v1295_v30, %v3179_v49  ;;  %v1324_v6 = vmul.f32 %v1260_v33, %v3189_v52  ;;  %v1197_v14 = vmul.f32 0.044715, %v3202_v17 }
 0x2a8   : > { %1704 = vst [vmem:[%s2717_s26 + $0x1a0] sm:$0xff] %v1640_v34  ;;  %2006 = vtanh.f32 %v1422_v2  ;;  %v1198_v61 = vmul.f32 0.044715, %v3206_v29  ;;  %v1999_v55 = vpop.eup %1998  ;;  %v3219_v43 = vadd.f32 %v2896_v37, %v2608_v31  ;;  %v3225_v3 = vadd.f32 %v2900_v44, %v2606_v28 }
 0x2a9   : > { %v1641_v47 = vmul.f32 %v1577_v5, %v1129_v15  ;;  %v1423_v9 = vmul.f32 0.7978846, %v1359_v13  ;;  %v1388_v38 = vadd.f32 %v1324_v6, %v3189_v52  ;;  %v1578_v7 = vadd.f32 1.0, %v1999_v55 }
 0x2aa   : > { %v1261_v51 = vmul.f32 %v1197_v14, %v3202_v17  ;;  %v1262_v60 = vmul.f32 %v1198_v61, %v3206_v29  ;;  %v1131_v39 = vmul.f32 0.5, %v3140_v32  ;;  %v1199_v63 = vmul.f32 0.044715, %v3219_v43 }
 0x2ab   : > { %v2001_v11 = vpop.eup %2000  ;;  %1705 = vst [vmem:[%s2717_s26 + $0x1a8] sm:$0xff] %v1641_v47  ;;  %2008 = vtanh.f32 %v1423_v9  ;;  %v1452_v54 = vmul.f32 0.7978846, %v1388_v38  ;;  %v1642_v37 = vmul.f32 %v1578_v7, %v1130_v19  ;;  %v1100_v53 = vmul.f32 0.5, %v3149_v16 }
 0x2ac   : > { %v1579_v8 = vadd.f32 1.0, %v2001_v11  ;;  %v1325_v40 = vmul.f32 %v1261_v51, %v3202_v17  ;;  %v1326_v20 = vmul.f32 %v1262_v60, %v3206_v29  ;;  %v1263_v44 = vmul.f32 %v1199_v63, %v3219_v43 }
 0x2ad   : > { %2010 = vtanh.f32 %v1452_v54  ;;  %v1168_v50 = vmul.f32 0.044715, %v3225_v3  ;;  %v2003_v23 = vpop.eup %2002  ;;  %1706 = vst [vmem:[%s2717_s26 + $0x1b0] sm:$0xff] %v1642_v37  ;;  %v3240_v57 = vadd.f32 %v2910_v18, %v2608_v31  ;;  %v3246_v36 = vadd.f32 %v2922_v48, %v2606_v28 }
 0x2ae   : > { %v1643_v32 = vmul.f32 %v1579_v8, %v1131_v39  ;;  %v1389_v10 = vadd.f32 %v1325_v40, %v3202_v17  ;;  %v1390_v35 = vadd.f32 %v1326_v20, %v3206_v29  ;;  %v1548_v12 = vadd.f32 1.0, %v2003_v23  ;;  %v3342_v8 = vld [vmem:[#allocation2_spill] sm:$0xff] }
 0x2af   : > { %v1327_v0 = vmul.f32 %v1263_v44, %v3219_v43  ;;  %v1232_v16 = vmul.f32 %v1168_v50, %v3225_v3  ;;  %v1101_v21 = vmul.f32 0.5, %v3159_v56  ;;  %v3252_v18 = vadd.f32 %v2926_v62, %v2608_v31  ;;  %v3343_v44 = vld [vmem:[#allocation3_spill] sm:$0xff] }
 0x2b0   : > { %v2005_v27 = vpop.eup %2004  ;;  %1707 = vst [vmem:[%s2717_s26 + $0x1b8] sm:$0xff] %v1643_v32  ;;  %v1453_v1 = vmul.f32 0.7978846, %v1389_v10  ;;  %v1454_v26 = vmul.f32 0.7978846, %v1390_v35  ;;  %v1612_v25 = vmul.f32 %v1548_v12, %v1100_v53  ;;  %v1102_v46 = vmul.f32 0.5, %v3165_v45 }
 0x2b1   : > { %v1549_v42 = vadd.f32 1.0, %v2005_v27  ;;  %v1391_v4 = vadd.f32 %v1327_v0, %v3219_v43  ;;  %v1296_v59 = vmul.f32 %v1232_v16, %v3225_v3  ;;  %v1169_v58 = vmul.f32 0.044715, %v3240_v57 }
 0x2b2   : > { %v2007_v48 = vpop.eup %2006  ;;  %2012 = vtanh.f32 %v1453_v1  ;;  %v1170_v56 = vmul.f32 0.044715, %v3246_v36  ;;  %1676 = vst [vmem:[%s2717_s26 + $0xc0] sm:$0xff] %v1612_v25  ;;  %v1103_v24 = vmul.f32 0.5, %v3179_v49  ;;  %v1171_v13 = vmul.f32 0.044715, %v3252_v18 }
 0x2b3   : > { %v1613_v30 = vmul.f32 %v1549_v42, %v1101_v21  ;;  %v1550_v33 = vadd.f32 1.0, %v2007_v48  ;;  %2014 = vtanh.f32 %v1454_v26  ;;  %v1455_v62 = vmul.f32 0.7978846, %v1391_v4 }
 0x2b4   : > { %v1360_v34 = vadd.f32 %v1296_v59, %v3225_v3  ;;  %v1233_v2 = vmul.f32 %v1169_v58, %v3240_v57  ;;  %v1234_v15 = vmul.f32 %v1170_v56, %v3246_v36  ;;  %v3268_v6 = vadd.f32 %v2931_v22, %v2606_v28 }
 0x2b5   : > { %v2009_v45 = vpop.eup %2008  ;;  %1677 = vst [vmem:[%s2717_s26 + $0xc8] sm:$0xff] %v1613_v30  ;;  %v1614_v5 = vmul.f32 %v1550_v33, %v1102_v46  ;;  %2016 = vtanh.f32 %v1455_v62  ;;  %v1132_v47 = vmul.f32 0.5, %v3189_v52  ;;  %v1235_v9 = vmul.f32 %v1171_v13, %v3252_v18 }
 0x2b6   : > { %v1551_v19 = vadd.f32 1.0, %v2009_v45  ;;  %v1424_v14 = vmul.f32 0.7978846, %v1360_v34  ;;  %v1297_v49 = vmul.f32 %v1233_v2, %v3240_v57  ;;  %v1298_v61 = vmul.f32 %v1234_v15, %v3246_v36 }
 0x2b7   : > { %v2011_v55 = vpop.eup %2010  ;;  %1678 = vst [vmem:[%s2717_s26 + $0xd0] sm:$0xff] %v1614_v5  ;;  %v1200_v38 = vmul.f32 0.044715, %v3268_v6  ;;  %v3278_v7 = vadd.f32 %v2936_v41, %v2608_v31  ;;  %v1133_v11 = vmul.f32 0.5, %v3202_v17  ;;  %v1299_v52 = vmul.f32 %v1235_v9, %v3252_v18 }
 0x2b8   : > { %v1615_v22 = vmul.f32 %v1551_v19, %v1103_v24  ;;  %v1580_v51 = vadd.f32 1.0, %v2011_v55  ;;  %2018 = vtanh.f32 %v1424_v14  ;;  %v1361_v60 = vadd.f32 %v1297_v49, %v3240_v57 }
 0x2b9   : > { %v1362_v39 = vadd.f32 %v1298_v61, %v3246_v36  ;;  %v1264_v54 = vmul.f32 %v1200_v38, %v3268_v6  ;;  %v1201_v41 = vmul.f32 0.044715, %v3278_v7  ;;  %v3289_v40 = vadd.f32 %v3342_v8, %v2606_v28 }
 0x2ba   : > { %1679 = vst [vmem:[%s2717_s26 + $0xd8] sm:$0xff] %v1615_v22  ;;  %v1644_v63 = vmul.f32 %v1580_v51, %v1132_v47  ;;  %v1425_v37 = vmul.f32 0.7978846, %v1361_v60  ;;  %v1363_v53 = vadd.f32 %v1299_v52, %v3252_v18  ;;  %v3295_v50 = vadd.f32 %v3343_v44, %v2608_v31 }
 0x2bb   : > { %v1426_v20 = vmul.f32 0.7978846, %v1362_v39  ;;  %v1328_v17 = vmul.f32 %v1264_v54, %v3268_v6  ;;  %v1134_v32 = vmul.f32 0.5, %v3206_v29  ;;  %v1265_v10 = vmul.f32 %v1201_v41, %v3278_v7 }
 0x2bc   : > { %v2013_v23 = vpop.eup %2012  ;;  %1708 = vst [vmem:[%s2717_s26 + $0x1c0] sm:$0xff] %v1644_v63  ;;  %2020 = vtanh.f32 %v1425_v37  ;;  %v1202_v35 = vmul.f32 0.044715, %v3289_v40  ;;  %v1427_v0 = vmul.f32 0.7978846, %v1363_v53  ;;  %v1135_v31 = vmul.f32 0.5, %v3219_v43 }
 0x2bd   : > { %v2015_v28 = vpop.eup %2014  ;;  %v1581_v12 = vadd.f32 1.0, %v2013_v23  ;;  %2022 = vtanh.f32 %v1426_v20  ;;  %v1392_v16 = vadd.f32 %v1328_v17, %v3268_v6  ;;  %v1329_v21 = vmul.f32 %v1265_v10, %v3278_v7 }
 0x2be   : > { %v1582_v27 = vadd.f32 1.0, %v2015_v28  ;;  %v1266_v29 = vmul.f32 %v1202_v35, %v3289_v40  ;;  %2024 = vtanh.f32 %v1427_v0  ;;  %v1203_v42 = vmul.f32 0.044715, %v3295_v50 }
 0x2bf   : > { %v2017_v1 = vpop.eup %2016  ;;  %v1645_v26 = vmul.f32 %v1581_v12, %v1133_v11  ;;  %v1456_v25 = vmul.f32 0.7978846, %v1392_v16  ;;  %v1393_v48 = vadd.f32 %v1329_v21, %v3278_v7  ;;  %v1104_v62 = vmul.f32 0.5, %v3225_v3 }
 0x2c0   : > { %v1646_v4 = vmul.f32 %v1582_v27, %v1134_v32  ;;  %v1583_v59 = vadd.f32 1.0, %v2017_v1  ;;  %v1330_v46 = vmul.f32 %v1266_v29, %v3289_v40  ;;  %v1267_v43 = vmul.f32 %v1203_v42, %v3295_v50 }
 0x2c1   : > { %1709 = vst [vmem:[%s2717_s26 + $0x1c8] sm:$0xff] %v1645_v26  ;;  %2026 = vtanh.f32 %v1456_v25  ;;  %v1457_v30 = vmul.f32 0.7978846, %v1393_v48  ;;  %v1105_v19 = vmul.f32 0.5, %v3240_v57  ;;  %v1106_v3 = vmul.f32 0.5, %v3246_v36 }
 0x2c2   : > { %v2019_v58 = vpop.eup %2018  ;;  %1710 = vst [vmem:[%s2717_s26 + $0x1d0] sm:$0xff] %v1646_v4  ;;  %v1647_v56 = vmul.f32 %v1583_v59, %v1135_v31  ;;  %v1394_v33 = vadd.f32 %v1330_v46, %v3289_v40  ;;  %v1331_v34 = vmul.f32 %v1267_v43, %v3295_v50  ;;  %v1107_v38 = vmul.f32 0.5, %v3252_v18 }
 0x2c3   : > { %v1552_v24 = vadd.f32 1.0, %v2019_v58  ;;  %2028 = vtanh.f32 %v1457_v30  ;;  %v1136_v57 = vmul.f32 0.5, %v3268_v6  ;;  %v1137_v52 = vmul.f32 0.5, %v3278_v7 }
 0x2c4   : > { %1711 = vst [vmem:[%s2717_s26 + $0x1d8] sm:$0xff] %v1647_v56  ;;  %v1458_v2 = vmul.f32 0.7978846, %v1394_v33  ;;  %v1395_v45 = vadd.f32 %v1331_v34, %v3295_v50  ;;  %v1138_v37 = vmul.f32 0.5, %v3289_v40  ;;  %v1139_v6 = vmul.f32 0.5, %v3295_v50 }
 0x2c5   : > { %v1616_v15 = vmul.f32 %v1552_v24, %v1104_v62 }
 0x2c6   : > { %v2021_v5 = vpop.eup %2020  ;;  %2030 = vtanh.f32 %v1458_v2  ;;  %v1459_v49 = vmul.f32 0.7978846, %v1395_v45 }
 0x2c7   : > { %v2023_v13 = vpop.eup %2022  ;;  %1680 = vst [vmem:[%s2717_s26 + $0xe0] sm:$0xff] %v1616_v15  ;;  %v1553_v14 = vadd.f32 1.0, %v2021_v5 }
 0x2c8   : > { %v1554_v61 = vadd.f32 1.0, %v2023_v13  ;;  %v2025_v55 = vpop.eup %2024  ;;  %2032 = vtanh.f32 %v1459_v49 }
 0x2c9   : > { %v1617_v47 = vmul.f32 %v1553_v14, %v1105_v19  ;;  %v1555_v22 = vadd.f32 1.0, %v2025_v55 }
 0x2ca   : > { %v1618_v9 = vmul.f32 %v1554_v61, %v1106_v3 }
 0x2cb   : > { %v2027_v51 = vpop.eup %2026  ;;  %1681 = vst [vmem:[%s2717_s26 + $0xe8] sm:$0xff] %v1617_v47  ;;  %v1619_v60 = vmul.f32 %v1555_v22, %v1107_v38 }
 0x2cc   : > { %1682 = vst [vmem:[%s2717_s26 + $0xf0] sm:$0xff] %v1618_v9  ;;  %v1584_v11 = vadd.f32 1.0, %v2027_v51 }
 0x2cd   : > { %v2029_v39 = vpop.eup %2028  ;;  %1683 = vst [vmem:[%s2717_s26 + $0xf8] sm:$0xff] %v1619_v60 }
 0x2ce   : > { %v1648_v36 = vmul.f32 %v1584_v11, %v1136_v57  ;;  %v1585_v54 = vadd.f32 1.0, %v2029_v39 }
 0x2d0   : > { %v2031_v63 = vpop.eup %2030  ;;  %1712 = vst [vmem:[%s2717_s26 + $0x1e0] sm:$0xff] %v1648_v36  ;;  %v1649_v18 = vmul.f32 %v1585_v54, %v1137_v52 }
 0x2d1   : > { %v1586_v41 = vadd.f32 1.0, %v2031_v63 }
 0x2d2   : > { %v2033_v8 = vpop.eup %2032  ;;  %1713 = vst [vmem:[%s2717_s26 + $0x1e8] sm:$0xff] %v1649_v18 }
 0x2d3   : > { %v1650_v20 = vmul.f32 %v1586_v41, %v1138_v37  ;;  %v1587_v53 = vadd.f32 1.0, %v2033_v8 }
 0x2d5   : > { %1714 = vst [vmem:[%s2717_s26 + $0x1f0] sm:$0xff] %v1650_v20  ;;  %v1651_v17 = vmul.f32 %v1587_v53, %v1139_v6 }
 0x2d7   : > { %1715 = vst [vmem:[%s2717_s26 + $0x1f8] sm:$0xff] %v1651_v17 }
 0x2d8 PF: > { %s15_s18 = sadd.s32 1, %s2040_s18  }
 0x2d9   : > { %p12_p4 = scmp.ge.s32.totalorder %s15_s18, 4  }
 0x2db   :  { %14 = sbr.rel (!%p12_p4) target bundleno = 1 (0x1), region = 70 }

// kernel: forward.33
= control target key start
LH: loop header
LB: loop body
LE: loop exit
PB: predicated region body
PF: predicated region fallthrough
CT: control target
= control target key end

     0   :  { %s903_s12 = smov 0   ;;  %s1453_s0 = inlined_call_operand.vmem [shape: f32[512,64], index: 0, kind: input, shape index: {}]   ;;  %s1454_s1 = inlined_call_operand.vmem [shape: f32[1,64], index: 1, kind: input, shape index: {}]   ;;  %s1455_s2 = inlined_call_operand.vmem [shape: f32[1,64], index: 2, kind: input, shape index: {}]   ;;  %s1456_s3 = inlined_call_operand.vmem [shape: f32[512,64], index: 3, kind: output, shape index: {}]  }
   0x1 LB: > { %s790_s13 = sadd.s32 4294967295, %s881_s12   ;;  %p794_p0 = scmp.ge.s32.totalorder %s881_s12, 1  ;;  %s881_s12 = sphi %s903_s12, %s13_s12  }
   0x2   : > { %p138_p1 = scmp.lt.s32.totalorder %s881_s12, 3 }
   0x4   : > { %p139_p2 = pnand %p794_p0, %p138_p1 }
   0x5   : > { %s795_s14 = sshll.u32 (!%p139_p2), %s790_s13, 5  ;;  %vm206_vm0 = vcmask (!%p139_p2), 523264  }
   0x6   : > { %142 = sbr.rel (%p139_p2) target bundleno = 395 (0x18b), region = 32  ;;  %p163_p3 = scmp.lt.s32.totalorder (!%p139_p2), %s795_s14, 63 }
   0xd   : > { %s1458_s14 = smov (!%p163_p3, %s795_s14), 63 }
   0xe   : > { %s796_s15 = sshll.u32 %s1458_s14, 3 }
   0xf   : > { %s919_s18 = scalar_lea.vmem %s1453_s0, %s796_s15  ;;  %s1290_s25 = scalar_lea.vmem %s1456_s3, %s796_s15 }
  0x10   : > { %v922_v0 = vld [vmem:[%s919_s18] sm:$0xff]  ;;  %v925_v1 = vld [vmem:[%s919_s18 + $0x10] sm:$0xff]  ;;  %v928_v2 = vld [vmem:[%s919_s18 + $0x8] sm:$0xff] }
  0x11   : > { %v207_v3 = vsel %vm206_vm0, %v922_v0, 0.0  ;;  %v213_v4 = vsel %vm206_vm0, %v925_v1, 0.0  ;;  %v935_v5 = vld [vmem:[%s919_s18 + $0x18] sm:$0xff]  ;;  %v210_v6 = vsel %vm206_vm0, %v928_v2, 0.0  ;;  %v942_v8 = vld [vmem:[%s919_s18 + $0x20] sm:$0xff]  ;;  %v945_v9 = vld [vmem:[%s919_s18 + $0x28] sm:$0xff] }
  0x12   : > { %208 = vadd.xlane.f32.xlu0 %v207_v3  ;;  %214 = vadd.xlane.f32.xlu1 %v213_v4  ;;  %v216_v7 = vsel %vm206_vm0, %v935_v5, 0.0  ;;  %v219_v10 = vsel %vm206_vm0, %v942_v8, 0.0  ;;  %v222_v11 = vsel %vm206_vm0, %v945_v9, 0.0  ;;  %v952_v12 = vld [vmem:[%s919_s18 + $0x30] sm:$0xff]  ;;  %v955_v13 = vld [vmem:[%s919_s18 + $0x38] sm:$0xff]  ;;  %v962_v16 = vld [vmem:[%s919_s18 + $0x40] sm:$0xff] }
  0x13   : > { %v225_v14 = vsel %vm206_vm0, %v952_v12, 0.0  ;;  %v228_v15 = vsel %vm206_vm0, %v955_v13, 0.0  ;;  %v965_v17 = vld [vmem:[%s919_s18 + $0x48] sm:$0xff]  ;;  %v231_v18 = vsel %vm206_vm0, %v962_v16, 0.0  ;;  %v972_v20 = vld [vmem:[%s919_s18 + $0x50] sm:$0xff]  ;;  %v975_v21 = vld [vmem:[%s919_s18 + $0x58] sm:$0xff] }
  0x14   : > { %v234_v19 = vsel %vm206_vm0, %v965_v17, 0.0  ;;  %v237_v22 = vsel %vm206_vm0, %v972_v20, 0.0  ;;  %v240_v23 = vsel %vm206_vm0, %v975_v21, 0.0  ;;  %v982_v24 = vld [vmem:[%s919_s18 + $0x60] sm:$0xff]  ;;  %v985_v25 = vld [vmem:[%s919_s18 + $0x68] sm:$0xff]  ;;  %v992_v28 = vld [vmem:[%s919_s18 + $0x70] sm:$0xff] }
  0x15   : > { %v243_v26 = vsel %vm206_vm0, %v982_v24, 0.0  ;;  %v246_v27 = vsel %vm206_vm0, %v985_v25, 0.0  ;;  %v995_v29 = vld [vmem:[%s919_s18 + $0x78] sm:$0xff]  ;;  %v249_v30 = vsel %vm206_vm0, %v992_v28, 0.0  ;;  %v1002_v32 = vld [vmem:[%s919_s18 + $0x80] sm:$0xff]  ;;  %v1005_v33 = vld [vmem:[%s919_s18 + $0x88] sm:$0xff] }
  0x16   : > { %211 = vadd.xlane.f32.xlu0 %v210_v6  ;;  %217 = vadd.xlane.f32.xlu1 %v216_v7  ;;  %v252_v31 = vsel %vm206_vm0, %v995_v29, 0.0  ;;  %v255_v34 = vsel %vm206_vm0, %v1002_v32, 0.0  ;;  %v258_v35 = vsel %vm206_vm0, %v1005_v33, 0.0  ;;  %v1012_v36 = vld [vmem:[%s919_s18 + $0x90] sm:$0xff]  ;;  %v1015_v37 = vld [vmem:[%s919_s18 + $0x98] sm:$0xff]  ;;  %v1022_v40 = vld [vmem:[%s919_s18 + $0xa0] sm:$0xff] }
  0x17   : > { %v261_v38 = vsel %vm206_vm0, %v1012_v36, 0.0  ;;  %v264_v39 = vsel %vm206_vm0, %v1015_v37, 0.0  ;;  %v1025_v41 = vld [vmem:[%s919_s18 + $0xa8] sm:$0xff]  ;;  %v267_v42 = vsel %vm206_vm0, %v1022_v40, 0.0  ;;  %v1032_v44 = vld [vmem:[%s919_s18 + $0xb0] sm:$0xff]  ;;  %v1035_v45 = vld [vmem:[%s919_s18 + $0xb8] sm:$0xff] }
  0x18   : > { %v270_v43 = vsel %vm206_vm0, %v1025_v41, 0.0  ;;  %v273_v46 = vsel %vm206_vm0, %v1032_v44, 0.0  ;;  %v276_v47 = vsel %vm206_vm0, %v1035_v45, 0.0  ;;  %v1042_v48 = vld [vmem:[%s919_s18 + $0xc0] sm:$0xff]  ;;  %v1045_v49 = vld [vmem:[%s919_s18 + $0xc8] sm:$0xff]  ;;  %v1052_v52 = vld [vmem:[%s919_s18 + $0xd0] sm:$0xff] }
  0x19   : > { %v279_v50 = vsel %vm206_vm0, %v1042_v48, 0.0  ;;  %v282_v51 = vsel %vm206_vm0, %v1045_v49, 0.0  ;;  %v1055_v53 = vld [vmem:[%s919_s18 + $0xd8] sm:$0xff]  ;;  %v285_v54 = vsel %vm206_vm0, %v1052_v52, 0.0  ;;  %v1062_v56 = vld [vmem:[%s919_s18 + $0xe0] sm:$0xff]  ;;  %v1065_v57 = vld [vmem:[%s919_s18 + $0xe8] sm:$0xff] }
  0x1a   : > { %220 = vadd.xlane.f32.xlu0 %v219_v10  ;;  %223 = vadd.xlane.f32.xlu1 %v222_v11  ;;  %v288_v55 = vsel %vm206_vm0, %v1055_v53, 0.0  ;;  %v291_v58 = vsel %vm206_vm0, %v1062_v56, 0.0  ;;  %v294_v59 = vsel %vm206_vm0, %v1065_v57, 0.0  ;;  %v1072_v60 = vld [vmem:[%s919_s18 + $0xf0] sm:$0xff]  ;;  %v1075_v61 = vld [vmem:[%s919_s18 + $0xf8] sm:$0xff] }
  0x1b   : > { %v297_v62 = vsel %vm206_vm0, %v1072_v60, 0.0  ;;  %v300_v63 = vsel %vm206_vm0, %v1075_v61, 0.0 }
  0x1e   : > { %226 = vadd.xlane.f32.xlu0 %v225_v14  ;;  %229 = vadd.xlane.f32.xlu1 %v228_v15 }
  0x22   : > { %232 = vadd.xlane.f32.xlu0 %v231_v18  ;;  %235 = vadd.xlane.f32.xlu1 %v234_v19 }
  0x26   : > { %238 = vadd.xlane.f32.xlu0 %v237_v22  ;;  %241 = vadd.xlane.f32.xlu1 %v240_v23 }
  0x2a   : > { %244 = vadd.xlane.f32.xlu0 %v243_v26  ;;  %247 = vadd.xlane.f32.xlu1 %v246_v27 }
  0x2e   : > { %250 = vadd.xlane.f32.xlu0 %v249_v30  ;;  %253 = vadd.xlane.f32.xlu1 %v252_v31 }
  0x32   : > { %256 = vadd.xlane.f32.xlu0 %v255_v34  ;;  %259 = vadd.xlane.f32.xlu1 %v258_v35 }
  0x36   : > { %262 = vadd.xlane.f32.xlu0 %v261_v38  ;;  %265 = vadd.xlane.f32.xlu1 %v264_v39 }
  0x3a   : > { %268 = vadd.xlane.f32.xlu0 %v267_v42  ;;  %271 = vadd.xlane.f32.xlu1 %v270_v43 }
  0x3e   : > { %274 = vadd.xlane.f32.xlu0 %v273_v46  ;;  %277 = vadd.xlane.f32.xlu1 %v276_v47 }
  0x42   : > { %280 = vadd.xlane.f32.xlu0 %v279_v50  ;;  %283 = vadd.xlane.f32.xlu1 %v282_v51 }
  0x46   : > { %286 = vadd.xlane.f32.xlu0 %v285_v54  ;;  %289 = vadd.xlane.f32.xlu1 %v288_v55 }
  0x4a   : > { %292 = vadd.xlane.f32.xlu0 %v291_v58  ;;  %295 = vadd.xlane.f32.xlu1 %v294_v59 }
  0x4e   : > { %298 = vadd.xlane.f32.xlu0 %v297_v62  ;;  %301 = vadd.xlane.f32.xlu1 %v300_v63 }
  0x9f   : > { %v209_v3 = vpop.xlane.xlu0 %208  ;;  %v215_v4 = vpop.xlane.xlu1 %214 }
  0xa0   : > { %v304_v6 = vmul.f32 0.015625, %v209_v3  ;;  %v306_v7 = vmul.f32 0.015625, %v215_v4 }
  0xa2   : > { %v1082_v10 = vsub.f32 %v922_v0, %v304_v6  ;;  %v1085_v11 = vsub.f32 %v925_v1, %v306_v7 }
  0xa3   : > { %v212_v14 = vpop.xlane.xlu0 %211  ;;  %v218_v15 = vpop.xlane.xlu1 %217 }
  0xa4   : > { %v305_v18 = vmul.f32 0.015625, %v212_v14  ;;  %v307_v19 = vmul.f32 0.015625, %v218_v15  ;;  %v368_v22 = vmul.f32 %v1082_v10, %v1082_v10  ;;  %v370_v23 = vmul.f32 %v1085_v11, %v1085_v11 }
  0xa6   : > { %v1092_v26 = vsub.f32 %v928_v2, %v305_v18  ;;  %v1095_v27 = vsub.f32 %v935_v5, %v307_v19  ;;  %v400_v0 = vsel %vm206_vm0, %v368_v22, 0.0  ;;  %v406_v31 = vsel %vm206_vm0, %v370_v23, 0.0 }
  0xa7   : > { %401 = vadd.xlane.f32.xlu0 %v400_v0  ;;  %v221_v1 = vpop.xlane.xlu0 %220  ;;  %v224_v30 = vpop.xlane.xlu1 %223 }
  0xa8   : > { %v308_v34 = vmul.f32 0.015625, %v221_v1  ;;  %v309_v35 = vmul.f32 0.015625, %v224_v30  ;;  %v369_v38 = vmul.f32 %v1092_v26, %v1092_v26  ;;  %v371_v39 = vmul.f32 %v1095_v27, %v1095_v27 }
  0xaa   : > { %v1104_v2 = vsub.f32 %v942_v8, %v308_v34  ;;  %v1107_v5 = vsub.f32 %v945_v9, %v309_v35  ;;  %v403_v42 = vsel %vm206_vm0, %v369_v38, 0.0  ;;  %v409_v47 = vsel %vm206_vm0, %v371_v39, 0.0 }
  0xab   : > { %407 = vadd.xlane.f32.xlu0 %v406_v31  ;;  %404 = vadd.xlane.f32.xlu1 %v403_v42  ;;  %v227_v43 = vpop.xlane.xlu0 %226  ;;  %v230_v46 = vpop.xlane.xlu1 %229 }
  0xac   : > { %v310_v50 = vmul.f32 0.015625, %v227_v43  ;;  %v311_v51 = vmul.f32 0.015625, %v230_v46  ;;  %v372_v54 = vmul.f32 %v1104_v2, %v1104_v2  ;;  %v373_v8 = vmul.f32 %v1107_v5, %v1107_v5 }
  0xae   : > { %v1116_v55 = vsub.f32 %v952_v12, %v310_v50  ;;  %v1119_v9 = vsub.f32 %v955_v13, %v311_v51  ;;  %v412_v58 = vsel %vm206_vm0, %v372_v54, 0.0  ;;  %v415_v63 = vsel %vm206_vm0, %v373_v8, 0.0 }
  0xaf   : > { %410 = vadd.xlane.f32.xlu1 %v409_v47  ;;  %413 = vadd.xlane.f32.xlu0 %v412_v58  ;;  %v233_v59 = vpop.xlane.xlu0 %232  ;;  %v236_v62 = vpop.xlane.xlu1 %235 }
  0xb0   : > { %v312_v3 = vmul.f32 0.015625, %v233_v59  ;;  %v313_v4 = vmul.f32 0.015625, %v236_v62  ;;  %v374_v6 = vmul.f32 %v1116_v55, %v1116_v55  ;;  %v375_v12 = vmul.f32 %v1119_v9, %v1119_v9 }
  0xb2   : > { %v1128_v7 = vsub.f32 %v962_v16, %v312_v3  ;;  %v1131_v13 = vsub.f32 %v965_v17, %v313_v4  ;;  %v418_v14 = vsel %vm206_vm0, %v374_v6, 0.0  ;;  %v421_v19 = vsel %vm206_vm0, %v375_v12, 0.0 }
  0xb3   : > { %416 = vadd.xlane.f32.xlu1 %v415_v63  ;;  %419 = vadd.xlane.f32.xlu0 %v418_v14  ;;  %v239_v15 = vpop.xlane.xlu0 %238  ;;  %v242_v18 = vpop.xlane.xlu1 %241 }
  0xb4   : > { %v314_v22 = vmul.f32 0.015625, %v239_v15  ;;  %v315_v23 = vmul.f32 0.015625, %v242_v18  ;;  %v376_v0 = vmul.f32 %v1128_v7, %v1128_v7  ;;  %v377_v16 = vmul.f32 %v1131_v13, %v1131_v13 }
  0xb6   : > { %v1140_v1 = vsub.f32 %v972_v20, %v314_v22  ;;  %v1143_v17 = vsub.f32 %v975_v21, %v315_v23  ;;  %v424_v30 = vsel %vm206_vm0, %v376_v0, 0.0  ;;  %v427_v35 = vsel %vm206_vm0, %v377_v16, 0.0 }
  0xb7   : > { %422 = vadd.xlane.f32.xlu1 %v421_v19  ;;  %425 = vadd.xlane.f32.xlu0 %v424_v30  ;;  %v245_v31 = vpop.xlane.xlu0 %244  ;;  %v248_v34 = vpop.xlane.xlu1 %247 }
  0xb8   : > { %v316_v38 = vmul.f32 0.015625, %v245_v31  ;;  %v317_v39 = vmul.f32 0.015625, %v248_v34  ;;  %v378_v42 = vmul.f32 %v1140_v1, %v1140_v1  ;;  %v379_v20 = vmul.f32 %v1143_v17, %v1143_v17 }
  0xba   : > { %v1152_v43 = vsub.f32 %v982_v24, %v316_v38  ;;  %v1155_v21 = vsub.f32 %v985_v25, %v317_v39  ;;  %v430_v46 = vsel %vm206_vm0, %v378_v42, 0.0  ;;  %v433_v51 = vsel %vm206_vm0, %v379_v20, 0.0 }
  0xbb   : > { %428 = vadd.xlane.f32.xlu1 %v427_v35  ;;  %431 = vadd.xlane.f32.xlu0 %v430_v46  ;;  %v251_v47 = vpop.xlane.xlu0 %250  ;;  %v254_v50 = vpop.xlane.xlu1 %253 }
  0xbc   : > { %v318_v54 = vmul.f32 0.015625, %v251_v47  ;;  %v319_v8 = vmul.f32 0.015625, %v254_v50  ;;  %v380_v58 = vmul.f32 %v1152_v43, %v1152_v43  ;;  %v381_v24 = vmul.f32 %v1155_v21, %v1155_v21 }
  0xbe   : > { %v1164_v59 = vsub.f32 %v992_v28, %v318_v54  ;;  %v1167_v25 = vsub.f32 %v995_v29, %v319_v8  ;;  %v436_v62 = vsel %vm206_vm0, %v380_v58, 0.0  ;;  %v439_v4 = vsel %vm206_vm0, %v381_v24, 0.0 }
  0xbf   : > { %434 = vadd.xlane.f32.xlu1 %v433_v51  ;;  %437 = vadd.xlane.f32.xlu0 %v436_v62  ;;  %v257_v63 = vpop.xlane.xlu0 %256  ;;  %v260_v3 = vpop.xlane.xlu1 %259 }
  0xc0   : > { %v320_v6 = vmul.f32 0.015625, %v257_v63  ;;  %v321_v12 = vmul.f32 0.015625, %v260_v3  ;;  %v382_v14 = vmul.f32 %v1164_v59, %v1164_v59  ;;  %v383_v28 = vmul.f32 %v1167_v25, %v1167_v25 }
  0xc2   : > { %v1176_v15 = vsub.f32 %v1002_v32, %v320_v6  ;;  %v1179_v29 = vsub.f32 %v1005_v33, %v321_v12  ;;  %v442_v18 = vsel %vm206_vm0, %v382_v14, 0.0  ;;  %v445_v23 = vsel %vm206_vm0, %v383_v28, 0.0 }
  0xc3   : > { %440 = vadd.xlane.f32.xlu1 %v439_v4  ;;  %443 = vadd.xlane.f32.xlu0 %v442_v18  ;;  %v263_v19 = vpop.xlane.xlu0 %262  ;;  %v266_v22 = vpop.xlane.xlu1 %265 }
  0xc4   : > { %v322_v0 = vmul.f32 0.015625, %v263_v19  ;;  %v323_v16 = vmul.f32 0.015625, %v266_v22  ;;  %v384_v30 = vmul.f32 %v1176_v15, %v1176_v15  ;;  %v385_v32 = vmul.f32 %v1179_v29, %v1179_v29 }
  0xc6   : > { %v1188_v31 = vsub.f32 %v1012_v36, %v322_v0  ;;  %v1191_v33 = vsub.f32 %v1015_v37, %v323_v16  ;;  %v448_v34 = vsel %vm206_vm0, %v384_v30, 0.0  ;;  %v451_v39 = vsel %vm206_vm0, %v385_v32, 0.0 }
  0xc7   : > { %446 = vadd.xlane.f32.xlu1 %v445_v23  ;;  %449 = vadd.xlane.f32.xlu0 %v448_v34  ;;  %v269_v35 = vpop.xlane.xlu0 %268  ;;  %v272_v38 = vpop.xlane.xlu1 %271 }
  0xc8   : > { %v324_v42 = vmul.f32 0.015625, %v269_v35  ;;  %v325_v20 = vmul.f32 0.015625, %v272_v38  ;;  %v386_v46 = vmul.f32 %v1188_v31, %v1188_v31  ;;  %v387_v36 = vmul.f32 %v1191_v33, %v1191_v33 }
  0xca   : > { %v1200_v47 = vsub.f32 %v1022_v40, %v324_v42  ;;  %v1203_v37 = vsub.f32 %v1025_v41, %v325_v20  ;;  %v454_v50 = vsel %vm206_vm0, %v386_v46, 0.0  ;;  %v457_v8 = vsel %vm206_vm0, %v387_v36, 0.0 }
  0xcb   : > { %452 = vadd.xlane.f32.xlu1 %v451_v39  ;;  %455 = vadd.xlane.f32.xlu0 %v454_v50  ;;  %v275_v51 = vpop.xlane.xlu0 %274  ;;  %v278_v54 = vpop.xlane.xlu1 %277 }
  0xcc   : > { %v326_v58 = vmul.f32 0.015625, %v275_v51  ;;  %v327_v24 = vmul.f32 0.015625, %v278_v54  ;;  %v388_v62 = vmul.f32 %v1200_v47, %v1200_v47  ;;  %v389_v40 = vmul.f32 %v1203_v37, %v1203_v37 }
  0xce   : > { %v1212_v63 = vsub.f32 %v1032_v44, %v326_v58  ;;  %v1215_v41 = vsub.f32 %v1035_v45, %v327_v24  ;;  %v460_v3 = vsel %vm206_vm0, %v388_v62, 0.0  ;;  %v463_v12 = vsel %vm206_vm0, %v389_v40, 0.0 }
  0xcf   : > { %458 = vadd.xlane.f32.xlu1 %v457_v8  ;;  %461 = vadd.xlane.f32.xlu0 %v460_v3  ;;  %v281_v4 = vpop.xlane.xlu0 %280  ;;  %v284_v6 = vpop.xlane.xlu1 %283 }
  0xd0   : > { %v328_v14 = vmul.f32 0.015625, %v281_v4  ;;  %v329_v28 = vmul.f32 0.015625, %v284_v6  ;;  %v390_v18 = vmul.f32 %v1212_v63, %v1212_v63  ;;  %v391_v44 = vmul.f32 %v1215_v41, %v1215_v41 }
  0xd2   : > { %v1224_v19 = vsub.f32 %v1042_v48, %v328_v14  ;;  %v1227_v45 = vsub.f32 %v1045_v49, %v329_v28  ;;  %v466_v22 = vsel %vm206_vm0, %v390_v18, 0.0  ;;  %v469_v16 = vsel %vm206_vm0, %v391_v44, 0.0 }
  0xd3   : > { %464 = vadd.xlane.f32.xlu1 %v463_v12  ;;  %467 = vadd.xlane.f32.xlu0 %v466_v22  ;;  %v287_v23 = vpop.xlane.xlu0 %286  ;;  %v290_v0 = vpop.xlane.xlu1 %289 }
  0xd4   : > { %v330_v30 = vmul.f32 0.015625, %v287_v23  ;;  %v331_v32 = vmul.f32 0.015625, %v290_v0  ;;  %v392_v34 = vmul.f32 %v1224_v19, %v1224_v19  ;;  %v393_v48 = vmul.f32 %v1227_v45, %v1227_v45 }
  0xd6   : > { %v1236_v35 = vsub.f32 %v1052_v52, %v330_v30  ;;  %v1239_v49 = vsub.f32 %v1055_v53, %v331_v32  ;;  %v472_v38 = vsel %vm206_vm0, %v392_v34, 0.0  ;;  %v475_v20 = vsel %vm206_vm0, %v393_v48, 0.0 }
  0xd7   : > { %470 = vadd.xlane.f32.xlu1 %v469_v16  ;;  %473 = vadd.xlane.f32.xlu0 %v472_v38  ;;  %v293_v39 = vpop.xlane.xlu0 %292  ;;  %v296_v42 = vpop.xlane.xlu1 %295 }
  0xd8   : > { %v332_v46 = vmul.f32 0.015625, %v293_v39  ;;  %v333_v36 = vmul.f32 0.015625, %v296_v42  ;;  %v394_v50 = vmul.f32 %v1236_v35, %v1236_v35  ;;  %v395_v52 = vmul.f32 %v1239_v49, %v1239_v49 }
  0xda   : > { %v1248_v51 = vsub.f32 %v1062_v56, %v332_v46  ;;  %v1251_v53 = vsub.f32 %v1065_v57, %v333_v36  ;;  %v478_v54 = vsel %vm206_vm0, %v394_v50, 0.0  ;;  %v481_v24 = vsel %vm206_vm0, %v395_v52, 0.0 }
  0xdb   : > { %476 = vadd.xlane.f32.xlu1 %v475_v20  ;;  %479 = vadd.xlane.f32.xlu0 %v478_v54  ;;  %v299_v8 = vpop.xlane.xlu0 %298  ;;  %v302_v58 = vpop.xlane.xlu1 %301 }
  0xdc   : > { %v334_v62 = vmul.f32 0.015625, %v299_v8  ;;  %v335_v40 = vmul.f32 0.015625, %v302_v58  ;;  %v396_v3 = vmul.f32 %v1248_v51, %v1248_v51  ;;  %v397_v56 = vmul.f32 %v1251_v53, %v1251_v53  ;;  %v1276_v58 = vld [vmem:[%s1454_s1] ss:$0 sm:$0xff] }
  0xde   : > { %v1260_v4 = vsub.f32 %v1072_v60, %v334_v62  ;;  %v1263_v57 = vsub.f32 %v1075_v61, %v335_v40  ;;  %v484_v6 = vsel %vm206_vm0, %v396_v3, 0.0  ;;  %v487_v12 = vsel %vm206_vm0, %v397_v56, 0.0 }
  0xdf   : > { %482 = vadd.xlane.f32.xlu1 %v481_v24  ;;  %485 = vadd.xlane.f32.xlu0 %v484_v6  ;;  %v1282_v6 = vld [vmem:[%s1455_s2] ss:$0 sm:$0xff] }
  0xe0   : > { %v398_v14 = vmul.f32 %v1260_v4, %v1260_v4  ;;  %v399_v28 = vmul.f32 %v1263_v57, %v1263_v57 }
  0xe2   : > { %v490_v18 = vsel %vm206_vm0, %v398_v14, 0.0  ;;  %v493_v60 = vsel %vm206_vm0, %v399_v28, 0.0 }
  0xe3   : > { %488 = vadd.xlane.f32.xlu1 %v487_v12  ;;  %491 = vadd.xlane.f32.xlu0 %v490_v18 }
  0xe7   : > { %494 = vadd.xlane.f32.xlu1 %v493_v60 }
 0x134   : > { %v402_v61 = vpop.xlane.xlu0 %401 }
 0x135   : > { %v496_v44 = vmul.f32 0.015625, %v402_v61 }
 0x137   : > { %v528_v22 = vadd.f32 1e-06, %v496_v44 }
 0x138   : > { %v405_v23 = vpop.xlane.xlu1 %404  ;;  %v408_v0 = vpop.xlane.xlu0 %407 }
 0x139   : > { %811 = vrsqrt.f32 %v528_v22  ;;  %v497_v16 = vmul.f32 0.015625, %v405_v23  ;;  %v498_v30 = vmul.f32 0.015625, %v408_v0 }
 0x13b   : > { %v529_v32 = vadd.f32 1e-06, %v497_v16  ;;  %v530_v34 = vadd.f32 1e-06, %v498_v30 }
 0x13c   : > { %v411_v48 = vpop.xlane.xlu1 %410  ;;  %v414_v38 = vpop.xlane.xlu0 %413 }
 0x13d   : > { %813 = vrsqrt.f32 %v529_v32  ;;  %v499_v39 = vmul.f32 0.015625, %v411_v48  ;;  %v500_v42 = vmul.f32 0.015625, %v414_v38 }
 0x13e   : > { %815 = vrsqrt.f32 %v530_v34 }
 0x13f   : > { %v531_v20 = vadd.f32 1e-06, %v499_v39  ;;  %v532_v46 = vadd.f32 1e-06, %v500_v42 }
 0x140   : > { %v417_v36 = vpop.xlane.xlu1 %416  ;;  %v420_v50 = vpop.xlane.xlu0 %419 }
 0x141   : > { %817 = vrsqrt.f32 %v531_v20  ;;  %v501_v52 = vmul.f32 0.015625, %v417_v36  ;;  %v502_v54 = vmul.f32 0.015625, %v420_v50 }
 0x142   : > { %819 = vrsqrt.f32 %v532_v46 }
 0x143   : > { %v812_v8 = vpop.eup %811  ;;  %v533_v24 = vadd.f32 1e-06, %v501_v52  ;;  %v534_v62 = vadd.f32 1e-06, %v502_v54 }
 0x144   : > { %v592_v40 = vmul.f32 %v812_v8, %v1082_v10  ;;  %v423_v3 = vpop.xlane.xlu1 %422  ;;  %v426_v56 = vpop.xlane.xlu0 %425 }
 0x145   : > { %821 = vrsqrt.f32 %v533_v24  ;;  %v503_v12 = vmul.f32 0.015625, %v423_v3  ;;  %v504_v14 = vmul.f32 0.015625, %v426_v56 }
 0x146   : > { %v631_v28 = vmul.f32 %v1276_v58, %v592_v40  ;;  %823 = vrsqrt.f32 %v534_v62 }
 0x147   : > { %v814_v18 = vpop.eup %813  ;;  %v535_v10 = vadd.f32 1e-06, %v503_v12  ;;  %v536_v60 = vadd.f32 1e-06, %v504_v14 }
 0x148   : > { %v816_v61 = vpop.eup %815  ;;  %v670_v44 = vadd.f32 %v1282_v6, %v631_v28  ;;  %v593_v22 = vmul.f32 %v814_v18, %v1092_v26  ;;  %v429_v23 = vpop.xlane.xlu1 %428 }
 0x149   : > { %v432_v0 = vpop.xlane.xlu0 %431  ;;  %v594_v16 = vmul.f32 %v816_v61, %v1085_v11  ;;  %825 = vrsqrt.f32 %v535_v10  ;;  %v505_v30 = vmul.f32 0.015625, %v429_v23 }
 0x14a   : > { %v506_v32 = vmul.f32 0.015625, %v432_v0  ;;  %702 = vst.msk [vmem:[%s1290_s25] sm:$0xff] %vm206_vm0, %v670_v44  ;;  %v632_v34 = vmul.f32 %v1276_v58, %v593_v22  ;;  %827 = vrsqrt.f32 %v536_v60 }
 0x14b   : > { %v818_v48 = vpop.eup %817  ;;  %v633_v38 = vmul.f32 %v1276_v58, %v594_v16  ;;  %v537_v39 = vadd.f32 1e-06, %v505_v30 }
 0x14c   : > { %v538_v42 = vadd.f32 1e-06, %v506_v32  ;;  %v820_v26 = vpop.eup %819  ;;  %v671_v20 = vadd.f32 %v1282_v6, %v632_v34  ;;  %v595_v11 = vmul.f32 %v818_v48, %v1095_v27  ;;  %v435_v46 = vpop.xlane.xlu1 %434 }
 0x14d   : > { %v438_v36 = vpop.xlane.xlu0 %437  ;;  %v672_v50 = vadd.f32 %v1282_v6, %v633_v38  ;;  %v596_v52 = vmul.f32 %v820_v26, %v1104_v2  ;;  %829 = vrsqrt.f32 %v537_v39  ;;  %v507_v54 = vmul.f32 0.015625, %v435_v46 }
 0x14e   : > { %703 = vst.msk [vmem:[%s1290_s25 + $0x8] sm:$0xff] %vm206_vm0, %v671_v20  ;;  %v634_v8 = vmul.f32 %v1276_v58, %v595_v11  ;;  %831 = vrsqrt.f32 %v538_v42  ;;  %v508_v24 = vmul.f32 0.015625, %v438_v36 }
 0x14f   : > { %v822_v62 = vpop.eup %821  ;;  %704 = vst.msk [vmem:[%s1290_s25 + $0x10] sm:$0xff] %vm206_vm0, %v672_v50  ;;  %v635_v27 = vmul.f32 %v1276_v58, %v596_v52  ;;  %v539_v40 = vadd.f32 1e-06, %v507_v54 }
 0x150   : > { %v824_v3 = vpop.eup %823  ;;  %v673_v56 = vadd.f32 %v1282_v6, %v634_v8  ;;  %v597_v2 = vmul.f32 %v822_v62, %v1107_v5  ;;  %v540_v12 = vadd.f32 1e-06, %v508_v24  ;;  %v441_v14 = vpop.xlane.xlu1 %440 }
 0x151   : > { %v444_v28 = vpop.xlane.xlu0 %443  ;;  %v674_v18 = vadd.f32 %v1282_v6, %v635_v27  ;;  %v598_v10 = vmul.f32 %v824_v3, %v1116_v55  ;;  %833 = vrsqrt.f32 %v539_v40  ;;  %v509_v60 = vmul.f32 0.015625, %v441_v14 }
 0x152   : > { %705 = vst.msk [vmem:[%s1290_s25 + $0x18] sm:$0xff] %vm206_vm0, %v673_v56  ;;  %v636_v61 = vmul.f32 %v1276_v58, %v597_v2  ;;  %835 = vrsqrt.f32 %v540_v12  ;;  %v510_v44 = vmul.f32 0.015625, %v444_v28 }
 0x153   : > { %v826_v22 = vpop.eup %825  ;;  %706 = vst.msk [vmem:[%s1290_s25 + $0x20] sm:$0xff] %vm206_vm0, %v674_v18  ;;  %v637_v5 = vmul.f32 %v1276_v58, %v598_v10  ;;  %v541_v23 = vadd.f32 1e-06, %v509_v60 }
 0x154   : > { %v828_v0 = vpop.eup %827  ;;  %v675_v16 = vadd.f32 %v1282_v6, %v636_v61  ;;  %v599_v55 = vmul.f32 %v826_v22, %v1119_v9  ;;  %v542_v30 = vadd.f32 1e-06, %v510_v44  ;;  %v447_v32 = vpop.xlane.xlu1 %446 }
 0x155   : > { %v450_v34 = vpop.xlane.xlu0 %449  ;;  %v676_v48 = vadd.f32 %v1282_v6, %v637_v5  ;;  %v600_v38 = vmul.f32 %v828_v0, %v1128_v7  ;;  %837 = vrsqrt.f32 %v541_v23  ;;  %v511_v39 = vmul.f32 0.015625, %v447_v32 }
 0x156   : > { %707 = vst.msk [vmem:[%s1290_s25 + $0x28] sm:$0xff] %vm206_vm0, %v675_v16  ;;  %v638_v42 = vmul.f32 %v1276_v58, %v599_v55  ;;  %839 = vrsqrt.f32 %v542_v30  ;;  %v512_v26 = vmul.f32 0.015625, %v450_v34 }
 0x157   : > { %v830_v20 = vpop.eup %829  ;;  %708 = vst.msk [vmem:[%s1290_s25 + $0x30] sm:$0xff] %vm206_vm0, %v676_v48  ;;  %v639_v9 = vmul.f32 %v1276_v58, %v600_v38  ;;  %v543_v11 = vadd.f32 1e-06, %v511_v39 }
 0x158   : > { %v832_v46 = vpop.eup %831  ;;  %v677_v36 = vadd.f32 %v1282_v6, %v638_v42  ;;  %v601_v7 = vmul.f32 %v830_v20, %v1131_v13  ;;  %v544_v50 = vadd.f32 1e-06, %v512_v26  ;;  %v453_v52 = vpop.xlane.xlu1 %452 }
 0x159   : > { %v456_v54 = vpop.xlane.xlu0 %455  ;;  %v678_v8 = vadd.f32 %v1282_v6, %v639_v9  ;;  %v602_v24 = vmul.f32 %v832_v46, %v1140_v1  ;;  %841 = vrsqrt.f32 %v543_v11  ;;  %v513_v62 = vmul.f32 0.015625, %v453_v52 }
 0x15a   : > { %709 = vst.msk [vmem:[%s1290_s25 + $0x38] sm:$0xff] %vm206_vm0, %v677_v36  ;;  %v640_v27 = vmul.f32 %v1276_v58, %v601_v7  ;;  %843 = vrsqrt.f32 %v544_v50  ;;  %v514_v40 = vmul.f32 0.015625, %v456_v54 }
 0x15b   : > { %v834_v3 = vpop.eup %833  ;;  %710 = vst.msk [vmem:[%s1290_s25 + $0x40] sm:$0xff] %vm206_vm0, %v678_v8  ;;  %v641_v13 = vmul.f32 %v1276_v58, %v602_v24  ;;  %v545_v56 = vadd.f32 1e-06, %v513_v62 }
 0x15c   : > { %v836_v2 = vpop.eup %835  ;;  %v679_v12 = vadd.f32 %v1282_v6, %v640_v27  ;;  %v603_v1 = vmul.f32 %v834_v3, %v1143_v17  ;;  %v546_v14 = vadd.f32 1e-06, %v514_v40  ;;  %v459_v28 = vpop.xlane.xlu1 %458 }
 0x15d   : > { %v462_v18 = vpop.xlane.xlu0 %461  ;;  %v680_v10 = vadd.f32 %v1282_v6, %v641_v13  ;;  %v604_v60 = vmul.f32 %v836_v2, %v1152_v43  ;;  %845 = vrsqrt.f32 %v545_v56  ;;  %v515_v61 = vmul.f32 0.015625, %v459_v28 }
 0x15e   : > { %711 = vst.msk [vmem:[%s1290_s25 + $0x48] sm:$0xff] %vm206_vm0, %v679_v12  ;;  %v642_v44 = vmul.f32 %v1276_v58, %v603_v1  ;;  %847 = vrsqrt.f32 %v546_v14  ;;  %v516_v22 = vmul.f32 0.015625, %v462_v18 }
 0x15f   : > { %v838_v5 = vpop.eup %837  ;;  %712 = vst.msk [vmem:[%s1290_s25 + $0x50] sm:$0xff] %vm206_vm0, %v680_v10  ;;  %v643_v17 = vmul.f32 %v1276_v58, %v604_v60  ;;  %v547_v23 = vadd.f32 1e-06, %v515_v61 }
 0x160   : > { %v840_v0 = vpop.eup %839  ;;  %v681_v16 = vadd.f32 %v1282_v6, %v642_v44  ;;  %v605_v43 = vmul.f32 %v838_v5, %v1155_v21  ;;  %v548_v55 = vadd.f32 1e-06, %v516_v22  ;;  %v465_v30 = vpop.xlane.xlu1 %464 }
 0x161   : > { %v468_v32 = vpop.xlane.xlu0 %467  ;;  %v682_v34 = vadd.f32 %v1282_v6, %v643_v17  ;;  %v606_v48 = vmul.f32 %v840_v0, %v1164_v59  ;;  %849 = vrsqrt.f32 %v547_v23  ;;  %v517_v38 = vmul.f32 0.015625, %v465_v30 }
 0x162   : > { %713 = vst.msk [vmem:[%s1290_s25 + $0x58] sm:$0xff] %vm206_vm0, %v681_v16  ;;  %v644_v39 = vmul.f32 %v1276_v58, %v605_v43  ;;  %851 = vrsqrt.f32 %v548_v55  ;;  %v518_v42 = vmul.f32 0.015625, %v468_v32 }
 0x163   : > { %v842_v26 = vpop.eup %841  ;;  %714 = vst.msk [vmem:[%s1290_s25 + $0x60] sm:$0xff] %vm206_vm0, %v682_v34  ;;  %v645_v21 = vmul.f32 %v1276_v58, %v606_v48  ;;  %v549_v20 = vadd.f32 1e-06, %v517_v38 }
 0x164   : > { %v844_v9 = vpop.eup %843  ;;  %v683_v11 = vadd.f32 %v1282_v6, %v644_v39  ;;  %v607_v59 = vmul.f32 %v842_v26, %v1167_v25  ;;  %v550_v46 = vadd.f32 1e-06, %v518_v42  ;;  %v471_v36 = vpop.xlane.xlu1 %470 }
 0x165   : > { %v474_v7 = vpop.xlane.xlu0 %473  ;;  %v684_v50 = vadd.f32 %v1282_v6, %v645_v21  ;;  %v608_v52 = vmul.f32 %v844_v9, %v1176_v15  ;;  %853 = vrsqrt.f32 %v549_v20  ;;  %v519_v54 = vmul.f32 0.015625, %v471_v36 }
 0x166   : > { %715 = vst.msk [vmem:[%s1290_s25 + $0x68] sm:$0xff] %vm206_vm0, %v683_v11  ;;  %v646_v8 = vmul.f32 %v1276_v58, %v607_v59  ;;  %855 = vrsqrt.f32 %v550_v46  ;;  %v520_v24 = vmul.f32 0.015625, %v474_v7 }
 0x167   : > { %v846_v62 = vpop.eup %845  ;;  %716 = vst.msk [vmem:[%s1290_s25 + $0x70] sm:$0xff] %vm206_vm0, %v684_v50  ;;  %v647_v25 = vmul.f32 %v1276_v58, %v608_v52  ;;  %v551_v27 = vadd.f32 1e-06, %v519_v54 }
 0x168   : > { %v848_v40 = vpop.eup %847  ;;  %v685_v3 = vadd.f32 %v1282_v6, %v646_v8  ;;  %v609_v15 = vmul.f32 %v846_v62, %v1179_v29  ;;  %v552_v13 = vadd.f32 1e-06, %v520_v24  ;;  %v477_v56 = vpop.xlane.xlu1 %476 }
 0x169   : > { %v480_v2 = vpop.xlane.xlu0 %479  ;;  %v686_v12 = vadd.f32 %v1282_v6, %v647_v25  ;;  %v610_v1 = vmul.f32 %v848_v40, %v1188_v31  ;;  %857 = vrsqrt.f32 %v551_v27  ;;  %v521_v14 = vmul.f32 0.015625, %v477_v56 }
 0x16a   : > { %717 = vst.msk [vmem:[%s1290_s25 + $0x78] sm:$0xff] %vm206_vm0, %v685_v3  ;;  %v648_v28 = vmul.f32 %v1276_v58, %v609_v15  ;;  %859 = vrsqrt.f32 %v552_v13  ;;  %v522_v18 = vmul.f32 0.015625, %v480_v2 }
 0x16b   : > { %v850_v10 = vpop.eup %849  ;;  %718 = vst.msk [vmem:[%s1290_s25 + $0x80] sm:$0xff] %vm206_vm0, %v686_v12  ;;  %v649_v29 = vmul.f32 %v1276_v58, %v610_v1  ;;  %v553_v60 = vadd.f32 1e-06, %v521_v14 }
 0x16c   : > { %v852_v61 = vpop.eup %851  ;;  %v687_v44 = vadd.f32 %v1282_v6, %v648_v28  ;;  %v611_v31 = vmul.f32 %v850_v10, %v1191_v33  ;;  %v554_v22 = vadd.f32 1e-06, %v522_v18  ;;  %v483_v5 = vpop.xlane.xlu1 %482 }
 0x16d   : > { %v486_v17 = vpop.xlane.xlu0 %485  ;;  %v688_v23 = vadd.f32 %v1282_v6, %v649_v29  ;;  %v612_v0 = vmul.f32 %v852_v61, %v1200_v47  ;;  %861 = vrsqrt.f32 %v553_v60  ;;  %v523_v16 = vmul.f32 0.015625, %v483_v5 }
 0x16e   : > { %719 = vst.msk [vmem:[%s1290_s25 + $0x88] sm:$0xff] %vm206_vm0, %v687_v44  ;;  %v650_v43 = vmul.f32 %v1276_v58, %v611_v31  ;;  %863 = vrsqrt.f32 %v554_v22  ;;  %v524_v55 = vmul.f32 0.015625, %v486_v17 }
 0x16f   : > { %v854_v30 = vpop.eup %853  ;;  %720 = vst.msk [vmem:[%s1290_s25 + $0x90] sm:$0xff] %vm206_vm0, %v688_v23  ;;  %v651_v33 = vmul.f32 %v1276_v58, %v612_v0  ;;  %v555_v32 = vadd.f32 1e-06, %v523_v16 }
 0x170   : > { %v856_v34 = vpop.eup %855  ;;  %v689_v48 = vadd.f32 %v1282_v6, %v650_v43  ;;  %v613_v47 = vmul.f32 %v854_v30, %v1203_v37  ;;  %v556_v38 = vadd.f32 1e-06, %v524_v55  ;;  %v489_v39 = vpop.xlane.xlu1 %488 }
 0x171   : > { %v492_v42 = vpop.xlane.xlu0 %491  ;;  %v690_v26 = vadd.f32 %v1282_v6, %v651_v33  ;;  %v614_v21 = vmul.f32 %v856_v34, %v1212_v63  ;;  %865 = vrsqrt.f32 %v555_v32  ;;  %v525_v20 = vmul.f32 0.015625, %v489_v39 }
 0x172   : > { %721 = vst.msk [vmem:[%s1290_s25 + $0x98] sm:$0xff] %vm206_vm0, %v689_v48  ;;  %v652_v9 = vmul.f32 %v1276_v58, %v613_v47  ;;  %867 = vrsqrt.f32 %v556_v38  ;;  %v526_v11 = vmul.f32 0.015625, %v492_v42 }
 0x173   : > { %v858_v59 = vpop.eup %857  ;;  %722 = vst.msk [vmem:[%s1290_s25 + $0xa0] sm:$0xff] %vm206_vm0, %v690_v26  ;;  %v653_v37 = vmul.f32 %v1276_v58, %v614_v21  ;;  %v557_v46 = vadd.f32 1e-06, %v525_v20 }
 0x174   : > { %v860_v36 = vpop.eup %859  ;;  %v691_v7 = vadd.f32 %v1282_v6, %v652_v9  ;;  %v615_v63 = vmul.f32 %v858_v59, %v1215_v41  ;;  %v558_v50 = vadd.f32 1e-06, %v526_v11  ;;  %v495_v52 = vpop.xlane.xlu1 %494 }
 0x175   : > { %v692_v54 = vadd.f32 %v1282_v6, %v653_v37  ;;  %v616_v8 = vmul.f32 %v860_v36, %v1224_v19  ;;  %869 = vrsqrt.f32 %v557_v46  ;;  %v527_v24 = vmul.f32 0.015625, %v495_v52 }
 0x176   : > { %723 = vst.msk [vmem:[%s1290_s25 + $0xa8] sm:$0xff] %vm206_vm0, %v691_v7  ;;  %v654_v62 = vmul.f32 %v1276_v58, %v615_v63  ;;  %871 = vrsqrt.f32 %v558_v50 }
 0x177   : > { %v862_v25 = vpop.eup %861  ;;  %724 = vst.msk [vmem:[%s1290_s25 + $0xb0] sm:$0xff] %vm206_vm0, %v692_v54  ;;  %v655_v41 = vmul.f32 %v1276_v58, %v616_v8  ;;  %v559_v27 = vadd.f32 1e-06, %v527_v24 }
 0x178   : > { %v864_v40 = vpop.eup %863  ;;  %v693_v3 = vadd.f32 %v1282_v6, %v654_v62  ;;  %v617_v19 = vmul.f32 %v862_v25, %v1227_v45 }
 0x179   : > { %v694_v15 = vadd.f32 %v1282_v6, %v655_v41  ;;  %v618_v13 = vmul.f32 %v864_v40, %v1236_v35  ;;  %873 = vrsqrt.f32 %v559_v27 }
 0x17a   : > { %725 = vst.msk [vmem:[%s1290_s25 + $0xb8] sm:$0xff] %vm206_vm0, %v693_v3  ;;  %v656_v56 = vmul.f32 %v1276_v58, %v617_v19 }
 0x17b   : > { %v866_v2 = vpop.eup %865  ;;  %726 = vst.msk [vmem:[%s1290_s25 + $0xc0] sm:$0xff] %vm206_vm0, %v694_v15  ;;  %v657_v12 = vmul.f32 %v1276_v58, %v618_v13 }
 0x17c   : > { %v868_v1 = vpop.eup %867  ;;  %v695_v14 = vadd.f32 %v1282_v6, %v656_v56  ;;  %v619_v45 = vmul.f32 %v866_v2, %v1239_v49 }
 0x17d   : > { %v696_v28 = vadd.f32 %v1282_v6, %v657_v12  ;;  %v620_v35 = vmul.f32 %v868_v1, %v1248_v51 }
 0x17e   : > { %727 = vst.msk [vmem:[%s1290_s25 + $0xc8] sm:$0xff] %vm206_vm0, %v695_v14  ;;  %v658_v18 = vmul.f32 %v1276_v58, %v619_v45 }
 0x17f   : > { %v870_v10 = vpop.eup %869  ;;  %728 = vst.msk [vmem:[%s1290_s25 + $0xd0] sm:$0xff] %vm206_vm0, %v696_v28  ;;  %v659_v29 = vmul.f32 %v1276_v58, %v620_v35 }
 0x180   : > { %v872_v60 = vpop.eup %871  ;;  %v697_v61 = vadd.f32 %v1282_v6, %v658_v18  ;;  %v621_v49 = vmul.f32 %v870_v10, %v1251_v53 }
 0x181   : > { %v698_v44 = vadd.f32 %v1282_v6, %v659_v29  ;;  %v622_v51 = vmul.f32 %v872_v60, %v1260_v4 }
 0x182   : > { %729 = vst.msk [vmem:[%s1290_s25 + $0xd8] sm:$0xff] %vm206_vm0, %v697_v61  ;;  %v660_v31 = vmul.f32 %v1276_v58, %v621_v49 }
 0x183   : > { %v874_v22 = vpop.eup %873  ;;  %730 = vst.msk [vmem:[%s1290_s25 + $0xe0] sm:$0xff] %vm206_vm0, %v698_v44  ;;  %v661_v5 = vmul.f32 %v1276_v58, %v622_v51 }
 0x184   : > { %v699_v17 = vadd.f32 %v1282_v6, %v660_v31  ;;  %v623_v23 = vmul.f32 %v874_v22, %v1263_v57 }
 0x185   : > { %v700_v0 = vadd.f32 %v1282_v6, %v661_v5 }
 0x186   : > { %731 = vst.msk [vmem:[%s1290_s25 + $0xe8] sm:$0xff] %vm206_vm0, %v699_v17  ;;  %v662_v53 = vmul.f32 %v1276_v58, %v623_v23 }
 0x187   : > { %732 = vst.msk [vmem:[%s1290_s25 + $0xf0] sm:$0xff] %vm206_vm0, %v700_v0 }
 0x188   : > { %v701_v4 = vadd.f32 %v1282_v6, %v662_v53 }
 0x18a   : > { %733 = vst.msk [vmem:[%s1290_s25 + $0xf8] sm:$0xff] %vm206_vm0, %v701_v4 }
 0x18b PF: > { %s13_s12 = sadd.s32 1, %s881_s12  }
 0x18c   : > { %p10_p4 = scmp.ge.s32.totalorder %s13_s12, 4  }
 0x18e   :  { %12 = sbr.rel (!%p10_p4) target bundleno = 1 (0x1), region = 62 }

// kernel: forward.22
= control target key start
LH: loop header
LB: loop body
LE: loop exit
PB: predicated region body
PF: predicated region fallthrough
CT: control target
= control target key end

     0   :  { %s1001_s15 = smov 0   ;;  %s1352_s0 = inlined_call_operand.vmem [shape: f32[512,256], index: 0, kind: input, shape index: {}]   ;;  %s1353_s1 = inlined_call_operand.vmem [shape: bf16[256,64], index: 1, kind: input, shape index: {}]   ;;  %s1354_s2 = inlined_call_operand.vmem [shape: f32[1,64], index: 2, kind: input, shape index: {}]   ;;  %s1355_s3 = inlined_call_operand.vmem [shape: f32[512,64], index: 3, kind: input, shape index: {}, may-alias: {3,4}]   ;;  %s1356_s4 = inlined_call_operand.vmem [shape: f32[512,64], index: 4, kind: output, shape index: {}, may-alias: {3,4}]  }
   0x1 LB: > { %s784_s16 = sadd.s32 4294967295, %s974_s15   ;;  %p788_p0 = scmp.ge.s32.totalorder %s974_s15, 1  ;;  %s974_s15 = sphi %s1001_s15, %s14_s15  }
   0x2   : > { %p175_p1 = scmp.lt.s32.totalorder %s974_s15, 3 }
   0x4   : > { %p176_p2 = pnand %p788_p0, %p175_p1 }
   0x5   : > { %v952_v0 = vld [vmem:[%s1353_s1 + $0x40] sm:$0xff] (!%p176_p2)   ;;  %s789_s19 = sshll.u32 (!%p176_p2), %s784_s16, 5  ;;  %v954_v2 = vld [vmem:[%s1353_s1 + $0x48] sm:$0xff] (!%p176_p2)   ;;  %v956_v4 = vld [vmem:[%s1353_s1 + $0x50] sm:$0xff] (!%p176_p2)   ;;  %vm683_vm0 = vcmask (!%p176_p2), 523264  }
   0x6   : > { %179 = sbr.rel (%p176_p2) target bundleno = 316 (0x13c), region = 36  ;;  %v953_v1 = vld [vmem:[%s1353_s1] sm:$0xff] (!%p176_p2)   ;;  %816 = vmatprep.subr.bf16.mxu0 (!%p176_p2), %v952_v0  ;;  %928 = vmatprep.subr.bf16.mxu1 (!%p176_p2), %v952_v0  ;;  %p208_p3 = scmp.lt.s32.totalorder (!%p176_p2), %s789_s19, 63  ;;  %v955_v3 = vld [vmem:[%s1353_s1 + $0x8] sm:$0xff] (!%p176_p2)   ;;  %v957_v5 = vld [vmem:[%s1353_s1 + $0x10] sm:$0xff] (!%p176_p2)  }
   0x7   : > { %817 = vmatpush3.bf16.msra.mxu0 (!%p176_p2), %v953_v1  ;;  %936 = vmatpush3.bf16.msra.mxu1 (!%p176_p2), %v953_v1  ;;  %v958_v6 = vld [vmem:[%s1353_s1 + $0x58] sm:$0xff] (!%p176_p2)   ;;  %v960_v8 = vld [vmem:[%s1353_s1 + $0x60] sm:$0xff] (!%p176_p2)   ;;  %v962_v10 = vld [vmem:[%s1353_s1 + $0x68] sm:$0xff] (!%p176_p2)  }
   0x8   : > { %818 = vmatprep.subr.bf16.mxu0 (!%p176_p2), %v954_v2  ;;  %929 = vmatprep.subr.bf16.mxu1 (!%p176_p2), %v954_v2  ;;  %v959_v7 = vld [vmem:[%s1353_s1 + $0x18] sm:$0xff] (!%p176_p2)   ;;  %v961_v9 = vld [vmem:[%s1353_s1 + $0x20] sm:$0xff] (!%p176_p2)   ;;  %v963_v17 = vld [vmem:[%s1353_s1 + $0x28] sm:$0xff] (!%p176_p2)  }
   0x9   : > { %v964_v18 = vld [vmem:[%s1353_s1 + $0x70] sm:$0xff] (!%p176_p2)   ;;  %v966_v20 = vld [vmem:[%s1353_s1 + $0x78] sm:$0xff] (!%p176_p2)  }
   0xa   : > { %v965_v19 = vld [vmem:[%s1353_s1 + $0x30] sm:$0xff] (!%p176_p2)   ;;  %v967_v21 = vld [vmem:[%s1353_s1 + $0x38] sm:$0xff] (!%p176_p2)  }
   0xb   : > { %819 = vmatpush3.bf16.msra.mxu0 (!%p176_p2), %v955_v3  ;;  %937 = vmatpush3.bf16.msra.mxu1 (!%p176_p2), %v955_v3 }
   0xc   : > { %820 = vmatprep.subr.bf16.mxu0 (!%p176_p2), %v956_v4  ;;  %930 = vmatprep.subr.bf16.mxu1 (!%p176_p2), %v956_v4 }
   0xd   : > { %s1358_s19 = smov (!%p208_p3, %s789_s19), 63 }
   0xe   : > { %s815_s6 = sshll.u32 %s1358_s19, 4  ;;  %s793_s30 = sshll.u32 %s1358_s19, 3 }
   0xf   : > { %821 = vmatpush3.bf16.msra.mxu0 %v957_v5  ;;  %938 = vmatpush3.bf16.msra.mxu1 %v957_v5  ;;  %s1042_s13 = scalar_lea.vmem %s1352_s0, %s815_s6  ;;  %s1135_s7 = scalar_lea.vmem %s1355_s3, %s793_s30 }
  0x10   : > { %822 = vmatprep.subr.bf16.mxu0 %v958_v6  ;;  %931 = vmatprep.subr.bf16.mxu1 %v958_v6  ;;  %v228_v11 = vld [vmem:[%s1042_s13 + $0x8] sm:$0xff]  ;;  %v230_v12 = vld [vmem:[%s1042_s13 + $0x18] sm:$0xff]  ;;  %v227_v22 = vld [vmem:[%s1042_s13] sm:$0xff]  ;;  %s1220_s12 = scalar_lea.vmem %s1356_s4, %s793_s30 }
  0x11   : > { %v260_v13 = vld [vmem:[%s1042_s13 + $0x108] sm:$0xff]  ;;  %v292_v14 = vpack.c.bf16 %v230_v12, %v228_v11  ;;  %v262_v15 = vld [vmem:[%s1042_s13 + $0x118] sm:$0xff]  ;;  %v229_v23 = vld [vmem:[%s1042_s13 + $0x10] sm:$0xff] }
  0x12   : > { %v308_v16 = vpack.c.bf16 %v262_v15, %v260_v13  ;;  %v259_v24 = vld [vmem:[%s1042_s13 + $0x100] sm:$0xff]  ;;  %v261_v25 = vld [vmem:[%s1042_s13 + $0x110] sm:$0xff]  ;;  %v232_v26 = vld [vmem:[%s1042_s13 + $0x28] sm:$0xff]  ;;  %v291_v30 = vpack.c.bf16 %v229_v23, %v227_v22 }
  0x13   : > { %823 = vmatpush3.bf16.msra.mxu0 %v959_v7  ;;  %939 = vmatpush3.bf16.msra.mxu1 %v959_v7  ;;  %v234_v27 = vld [vmem:[%s1042_s13 + $0x38] sm:$0xff]  ;;  %v264_v28 = vld [vmem:[%s1042_s13 + $0x128] sm:$0xff]  ;;  %v307_v31 = vpack.c.bf16 %v261_v25, %v259_v24  ;;  %v231_v34 = vld [vmem:[%s1042_s13 + $0x20] sm:$0xff] }
  0x14   : > { %824 = vmatprep.subr.bf16.mxu0 %v960_v8  ;;  %932 = vmatprep.subr.bf16.mxu1 %v960_v8  ;;  %v266_v29 = vld [vmem:[%s1042_s13 + $0x138] sm:$0xff]  ;;  %v294_v32 = vpack.c.bf16 %v234_v27, %v232_v26  ;;  %v233_v35 = vld [vmem:[%s1042_s13 + $0x30] sm:$0xff]  ;;  %v263_v36 = vld [vmem:[%s1042_s13 + $0x120] sm:$0xff] }
  0x15   : > { %490 = vmatprep.mubr.bf16.mxu0 %v292_v14  ;;  %554 = vmatprep.mubr.bf16.mxu1 %v308_v16  ;;  %v310_v33 = vpack.c.bf16 %v266_v29, %v264_v28  ;;  %v265_v37 = vld [vmem:[%s1042_s13 + $0x130] sm:$0xff]  ;;  %v236_v38 = vld [vmem:[%s1042_s13 + $0x48] sm:$0xff]  ;;  %v238_v39 = vld [vmem:[%s1042_s13 + $0x58] sm:$0xff]  ;;  %v293_v42 = vpack.c.bf16 %v233_v35, %v231_v34 }
  0x16   : > { %v268_v40 = vld [vmem:[%s1042_s13 + $0x148] sm:$0xff]  ;;  %v270_v41 = vld [vmem:[%s1042_s13 + $0x158] sm:$0xff]  ;;  %v309_v43 = vpack.c.bf16 %v265_v37, %v263_v36  ;;  %v296_v44 = vpack.c.bf16 %v238_v39, %v236_v38  ;;  %v235_v46 = vld [vmem:[%s1042_s13 + $0x40] sm:$0xff] }
  0x17   : > { %825 = vmatpush3.bf16.msra.mxu0 %v961_v9  ;;  %940 = vmatpush3.bf16.msra.mxu1 %v961_v9  ;;  %v312_v45 = vpack.c.bf16 %v270_v41, %v268_v40  ;;  %v237_v47 = vld [vmem:[%s1042_s13 + $0x50] sm:$0xff]  ;;  %v267_v48 = vld [vmem:[%s1042_s13 + $0x140] sm:$0xff]  ;;  %v240_v50 = vld [vmem:[%s1042_s13 + $0x68] sm:$0xff] }
  0x18   : > { %826 = vmatprep.subr.bf16.mxu0 %v962_v10  ;;  %933 = vmatprep.subr.bf16.mxu1 %v962_v10  ;;  %v269_v49 = vld [vmem:[%s1042_s13 + $0x150] sm:$0xff]  ;;  %v242_v51 = vld [vmem:[%s1042_s13 + $0x78] sm:$0xff]  ;;  %v272_v52 = vld [vmem:[%s1042_s13 + $0x168] sm:$0xff]  ;;  %v295_v54 = vpack.c.bf16 %v237_v47, %v235_v46 }
  0x19   : > { %v274_v53 = vld [vmem:[%s1042_s13 + $0x178] sm:$0xff]  ;;  %v311_v55 = vpack.c.bf16 %v269_v49, %v267_v48  ;;  %v298_v56 = vpack.c.bf16 %v242_v51, %v240_v50  ;;  %v239_v58 = vld [vmem:[%s1042_s13 + $0x60] sm:$0xff]  ;;  %v241_v59 = vld [vmem:[%s1042_s13 + $0x70] sm:$0xff] }
  0x1a   : > { %v314_v57 = vpack.c.bf16 %v274_v53, %v272_v52  ;;  %v271_v60 = vld [vmem:[%s1042_s13 + $0x160] sm:$0xff]  ;;  %v273_v61 = vld [vmem:[%s1042_s13 + $0x170] sm:$0xff]  ;;  %v244_v62 = vld [vmem:[%s1042_s13 + $0x88] sm:$0xff]  ;;  %v297_v2 = vpack.c.bf16 %v241_v59, %v239_v58 }
  0x1b   : > { %827 = vmatpush3.bf16.msra.mxu0 %v963_v17  ;;  %941 = vmatpush3.bf16.msra.mxu1 %v963_v17  ;;  %v246_v63 = vld [vmem:[%s1042_s13 + $0x98] sm:$0xff]  ;;  %v276_v0 = vld [vmem:[%s1042_s13 + $0x188] sm:$0xff]  ;;  %v313_v3 = vpack.c.bf16 %v273_v61, %v271_v60  ;;  %v243_v6 = vld [vmem:[%s1042_s13 + $0x80] sm:$0xff] }
  0x1c   : > { %828 = vmatprep.subr.bf16.mxu0 %v964_v18  ;;  %934 = vmatprep.subr.bf16.mxu1 %v964_v18  ;;  %v278_v1 = vld [vmem:[%s1042_s13 + $0x198] sm:$0xff]  ;;  %v300_v4 = vpack.c.bf16 %v246_v63, %v244_v62  ;;  %v245_v7 = vld [vmem:[%s1042_s13 + $0x90] sm:$0xff]  ;;  %v275_v8 = vld [vmem:[%s1042_s13 + $0x180] sm:$0xff] }
  0x1d   : > { %v316_v5 = vpack.c.bf16 %v278_v1, %v276_v0  ;;  %v277_v9 = vld [vmem:[%s1042_s13 + $0x190] sm:$0xff]  ;;  %v248_v10 = vld [vmem:[%s1042_s13 + $0xa8] sm:$0xff]  ;;  %v250_v11 = vld [vmem:[%s1042_s13 + $0xb8] sm:$0xff]  ;;  %v299_v14 = vpack.c.bf16 %v245_v7, %v243_v6 }
  0x1e   : > { %v280_v12 = vld [vmem:[%s1042_s13 + $0x1a8] sm:$0xff]  ;;  %v282_v13 = vld [vmem:[%s1042_s13 + $0x1b8] sm:$0xff]  ;;  %v315_v15 = vpack.c.bf16 %v277_v9, %v275_v8  ;;  %v302_v16 = vpack.c.bf16 %v250_v11, %v248_v10  ;;  %v247_v18 = vld [vmem:[%s1042_s13 + $0xa0] sm:$0xff] }
  0x1f   : > { %829 = vmatpush3.bf16.msra.mxu0 %v965_v19  ;;  %942 = vmatpush3.bf16.msra.mxu1 %v965_v19  ;;  %v318_v17 = vpack.c.bf16 %v282_v13, %v280_v12  ;;  %v249_v19 = vld [vmem:[%s1042_s13 + $0xb0] sm:$0xff]  ;;  %v252_v22 = vld [vmem:[%s1042_s13 + $0xc8] sm:$0xff]  ;;  %v254_v23 = vld [vmem:[%s1042_s13 + $0xd8] sm:$0xff] }
  0x20   : > { %830 = vmatprep.subr.bf16.mxu0 %v966_v20  ;;  %935 = vmatprep.subr.bf16.mxu1 %v966_v20  ;;  %v279_v20 = vld [vmem:[%s1042_s13 + $0x1a0] sm:$0xff]  ;;  %v284_v24 = vld [vmem:[%s1042_s13 + $0x1c8] sm:$0xff]  ;;  %v286_v25 = vld [vmem:[%s1042_s13 + $0x1d8] sm:$0xff]  ;;  %v301_v26 = vpack.c.bf16 %v249_v19, %v247_v18  ;;  %v304_v28 = vpack.c.bf16 %v254_v23, %v252_v22 }
  0x21   : > { %v320_v29 = vpack.c.bf16 %v286_v25, %v284_v24  ;;  %v256_v34 = vld [vmem:[%s1042_s13 + $0xe8] sm:$0xff]  ;;  %v258_v35 = vld [vmem:[%s1042_s13 + $0xf8] sm:$0xff]  ;;  %v1140_v50 = vld [vmem:[%s1354_s2] ss:$0 sm:$0xff] }
  0x22   : > { %v288_v36 = vld [vmem:[%s1042_s13 + $0x1e8] sm:$0xff]  ;;  %v290_v37 = vld [vmem:[%s1042_s13 + $0x1f8] sm:$0xff]  ;;  %v306_v40 = vpack.c.bf16 %v258_v35, %v256_v34  ;;  %v621_v63 = vld [vmem:[%s1135_s7 + $0x10] sm:$0xff] }
  0x23   : > { %831 = vmatpush3.bf16.msra.mxu0 %v967_v21  ;;  %943 = vmatpush3.bf16.msra.mxu1 %v967_v21  ;;  %v281_v21 = vld [vmem:[%s1042_s13 + $0x1b0] sm:$0xff]  ;;  %v322_v41 = vpack.c.bf16 %v290_v37, %v288_v36  ;;  %v620_v60 = vld [vmem:[%s1135_s7 + $0x8] sm:$0xff]  ;;  %v622_v1 = vld [vmem:[%s1135_s7 + $0x18] sm:$0xff] }
  0x24   : > { %v317_v27 = vpack.c.bf16 %v281_v21, %v279_v20  ;;  %v636_v62 = vld [vmem:[%s1135_s7 + $0x88] sm:$0xff]  ;;  %v637_v0 = vld [vmem:[%s1135_s7 + $0x90] sm:$0xff]  ;;  %v1169_v9 = vld [vmem:[%s1135_s7 + $0x38] sm:$0xff] }
  0x25   : > { %v1160_v6 = vld [vmem:[%s1135_s7 + $0xa8] sm:$0xff]  ;;  %v1163_v7 = vld [vmem:[%s1135_s7 + $0x30] sm:$0xff]  ;;  %v1172_v10 = vld [vmem:[%s1135_s7 + $0xb8] sm:$0xff] }
  0x26   : > { %491 = vmatmul.mubr.bf16.vlgmr.msra.gmra.mrb[0].mxu0 %v291_v30  ;;  %555 = vmatmul.mubr.bf16.vlgmr.msra.gmra.mrb[0].mxu1 %v307_v31  ;;  %v251_v30 = vld [vmem:[%s1042_s13 + $0xc0] sm:$0xff]  ;;  %v253_v31 = vld [vmem:[%s1042_s13 + $0xd0] sm:$0xff]  ;;  %v1181_v13 = vld [vmem:[%s1135_s7 + $0x48] sm:$0xff] }
  0x27   : > { %498 = vmatprep.mubr.bf16.mxu0 %v294_v32  ;;  %562 = vmatprep.mubr.bf16.mxu1 %v310_v33  ;;  %v283_v32 = vld [vmem:[%s1042_s13 + $0x1c0] sm:$0xff]  ;;  %v285_v33 = vld [vmem:[%s1042_s13 + $0x1d0] sm:$0xff]  ;;  %v303_v38 = vpack.c.bf16 %v253_v31, %v251_v30  ;;  %v1196_v18 = vld [vmem:[%s1135_s7 + $0xd8] sm:$0xff] }
  0x28   : > { %v319_v39 = vpack.c.bf16 %v285_v33, %v283_v32  ;;  %v1166_v8 = vld [vmem:[%s1135_s7 + $0xb0] sm:$0xff]  ;;  %v1175_v11 = vld [vmem:[%s1135_s7 + $0x40] sm:$0xff]  ;;  %v1207_v25 = vld [vmem:[%s1135_s7 + $0x68] sm:$0xff] }
  0x29   : > { %v1178_v12 = vld [vmem:[%s1135_s7 + $0xc0] sm:$0xff]  ;;  %v1229_v30 = vld [vmem:[%s1135_s7 + $0xf8] sm:$0xff] }
  0x2a   : > { %v1199_v19 = vld [vmem:[%s1135_s7 + $0x60] sm:$0xff] }
  0x2b   : > { %v1202_v20 = vld [vmem:[%s1135_s7 + $0xe0] sm:$0xff] }
  0x2e   : > { %499 = vmatmul.mubr.bf16.gmra.mrb[4].mxu0 %v293_v42  ;;  %563 = vmatmul.mubr.bf16.gmra.mrb[4].mxu1 %v309_v43  ;;  %v255_v42 = vld [vmem:[%s1042_s13 + $0xe0] sm:$0xff]  ;;  %v257_v43 = vld [vmem:[%s1042_s13 + $0xf0] sm:$0xff] }
  0x2f   : > { %506 = vmatprep.mubr.bf16.mxu0 %v296_v44  ;;  %570 = vmatprep.mubr.bf16.mxu1 %v312_v45  ;;  %v287_v44 = vld [vmem:[%s1042_s13 + $0x1e0] sm:$0xff]  ;;  %v289_v45 = vld [vmem:[%s1042_s13 + $0x1f0] sm:$0xff]  ;;  %v305_v46 = vpack.c.bf16 %v257_v43, %v255_v42 }
  0x30   : > { %v321_v47 = vpack.c.bf16 %v289_v45, %v287_v44 }
  0x36   : > { %507 = vmatmul.mubr.bf16.gmra.mrb[8].mxu0 %v295_v54  ;;  %571 = vmatmul.mubr.bf16.gmra.mrb[8].mxu1 %v311_v55  ;;  %v619_v54 = vld [vmem:[%s1135_s7] sm:$0xff] }
  0x37   : > { %514 = vmatprep.mubr.bf16.mxu0 %v298_v56  ;;  %578 = vmatprep.mubr.bf16.mxu1 %v314_v57  ;;  %v635_v56 = vld [vmem:[%s1135_s7 + $0x80] sm:$0xff] }
  0x3e   : > { %515 = vmatmul.mubr.bf16.gmra.mrb[12].mxu0 %v297_v2  ;;  %579 = vmatmul.mubr.bf16.gmra.mrb[12].mxu1 %v313_v3  ;;  %v638_v2 = vld [vmem:[%s1135_s7 + $0x98] sm:$0xff]  ;;  %v1151_v3 = vld [vmem:[%s1135_s7 + $0x20] sm:$0xff] }
  0x3f   : > { %522 = vmatprep.mubr.bf16.mxu0 %v300_v4  ;;  %586 = vmatprep.mubr.bf16.mxu1 %v316_v5  ;;  %v1154_v4 = vld [vmem:[%s1135_s7 + $0xa0] sm:$0xff]  ;;  %v1157_v5 = vld [vmem:[%s1135_s7 + $0x28] sm:$0xff] }
  0x46   : > { %523 = vmatmul.mubr.bf16.gmra.mrb[16].mxu0 %v299_v14  ;;  %587 = vmatmul.mubr.bf16.gmra.mrb[16].mxu1 %v315_v15  ;;  %v1184_v14 = vld [vmem:[%s1135_s7 + $0xc8] sm:$0xff]  ;;  %v1187_v15 = vld [vmem:[%s1135_s7 + $0x50] sm:$0xff] }
  0x47   : > { %530 = vmatprep.mubr.bf16.mxu0 %v302_v16  ;;  %594 = vmatprep.mubr.bf16.mxu1 %v318_v17  ;;  %v1190_v16 = vld [vmem:[%s1135_s7 + $0xd0] sm:$0xff]  ;;  %v1193_v17 = vld [vmem:[%s1135_s7 + $0x58] sm:$0xff] }
  0x4e   : > { %531 = vmatmul.mubr.bf16.gmra.mrb[20].mxu0 %v301_v26  ;;  %595 = vmatmul.mubr.bf16.gmra.mrb[20].mxu1 %v317_v27  ;;  %v1210_v26 = vld [vmem:[%s1135_s7 + $0xe8] sm:$0xff]  ;;  %v1213_v27 = vld [vmem:[%s1135_s7 + $0x70] sm:$0xff] }
  0x4f   : > { %538 = vmatprep.mubr.bf16.mxu0 %v304_v28  ;;  %602 = vmatprep.mubr.bf16.mxu1 %v320_v29  ;;  %v1223_v28 = vld [vmem:[%s1135_s7 + $0xf0] sm:$0xff]  ;;  %v1226_v29 = vld [vmem:[%s1135_s7 + $0x78] sm:$0xff] }
  0x56   : > { %539 = vmatmul.mubr.bf16.gmra.mrb[24].mxu0 %v303_v38  ;;  %603 = vmatmul.mubr.bf16.gmra.mrb[24].mxu1 %v319_v39 }
  0x57   : > { %546 = vmatprep.mubr.bf16.mxu0 %v306_v40  ;;  %610 = vmatprep.mubr.bf16.mxu1 %v322_v41 }
  0x5e   : > { %547 = vmatmul.mubr.bf16.gmra.mrb[28].mxu0 %v305_v46  ;;  %611 = vmatmul.mubr.bf16.gmra.mrb[28].mxu1 %v321_v47 }
  0xf9   : > { %v832_v48 = vpop.f32.mrb[0].mxu0  ;;  %v880_v49 = vpop.f32.mrb[0].mxu1 }
  0xfa   : > { %v833_v51 = vpop.f32.mrb[1].mxu0  ;;  %v881_v52 = vpop.f32.mrb[1].mxu1 }
  0xfb   : > { %v834_v53 = vadd.f32 %v833_v51, %v832_v48  ;;  %v882_v55 = vadd.f32 %v881_v52, %v880_v49  ;;  %v835_v57 = vpop.f32.mrb[2].mxu0  ;;  %v883_v58 = vpop.f32.mrb[2].mxu1 }
  0xfc   : > { %v836_v59 = vpop.f32.mrb[3].mxu0  ;;  %v884_v61 = vpop.f32.mrb[3].mxu1 }
  0xfd   : > { %v493_v21 = vadd.f32 %v834_v53, %v1140_v50  ;;  %v557_v22 = vadd.f32 %v882_v55, %v1140_v50  ;;  %v837_v23 = vadd.f32 %v836_v59, %v835_v57  ;;  %v885_v24 = vadd.f32 %v884_v61, %v883_v58 }
  0xff   : > { %v651_v31 = vadd.f32 %v619_v54, %v493_v21  ;;  %v667_v32 = vadd.f32 %v635_v56, %v557_v22  ;;  %v496_v33 = vadd.f32 %v837_v23, %v1140_v50  ;;  %v560_v34 = vadd.f32 %v885_v24, %v1140_v50 }
 0x101   : > { %v652_v35 = vadd.f32 %v620_v60, %v496_v33  ;;  %v668_v36 = vadd.f32 %v636_v62, %v560_v34  ;;  %v838_v37 = vpop.f32.mrb[4].mxu0  ;;  %v886_v38 = vpop.f32.mrb[4].mxu1  ;;  %684 = vst.msk [vmem:[%s1220_s12] sm:$0xff] %vm683_vm0, %v651_v31  ;;  %700 = vst.msk [vmem:[%s1220_s12 + $0x80] sm:$0xff] %vm683_vm0, %v667_v32 }
 0x102   : > { %v839_v39 = vpop.f32.mrb[5].mxu0  ;;  %v887_v40 = vpop.f32.mrb[5].mxu1 }
 0x103   : > { %v840_v41 = vadd.f32 %v839_v39, %v838_v37  ;;  %v888_v42 = vadd.f32 %v887_v40, %v886_v38  ;;  %v841_v43 = vpop.f32.mrb[6].mxu0  ;;  %v889_v44 = vpop.f32.mrb[6].mxu1  ;;  %685 = vst.msk [vmem:[%s1220_s12 + $0x8] sm:$0xff] %vm683_vm0, %v652_v35  ;;  %701 = vst.msk [vmem:[%s1220_s12 + $0x88] sm:$0xff] %vm683_vm0, %v668_v36 }
 0x104   : > { %v842_v45 = vpop.f32.mrb[7].mxu0  ;;  %v890_v46 = vpop.f32.mrb[7].mxu1 }
 0x105   : > { %v501_v47 = vadd.f32 %v840_v41, %v1140_v50  ;;  %v565_v48 = vadd.f32 %v888_v42, %v1140_v50  ;;  %v843_v49 = vadd.f32 %v842_v45, %v841_v43  ;;  %v891_v51 = vadd.f32 %v890_v46, %v889_v44 }
 0x107   : > { %v653_v52 = vadd.f32 %v621_v63, %v501_v47  ;;  %v669_v53 = vadd.f32 %v637_v0, %v565_v48  ;;  %v504_v54 = vadd.f32 %v843_v49, %v1140_v50  ;;  %v568_v55 = vadd.f32 %v891_v51, %v1140_v50 }
 0x109   : > { %v654_v56 = vadd.f32 %v622_v1, %v504_v54  ;;  %v670_v57 = vadd.f32 %v638_v2, %v568_v55  ;;  %v844_v58 = vpop.f32.mrb[8].mxu0  ;;  %v892_v59 = vpop.f32.mrb[8].mxu1  ;;  %686 = vst.msk [vmem:[%s1220_s12 + $0x10] sm:$0xff] %vm683_vm0, %v653_v52  ;;  %702 = vst.msk [vmem:[%s1220_s12 + $0x90] sm:$0xff] %vm683_vm0, %v669_v53 }
 0x10a   : > { %v845_v60 = vpop.f32.mrb[9].mxu0  ;;  %v893_v61 = vpop.f32.mrb[9].mxu1 }
 0x10b   : > { %v846_v62 = vadd.f32 %v845_v60, %v844_v58  ;;  %v894_v21 = vadd.f32 %v893_v61, %v892_v59  ;;  %v847_v63 = vpop.f32.mrb[10].mxu0  ;;  %v895_v22 = vpop.f32.mrb[10].mxu1  ;;  %687 = vst.msk [vmem:[%s1220_s12 + $0x18] sm:$0xff] %vm683_vm0, %v654_v56  ;;  %703 = vst.msk [vmem:[%s1220_s12 + $0x98] sm:$0xff] %vm683_vm0, %v670_v57 }
 0x10c   : > { %v848_v0 = vpop.f32.mrb[11].mxu0  ;;  %v896_v1 = vpop.f32.mrb[11].mxu1 }
 0x10d   : > { %v509_v2 = vadd.f32 %v846_v62, %v1140_v50  ;;  %v573_v23 = vadd.f32 %v894_v21, %v1140_v50  ;;  %v849_v24 = vadd.f32 %v848_v0, %v847_v63  ;;  %v897_v31 = vadd.f32 %v896_v1, %v895_v22 }
 0x10f   : > { %v655_v32 = vadd.f32 %v1151_v3, %v509_v2  ;;  %v671_v33 = vadd.f32 %v1154_v4, %v573_v23  ;;  %v512_v34 = vadd.f32 %v849_v24, %v1140_v50  ;;  %v576_v35 = vadd.f32 %v897_v31, %v1140_v50 }
 0x111   : > { %v656_v36 = vadd.f32 %v1157_v5, %v512_v34  ;;  %v672_v37 = vadd.f32 %v1160_v6, %v576_v35  ;;  %v850_v38 = vpop.f32.mrb[12].mxu0  ;;  %v898_v39 = vpop.f32.mrb[12].mxu1  ;;  %688 = vst.msk [vmem:[%s1220_s12 + $0x20] sm:$0xff] %vm683_vm0, %v655_v32  ;;  %704 = vst.msk [vmem:[%s1220_s12 + $0xa0] sm:$0xff] %vm683_vm0, %v671_v33 }
 0x112   : > { %v851_v40 = vpop.f32.mrb[13].mxu0  ;;  %v899_v3 = vpop.f32.mrb[13].mxu1 }
 0x113   : > { %v852_v41 = vadd.f32 %v851_v40, %v850_v38  ;;  %v900_v42 = vadd.f32 %v899_v3, %v898_v39  ;;  %v853_v4 = vpop.f32.mrb[14].mxu0  ;;  %v901_v43 = vpop.f32.mrb[14].mxu1  ;;  %689 = vst.msk [vmem:[%s1220_s12 + $0x28] sm:$0xff] %vm683_vm0, %v656_v36  ;;  %705 = vst.msk [vmem:[%s1220_s12 + $0xa8] sm:$0xff] %vm683_vm0, %v672_v37 }
 0x114   : > { %v854_v5 = vpop.f32.mrb[15].mxu0  ;;  %v902_v6 = vpop.f32.mrb[15].mxu1 }
 0x115   : > { %v517_v44 = vadd.f32 %v852_v41, %v1140_v50  ;;  %v581_v45 = vadd.f32 %v900_v42, %v1140_v50  ;;  %v855_v46 = vadd.f32 %v854_v5, %v853_v4  ;;  %v903_v47 = vadd.f32 %v902_v6, %v901_v43 }
 0x117   : > { %v657_v48 = vadd.f32 %v1163_v7, %v517_v44  ;;  %v673_v49 = vadd.f32 %v1166_v8, %v581_v45  ;;  %v520_v51 = vadd.f32 %v855_v46, %v1140_v50  ;;  %v584_v52 = vadd.f32 %v903_v47, %v1140_v50 }
 0x119   : > { %v658_v53 = vadd.f32 %v1169_v9, %v520_v51  ;;  %v674_v54 = vadd.f32 %v1172_v10, %v584_v52  ;;  %v856_v55 = vpop.f32.mrb[16].mxu0  ;;  %v904_v56 = vpop.f32.mrb[16].mxu1  ;;  %690 = vst.msk [vmem:[%s1220_s12 + $0x30] sm:$0xff] %vm683_vm0, %v657_v48  ;;  %706 = vst.msk [vmem:[%s1220_s12 + $0xb0] sm:$0xff] %vm683_vm0, %v673_v49 }
 0x11a   : > { %v857_v57 = vpop.f32.mrb[17].mxu0  ;;  %v905_v7 = vpop.f32.mrb[17].mxu1 }
 0x11b   : > { %v858_v58 = vadd.f32 %v857_v57, %v856_v55  ;;  %v906_v59 = vadd.f32 %v905_v7, %v904_v56  ;;  %v859_v8 = vpop.f32.mrb[18].mxu0  ;;  %v907_v60 = vpop.f32.mrb[18].mxu1  ;;  %691 = vst.msk [vmem:[%s1220_s12 + $0x38] sm:$0xff] %vm683_vm0, %v658_v53  ;;  %707 = vst.msk [vmem:[%s1220_s12 + $0xb8] sm:$0xff] %vm683_vm0, %v674_v54 }
 0x11c   : > { %v860_v9 = vpop.f32.mrb[19].mxu0  ;;  %v908_v10 = vpop.f32.mrb[19].mxu1 }
 0x11d   : > { %v525_v61 = vadd.f32 %v858_v58, %v1140_v50  ;;  %v589_v62 = vadd.f32 %v906_v59, %v1140_v50  ;;  %v861_v21 = vadd.f32 %v860_v9, %v859_v8  ;;  %v909_v63 = vadd.f32 %v908_v10, %v907_v60 }
 0x11f   : > { %v659_v22 = vadd.f32 %v1175_v11, %v525_v61  ;;  %v675_v0 = vadd.f32 %v1178_v12, %v589_v62  ;;  %v528_v1 = vadd.f32 %v861_v21, %v1140_v50  ;;  %v592_v2 = vadd.f32 %v909_v63, %v1140_v50 }
 0x121   : > { %v660_v23 = vadd.f32 %v1181_v13, %v528_v1  ;;  %v676_v24 = vadd.f32 %v1184_v14, %v592_v2  ;;  %v862_v31 = vpop.f32.mrb[20].mxu0  ;;  %v910_v32 = vpop.f32.mrb[20].mxu1  ;;  %692 = vst.msk [vmem:[%s1220_s12 + $0x40] sm:$0xff] %vm683_vm0, %v659_v22  ;;  %708 = vst.msk [vmem:[%s1220_s12 + $0xc0] sm:$0xff] %vm683_vm0, %v675_v0 }
 0x122   : > { %v863_v33 = vpop.f32.mrb[21].mxu0  ;;  %v911_v11 = vpop.f32.mrb[21].mxu1 }
 0x123   : > { %v864_v34 = vadd.f32 %v863_v33, %v862_v31  ;;  %v912_v35 = vadd.f32 %v911_v11, %v910_v32  ;;  %v865_v12 = vpop.f32.mrb[22].mxu0  ;;  %v913_v36 = vpop.f32.mrb[22].mxu1  ;;  %693 = vst.msk [vmem:[%s1220_s12 + $0x48] sm:$0xff] %vm683_vm0, %v660_v23  ;;  %709 = vst.msk [vmem:[%s1220_s12 + $0xc8] sm:$0xff] %vm683_vm0, %v676_v24 }
 0x124   : > { %v866_v13 = vpop.f32.mrb[23].mxu0  ;;  %v914_v14 = vpop.f32.mrb[23].mxu1 }
 0x125   : > { %v533_v37 = vadd.f32 %v864_v34, %v1140_v50  ;;  %v597_v38 = vadd.f32 %v912_v35, %v1140_v50  ;;  %v867_v39 = vadd.f32 %v866_v13, %v865_v12  ;;  %v915_v40 = vadd.f32 %v914_v14, %v913_v36 }
 0x127   : > { %v661_v3 = vadd.f32 %v1187_v15, %v533_v37  ;;  %v677_v41 = vadd.f32 %v1190_v16, %v597_v38  ;;  %v536_v42 = vadd.f32 %v867_v39, %v1140_v50  ;;  %v600_v4 = vadd.f32 %v915_v40, %v1140_v50 }
 0x129   : > { %v662_v43 = vadd.f32 %v1193_v17, %v536_v42  ;;  %v678_v5 = vadd.f32 %v1196_v18, %v600_v4  ;;  %v868_v6 = vpop.f32.mrb[24].mxu0  ;;  %v916_v44 = vpop.f32.mrb[24].mxu1  ;;  %694 = vst.msk [vmem:[%s1220_s12 + $0x50] sm:$0xff] %vm683_vm0, %v661_v3  ;;  %710 = vst.msk [vmem:[%s1220_s12 + $0xd0] sm:$0xff] %vm683_vm0, %v677_v41 }
 0x12a   : > { %v869_v45 = vpop.f32.mrb[25].mxu0  ;;  %v917_v15 = vpop.f32.mrb[25].mxu1 }
 0x12b   : > { %v870_v46 = vadd.f32 %v869_v45, %v868_v6  ;;  %v918_v47 = vadd.f32 %v917_v15, %v916_v44  ;;  %v871_v16 = vpop.f32.mrb[26].mxu0  ;;  %v919_v48 = vpop.f32.mrb[26].mxu1  ;;  %695 = vst.msk [vmem:[%s1220_s12 + $0x58] sm:$0xff] %vm683_vm0, %v662_v43  ;;  %711 = vst.msk [vmem:[%s1220_s12 + $0xd8] sm:$0xff] %vm683_vm0, %v678_v5 }
 0x12c   : > { %v872_v17 = vpop.f32.mrb[27].mxu0  ;;  %v920_v18 = vpop.f32.mrb[27].mxu1 }
 0x12d   : > { %v541_v49 = vadd.f32 %v870_v46, %v1140_v50  ;;  %v605_v51 = vadd.f32 %v918_v47, %v1140_v50  ;;  %v873_v52 = vadd.f32 %v872_v17, %v871_v16  ;;  %v921_v53 = vadd.f32 %v920_v18, %v919_v48 }
 0x12f   : > { %v663_v54 = vadd.f32 %v1199_v19, %v541_v49  ;;  %v679_v55 = vadd.f32 %v1202_v20, %v605_v51  ;;  %v544_v56 = vadd.f32 %v873_v52, %v1140_v50  ;;  %v608_v57 = vadd.f32 %v921_v53, %v1140_v50 }
 0x131   : > { %v664_v7 = vadd.f32 %v1207_v25, %v544_v56  ;;  %v680_v58 = vadd.f32 %v1210_v26, %v608_v57  ;;  %v874_v59 = vpop.f32.mrb[28].mxu0  ;;  %v922_v8 = vpop.f32.mrb[28].mxu1  ;;  %696 = vst.msk [vmem:[%s1220_s12 + $0x60] sm:$0xff] %vm683_vm0, %v663_v54  ;;  %712 = vst.msk [vmem:[%s1220_s12 + $0xe0] sm:$0xff] %vm683_vm0, %v679_v55 }
 0x132   : > { %v875_v60 = vpop.f32.mrb[29].mxu0  ;;  %v923_v19 = vpop.f32.mrb[29].mxu1 }
 0x133   : > { %v876_v9 = vadd.f32 %v875_v60, %v874_v59  ;;  %v924_v10 = vadd.f32 %v923_v19, %v922_v8  ;;  %v877_v20 = vpop.f32.mrb[30].mxu0  ;;  %v925_v61 = vpop.f32.mrb[30].mxu1  ;;  %697 = vst.msk [vmem:[%s1220_s12 + $0x68] sm:$0xff] %vm683_vm0, %v664_v7  ;;  %713 = vst.msk [vmem:[%s1220_s12 + $0xe8] sm:$0xff] %vm683_vm0, %v680_v58 }
 0x134   : > { %v878_v25 = vpop.f32.mrb[31].mxu0  ;;  %v926_v26 = vpop.f32.mrb[31].mxu1 }
 0x135   : > { %v549_v62 = vadd.f32 %v876_v9, %v1140_v50  ;;  %v613_v21 = vadd.f32 %v924_v10, %v1140_v50  ;;  %v879_v63 = vadd.f32 %v878_v25, %v877_v20  ;;  %v927_v22 = vadd.f32 %v926_v26, %v925_v61 }
 0x137   : > { %v665_v0 = vadd.f32 %v1213_v27, %v549_v62  ;;  %v681_v1 = vadd.f32 %v1223_v28, %v613_v21  ;;  %v552_v2 = vadd.f32 %v879_v63, %v1140_v50  ;;  %v616_v23 = vadd.f32 %v927_v22, %v1140_v50 }
 0x139   : > { %v666_v24 = vadd.f32 %v1226_v29, %v552_v2  ;;  %v682_v31 = vadd.f32 %v1229_v30, %v616_v23  ;;  %698 = vst.msk [vmem:[%s1220_s12 + $0x70] sm:$0xff] %vm683_vm0, %v665_v0  ;;  %714 = vst.msk [vmem:[%s1220_s12 + $0xf0] sm:$0xff] %vm683_vm0, %v681_v1 }
 0x13b   : > { %699 = vst.msk [vmem:[%s1220_s12 + $0x78] sm:$0xff] %vm683_vm0, %v666_v24  ;;  %715 = vst.msk [vmem:[%s1220_s12 + $0xf8] sm:$0xff] %vm683_vm0, %v682_v31 }
 0x13c PF: > { %s14_s15 = sadd.s32 1, %s974_s15  }
 0x13d   : > { %p11_p4 = scmp.ge.s32.totalorder %s14_s15, 4  }
 0x13f   :  { %13 = sbr.rel (!%p11_p4) target bundleno = 1 (0x1), region = 69 }

</bundles_post_ra>
